<compile_context>
chip_gen: v7x
topology: tpu7x:2x2x1
jax: 0.10.0
libtpu: 0.0.40
codegen_flags: <defaults>
</compile_context>

<pallas_src>
import jax
import jax.numpy as jnp
from jax.experimental import pallas as pl
from jax.experimental.pallas import tpu as pltpu

# Geometry implied by FusionNet.__init__ / forward:
#   out_vgg    : (N, 512,  2,   2) -> MaxPool2d(2,2)     -> (N, 512, 1, 1)
#   out_yolo74 : (N, 128, 92, 160) -> MaxPool2d(92,160)  -> (N, 128, 1, 1)
#   out_yolo75 : (N, 256, 46,  80) -> MaxPool2d(46,80)   -> (N, 256, 1, 1)
#   out_yolo76 : (N, 512, 23,  40) -> MaxPool2d(23,40)   -> (N, 512, 1, 1)
#   cat dim=1  : 1408 -> Linear(1408,128) -> ReLU -> Linear(128,1) -> sigmoid
C_VGG, H_VGG, W_VGG = 512, 2, 2
C_74,  H_74,  W_74  = 128, 92, 160
C_75,  H_75,  W_75  = 256, 46, 80
C_76,  H_76,  W_76  = 512, 23, 40
D_IN, D_HID, D_OUT = 1408, 128, 1


def fusion_kernel(vgg_ref, y74_ref, y75_ref, y76_ref,
                  w1_ref, b1_ref, w2_ref, b2_ref, out_ref):
    # nn.Dropout(0.3) is identity at inference time.
    # MaxPool2d with kernel == full spatial extent == global max over spatial
    # (last axis of the (C, H*W) block); accumulate in f32 afterwards.
    p_vgg = jnp.max(vgg_ref[0], axis=-1, keepdims=True).astype(jnp.float32)  # (512, 1)
    p_74  = jnp.max(y74_ref[0], axis=-1, keepdims=True).astype(jnp.float32)  # (128, 1)
    p_75  = jnp.max(y75_ref[0], axis=-1, keepdims=True).astype(jnp.float32)  # (256, 1)
    p_76  = jnp.max(y76_ref[0], axis=-1, keepdims=True).astype(jnp.float32)  # (512, 1)

    # W1 stored PyTorch-style as (out=128, in=1408).  The concat
    # cat([vgg, y74, y75, y76]) @ W1^T == sum of partial dots over W1 column
    # blocks (order matches torch.cat((out_vgg, out_yolo74, out_yolo75,
    # out_yolo76), dim=1)); slice offsets 0/512/640/896 are lane-aligned.
    y1 = jnp.dot(w1_ref[:, 0:512], p_vgg, preferred_element_type=jnp.float32)
    y1 = y1 + jnp.dot(w1_ref[:, 512:640], p_74, preferred_element_type=jnp.float32)
    y1 = y1 + jnp.dot(w1_ref[:, 640:896], p_75, preferred_element_type=jnp.float32)
    y1 = y1 + jnp.dot(w1_ref[:, 896:1408], p_76, preferred_element_type=jnp.float32)
    y1 = jnp.maximum(y1 + b1_ref[...], 0.0)                                   # (128, 1)

    y2 = jnp.dot(w2_ref[...], y1, preferred_element_type=jnp.float32) + b2_ref[...]
    out_ref[0] = jax.nn.sigmoid(y2)                                           # (1, 1)


def fusion_forward(vgg_f, y74_f, y75_f, y76_f, w1, b1, w2, b2):
    """Features as (N, C, H*W) (bf16 or f32); weights PyTorch-style (out, in)."""
    n = vgg_f.shape[0]

    def feat_spec(c, hw):
        return pl.BlockSpec((1, c, hw), lambda i: (i, 0, 0))

    def const_spec(shape):
        # Constant index_map -> weights DMA'd once, stay resident across steps.
        return pl.BlockSpec(shape, lambda i: (0, 0))

    out = pl.pallas_call(
        fusion_kernel,
        out_shape=jax.ShapeDtypeStruct((n, 1, 1), jnp.float32),
        grid_spec=pltpu.PrefetchScalarGridSpec(
            num_scalar_prefetch=0,
            grid=(n,),
            in_specs=[
                feat_spec(C_VGG, H_VGG * W_VGG),
                feat_spec(C_74, H_74 * W_74),
                feat_spec(C_75, H_75 * W_75),
                feat_spec(C_76, H_76 * W_76),
                const_spec((D_HID, D_IN)),   # W1 (128, 1408)
                const_spec((D_HID, 1)),      # b1 (128, 1)
                const_spec((D_OUT, D_HID)),  # W2 (1, 128)
                const_spec((D_OUT, 1)),      # b2 (1, 1)
            ],
            out_specs=pl.BlockSpec((1, 1, 1), lambda i: (i, 0, 0)),
        ),
        compiler_params=pltpu.CompilerParams(
            dimension_semantics=("parallel",),   # per-sample output block -> megacore OK
            vmem_limit_bytes=48 * 1024 * 1024,   # fits v7x's 64 MiB physical VMEM
        ),
    )(vgg_f, y74_f, y75_f, y76_f, w1, b1, w2, b2)
    return out.reshape(n, D_OUT)


def _nchw_to_kernel(x, dtype=jnp.bfloat16):
    # NCHW -> (N, C, H*W): pure metadata reshape (no transpose / HBM shuffle),
    # plus a dtype cast for cheaper streaming of the HBM-bound features.
    n, c = x.shape[0], x.shape[1]
    return x.reshape(n, c, -1).astype(dtype)


if __name__ == "__main__":
    key = jax.random.PRNGKey(0)
    ks = jax.random.split(key, 8)
    N = 2

    # TODO(synk): vgg11/yolov7 backbones are not reimplemented — their hooked
    # feature maps (NCHW, as the PyTorch module would see them) are synthesized.
    out_vgg = jax.random.normal(ks[0], (N, C_VGG, H_VGG, W_VGG), jnp.float32)
    out_y74 = jax.random.normal(ks[1], (N, C_74, H_74, W_74), jnp.float32)
    out_y75 = jax.random.normal(ks[2], (N, C_75, H_75, W_75), jnp.float32)
    out_y76 = jax.random.normal(ks[3], (N, C_76, H_76, W_76), jnp.float32)

    # Deterministic Linear params (PyTorch-style uniform init), stored (out, in).
    lim1 = 1.0 / jnp.sqrt(jnp.float32(D_IN))
    w1 = jax.random.uniform(ks[4], (D_HID, D_IN), jnp.float32, -lim1, lim1)
    b1 = jax.random.uniform(ks[5], (D_HID, 1), jnp.float32, -lim1, lim1)
    lim2 = 1.0 / jnp.sqrt(jnp.float32(D_HID))
    w2 = jax.random.uniform(ks[6], (D_OUT, D_HID), jnp.float32, -lim2, lim2)
    b2 = jax.random.uniform(ks[7], (D_OUT, 1), jnp.float32, -lim2, lim2)

    vgg_k = _nchw_to_kernel(out_vgg)
    y74_k = _nchw_to_kernel(out_y74)
    y75_k = _nchw_to_kernel(out_y75)
    y76_k = _nchw_to_kernel(out_y76)

    out = fusion_forward(vgg_k, y74_k, y75_k, y76_k, w1, b1, w2, b2)
    out = jax.block_until_ready(out)

    # Pure-JAX reference (global max pool -> concat -> MLP -> sigmoid).
    def ref_forward(feats):
        pools = [jnp.max(t.astype(jnp.float32), axis=-1) for t in feats]  # (N, C) each
        x = jnp.concatenate(pools, axis=1)                                # (N, 1408)
        x = jnp.maximum(x @ w1.T + b1.reshape(1, -1), 0.0)
        return jax.nn.sigmoid(x @ w2.T + b2.reshape(1, -1))               # (N, 1)

    # Tight check against the same bf16-streamed features (kernel correctness).
    expect_bf16_in = ref_forward([vgg_k, y74_k, y75_k, y76_k])
    # Loose check against the original f32 features (semantics of the module;
    # only difference is bf16 rounding of the streamed activations).
    expect_f32_in = ref_forward([
        _nchw_to_kernel(out_vgg, jnp.float32), _nchw_to_kernel(out_y74, jnp.float32),
        _nchw_to_kernel(out_y75, jnp.float32), _nchw_to_kernel(out_y76, jnp.float32)])

    assert out.shape == (N, D_OUT)
    assert jnp.allclose(out, expect_bf16_in, atol=1e-4, rtol=1e-4)
    assert jnp.allclose(out, expect_f32_in, atol=1e-2, rtol=1e-2)
    print("KERNEL_OK")
</pallas_src>

<mosaic_0001>
module attributes {stable_mosaic.version = 11 : i64} {
  func.func @fusion_kernel(%arg0: i32, %arg1: memref<1x512x4xbf16, #tpu.memory_space<vmem>>, %arg2: memref<1x128x14720xbf16, #tpu.memory_space<vmem>>, %arg3: memref<1x256x3680xbf16, #tpu.memory_space<vmem>>, %arg4: memref<1x512x920xbf16, #tpu.memory_space<vmem>>, %arg5: memref<128x1408xf32, #tpu.memory_space<vmem>>, %arg6: memref<128x1xf32, #tpu.memory_space<vmem>>, %arg7: memref<1x128xf32, #tpu.memory_space<vmem>>, %arg8: memref<1x1xf32, #tpu.memory_space<vmem>>, %arg9: memref<1x1x1xf32, #tpu.memory_space<vmem>>) attributes {dimension_semantics = [#tpu.dimension_semantics<parallel>], iteration_bounds = array<i64: 2>, scalar_prefetch = 0 : i64, scratch_operands = 0 : i64, tpu.core_type = #tpu.core_type<tc>, window_params = [{transform_indices = @transform_0, window_bounds = array<i64: 1, 512, 4>}, {transform_indices = @transform_1, window_bounds = array<i64: 1, 128, 14720>}, {transform_indices = @transform_2, window_bounds = array<i64: 1, 256, 3680>}, {transform_indices = @transform_3, window_bounds = array<i64: 1, 512, 920>}, {pipeline_mode = #tpu.pipeline_mode<synchronous>, transform_indices = @transform_4, window_bounds = array<i64: 128, 1408>}, {pipeline_mode = #tpu.pipeline_mode<synchronous>, transform_indices = @transform_5, window_bounds = array<i64: 128, 1>}, {pipeline_mode = #tpu.pipeline_mode<synchronous>, transform_indices = @transform_6, window_bounds = array<i64: 1, 128>}, {pipeline_mode = #tpu.pipeline_mode<synchronous>, transform_indices = @transform_7, window_bounds = array<i64: 1, 1>}, {transform_indices = @transform_8, window_bounds = array<i64: 1, 1, 1>}]} {
    %c0 = arith.constant 0 : index
    %c0_0 = arith.constant 0 : index
    %c0_1 = arith.constant 0 : index
    %0 = vector.load %arg1[%c0, %c0_0, %c0_1] : memref<1x512x4xbf16, #tpu.memory_space<vmem>>, vector<1x512x4xbf16>
    %1 = vector.shape_cast %0 : vector<1x512x4xbf16> to vector<512x4xbf16>
    %cst = arith.constant dense<0xFF80> : vector<512xbf16>
    %2 = vector.multi_reduction <maximumf>, %1, %cst [1] : vector<512x4xbf16> to vector<512xbf16>
    %3 = vector.shape_cast %2 : vector<512xbf16> to vector<512x1xbf16>
    %4 = arith.extf %3 : vector<512x1xbf16> to vector<512x1xf32>
    %c0_2 = arith.constant 0 : index
    %c0_3 = arith.constant 0 : index
    %c0_4 = arith.constant 0 : index
    %5 = vector.load %arg2[%c0_2, %c0_3, %c0_4] : memref<1x128x14720xbf16, #tpu.memory_space<vmem>>, vector<1x128x14720xbf16>
    %6 = vector.shape_cast %5 : vector<1x128x14720xbf16> to vector<128x14720xbf16>
    %cst_5 = arith.constant dense<0xFF80> : vector<128xbf16>
    %7 = vector.multi_reduction <maximumf>, %6, %cst_5 [1] : vector<128x14720xbf16> to vector<128xbf16>
    %8 = vector.shape_cast %7 : vector<128xbf16> to vector<128x1xbf16>
    %9 = arith.extf %8 : vector<128x1xbf16> to vector<128x1xf32>
    %c0_6 = arith.constant 0 : index
    %c0_7 = arith.constant 0 : index
    %c0_8 = arith.constant 0 : index
    %10 = vector.load %arg3[%c0_6, %c0_7, %c0_8] : memref<1x256x3680xbf16, #tpu.memory_space<vmem>>, vector<1x256x3680xbf16>
    %11 = vector.shape_cast %10 : vector<1x256x3680xbf16> to vector<256x3680xbf16>
    %cst_9 = arith.constant dense<0xFF80> : vector<256xbf16>
    %12 = vector.multi_reduction <maximumf>, %11, %cst_9 [1] : vector<256x3680xbf16> to vector<256xbf16>
    %13 = vector.shape_cast %12 : vector<256xbf16> to vector<256x1xbf16>
    %14 = arith.extf %13 : vector<256x1xbf16> to vector<256x1xf32>
    %c0_10 = arith.constant 0 : index
    %c0_11 = arith.constant 0 : index
    %c0_12 = arith.constant 0 : index
    %15 = vector.load %arg4[%c0_10, %c0_11, %c0_12] : memref<1x512x920xbf16, #tpu.memory_space<vmem>>, vector<1x512x920xbf16>
    %16 = vector.shape_cast %15 : vector<1x512x920xbf16> to vector<512x920xbf16>
    %cst_13 = arith.constant dense<0xFF80> : vector<512xbf16>
    %17 = vector.multi_reduction <maximumf>, %16, %cst_13 [1] : vector<512x920xbf16> to vector<512xbf16>
    %18 = vector.shape_cast %17 : vector<512xbf16> to vector<512x1xbf16>
    %19 = arith.extf %18 : vector<512x1xbf16> to vector<512x1xf32>
    %c0_14 = arith.constant 0 : index
    %c0_15 = arith.constant 0 : index
    %20 = vector.load %arg5[%c0_14, %c0_15] : memref<128x1408xf32, #tpu.memory_space<vmem>>, vector<128x512xf32>
    %cst_16 = arith.constant dense<0.000000e+00> : vector<128x1xf32>
    %21 = tpu.matmul %20, %4, %cst_16 {dimension_numbers = #tpu.dot_dimension_numbers<[1], [0], [0], [1], [0, 0, 1, 1], [], []>} : vector<128x512xf32>, vector<512x1xf32>, vector<128x1xf32> -> vector<128x1xf32>
    %c0_17 = arith.constant 0 : index
    %c512 = arith.constant 512 : index
    %22 = vector.load %arg5[%c0_17, %c512] : memref<128x1408xf32, #tpu.memory_space<vmem>>, vector<128x128xf32>
    %cst_18 = arith.constant dense<0.000000e+00> : vector<128x1xf32>
    %23 = tpu.matmul %22, %9, %cst_18 {dimension_numbers = #tpu.dot_dimension_numbers<[1], [0], [0], [1], [0, 0, 1, 1], [], []>} : vector<128x128xf32>, vector<128x1xf32>, vector<128x1xf32> -> vector<128x1xf32>
    %24 = arith.addf %21, %23 : vector<128x1xf32>
    %c0_19 = arith.constant 0 : index
    %c640 = arith.constant 640 : index
    %25 = vector.load %arg5[%c0_19, %c640] : memref<128x1408xf32, #tpu.memory_space<vmem>>, vector<128x256xf32>
    %cst_20 = arith.constant dense<0.000000e+00> : vector<128x1xf32>
    %26 = tpu.matmul %25, %14, %cst_20 {dimension_numbers = #tpu.dot_dimension_numbers<[1], [0], [0], [1], [0, 0, 1, 1], [], []>} : vector<128x256xf32>, vector<256x1xf32>, vector<128x1xf32> -> vector<128x1xf32>
    %27 = arith.addf %24, %26 : vector<128x1xf32>
    %c0_21 = arith.constant 0 : index
    %c896 = arith.constant 896 : index
    %28 = vector.load %arg5[%c0_21, %c896] : memref<128x1408xf32, #tpu.memory_space<vmem>>, vector<128x512xf32>
    %cst_22 = arith.constant dense<0.000000e+00> : vector<128x1xf32>
    %29 = tpu.matmul %28, %19, %cst_22 {dimension_numbers = #tpu.dot_dimension_numbers<[1], [0], [0], [1], [0, 0, 1, 1], [], []>} : vector<128x512xf32>, vector<512x1xf32>, vector<128x1xf32> -> vector<128x1xf32>
    %30 = arith.addf %27, %29 : vector<128x1xf32>
    %c0_23 = arith.constant 0 : index
    %c0_24 = arith.constant 0 : index
    %31 = vector.load %arg6[%c0_23, %c0_24] : memref<128x1xf32, #tpu.memory_space<vmem>>, vector<128x1xf32>
    %32 = arith.addf %30, %31 : vector<128x1xf32>
    %cst_25 = arith.constant 0.000000e+00 : f32
    %33 = vector.broadcast %cst_25 : f32 to vector<128x1xf32>
    %34 = arith.maximumf %32, %33 : vector<128x1xf32>
    %c0_26 = arith.constant 0 : index
    %c0_27 = arith.constant 0 : index
    %35 = vector.load %arg7[%c0_26, %c0_27] : memref<1x128xf32, #tpu.memory_space<vmem>>, vector<1x128xf32>
    %cst_28 = arith.constant dense<0.000000e+00> : vector<1x1xf32>
    %36 = tpu.matmul %35, %34, %cst_28 {dimension_numbers = #tpu.dot_dimension_numbers<[1], [0], [0], [1], [0, 0, 1, 1], [], []>} : vector<1x128xf32>, vector<128x1xf32>, vector<1x1xf32> -> vector<1x1xf32>
    %c0_29 = arith.constant 0 : index
    %c0_30 = arith.constant 0 : index
    %37 = vector.load %arg8[%c0_29, %c0_30] : memref<1x1xf32, #tpu.memory_space<vmem>>, vector<1x1xf32>
    %38 = arith.addf %36, %37 : vector<1x1xf32>
    %39 = arith.negf %38 : vector<1x1xf32>
    %40 = math.exp %39 : vector<1x1xf32>
    %cst_31 = arith.constant 1.000000e+00 : f32
    %41 = vector.broadcast %cst_31 : f32 to vector<1x1xf32>
    %42 = arith.addf %41, %40 : vector<1x1xf32>
    %43 = arith.divf %41, %42 : vector<1x1xf32>
    %c0_32 = arith.constant 0 : index
    %c0_33 = arith.constant 0 : index
    %c0_34 = arith.constant 0 : index
    %44 = vector.load %arg9[%c0_32, %c0_33, %c0_34] : memref<1x1x1xf32, #tpu.memory_space<vmem>>, vector<1x1x1xf32>
    %45 = vector.shape_cast %44 : vector<1x1x1xf32> to vector<1x1xf32>
    %46 = vector.shape_cast %43 : vector<1x1xf32> to vector<1x1x1xf32>
    tpu.vector_store %arg9[%c0_32, %c0_33, %c0_34], %46 {strides = array<i32>} : memref<1x1x1xf32, #tpu.memory_space<vmem>>, vector<1x1x1xf32>,
    return
  }
  func.func @transform_0(%arg0: i32) -> (i32, i32, i32) {
    %c0_i32 = arith.constant 0 : i32
    %c0_i32_0 = arith.constant 0 : i32
    %c0_i32_1 = arith.constant 0 : i32
    return %arg0, %c0_i32, %c0_i32_0 : i32, i32, i32
  }
  func.func @transform_1(%arg0: i32) -> (i32, i32, i32) {
    %c0_i32 = arith.constant 0 : i32
    %c0_i32_0 = arith.constant 0 : i32
    %c0_i32_1 = arith.constant 0 : i32
    return %arg0, %c0_i32, %c0_i32_0 : i32, i32, i32
  }
  func.func @transform_2(%arg0: i32) -> (i32, i32, i32) {
    %c0_i32 = arith.constant 0 : i32
    %c0_i32_0 = arith.constant 0 : i32
    %c0_i32_1 = arith.constant 0 : i32
    return %arg0, %c0_i32, %c0_i32_0 : i32, i32, i32
  }
  func.func @transform_3(%arg0: i32) -> (i32, i32, i32) {
    %c0_i32 = arith.constant 0 : i32
    %c0_i32_0 = arith.constant 0 : i32
    %c0_i32_1 = arith.constant 0 : i32
    return %arg0, %c0_i32, %c0_i32_0 : i32, i32, i32
  }
  func.func @transform_4(%arg0: i32) -> (i32, i32) {
    %c0_i32 = arith.constant 0 : i32
    %c0_i32_0 = arith.constant 0 : i32
    %c0_i32_1 = arith.constant 0 : i32
    return %c0_i32, %c0_i32_0 : i32, i32
  }
  func.func @transform_5(%arg0: i32) -> (i32, i32) {
    %c0_i32 = arith.constant 0 : i32
    %c0_i32_0 = arith.constant 0 : i32
    %c0_i32_1 = arith.constant 0 : i32
    return %c0_i32, %c0_i32_0 : i32, i32
  }
  func.func @transform_6(%arg0: i32) -> (i32, i32) {
    %c0_i32 = arith.constant 0 : i32
    %c0_i32_0 = arith.constant 0 : i32
    %c0_i32_1 = arith.constant 0 : i32
    return %c0_i32, %c0_i32_0 : i32, i32
  }
  func.func @transform_7(%arg0: i32) -> (i32, i32) {
    %c0_i32 = arith.constant 0 : i32
    %c0_i32_0 = arith.constant 0 : i32
    %c0_i32_1 = arith.constant 0 : i32
    return %c0_i32, %c0_i32_0 : i32, i32
  }
  func.func @transform_8(%arg0: i32) -> (i32, i32, i32) {
    %c0_i32 = arith.constant 0 : i32
    %c0_i32_0 = arith.constant 0 : i32
    %c0_i32_1 = arith.constant 0 : i32
    return %arg0, %c0_i32, %c0_i32_0 : i32, i32, i32
  }
}

</mosaic_0001>

<bundles_post_ra>
// kernel: tpu_custom_call.1
= control target key start
LH: loop header
LB: loop body
LE: loop exit
PB: predicated region body
PF: predicated region fallthrough
CT: control target
= control target key end

     0   :  { %s20987_s0 = inlined_call_operand.vmem [shape: bf16[2,512,4], index: 0, kind: input, shape index: {}]   ;;  %s20988_s1 = inlined_call_operand.vmem [shape: bf16[2,128,14720], index: 1, kind: input, shape index: {}]   ;;  %s20989_s2 = inlined_call_operand.vmem [shape: bf16[2,256,3680], index: 2, kind: input, shape index: {}]   ;;  %s20990_s3 = inlined_call_operand.vmem [shape: bf16[2,512,920], index: 3, kind: input, shape index: {}]   ;;  %s20991_s4 = inlined_call_operand.hbm [shape: f32[128,1408], index: 4, kind: input, shape index: {}]   ;;  %s20992_s5 = inlined_call_operand.vmem [shape: f32[128,1], index: 5, kind: input, shape index: {}]   ;;  %s20993_s6 = inlined_call_operand.vmem [shape: f32[1,128], index: 6, kind: input, shape index: {}]   ;;  %s20994_s7 = inlined_call_operand.<no memory space> [shape: f32[1,1], index: 7, kind: input, shape index: {}]   ;;  %s20995_s8 = inlined_call_operand.vmem [shape: f32[2,1,1], index: 8, kind: output, shape index: {}]  }
   0x1   :  { %v13_v0 = vstv %s20994_s7 }
   0x2   :  { %14 = vst [vmem:[#allocation2] sm:$0x1] %v13_v0 }
   0x3   :  { %15 = vsyncpa [#allocation4], 0  ;;  %s18591_s29 = smov 0  }
   0x4 LB: > { %s18597_s30 = sadd.s32 4294967295, %s18535_s29   ;;  %p13927_p0 = scmp.ge.s32.totalorder %s18535_s29, 1  ;;  %s18535_s29 = sphi %s18591_s29, %s21_s29  }
   0x5   : > { %p240_p1 = scmp.lt.s32.totalorder %s18535_s29, 3  ;;  %s18537_s9 = smov [#allocation3]  }
   0x6   : > { %s252_s7 = sshll.u32 %s18537_s9, 4  ;;  %p20996_p3 = scmp.eq.s32.totalorder %s18597_s30, 0  ;;  %s253_s7 = int_to_ptr.vmem [resolvable:$true] %s252_s7 }
   0x7   : > { %p18601_p2 = pnand %p13927_p0, %p240_p1  ;;  %s18497_s14 = scalar_lea.hbm %s20991_s4, 22528 }
   0x8   : > { %p18498_p6 = scmp.ne.s32.totalorder %s20991_s4, %s18497_s14  ;;  %p18504_p10 = scmp.lt.u32.totalorder %s18497_s14, %s20991_s4 }
   0x9   : > { %s20998_s10 = scalar_select %p18601_p2, 1, 0 }
   0xa   : > { %p16377_p4 = pneg %p18601_p2 }
   0xc   : > { %p18610_p5 = pnand %p20996_p3, %p16377_p4 }
   0xe   : > { %p18499_p7 = pneg %p18610_p5 }
  0x10   : > { %p18500_p8 = pnand %p18499_p7, %p18498_p6 }
  0x12   : > { %p18501_p9 = pneg %p18500_p8 }
  0x14   : > { %p18506_p11 = pnand %p18504_p10, %p18501_p9 }
  0x16   : > { %18509 = shalt.err (!%p18506_p11)
}
  0x17   : > { %s18510_s19 = scalar_lea.vmem %s253_s7, 22528  ;;  %p18518_p1 = scmp.lt.s32.totalorder %s253_s7, %s253_s7 }
  0x18   : > { %p18511_p12 = scmp.ne.s32.totalorder %s253_s7, %s18510_s19  ;;  %p18519_p4 = scmp.lt.s32.totalorder %s18510_s19, %s18510_s19 }
  0x1a   : > { %p18513_p13 = pnand %p18511_p12, %p18499_p7  ;;  %p18520_p3 = por %p18519_p4, %p18518_p1 }
  0x1c   : > { %p18514_p0 = pneg %p18513_p13 }
  0x1e   : > { %p18521_p2 = pnand %p18520_p3, %p18514_p0 }
  0x20   : > { %18524 = shalt.err (!%p18521_p2)
}
  0x21   : > { %s18538_s20 = smov 1408   ;;  %s18539_s21 = smov 88  }
  0x22   : > { %16380 = dma.hbm_to_vmem [thread:$0]  (!%p18610_p5), %s20991_s4, 22528, %s253_s7, [#allocation4], %s18538_s20, %s18538_s20, %s18539_s21  }
  0x23   : > { %p21000_p6 = scmp.ne.s32.totalorder %s20998_s10, 0 }
  0x24   : > { %p21001_p8 = scmp.eq.s32.totalorder (!%p21000_p6), %s18597_s30, 0 }
  0x25   : > { %309 = sbr.rel (%p21000_p6) target bundleno = 1859 (0x743), region = 52 }
  0x2c   : > { %18530 = dma.done.wait (%p21001_p8), [#allocation4], 22528   ;;  %p21002_p7 = pmov %p21001_p8 }
  0x2d   : > { %p356_p2 = scmp.lt.s32.totalorder %s18597_s30, 1  ;;  %vm604_vm0 = vcmask 31744   ;;  %vm10137_vm1 = vcmask 785408   ;;  %vm12181_vm2 = vcmask 195584   ;;  %vm18541_vm3 = vmmov 0  }
  0x2e   : > { %18532 = vsyncadd (%p21002_p7), [#allocation4], 4294944768  ;;  %vm13828_vm4 = vcmask 0  }
  0x2f   : > { %s21007_s30 = smov (!%p356_p2, %s18597_s30), 1 }
  0x30   : > { %s15613_s24 = sshll.u32 %s21007_s30, 8  ;;  %s16372_s28 = smul.u32 3712, %s21007_s30 }
  0x31   : > { %s18644_s27 = scalar_lea.vmem %s20987_s0, %s15613_s24  ;;  %s15614_s11 = sshll.u32 %s21007_s30, 11 }
  0x32   : > { %v16397_v1 = vld [vmem:[%s18644_s27 + $0x40] sm:$0xff]   ;;  %v16399_v4 = vld [vmem:[%s18644_s27 + $0x48] sm:$0xff]   ;;  %v16401_v9 = vld [vmem:[%s18644_s27 + $0x50] sm:$0xff]   ;;  %s18661_s10 = scalar_lea.vmem %s20989_s2, %s16372_s28  ;;  %s19163_s14 = scalar_lea.vmem %s20990_s3, %s15614_s11 }
  0x33   : > { %v647_v2 = vsel %vm604_vm0, %v16397_v1, 4286644096  ;;  %v16398_v3 = vld [vmem:[%s18644_s27] sm:$0xff]   ;;  %v652_v5 = vsel %vm604_vm0, %v16399_v4, 4286644096  ;;  %v16400_v6 = vld [vmem:[%s18644_s27 + $0x8] sm:$0xff]   ;;  %s378_s13 = scalar_lea.vmem %s20995_s8, %s21007_s30 }
  0x34   : > { %649 = vmax.xlane.bf16.xlu0 %v647_v2  ;;  %654 = vmax.xlane.bf16.xlu1 %v652_v5  ;;  %v607_v7 = vsel %vm604_vm0, %v16398_v3, 4286644096  ;;  %v612_v8 = vsel %vm604_vm0, %v16400_v6, 4286644096  ;;  %v16402_v10 = vld [vmem:[%s18644_s27 + $0x10] sm:$0xff]   ;;  %v16403_v13 = vld [vmem:[%s18644_s27 + $0x58] sm:$0xff]  }
  0x35   : > { %v657_v11 = vsel %vm604_vm0, %v16401_v9, 4286644096  ;;  %v617_v12 = vsel %vm604_vm0, %v16402_v10, 4286644096  ;;  %v16404_v14 = vld [vmem:[%s18644_s27 + $0x18] sm:$0xff]   ;;  %v16405_v16 = vld [vmem:[%s18644_s27 + $0x60] sm:$0xff]  }
  0x36   : > { %v662_v15 = vsel %vm604_vm0, %v16403_v13, 4286644096  ;;  %v622_v17 = vsel %vm604_vm0, %v16404_v14, 4286644096  ;;  %v16413_v18 = vld [vmem:[%s18661_s10 + $0x740] ss:$116 sps:$4 sm:$0xff]  }
  0x37   : > { %v16415_v19 = vld [vmem:[%s18661_s10 + $0x744] ss:$116 sps:$4 sm:$0xff]   ;;  %v16416_v20 = vld [vmem:[%s18661_s10 + $0x748] ss:$116 sps:$4 sm:$0xff]   ;;  %v16418_v22 = vld [vmem:[%s18661_s10 + $0x74c] ss:$116 sps:$4 sm:$0xff]  }
  0x38   : > { %v16406_v21 = vld [vmem:[%s18644_s27 + $0x20] sm:$0xff]   ;;  %v10375_v23 = vmax.bf16 %v16415_v19, %v16413_v18  ;;  %v667_v24 = vsel %vm604_vm0, %v16405_v16, 4286644096  ;;  %v16421_v28 = vld [vmem:[%s18661_s10 + $0x754] ss:$116 sps:$4 sm:$0xff]   ;;  %v16411_v57 = vld [vmem:[%s18644_s27 + $0x78] sm:$0xff]  }
  0x39   : > { %v16419_v25 = vld [vmem:[%s18661_s10 + $0x750] ss:$116 sps:$4 sm:$0xff]   ;;  %v627_v27 = vsel %vm604_vm0, %v16406_v21, 4286644096  ;;  %v16407_v30 = vld [vmem:[%s18644_s27 + $0x68] sm:$0xff]   ;;  %v16412_v62 = vld [vmem:[%s18644_s27 + $0x38] sm:$0xff]  }
  0x3a   : > { %v10376_v26 = vmax.bf16 %v16416_v20, %v10375_v23  ;;  %v16422_v31 = vld [vmem:[%s18661_s10 + $0x758] ss:$116 sps:$4 sm:$0xff]   ;;  %v16424_v34 = vld [vmem:[%s18661_s10 + $0x75c] ss:$116 sps:$4 sm:$0xff]   ;;  %v16425_v35 = vld [vmem:[%s18661_s10 + $0x760] ss:$116 sps:$4 sm:$0xff]  }
  0x3b   : > { %v16408_v33 = vld [vmem:[%s18644_s27 + $0x28] sm:$0xff]   ;;  %v672_v37 = vsel %vm604_vm0, %v16407_v30, 4286644096  ;;  %v16427_v38 = vld [vmem:[%s18661_s10 + $0x764] ss:$116 sps:$4 sm:$0xff]   ;;  %v16409_v40 = vld [vmem:[%s18644_s27 + $0x70] sm:$0xff]  }
  0x3c   : > { %609 = vmax.xlane.bf16.xlu0 %v607_v7  ;;  %614 = vmax.xlane.bf16.xlu1 %v612_v8  ;;  %v10377_v29 = vmax.bf16 %v16418_v22, %v10376_v26  ;;  %v632_v41 = vsel %vm604_vm0, %v16408_v33, 4286644096  ;;  %v16428_v42 = vld [vmem:[%s18661_s10 + $0x768] ss:$116 sps:$4 sm:$0xff]   ;;  %v16410_v44 = vld [vmem:[%s18644_s27 + $0x30] sm:$0xff]   ;;  %v16456_v14 = vld [vmem:[%s18644_s27 + $0xc0] sm:$0xff]  }
  0x3d   : > { %v16430_v45 = vld [vmem:[%s18661_s10 + $0x76c] ss:$116 sps:$4 sm:$0xff]   ;;  %v16431_v47 = vld [vmem:[%s18661_s10 + $0x770] ss:$116 sps:$4 sm:$0xff]   ;;  %v677_v49 = vsel %vm604_vm0, %v16409_v40, 4286644096 }
  0x3e   : > { %v10378_v32 = vmax.bf16 %v16419_v25, %v10377_v29  ;;  %v16457_v51 = vld [vmem:[%s18661_s10] ss:$116 sps:$4 sm:$0xff]   ;;  %v16459_v52 = vld [vmem:[%s18661_s10 + $0x4] ss:$116 sps:$4 sm:$0xff]   ;;  %v16460_v53 = vld [vmem:[%s18661_s10 + $0x8] ss:$116 sps:$4 sm:$0xff]  }
  0x3f   : > { %v637_v54 = vsel %vm604_vm0, %v16410_v44, 4286644096  ;;  %v16433_v55 = vld [vmem:[%s18661_s10 + $0x774] ss:$116 sps:$4 sm:$0xff]   ;;  %v16462_v58 = vld [vmem:[%s18661_s10 + $0xc] ss:$116 sps:$4 sm:$0xff]   ;;  %v10110_v59 = vmax.bf16 %v16459_v52, %v16457_v51 }
  0x40   : > { %v10379_v36 = vmax.bf16 %v16421_v28, %v10378_v32  ;;  %v16434_v60 = vld [vmem:[%s18661_s10 + $0x778] ss:$116 sps:$4 sm:$0xff]   ;;  %v16463_v63 = vld [vmem:[%s18661_s10 + $0x10] ss:$116 sps:$4 sm:$0xff]   ;;  %v682_v3 = vsel %vm604_vm0, %v16411_v57, 4286644096 }
  0x41   : > { %v10111_v0 = vmax.bf16 %v16460_v53, %v10110_v59  ;;  %v16436_v1 = vld [vmem:[%s18661_s10 + $0x77c] ss:$116 sps:$4 sm:$0xff]   ;;  %v16465_v4 = vld [vmem:[%s18661_s10 + $0x14] ss:$116 sps:$4 sm:$0xff]   ;;  %v642_v8 = vsel %vm604_vm0, %v16412_v62, 4286644096 }
  0x42   : > { %v10380_v39 = vmax.bf16 %v16422_v31, %v10379_v36  ;;  %v16437_v6 = vld [vmem:[%s18661_s10 + $0x780] ss:$116 sps:$4 sm:$0xff]   ;;  %v16439_v9 = vld [vmem:[%s18661_s10 + $0x784] ss:$116 sps:$4 sm:$0xff]   ;;  %v16472_v25 = vld [vmem:[%s18661_s10 + $0x28] ss:$116 sps:$4 sm:$0xff]  }
  0x43   : > { %v10112_v5 = vmax.bf16 %v16462_v58, %v10111_v0  ;;  %v16466_v10 = vld [vmem:[%s18661_s10 + $0x18] ss:$116 sps:$4 sm:$0xff]   ;;  %v16469_v16 = vld [vmem:[%s18661_s10 + $0x20] ss:$116 sps:$4 sm:$0xff]   ;;  %v16443_v22 = vld [vmem:[%s18661_s10 + $0x790] ss:$116 sps:$4 sm:$0xff]  }
  0x44   : > { %659 = vmax.xlane.bf16.xlu0 %v657_v11  ;;  %619 = vmax.xlane.bf16.xlu1 %v617_v12  ;;  %v10381_v43 = vmax.bf16 %v16424_v34, %v10380_v39  ;;  %v16440_v12 = vld [vmem:[%s18661_s10 + $0x788] ss:$116 sps:$4 sm:$0xff]   ;;  %v16442_v18 = vld [vmem:[%s18661_s10 + $0x78c] ss:$116 sps:$4 sm:$0xff]   ;;  %v16471_v20 = vld [vmem:[%s18661_s10 + $0x24] ss:$116 sps:$4 sm:$0xff]  }
  0x45   : > { %v10113_v11 = vmax.bf16 %v16463_v63, %v10112_v5  ;;  %v16474_v29 = vld [vmem:[%s18661_s10 + $0x2c] ss:$116 sps:$4 sm:$0xff]   ;;  %v16475_v34 = vld [vmem:[%s18661_s10 + $0x30] ss:$116 sps:$4 sm:$0xff]   ;;  %v16452_v58 = vld [vmem:[%s18661_s10 + $0x7a8] ss:$116 sps:$4 sm:$0xff]  }
  0x46   : > { %v10382_v46 = vmax.bf16 %v16425_v35, %v10381_v43  ;;  %v16500_v31 = vld [vmem:[%s18644_s27 + $0x80] sm:$0xff]   ;;  %v16446_v32 = vld [vmem:[%s18661_s10 + $0x798] ss:$116 sps:$4 sm:$0xff]   ;;  %v16448_v39 = vld [vmem:[%s18661_s10 + $0x79c] ss:$116 sps:$4 sm:$0xff]   ;;  %s16371_s15 = smul.u32 7360, %s21007_s30 }
  0x47   : > { %v16477_v43 = vld [vmem:[%s18661_s10 + $0x34] ss:$116 sps:$4 sm:$0xff]   ;;  %v16451_v52 = vld [vmem:[%s18661_s10 + $0x7a4] ss:$116 sps:$4 sm:$0xff]  }
  0x48   : > { %v10383_v48 = vmax.bf16 %v16427_v38, %v10382_v46  ;;  %v16501_v38 = vld [vmem:[%s18661_s10 + $0x828] ss:$116 sps:$4 sm:$0xff]   ;;  %v16449_v46 = vld [vmem:[%s18661_s10 + $0x7a0] ss:$116 sps:$4 sm:$0xff]   ;;  %v16455_v62 = vld [vmem:[%s18661_s10 + $0x7b0] ss:$116 sps:$4 sm:$0xff]   ;;  %s19188_s18 = scalar_lea.vmem %s20988_s1, %s16371_s15 }
  0x49   : > { %v16481_v63 = vld [vmem:[%s18661_s10 + $0x40] ss:$116 sps:$4 sm:$0xff]  }
  0x4a   : > { %v10384_v50 = vmax.bf16 %v16428_v42, %v10383_v48  ;;  %v16504_v42 = vld [vmem:[%s18661_s10 + $0x830] ss:$116 sps:$4 sm:$0xff]   ;;  %v16506_v48 = vld [vmem:[%s18661_s10 + $0x834] ss:$116 sps:$4 sm:$0xff]  }
  0x4c   : > { %664 = vmax.xlane.bf16.xlu0 %v662_v15  ;;  %624 = vmax.xlane.bf16.xlu1 %v622_v17  ;;  %v10385_v56 = vmax.bf16 %v16430_v45, %v10384_v50  ;;  %v16468_v15 = vld [vmem:[%s18661_s10 + $0x1c] ss:$116 sps:$4 sm:$0xff]   ;;  %v10114_v17 = vmax.bf16 %v16465_v4, %v10113_v11  ;;  %v687_v45 = vsel %vm604_vm0, %v16500_v31, 4286644096  ;;  %v16478_v50 = vld [vmem:[%s18661_s10 + $0x38] ss:$116 sps:$4 sm:$0xff]  }
  0x4d   : > { %v16510_v4 = vld [vmem:[%s18661_s10 + $0x840] ss:$116 sps:$4 sm:$0xff]   ;;  %v16519_v31 = vld [vmem:[%s18661_s10 + $0x858] ss:$116 sps:$4 sm:$0xff]  }
  0x4e   : > { %v10386_v61 = vmax.bf16 %v16431_v47, %v10385_v56  ;;  %v10115_v21 = vmax.bf16 %v16466_v10, %v10114_v17  ;;  %v16480_v56 = vld [vmem:[%s18661_s10 + $0x3c] ss:$116 sps:$4 sm:$0xff]   ;;  %v16515_v17 = vld [vmem:[%s18661_s10 + $0x84c] ss:$116 sps:$4 sm:$0xff]  }
  0x4f   : > { %v16513_v10 = vld [vmem:[%s18661_s10 + $0x848] ss:$116 sps:$4 sm:$0xff]  }
  0x50   : > { %v10387_v2 = vmax.bf16 %v16433_v55, %v10386_v61  ;;  %v10116_v26 = vmax.bf16 %v16468_v15, %v10115_v21 }
  0x52   : > { %v10388_v7 = vmax.bf16 %v16434_v60, %v10387_v2  ;;  %v10117_v30 = vmax.bf16 %v16469_v16, %v10116_v26  ;;  %v16509_v60 = vld [vmem:[%s18661_s10 + $0x83c] ss:$116 sps:$4 sm:$0xff]  }
  0x54   : > { %669 = vmax.xlane.bf16.xlu0 %v667_v24  ;;  %629 = vmax.xlane.bf16.xlu1 %v627_v27  ;;  %v10389_v13 = vmax.bf16 %v16436_v1, %v10388_v7  ;;  %v727_v24 = vsel %vm604_vm0, %v16456_v14, 4286644096  ;;  %v16445_v27 = vld [vmem:[%s18661_s10 + $0x794] ss:$116 sps:$4 sm:$0xff]   ;;  %v10118_v35 = vmax.bf16 %v16471_v20, %v10117_v30  ;;  %v16454_v1 = vld [vmem:[%s18661_s10 + $0x7ac] ss:$116 sps:$4 sm:$0xff]  }
  0x55   : > { %v16486_v14 = vld [vmem:[%s18661_s10 + $0x4c] ss:$116 sps:$4 sm:$0xff]   ;;  %v16487_v20 = vld [vmem:[%s18661_s10 + $0x50] ss:$116 sps:$4 sm:$0xff]  }
  0x56   : > { %v10390_v19 = vmax.bf16 %v16437_v6, %v10389_v13  ;;  %v16484_v6 = vld [vmem:[%s18661_s10 + $0x48] ss:$116 sps:$4 sm:$0xff]   ;;  %v10403_v13 = vsel %vm10137_vm1, %v16455_v62, 4286644096 }
  0x58   : > { %v10391_v23 = vmax.bf16 %v16439_v9, %v10390_v19 }
  0x5a   : > { %v10392_v28 = vmax.bf16 %v16440_v12, %v10391_v23  ;;  %v16544_v12 = vld [vmem:[%s18644_s27 + $0xc8] sm:$0xff]   ;;  %v16516_v23 = vld [vmem:[%s18661_s10 + $0x850] ss:$116 sps:$4 sm:$0xff]  }
  0x5b   : > { %v732_v19 = vsel %vm604_vm0, %v16544_v12, 4286644096  ;;  %v16559_v12 = vld [vmem:[%s18661_s10 + $0x10c] ss:$116 sps:$4 sm:$0xff]  }
  0x5c   : > { %674 = vmax.xlane.bf16.xlu0 %v672_v37  ;;  %634 = vmax.xlane.bf16.xlu1 %v632_v41  ;;  %v10393_v33 = vmax.bf16 %v16442_v18, %v10392_v28  ;;  %v10119_v37 = vmax.bf16 %v16472_v25, %v10118_v35  ;;  %v16503_v41 = vld [vmem:[%s18661_s10 + $0x82c] ss:$116 sps:$4 sm:$0xff]   ;;  %v16489_v25 = vld [vmem:[%s18661_s10 + $0x54] ss:$116 sps:$4 sm:$0xff]  }
  0x5d   : > { %v16545_v35 = vld [vmem:[%s18661_s10 + $0xe8] ss:$116 sps:$4 sm:$0xff]  }
  0x5e   : > { %v10394_v36 = vmax.bf16 %v16443_v22, %v10393_v33  ;;  %v10120_v44 = vmax.bf16 %v16474_v29, %v10119_v37  ;;  %v16490_v29 = vld [vmem:[%s18661_s10 + $0x58] ss:$116 sps:$4 sm:$0xff]   ;;  %v16492_v37 = vld [vmem:[%s18661_s10 + $0x5c] ss:$116 sps:$4 sm:$0xff]  }
  0x60   : > { %v10395_v40 = vmax.bf16 %v16445_v27, %v10394_v36  ;;  %v10121_v51 = vmax.bf16 %v16475_v34, %v10120_v44  ;;  %v16518_v27 = vld [vmem:[%s18661_s10 + $0x854] ss:$116 sps:$4 sm:$0xff]   ;;  %v16547_v36 = vld [vmem:[%s18661_s10 + $0xec] ss:$116 sps:$4 sm:$0xff]  }
  0x61   : > { %v16493_v44 = vld [vmem:[%s18661_s10 + $0x60] ss:$116 sps:$4 sm:$0xff]  }
  0x62   : > { %v10396_v47 = vmax.bf16 %v16446_v32, %v10395_v40  ;;  %v10122_v57 = vmax.bf16 %v16477_v43, %v10121_v51  ;;  %v16521_v40 = vld [vmem:[%s18661_s10 + $0x85c] ss:$116 sps:$4 sm:$0xff]   ;;  %v10144_v43 = vmax.bf16 %v16547_v36, %v16545_v35 }
  0x63   : > { %v16565_v36 = vld [vmem:[%s18661_s10 + $0x11c] ss:$116 sps:$4 sm:$0xff]  }
  0x64   : > { %679 = vmax.xlane.bf16.xlu0 %v677_v49  ;;  %639 = vmax.xlane.bf16.xlu1 %v637_v54  ;;  %v10408_v49 = vmax.bf16 %v16503_v41, %v16501_v38  ;;  %v10397_v53 = vmax.bf16 %v16448_v39, %v10396_v47  ;;  %v16507_v54 = vld [vmem:[%s18661_s10 + $0x838] ss:$116 sps:$4 sm:$0xff]   ;;  %v10123_v0 = vmax.bf16 %v16478_v50, %v10122_v57  ;;  %v16548_v39 = vld [vmem:[%s18661_s10 + $0xf0] ss:$116 sps:$4 sm:$0xff]  }
  0x65   : > { %v16495_v50 = vld [vmem:[%s18661_s10 + $0x64] ss:$116 sps:$4 sm:$0xff]  }
  0x66   : > { %v10409_v55 = vmax.bf16 %v16504_v42, %v10408_v49  ;;  %v10398_v59 = vmax.bf16 %v16449_v46, %v10397_v53  ;;  %v10124_v7 = vmax.bf16 %v16480_v56, %v10123_v0  ;;  %v16550_v42 = vld [vmem:[%s18661_s10 + $0xf4] ss:$116 sps:$4 sm:$0xff]   ;;  %v10145_v49 = vmax.bf16 %v16548_v39, %v10144_v43  ;;  %v16499_v57 = vld [vmem:[%s18661_s10 + $0x70] ss:$116 sps:$4 sm:$0xff]  }
  0x67   : > { %v16522_v46 = vld [vmem:[%s18661_s10 + $0x860] ss:$116 sps:$4 sm:$0xff]   ;;  %v16496_v56 = vld [vmem:[%s18661_s10 + $0x68] ss:$116 sps:$4 sm:$0xff]  }
  0x68   : > { %v10410_v61 = vmax.bf16 %v16506_v48, %v10409_v55  ;;  %v10399_v2 = vmax.bf16 %v16451_v52, %v10398_v59  ;;  %v10125_v15 = vmax.bf16 %v16481_v63, %v10124_v7  ;;  %v16551_v48 = vld [vmem:[%s18661_s10 + $0xf8] ss:$116 sps:$4 sm:$0xff]   ;;  %v10146_v55 = vmax.bf16 %v16550_v42, %v10145_v49  ;;  %v16525_v59 = vld [vmem:[%s18661_s10 + $0x868] ss:$116 sps:$4 sm:$0xff]   ;;  %v16566_v42 = vld [vmem:[%s18661_s10 + $0x120] ss:$116 sps:$4 sm:$0xff]  }
  0x69   : > { %v16524_v52 = vld [vmem:[%s18661_s10 + $0x864] ss:$116 sps:$4 sm:$0xff]   ;;  %v16498_v63 = vld [vmem:[%s18661_s10 + $0x6c] ss:$116 sps:$4 sm:$0xff]  }
  0x6a   : > { %v10411_v5 = vmax.bf16 %v16507_v54, %v10410_v61  ;;  %v10400_v9 = vmax.bf16 %v16452_v58, %v10399_v2  ;;  %v16553_v54 = vld [vmem:[%s18661_s10 + $0xfc] ss:$116 sps:$4 sm:$0xff]   ;;  %v16554_v61 = vld [vmem:[%s18661_s10 + $0x100] ss:$116 sps:$4 sm:$0xff]   ;;  %v10147_v62 = vmax.bf16 %v16551_v48, %v10146_v55  ;;  %v16556_v2 = vld [vmem:[%s18661_s10 + $0x104] ss:$116 sps:$4 sm:$0xff]  }
  0x6b   : > { %v16588_v7 = vld [vmem:[%s18644_s27 + $0x88] sm:$0xff]   ;;  %v16568_v48 = vld [vmem:[%s18661_s10 + $0x124] ss:$116 sps:$4 sm:$0xff]  }
  0x6c   : > { %684 = vmax.xlane.bf16.xlu0 %v682_v3  ;;  %644 = vmax.xlane.bf16.xlu1 %v642_v8  ;;  %v16483_v3 = vld [vmem:[%s18661_s10 + $0x44] ss:$116 sps:$4 sm:$0xff]   ;;  %v10412_v11 = vmax.bf16 %v16509_v60, %v10411_v5  ;;  %v10401_v16 = vmax.bf16 %v16454_v1, %v10400_v9  ;;  %v16527_v1 = vld [vmem:[%s18661_s10 + $0x86c] ss:$116 sps:$4 sm:$0xff]   ;;  %v16557_v5 = vld [vmem:[%s18661_s10 + $0x108] ss:$116 sps:$4 sm:$0xff]  }
  0x6d   : > { %v16512_v8 = vld [vmem:[%s18661_s10 + $0x844] ss:$116 sps:$4 sm:$0xff]   ;;  %v10126_v21 = vmax.bf16 %v16483_v3, %v10125_v15  ;;  %v10139_v9 = vsel %vm10137_vm1, %v16499_v57, 4286644096  ;;  %v16569_v55 = vld [vmem:[%s18661_s10 + $0x128] ss:$116 sps:$4 sm:$0xff]  }
  0x6e   : > { %v10413_v18 = vmax.bf16 %v16510_v4, %v10412_v11  ;;  %v10405_v22 = vmax.bf16 %v10403_v13, %v10401_v16  ;;  %v16528_v3 = vld [vmem:[%s18661_s10 + $0x870] ss:$116 sps:$4 sm:$0xff]   ;;  %v16531_v16 = vld [vmem:[%s18661_s10 + $0x878] ss:$116 sps:$4 sm:$0xff]   ;;  %v16542_v57 = vld [vmem:[%s18661_s10 + $0x894] ss:$116 sps:$4 sm:$0xff]  }
  0x6f   : > { %v10127_v26 = vmax.bf16 %v16484_v6, %v10126_v21  ;;  %v10148_v6 = vmax.bf16 %v16553_v54, %v10147_v62  ;;  %v16533_v21 = vld [vmem:[%s18661_s10 + $0x87c] ss:$116 sps:$4 sm:$0xff]  }
  0x70   : > { %v16572_v62 = vld [vmem:[%s18661_s10 + $0x130] ss:$116 sps:$4 sm:$0xff]  }
  0x71   : > { %v10128_v30 = vmax.bf16 %v16486_v14, %v10127_v26  ;;  %v10149_v13 = vmax.bf16 %v16554_v61, %v10148_v6  ;;  %v692_v14 = vsel %vm604_vm0, %v16588_v7, 4286644096  ;;  %v16574_v6 = vld [vmem:[%s18661_s10 + $0x134] ss:$116 sps:$4 sm:$0xff]  }
  0x73   : > { %v10129_v33 = vmax.bf16 %v16487_v20, %v10128_v30 }
  0x74   : > { %729 = vmax.xlane.bf16.xlu0 %v727_v24  ;;  %v10414_v24 = vmax.bf16 %v16512_v8, %v10413_v18  ;;  %10406 = vmax.xlane.bf16.xlu1 %v10405_v22  ;;  %v16560_v18 = vld [vmem:[%s18661_s10 + $0x110] ss:$116 sps:$4 sm:$0xff]  }
  0x75   : > { %v10130_v38 = vmax.bf16 %v16489_v25, %v10129_v33  ;;  %v16534_v25 = vld [vmem:[%s18661_s10 + $0x880] ss:$116 sps:$4 sm:$0xff]   ;;  %v16592_v33 = vld [vmem:[%s18661_s10 + $0x918] ss:$116 sps:$4 sm:$0xff]  }
  0x76   : > { %v10415_v28 = vmax.bf16 %v16513_v10, %v10414_v24  ;;  %v16530_v10 = vld [vmem:[%s18661_s10 + $0x874] ss:$116 sps:$4 sm:$0xff]  }
  0x78   : > { %v10416_v32 = vmax.bf16 %v16515_v17, %v10415_v28 }
  0x7a   : > { %v10417_v34 = vmax.bf16 %v16516_v23, %v10416_v32  ;;  %v16562_v23 = vld [vmem:[%s18661_s10 + $0x114] ss:$116 sps:$4 sm:$0xff]  }
  0x7b   : > { %v16591_v32 = vld [vmem:[%s18661_s10 + $0x914] ss:$116 sps:$4 sm:$0xff]  }
  0x7c   : > { %689 = vmax.xlane.bf16.xlu0 %v687_v45  ;;  %v10418_v41 = vmax.bf16 %v16518_v27, %v10417_v34  ;;  %v10131_v45 = vmax.bf16 %v16490_v29, %v10130_v38  ;;  %v16563_v27 = vld [vmem:[%s18661_s10 + $0x118] ss:$116 sps:$4 sm:$0xff]   ;;  %v16594_v38 = vld [vmem:[%s18661_s10 + $0x91c] ss:$116 sps:$4 sm:$0xff]  }
  0x7d   : > { %v16536_v34 = vld [vmem:[%s18661_s10 + $0x884] ss:$116 sps:$4 sm:$0xff]  }
  0x7e   : > { %v10419_v47 = vmax.bf16 %v16519_v31, %v10418_v41  ;;  %v10132_v51 = vmax.bf16 %v16492_v37, %v10131_v45  ;;  %v16589_v31 = vld [vmem:[%s18661_s10 + $0x910] ss:$116 sps:$4 sm:$0xff]  }
  0x7f   : > { %v10441_v39 = vmax.bf16 %v16591_v32, %v16589_v31  ;;  %v16636_v31 = vld [vmem:[%s18661_s10 + $0x1d8] ss:$116 sps:$4 sm:$0xff]  }
  0x80   : > { %v10420_v53 = vmax.bf16 %v16521_v40, %v10419_v47  ;;  %v10133_v58 = vmax.bf16 %v16493_v44, %v10132_v51  ;;  %v16537_v40 = vld [vmem:[%s18661_s10 + $0x888] ss:$116 sps:$4 sm:$0xff]   ;;  %v16595_v44 = vld [vmem:[%s18661_s10 + $0x920] ss:$116 sps:$4 sm:$0xff]   ;;  %v16609_v32 = vld [vmem:[%s18661_s10 + $0x944] ss:$116 sps:$4 sm:$0xff]  }
  0x81   : > { %v10442_v45 = vmax.bf16 %v16592_v33, %v10441_v39 }
  0x82   : > { %v10421_v60 = vmax.bf16 %v16522_v46, %v10420_v53  ;;  %v10134_v0 = vmax.bf16 %v16495_v50, %v10133_v58  ;;  %v16539_v46 = vld [vmem:[%s18661_s10 + $0x88c] ss:$116 sps:$4 sm:$0xff]   ;;  %v16597_v50 = vld [vmem:[%s18661_s10 + $0x924] ss:$116 sps:$4 sm:$0xff]  }
  0x83   : > { %v10443_v51 = vmax.bf16 %v16594_v38, %v10442_v45  ;;  %v16543_v53 = vld [vmem:[%s18661_s10 + $0x898] ss:$116 sps:$4 sm:$0xff]   ;;  %v16610_v38 = vld [vmem:[%s18661_s10 + $0x948] ss:$116 sps:$4 sm:$0xff]  }
  0x84   : > { %734 = vmax.xlane.bf16.xlu0 %v732_v19  ;;  %v10422_v4 = vmax.bf16 %v16524_v52, %v10421_v60  ;;  %v10135_v8 = vmax.bf16 %v16496_v56, %v10134_v0  ;;  %v10150_v19 = vmax.bf16 %v16556_v2, %v10149_v13  ;;  %v16540_v52 = vld [vmem:[%s18661_s10 + $0x890] ss:$116 sps:$4 sm:$0xff]   ;;  %v16571_v58 = vld [vmem:[%s18661_s10 + $0x12c] ss:$116 sps:$4 sm:$0xff]  }
  0x85   : > { %v10444_v60 = vmax.bf16 %v16595_v44, %v10443_v51  ;;  %v16600_v0 = vld [vmem:[%s18661_s10 + $0x92c] ss:$116 sps:$4 sm:$0xff]   ;;  %v16613_v51 = vld [vmem:[%s18661_s10 + $0x950] ss:$116 sps:$4 sm:$0xff]  }
  0x86   : > { %v10423_v11 = vmax.bf16 %v16525_v59, %v10422_v4  ;;  %v10136_v15 = vmax.bf16 %v16498_v63, %v10135_v8  ;;  %v10151_v24 = vmax.bf16 %v16557_v5, %v10150_v19  ;;  %v16598_v59 = vld [vmem:[%s18661_s10 + $0x928] ss:$116 sps:$4 sm:$0xff]   ;;  %v10436_v5 = vsel %vm10137_vm1, %v16543_v53, 4286644096  ;;  %v16612_v44 = vld [vmem:[%s18661_s10 + $0x94c] ss:$116 sps:$4 sm:$0xff]  }
  0x87   : > { %v10445_v2 = vmax.bf16 %v16597_v50, %v10444_v60  ;;  %v16603_v8 = vld [vmem:[%s18661_s10 + $0x934] ss:$116 sps:$4 sm:$0xff]   ;;  %v16606_v19 = vld [vmem:[%s18661_s10 + $0x93c] ss:$116 sps:$4 sm:$0xff]   ;;  %v16587_v50 = vld [vmem:[%s18661_s10 + $0x158] ss:$116 sps:$4 sm:$0xff]  }
  0x88   : > { %v10424_v17 = vmax.bf16 %v16527_v1, %v10423_v11  ;;  %v10141_v20 = vmax.bf16 %v10139_v9, %v10136_v15  ;;  %v10152_v28 = vmax.bf16 %v16559_v12, %v10151_v24  ;;  %v16601_v1 = vld [vmem:[%s18661_s10 + $0x930] ss:$116 sps:$4 sm:$0xff]   ;;  %v16575_v12 = vld [vmem:[%s18661_s10 + $0x138] ss:$116 sps:$4 sm:$0xff]   ;;  %v16586_v53 = vld [vmem:[%s18661_s10 + $0x154] ss:$116 sps:$4 sm:$0xff]  }
  0x89   : > { %v10446_v9 = vmax.bf16 %v16598_v59, %v10445_v2  ;;  %v16644_v60 = vld [vmem:[%s18661_s10 + $0x1ec] ss:$116 sps:$4 sm:$0xff]   ;;  %v16618_v2 = vld [vmem:[%s18661_s10 + $0x95c] ss:$116 sps:$4 sm:$0xff]  }
  0x8a   : > { %v10425_v22 = vmax.bf16 %v16528_v3, %v10424_v17  ;;  %10142 = vmax.xlane.bf16.xlu1 %v10141_v20  ;;  %v10153_v30 = vmax.bf16 %v16560_v18, %v10152_v28  ;;  %v16632_v3 = vld [vmem:[%s18644_s27 + $0xd0] sm:$0xff]   ;;  %v16580_v28 = vld [vmem:[%s18661_s10 + $0x144] ss:$116 sps:$4 sm:$0xff]  }
  0x8b   : > { %v10447_v15 = vmax.bf16 %v16600_v0, %v10446_v9  ;;  %v16577_v17 = vld [vmem:[%s18661_s10 + $0x13c] ss:$116 sps:$4 sm:$0xff]  }
  0x8c   : > { %694 = vmax.xlane.bf16.xlu0 %v692_v14  ;;  %v10426_v26 = vmax.bf16 %v16530_v10, %v10425_v22  ;;  %v10154_v37 = vmax.bf16 %v16562_v23, %v10153_v30  ;;  %v737_v10 = vsel %vm604_vm0, %v16632_v3, 4286644096  ;;  %v16604_v14 = vld [vmem:[%s18661_s10 + $0x938] ss:$116 sps:$4 sm:$0xff]   ;;  %v16607_v23 = vld [vmem:[%s18661_s10 + $0x940] ss:$116 sps:$4 sm:$0xff]  }
  0x8d   : > { %v10448_v20 = vmax.bf16 %v16601_v1, %v10447_v15  ;;  %v16635_v30 = vld [vmem:[%s18661_s10 + $0x1d4] ss:$116 sps:$4 sm:$0xff]   ;;  %v10172_v1 = vsel %vm10137_vm1, %v16587_v50, 4286644096  ;;  %v16686_v50 = vld [vmem:[%s18661_s10 + $0xa10] ss:$116 sps:$4 sm:$0xff]  }
  0x8e   : > { %v10427_v29 = vmax.bf16 %v16531_v16, %v10426_v26  ;;  %v10155_v43 = vmax.bf16 %v16563_v27, %v10154_v37  ;;  %v16633_v27 = vld [vmem:[%s18661_s10 + $0x1d0] ss:$116 sps:$4 sm:$0xff]  }
  0x8f   : > { %v10449_v24 = vmax.bf16 %v16603_v8, %v10448_v20  ;;  %v10177_v37 = vmax.bf16 %v16635_v30, %v16633_v27  ;;  %v16676_v0 = vld [vmem:[%s18644_s27 + $0x90] sm:$0xff]  }
  0x90   : > { %v10428_v35 = vmax.bf16 %v16533_v21, %v10427_v29  ;;  %v10156_v49 = vmax.bf16 %v16565_v36, %v10155_v43  ;;  %v16578_v21 = vld [vmem:[%s18661_s10 + $0x140] ss:$116 sps:$4 sm:$0xff]   ;;  %v16638_v36 = vld [vmem:[%s18661_s10 + $0x1dc] ss:$116 sps:$4 sm:$0xff]  }
  0x91   : > { %v10450_v26 = vmax.bf16 %v16604_v14, %v10449_v24  ;;  %v10178_v43 = vmax.bf16 %v16636_v31, %v10177_v37  ;;  %v16619_v8 = vld [vmem:[%s18661_s10 + $0x960] ss:$116 sps:$4 sm:$0xff]   ;;  %v16677_v24 = vld [vmem:[%s18661_s10 + $0x9f8] ss:$116 sps:$4 sm:$0xff]   ;;  %v16683_v37 = vld [vmem:[%s18661_s10 + $0xa08] ss:$116 sps:$4 sm:$0xff]  }
  0x92   : > { %v10429_v41 = vmax.bf16 %v16534_v25, %v10428_v35  ;;  %v10157_v56 = vmax.bf16 %v16566_v42, %v10156_v49  ;;  %v16639_v42 = vld [vmem:[%s18661_s10 + $0x1e0] ss:$116 sps:$4 sm:$0xff]   ;;  %v16682_v31 = vld [vmem:[%s18661_s10 + $0xa04] ss:$116 sps:$4 sm:$0xff]  }
  0x93   : > { %v10451_v33 = vmax.bf16 %v16606_v19, %v10450_v26  ;;  %v10179_v49 = vmax.bf16 %v16638_v36, %v10178_v43  ;;  %v16651_v20 = vld [vmem:[%s18661_s10 + $0x200] ss:$116 sps:$4 sm:$0xff]  }
  0x94   : > { %v10430_v47 = vmax.bf16 %v16536_v34, %v10429_v41  ;;  %v10158_v63 = vmax.bf16 %v16568_v48, %v10157_v56  ;;  %739 = vmax.xlane.bf16.xlu0 %v737_v10  ;;  %v16581_v34 = vld [vmem:[%s18661_s10 + $0x148] ss:$116 sps:$4 sm:$0xff]   ;;  %v16641_v48 = vld [vmem:[%s18661_s10 + $0x1e4] ss:$116 sps:$4 sm:$0xff]   ;;  %v16624_v26 = vld [vmem:[%s18661_s10 + $0x96c] ss:$116 sps:$4 sm:$0xff]  }
  0x95   : > { %v10452_v39 = vmax.bf16 %v16607_v23, %v10451_v33  ;;  %v16642_v56 = vld [vmem:[%s18661_s10 + $0x1e8] ss:$116 sps:$4 sm:$0xff]   ;;  %v16625_v33 = vld [vmem:[%s18661_s10 + $0x970] ss:$116 sps:$4 sm:$0xff]   ;;  %v16685_v43 = vld [vmem:[%s18661_s10 + $0xa0c] ss:$116 sps:$4 sm:$0xff]  }
  0x96   : > { %v10431_v54 = vmax.bf16 %v16537_v40, %v10430_v47  ;;  %v10159_v7 = vmax.bf16 %v16569_v55, %v10158_v63  ;;  %v16583_v40 = vld [vmem:[%s18661_s10 + $0x14c] ss:$116 sps:$4 sm:$0xff]   ;;  %v16615_v55 = vld [vmem:[%s18661_s10 + $0x954] ss:$116 sps:$4 sm:$0xff]  }
  0x97   : > { %v10453_v45 = vmax.bf16 %v16609_v32, %v10452_v39  ;;  %v16627_v39 = vld [vmem:[%s18661_s10 + $0x974] ss:$116 sps:$4 sm:$0xff]  }
  0x98   : > { %v10432_v61 = vmax.bf16 %v16539_v46, %v10431_v54  ;;  %v10160_v13 = vmax.bf16 %v16571_v58, %v10159_v7  ;;  %v16584_v46 = vld [vmem:[%s18661_s10 + $0x150] ss:$116 sps:$4 sm:$0xff]   ;;  %v16616_v58 = vld [vmem:[%s18661_s10 + $0x958] ss:$116 sps:$4 sm:$0xff]   ;;  %v697_v7 = vsel %vm604_vm0, %v16676_v0, 4286644096 }
  0x9a   : > { %v10433_v4 = vmax.bf16 %v16540_v52, %v10432_v61  ;;  %v10161_v18 = vmax.bf16 %v16572_v62, %v10160_v13  ;;  %v10454_v52 = vmax.bf16 %v16610_v38, %v10453_v45  ;;  %v16645_v62 = vld [vmem:[%s18661_s10 + $0x1f0] ss:$116 sps:$4 sm:$0xff]   ;;  %v16628_v45 = vld [vmem:[%s18661_s10 + $0x978] ss:$116 sps:$4 sm:$0xff]  }
  0x9b   : > { %v16621_v13 = vld [vmem:[%s18661_s10 + $0x964] ss:$116 sps:$4 sm:$0xff]  }
  0x9c   : > { %v10434_v11 = vmax.bf16 %v16542_v57, %v10433_v4  ;;  %v10162_v22 = vmax.bf16 %v16574_v6, %v10161_v18  ;;  %v10180_v57 = vmax.bf16 %v16639_v42, %v10179_v49  ;;  %v10455_v59 = vmax.bf16 %v16612_v44, %v10454_v52  ;;  %699 = vmax.xlane.bf16.xlu0 %v697_v7  ;;  %v16622_v18 = vld [vmem:[%s18661_s10 + $0x968] ss:$116 sps:$4 sm:$0xff]   ;;  %v16663_v7 = vld [vmem:[%s18661_s10 + $0x220] ss:$116 sps:$4 sm:$0xff]  }
  0x9d   : > { %v16630_v52 = vld [vmem:[%s18661_s10 + $0x97c] ss:$116 sps:$4 sm:$0xff]  }
  0x9e   : > { %v10438_v16 = vmax.bf16 %v10436_v5, %v10434_v11  ;;  %v10163_v25 = vmax.bf16 %v16575_v12, %v10162_v22  ;;  %v10181_v63 = vmax.bf16 %v16641_v48, %v10180_v57  ;;  %v10456_v3 = vmax.bf16 %v16613_v51, %v10455_v59  ;;  %v16647_v5 = vld [vmem:[%s18661_s10 + $0x1f4] ss:$116 sps:$4 sm:$0xff]   ;;  %v16648_v11 = vld [vmem:[%s18661_s10 + $0x1f8] ss:$116 sps:$4 sm:$0xff]   ;;  %v16657_v48 = vld [vmem:[%s18661_s10 + $0x210] ss:$116 sps:$4 sm:$0xff]  }
  0xa0   : > { %10439 = vmax.xlane.bf16.xlu1 %v10438_v16  ;;  %v10164_v29 = vmax.bf16 %v16577_v17, %v10163_v25  ;;  %v10182_v6 = vmax.bf16 %v16642_v56, %v10181_v63  ;;  %v10457_v9 = vmax.bf16 %v16615_v55, %v10456_v3  ;;  %v16650_v16 = vld [vmem:[%s18661_s10 + $0x1fc] ss:$116 sps:$4 sm:$0xff]   ;;  %v16688_v55 = vld [vmem:[%s18661_s10 + $0xa14] ss:$116 sps:$4 sm:$0xff]   ;;  %v16660_v56 = vld [vmem:[%s18661_s10 + $0x218] ss:$116 sps:$4 sm:$0xff]  }
  0xa1   : > { %v16679_v25 = vld [vmem:[%s18661_s10 + $0x9fc] ss:$116 sps:$4 sm:$0xff]  }
  0xa2   : > { %v10165_v35 = vmax.bf16 %v16578_v21, %v10164_v29  ;;  %v10183_v12 = vmax.bf16 %v16644_v60, %v10182_v6  ;;  %v10458_v14 = vmax.bf16 %v16616_v58, %v10457_v9  ;;  %v16653_v29 = vld [vmem:[%s18661_s10 + $0x204] ss:$116 sps:$4 sm:$0xff]   ;;  %v10474_v32 = vmax.bf16 %v16679_v25, %v16677_v24  ;;  %v16662_v63 = vld [vmem:[%s18661_s10 + $0x21c] ss:$116 sps:$4 sm:$0xff]   ;;  %v16692_v9 = vld [vmem:[%s18661_s10 + $0xa20] ss:$116 sps:$4 sm:$0xff]  }
  0xa3   : > { %v16689_v58 = vld [vmem:[%s18661_s10 + $0xa18] ss:$116 sps:$4 sm:$0xff]   ;;  %v16724_v24 = vld [vmem:[%s18661_s10 + $0x2c0] ss:$116 sps:$4 sm:$0xff]  }
  0xa4   : > { %v10166_v41 = vmax.bf16 %v16580_v28, %v10165_v35  ;;  %v10184_v17 = vmax.bf16 %v16645_v62, %v10183_v12  ;;  %v10459_v19 = vmax.bf16 %v16618_v2, %v10458_v14  ;;  %v16680_v28 = vld [vmem:[%s18661_s10 + $0xa00] ss:$116 sps:$4 sm:$0xff]   ;;  %v16654_v35 = vld [vmem:[%s18661_s10 + $0x208] ss:$116 sps:$4 sm:$0xff]   ;;  %v16665_v12 = vld [vmem:[%s18661_s10 + $0x224] ss:$116 sps:$4 sm:$0xff]  }
  0xa5   : > { %v10475_v38 = vmax.bf16 %v16680_v28, %v10474_v32  ;;  %v16720_v60 = vld [vmem:[%s18644_s27 + $0xd8] sm:$0xff]   ;;  %v16668_v25 = vld [vmem:[%s18661_s10 + $0x22c] ss:$116 sps:$4 sm:$0xff]  }
  0xa6   : > { %v10167_v47 = vmax.bf16 %v16581_v34, %v10166_v41  ;;  %v10185_v21 = vmax.bf16 %v16647_v5, %v10184_v17  ;;  %v10460_v22 = vmax.bf16 %v16619_v8, %v10459_v19  ;;  %v16656_v41 = vld [vmem:[%s18661_s10 + $0x20c] ss:$116 sps:$4 sm:$0xff]   ;;  %v742_v3 = vsel %vm604_vm0, %v16720_v60, 4286644096  ;;  %v16694_v14 = vld [vmem:[%s18661_s10 + $0xa24] ss:$116 sps:$4 sm:$0xff]  }
  0xa7   : > { %v10476_v44 = vmax.bf16 %v16682_v31, %v10475_v38  ;;  %744 = vmax.xlane.bf16.xlu0 %v742_v3  ;;  %v16669_v31 = vld [vmem:[%s18661_s10 + $0x230] ss:$116 sps:$4 sm:$0xff]   ;;  %v16707_v3 = vld [vmem:[%s18661_s10 + $0xa48] ss:$116 sps:$4 sm:$0xff]  }
  0xa8   : > { %v10168_v54 = vmax.bf16 %v16583_v40, %v10167_v47  ;;  %v10186_v23 = vmax.bf16 %v16648_v11, %v10185_v21  ;;  %v10461_v27 = vmax.bf16 %v16621_v13, %v10460_v22  ;;  %v16721_v22 = vld [vmem:[%s18661_s10 + $0x2b8] ss:$116 sps:$4 sm:$0xff]  }
  0xa9   : > { %v10477_v51 = vmax.bf16 %v16683_v37, %v10476_v44  ;;  %v16671_v37 = vld [vmem:[%s18661_s10 + $0x234] ss:$116 sps:$4 sm:$0xff]  }
  0xaa   : > { %v10169_v61 = vmax.bf16 %v16584_v46, %v10168_v54  ;;  %v10187_v30 = vmax.bf16 %v16650_v16, %v10186_v23  ;;  %v10462_v34 = vmax.bf16 %v16622_v18, %v10461_v27  ;;  %v16631_v46 = vld [vmem:[%s18661_s10 + $0x980] ss:$116 sps:$4 sm:$0xff]   ;;  %v16666_v16 = vld [vmem:[%s18661_s10 + $0x228] ss:$116 sps:$4 sm:$0xff]  }
  0xab   : > { %v16659_v54 = vld [vmem:[%s18661_s10 + $0x214] ss:$116 sps:$4 sm:$0xff]   ;;  %v10478_v59 = vmax.bf16 %v16685_v43, %v10477_v51  ;;  %v10469_v62 = vsel %vm10137_vm1, %v16631_v46, 4286644096  ;;  %v16723_v23 = vld [vmem:[%s18661_s10 + $0x2bc] ss:$116 sps:$4 sm:$0xff]  }
  0xac   : > { %v10170_v4 = vmax.bf16 %v16586_v53, %v10169_v61  ;;  %v10188_v36 = vmax.bf16 %v16651_v20, %v10187_v30  ;;  %v10463_v40 = vmax.bf16 %v16624_v26, %v10462_v34  ;;  %v16695_v18 = vld [vmem:[%s18661_s10 + $0xa28] ss:$116 sps:$4 sm:$0xff]   ;;  %v16697_v27 = vld [vmem:[%s18661_s10 + $0xa2c] ss:$116 sps:$4 sm:$0xff]   ;;  %v10210_v30 = vmax.bf16 %v16723_v23, %v16721_v22  ;;  %v16767_v22 = vld [vmem:[%s18661_s10 + $0xae4] ss:$116 sps:$4 sm:$0xff]  }
  0xad   : > { %v10479_v2 = vmax.bf16 %v16686_v50, %v10478_v59  ;;  %v16672_v43 = vld [vmem:[%s18661_s10 + $0x238] ss:$116 sps:$4 sm:$0xff]   ;;  %v16675_v44 = vld [vmem:[%s18661_s10 + $0x240] ss:$116 sps:$4 sm:$0xff]   ;;  %v16730_v50 = vld [vmem:[%s18661_s10 + $0x2d0] ss:$116 sps:$4 sm:$0xff]  }
  0xae   : > { %v10174_v10 = vmax.bf16 %v10172_v1, %v10170_v4  ;;  %v10189_v42 = vmax.bf16 %v16653_v29, %v10188_v36  ;;  %v10464_v47 = vmax.bf16 %v16625_v33, %v10463_v40  ;;  %v16691_v1 = vld [vmem:[%s18661_s10 + $0xa1c] ss:$116 sps:$4 sm:$0xff]   ;;  %v16726_v29 = vld [vmem:[%s18661_s10 + $0x2c4] ss:$116 sps:$4 sm:$0xff]   ;;  %v10211_v36 = vmax.bf16 %v16724_v24, %v10210_v30  ;;  %v16741_v24 = vld [vmem:[%s18661_s10 + $0x2ec] ss:$116 sps:$4 sm:$0xff]  }
  0xaf   : > { %v16698_v33 = vld [vmem:[%s18661_s10 + $0xa30] ss:$116 sps:$4 sm:$0xff]   ;;  %v16701_v46 = vld [vmem:[%s18661_s10 + $0xa38] ss:$116 sps:$4 sm:$0xff]   ;;  %v10205_v60 = vsel %vm10137_vm1, %v16675_v44, 4286644096 }
  0xb0   : > { %10175 = vmax.xlane.bf16.xlu1 %v10174_v10  ;;  %v10190_v49 = vmax.bf16 %v16654_v35, %v10189_v42  ;;  %v10465_v53 = vmax.bf16 %v16627_v39, %v10464_v47  ;;  %v10480_v10 = vmax.bf16 %v16688_v55, %v10479_v2  ;;  %v16727_v35 = vld [vmem:[%s18661_s10 + $0x2c8] ss:$116 sps:$4 sm:$0xff]   ;;  %v10212_v42 = vmax.bf16 %v16726_v29, %v10211_v36  ;;  %v16742_v30 = vld [vmem:[%s18661_s10 + $0x2f0] ss:$116 sps:$4 sm:$0xff]  }
  0xb1   : > { %v16700_v39 = vld [vmem:[%s18661_s10 + $0xa34] ss:$116 sps:$4 sm:$0xff]  }
  0xb2   : > { %v10191_v57 = vmax.bf16 %v16656_v41, %v10190_v49  ;;  %v10466_v61 = vmax.bf16 %v16628_v45, %v10465_v53  ;;  %v16729_v41 = vld [vmem:[%s18661_s10 + $0x2cc] ss:$116 sps:$4 sm:$0xff]   ;;  %v16703_v49 = vld [vmem:[%s18661_s10 + $0xa3c] ss:$116 sps:$4 sm:$0xff]   ;;  %v10213_v51 = vmax.bf16 %v16727_v35, %v10212_v42  ;;  %v16732_v55 = vld [vmem:[%s18661_s10 + $0x2d4] ss:$116 sps:$4 sm:$0xff]  }
  0xb3   : > { %v16704_v53 = vld [vmem:[%s18661_s10 + $0xa40] ss:$116 sps:$4 sm:$0xff]   ;;  %v16768_v23 = vld [vmem:[%s18661_s10 + $0xae8] ss:$116 sps:$4 sm:$0xff]  }
  0xb4   : > { %v10192_v0 = vmax.bf16 %v16657_v48, %v10191_v57  ;;  %v10467_v4 = vmax.bf16 %v16630_v52, %v10466_v61  ;;  %v16674_v48 = vld [vmem:[%s18661_s10 + $0x23c] ss:$116 sps:$4 sm:$0xff]   ;;  %v10214_v57 = vmax.bf16 %v16729_v41, %v10213_v51  ;;  %v16706_v61 = vld [vmem:[%s18661_s10 + $0xa44] ss:$116 sps:$4 sm:$0xff]   ;;  %v16744_v36 = vld [vmem:[%s18661_s10 + $0x2f4] ss:$116 sps:$4 sm:$0xff]  }
  0xb5   : > { %v16719_v42 = vld [vmem:[%s18661_s10 + $0xa68] ss:$116 sps:$4 sm:$0xff]  }
  0xb6   : > { %v10193_v8 = vmax.bf16 %v16659_v54, %v10192_v0  ;;  %v10471_v11 = vmax.bf16 %v10469_v62, %v10467_v4  ;;  %v10215_v0 = vmax.bf16 %v16730_v50, %v10214_v57  ;;  %v16748_v50 = vld [vmem:[%s18661_s10 + $0x300] ss:$116 sps:$4 sm:$0xff]   ;;  %v10502_v57 = vsel %vm10137_vm1, %v16719_v42, 4286644096 }
  0xb8   : > { %v10194_v13 = vmax.bf16 %v16660_v56, %v10193_v8  ;;  %10472 = vmax.xlane.bf16.xlu1 %v10471_v11  ;;  %v16733_v56 = vld [vmem:[%s18661_s10 + $0x2d8] ss:$116 sps:$4 sm:$0xff]  }
  0xb9   : > { %v16738_v11 = vld [vmem:[%s18661_s10 + $0x2e4] ss:$116 sps:$4 sm:$0xff]  }
  0xba   : > { %v10195_v17 = vmax.bf16 %v16662_v63, %v10194_v13  ;;  %v16735_v63 = vld [vmem:[%s18661_s10 + $0x2dc] ss:$116 sps:$4 sm:$0xff]  }
  0xbb   : > { %v16710_v13 = vld [vmem:[%s18661_s10 + $0xa50] ss:$116 sps:$4 sm:$0xff]  }
  0xbc   : > { %v10196_v20 = vmax.bf16 %v16663_v7, %v10195_v17  ;;  %v10216_v7 = vmax.bf16 %v16732_v55, %v10215_v0 }
  0xbe   : > { %v10197_v26 = vmax.bf16 %v16665_v12, %v10196_v20  ;;  %v10217_v12 = vmax.bf16 %v16733_v56, %v10216_v7  ;;  %v16712_v20 = vld [vmem:[%s18661_s10 + $0xa54] ss:$116 sps:$4 sm:$0xff]   ;;  %v16808_v56 = vld [vmem:[%s18644_s27 + $0xe0] sm:$0xff]  }
  0xbf   : > { %v16753_v7 = vld [vmem:[%s18661_s10 + $0x30c] ss:$116 sps:$4 sm:$0xff]  }
  0xc0   : > { %v10198_v32 = vmax.bf16 %v16666_v16, %v10197_v26  ;;  %v10218_v16 = vmax.bf16 %v16735_v63, %v10217_v12  ;;  %v16713_v26 = vld [vmem:[%s18661_s10 + $0xa58] ss:$116 sps:$4 sm:$0xff]   ;;  %v747_v63 = vsel %vm604_vm0, %v16808_v56, 4286644096 }
  0xc1   : > { %v16794_v56 = vld [vmem:[%s18661_s10 + $0xb2c] ss:$116 sps:$4 sm:$0xff]  }
  0xc2   : > { %v10199_v38 = vmax.bf16 %v16668_v25, %v10198_v32  ;;  %v16715_v32 = vld [vmem:[%s18661_s10 + $0xa5c] ss:$116 sps:$4 sm:$0xff]  }
  0xc4   : > { %v10200_v45 = vmax.bf16 %v16669_v31, %v10199_v38  ;;  %v16716_v38 = vld [vmem:[%s18661_s10 + $0xa60] ss:$116 sps:$4 sm:$0xff]  }
  0xc5   : > { %v650_v15 = vpop.xlane.xlu0 %649  ;;  %v655_v6 = vpop.xlane.xlu1 %654 }
  0xc6   : > { %16188 = vmatprep.subr.bf16.mxu1 %v650_v15  ;;  %v10481_v15 = vmax.bf16 %v16689_v58, %v10480_v10  ;;  %v10201_v52 = vmax.bf16 %v16671_v37, %v10200_v45  ;;  %v16764_v58 = vld [vmem:[%s18644_s27 + $0x98] sm:$0xff]  }
  0xc7   : > { %v16718_v45 = vld [vmem:[%s18661_s10 + $0xa64] ss:$116 sps:$4 sm:$0xff]  }
  0xc8   : > { %v10482_v19 = vmax.bf16 %v16691_v1, %v10481_v15  ;;  %v10202_v59 = vmax.bf16 %v16672_v43, %v10201_v52  ;;  %v702_v1 = vsel %vm604_vm0, %v16764_v58, 4286644096  ;;  %v16739_v15 = vld [vmem:[%s18661_s10 + $0x2e8] ss:$116 sps:$4 sm:$0xff]   ;;  %v16745_v43 = vld [vmem:[%s18661_s10 + $0x2f8] ss:$116 sps:$4 sm:$0xff]  }
  0xc9   : > { %704 = vmax.xlane.bf16.xlu0 %v702_v1  ;;  %v16776_v52 = vld [vmem:[%s18661_s10 + $0xafc] ss:$116 sps:$4 sm:$0xff]   ;;  %v16750_v58 = vld [vmem:[%s18661_s10 + $0x304] ss:$116 sps:$4 sm:$0xff]  }
  0xca   : > { %v10483_v21 = vmax.bf16 %v16692_v9, %v10482_v19  ;;  %v10203_v2 = vmax.bf16 %v16674_v48, %v10202_v59  ;;  %v16709_v9 = vld [vmem:[%s18661_s10 + $0xa4c] ss:$116 sps:$4 sm:$0xff]  }
  0xcb   : > { %v16765_v19 = vld [vmem:[%s18661_s10 + $0xae0] ss:$116 sps:$4 sm:$0xff]   ;;  %v16774_v48 = vld [vmem:[%s18661_s10 + $0xaf8] ss:$116 sps:$4 sm:$0xff]  }
  0xcc   : > { %v10484_v28 = vmax.bf16 %v16694_v14, %v10483_v21  ;;  %v10207_v8 = vmax.bf16 %v10205_v60, %v10203_v2  ;;  %v10507_v29 = vmax.bf16 %v16767_v22, %v16765_v19  ;;  %v16751_v2 = vld [vmem:[%s18661_s10 + $0x308] ss:$116 sps:$4 sm:$0xff]  }
  0xcd   : > { %v610_v5 = vpop.xlane.xlu0 %609  ;;  %v16756_v19 = vld [vmem:[%s18661_s10 + $0x314] ss:$116 sps:$4 sm:$0xff]  }
  0xce   : > { %16190 = vmatpush3.bf16.msra.mxu1 %v610_v5  ;;  %v10485_v34 = vmax.bf16 %v16695_v18, %v10484_v28  ;;  %v615_v5 = vpop.xlane.xlu1 %614  ;;  %10208 = vmax.xlane.bf16.xlu1 %v10207_v8  ;;  %v16770_v28 = vld [vmem:[%s18661_s10 + $0xaec] ss:$116 sps:$4 sm:$0xff]   ;;  %v10508_v35 = vmax.bf16 %v16768_v23, %v10507_v29  ;;  %v16785_v22 = vld [vmem:[%s18661_s10 + $0xb14] ss:$116 sps:$4 sm:$0xff]  }
  0xcf   : > { %16192 = vmatprep.subr.bf16.mxu1 %v655_v6  ;;  %v16736_v6 = vld [vmem:[%s18661_s10 + $0x2e0] ss:$116 sps:$4 sm:$0xff]  }
  0xd0   : > { %v10486_v40 = vmax.bf16 %v16697_v27, %v10485_v34  ;;  %v10219_v18 = vmax.bf16 %v16736_v6, %v10218_v16  ;;  %v16771_v34 = vld [vmem:[%s18661_s10 + $0xaf0] ss:$116 sps:$4 sm:$0xff]   ;;  %v10509_v41 = vmax.bf16 %v16770_v28, %v10508_v35  ;;  %v16786_v28 = vld [vmem:[%s18661_s10 + $0xb18] ss:$116 sps:$4 sm:$0xff]  }
  0xd1   : > { %749 = vmax.xlane.bf16.xlu0 %v747_v63 }
  0xd2   : > { %v10487_v47 = vmax.bf16 %v16698_v33, %v10486_v40  ;;  %16194 = vmatpush3.bf16.msra.mxu1 %v615_v5  ;;  %v10220_v25 = vmax.bf16 %v16738_v11, %v10219_v18  ;;  %v16773_v40 = vld [vmem:[%s18661_s10 + $0xaf4] ss:$116 sps:$4 sm:$0xff]   ;;  %v16754_v11 = vld [vmem:[%s18661_s10 + $0x310] ss:$116 sps:$4 sm:$0xff]  }
  0xd3   : > { %v16780_v5 = vld [vmem:[%s18661_s10 + $0xb08] ss:$116 sps:$4 sm:$0xff]   ;;  %v16811_v18 = vld [vmem:[%s18661_s10 + $0x3a4] ss:$116 sps:$4 sm:$0xff]  }
  0xd4   : > { %v10488_v54 = vmax.bf16 %v16700_v39, %v10487_v47  ;;  %v10221_v31 = vmax.bf16 %v16739_v15, %v10220_v25  ;;  %v16747_v47 = vld [vmem:[%s18661_s10 + $0x2fc] ss:$116 sps:$4 sm:$0xff]  }
  0xd5   : > { %v660_v0 = vpop.xlane.xlu0 %659  ;;  %v620_v1 = vpop.xlane.xlu1 %619 }
  0xd6   : > { %v10489_v62 = vmax.bf16 %v16701_v46, %v10488_v54  ;;  %v10222_v37 = vmax.bf16 %v16741_v24, %v10221_v31  ;;  %v16777_v54 = vld [vmem:[%s18661_s10 + $0xb00] ss:$116 sps:$4 sm:$0xff]   ;;  %16196 = vmatprep.subr.bf16.mxu1 %v660_v0  ;;  %v16795_v0 = vld [vmem:[%s18661_s10 + $0xb30] ss:$116 sps:$4 sm:$0xff]  }
  0xd7   : > { %16198 = vmatpush3.bf16.msra.mxu1 %v620_v1  ;;  %v16814_v24 = vld [vmem:[%s18661_s10 + $0x3ac] ss:$116 sps:$4 sm:$0xff]  }
  0xd8   : > { %v10490_v4 = vmax.bf16 %v16703_v49, %v10489_v62  ;;  %v10223_v44 = vmax.bf16 %v16742_v30, %v10222_v37  ;;  %v10510_v49 = vmax.bf16 %v16771_v34, %v10509_v41  ;;  %v16815_v30 = vld [vmem:[%s18661_s10 + $0x3b0] ss:$116 sps:$4 sm:$0xff]   ;;  %v16789_v41 = vld [vmem:[%s18661_s10 + $0xb20] ss:$116 sps:$4 sm:$0xff]  }
  0xd9   : > { %v16788_v34 = vld [vmem:[%s18661_s10 + $0xb1c] ss:$116 sps:$4 sm:$0xff]  }
  0xda   : > { %v10491_v10 = vmax.bf16 %v16704_v53, %v10490_v4  ;;  %v10224_v51 = vmax.bf16 %v16744_v36, %v10223_v44  ;;  %v10511_v55 = vmax.bf16 %v16773_v40, %v10510_v49  ;;  %v16817_v36 = vld [vmem:[%s18661_s10 + $0x3b4] ss:$116 sps:$4 sm:$0xff]  }
  0xdb   : > { %v16792_v49 = vld [vmem:[%s18661_s10 + $0xb28] ss:$116 sps:$4 sm:$0xff]  }
  0xdc   : > { %v10492_v14 = vmax.bf16 %v16706_v61, %v10491_v10  ;;  %v10225_v59 = vmax.bf16 %v16745_v43, %v10224_v51  ;;  %v16779_v61 = vld [vmem:[%s18661_s10 + $0xb04] ss:$116 sps:$4 sm:$0xff]   ;;  %v10512_v62 = vmax.bf16 %v16774_v48, %v10511_v55  ;;  %v16820_v48 = vld [vmem:[%s18661_s10 + $0x3bc] ss:$116 sps:$4 sm:$0xff]   ;;  %v16821_v51 = vld [vmem:[%s18661_s10 + $0x3c0] ss:$116 sps:$4 sm:$0xff]  }
  0xdd   : > { %v16818_v43 = vld [vmem:[%s18661_s10 + $0x3b8] ss:$116 sps:$4 sm:$0xff]   ;;  %v625_v63 = vpop.xlane.xlu1 %624 }
  0xde   : > { %v10493_v17 = vmax.bf16 %v16707_v3, %v10492_v14  ;;  %v10226_v3 = vmax.bf16 %v16747_v47, %v10225_v59  ;;  %v10513_v6 = vmax.bf16 %v16776_v52, %v10512_v62  ;;  %v16791_v47 = vld [vmem:[%s18661_s10 + $0xb24] ss:$116 sps:$4 sm:$0xff]   ;;  %v665_v62 = vpop.xlane.xlu0 %664 }
  0xdf   : > { %16200 = vmatprep.subr.bf16.mxu1 %v665_v62 }
  0xe0   : > { %v10494_v21 = vmax.bf16 %v16709_v9, %v10493_v17  ;;  %v10227_v8 = vmax.bf16 %v16748_v50, %v10226_v3  ;;  %v16782_v9 = vld [vmem:[%s18661_s10 + $0xb0c] ss:$116 sps:$4 sm:$0xff]   ;;  %v10514_v10 = vmax.bf16 %v16777_v54, %v10513_v6  ;;  %16202 = vmatpush3.bf16.msra.mxu1 %v625_v63 }
  0xe1   : > { %v16809_v17 = vld [vmem:[%s18661_s10 + $0x3a0] ss:$116 sps:$4 sm:$0xff]  }
  0xe2   : > { %v10495_v27 = vmax.bf16 %v16710_v13, %v10494_v21  ;;  %v10228_v12 = vmax.bf16 %v16750_v58, %v10227_v8  ;;  %v16783_v13 = vld [vmem:[%s18661_s10 + $0xb10] ss:$116 sps:$4 sm:$0xff]   ;;  %v10515_v14 = vmax.bf16 %v16779_v61, %v10514_v10  ;;  %v16812_v21 = vld [vmem:[%s18661_s10 + $0x3a8] ss:$116 sps:$4 sm:$0xff]   ;;  %v10243_v25 = vmax.bf16 %v16811_v18, %v16809_v17 }
  0xe3   : > { %v16823_v58 = vld [vmem:[%s18661_s10 + $0x3c4] ss:$116 sps:$4 sm:$0xff]   ;;  %v16800_v18 = vld [vmem:[%s18661_s10 + $0xb3c] ss:$116 sps:$4 sm:$0xff]  }
  0xe4   : > { %v10496_v33 = vmax.bf16 %v16712_v20, %v10495_v27  ;;  %v10229_v15 = vmax.bf16 %v16751_v2, %v10228_v12  ;;  %v10516_v16 = vmax.bf16 %v16780_v5, %v10515_v14  ;;  %v10244_v31 = vmax.bf16 %v16812_v21, %v10243_v25  ;;  %v16824_v2 = vld [vmem:[%s18661_s10 + $0x3c8] ss:$116 sps:$4 sm:$0xff]   ;;  %v16856_v17 = vld [vmem:[%s18661_s10 + $0xbd0] ss:$116 sps:$4 sm:$0xff]  }
  0xe5   : > { %v16797_v5 = vld [vmem:[%s18661_s10 + $0xb34] ss:$116 sps:$4 sm:$0xff]   ;;  %v670_v62 = vpop.xlane.xlu0 %669  ;;  %v630_v63 = vpop.xlane.xlu1 %629 }
  0xe6   : > { %v10497_v39 = vmax.bf16 %v16713_v26, %v10496_v33  ;;  %v10230_v20 = vmax.bf16 %v16753_v7, %v10229_v15  ;;  %v10517_v23 = vmax.bf16 %v16782_v9, %v10516_v16  ;;  %v16757_v26 = vld [vmem:[%s18661_s10 + $0x318] ss:$116 sps:$4 sm:$0xff]   ;;  %v10245_v37 = vmax.bf16 %v16814_v24, %v10244_v31  ;;  %v16853_v15 = vld [vmem:[%s18661_s10 + $0xbc8] ss:$116 sps:$4 sm:$0xff]   ;;  %v16801_v24 = vld [vmem:[%s18661_s10 + $0xb40] ss:$116 sps:$4 sm:$0xff]   ;;  %16204 = vmatprep.subr.bf16.mxu1 %v670_v62 }
  0xe7   : > { %v16826_v7 = vld [vmem:[%s18661_s10 + $0x3cc] ss:$116 sps:$4 sm:$0xff]   ;;  %16206 = vmatpush3.bf16.msra.mxu1 %v630_v63  ;;  %v16912_v63 = vld [vmem:[%s18661_s10 + $0x4b0] ss:$116 sps:$4 sm:$0xff]  }
  0xe8   : > { %v10498_v46 = vmax.bf16 %v16715_v32, %v10497_v39  ;;  %v10231_v27 = vmax.bf16 %v16754_v11, %v10230_v20  ;;  %v10518_v29 = vmax.bf16 %v16783_v13, %v10517_v23  ;;  %v16759_v32 = vld [vmem:[%s18661_s10 + $0x31c] ss:$116 sps:$4 sm:$0xff]   ;;  %v10246_v44 = vmax.bf16 %v16815_v30, %v10245_v37  ;;  %v16798_v9 = vld [vmem:[%s18661_s10 + $0xb38] ss:$116 sps:$4 sm:$0xff]   ;;  %v16829_v20 = vld [vmem:[%s18661_s10 + $0x3d4] ss:$116 sps:$4 sm:$0xff]  }
  0xe9   : > { %v16763_v39 = vld [vmem:[%s18661_s10 + $0x328] ss:$116 sps:$4 sm:$0xff]   ;;  %v16827_v11 = vld [vmem:[%s18661_s10 + $0x3d0] ss:$116 sps:$4 sm:$0xff]   ;;  %v16855_v16 = vld [vmem:[%s18661_s10 + $0xbcc] ss:$116 sps:$4 sm:$0xff]  }
  0xea   : > { %v10499_v53 = vmax.bf16 %v16716_v38, %v10498_v46  ;;  %v10232_v33 = vmax.bf16 %v16756_v19, %v10231_v27  ;;  %v10519_v35 = vmax.bf16 %v16785_v22, %v10518_v29  ;;  %v16760_v38 = vld [vmem:[%s18661_s10 + $0x320] ss:$116 sps:$4 sm:$0xff]   ;;  %v10247_v52 = vmax.bf16 %v16817_v36, %v10246_v44  ;;  %v16803_v30 = vld [vmem:[%s18661_s10 + $0xb44] ss:$116 sps:$4 sm:$0xff]   ;;  %v16804_v36 = vld [vmem:[%s18661_s10 + $0xb48] ss:$116 sps:$4 sm:$0xff]  }
  0xeb   : > { %v10238_v55 = vsel %vm10137_vm1, %v16763_v39, 4286644096  ;;  %v16858_v22 = vld [vmem:[%s18661_s10 + $0xbd4] ss:$116 sps:$4 sm:$0xff]   ;;  %v10540_v23 = vmax.bf16 %v16855_v16, %v16853_v15  ;;  %v16807_v37 = vld [vmem:[%s18661_s10 + $0xb50] ss:$116 sps:$4 sm:$0xff]  }
  0xec   : > { %v10500_v60 = vmax.bf16 %v16718_v45, %v10499_v53  ;;  %v10233_v40 = vmax.bf16 %v16757_v26, %v10232_v33  ;;  %v10520_v42 = vmax.bf16 %v16786_v28, %v10519_v35  ;;  %v16762_v45 = vld [vmem:[%s18661_s10 + $0x324] ss:$116 sps:$4 sm:$0xff]   ;;  %v10248_v59 = vmax.bf16 %v16818_v43, %v10247_v52  ;;  %v16833_v39 = vld [vmem:[%s18661_s10 + $0x3e0] ss:$116 sps:$4 sm:$0xff]  }
  0xed   : > { %v16852_v53 = vld [vmem:[%s18644_s27 + $0xa0] sm:$0xff]   ;;  %v16830_v26 = vld [vmem:[%s18661_s10 + $0x3d8] ss:$116 sps:$4 sm:$0xff]   ;;  %v10541_v29 = vmax.bf16 %v16856_v17, %v10540_v23 }
  0xee   : > { %v10504_v4 = vmax.bf16 %v10502_v57, %v10500_v60  ;;  %v10234_v46 = vmax.bf16 %v16759_v32, %v10233_v40  ;;  %v10521_v50 = vmax.bf16 %v16788_v34, %v10520_v42  ;;  %v707_v60 = vsel %vm604_vm0, %v16852_v53, 4286644096  ;;  %v16859_v28 = vld [vmem:[%s18661_s10 + $0xbd8] ss:$116 sps:$4 sm:$0xff]   ;;  %v16832_v32 = vld [vmem:[%s18661_s10 + $0x3dc] ss:$116 sps:$4 sm:$0xff]  }
  0xef   : > { %709 = vmax.xlane.bf16.xlu0 %v707_v60  ;;  %v10249_v3 = vmax.bf16 %v16820_v48, %v10248_v59  ;;  %v16861_v34 = vld [vmem:[%s18661_s10 + $0xbdc] ss:$116 sps:$4 sm:$0xff]   ;;  %v10542_v35 = vmax.bf16 %v16858_v22, %v10541_v29  ;;  %v16835_v42 = vld [vmem:[%s18661_s10 + $0x3e4] ss:$116 sps:$4 sm:$0xff]   ;;  %v16862_v43 = vld [vmem:[%s18661_s10 + $0xbe0] ss:$116 sps:$4 sm:$0xff]  }
  0xf0   : > { %10505 = vmax.xlane.bf16.xlu1 %v10504_v4  ;;  %v10235_v54 = vmax.bf16 %v16760_v38, %v10234_v46  ;;  %v10522_v57 = vmax.bf16 %v16789_v41, %v10521_v50  ;;  %v16806_v41 = vld [vmem:[%s18661_s10 + $0xb4c] ss:$116 sps:$4 sm:$0xff]   ;;  %v16836_v46 = vld [vmem:[%s18661_s10 + $0x3e8] ss:$116 sps:$4 sm:$0xff]   ;;  %v16864_v48 = vld [vmem:[%s18661_s10 + $0xbe4] ss:$116 sps:$4 sm:$0xff]  }
  0xf1   : > { %v10250_v8 = vmax.bf16 %v16821_v51, %v10249_v3  ;;  %v10543_v44 = vmax.bf16 %v16859_v28, %v10542_v35  ;;  %v16896_v51 = vld [vmem:[%s18644_s27 + $0xe8] sm:$0xff]   ;;  %v10535_v53 = vsel %vm10137_vm1, %v16807_v37, 4286644096  ;;  %v16839_v60 = vld [vmem:[%s18661_s10 + $0x3f0] ss:$116 sps:$4 sm:$0xff]  }
  0xf2   : > { %v10236_v61 = vmax.bf16 %v16762_v45, %v10235_v54  ;;  %v10523_v1 = vmax.bf16 %v16791_v47, %v10522_v57  ;;  %v16838_v54 = vld [vmem:[%s18661_s10 + $0x3ec] ss:$116 sps:$4 sm:$0xff]   ;;  %v16841_v3 = vld [vmem:[%s18661_s10 + $0x3f4] ss:$116 sps:$4 sm:$0xff]   ;;  %v16900_v17 = vld [vmem:[%s18661_s10 + $0x490] ss:$116 sps:$4 sm:$0xff]  }
  0xf3   : > { %v10251_v12 = vmax.bf16 %v16823_v58, %v10250_v8  ;;  %v10544_v50 = vmax.bf16 %v16861_v34, %v10543_v44  ;;  %v752_v58 = vsel %vm604_vm0, %v16896_v51, 4286644096  ;;  %v16899_v16 = vld [vmem:[%s18661_s10 + $0x48c] ss:$116 sps:$4 sm:$0xff]   ;;  %v16902_v22 = vld [vmem:[%s18661_s10 + $0x494] ss:$116 sps:$4 sm:$0xff]  }
  0xf4   : > { %v10240_v4 = vmax.bf16 %v10238_v55, %v10236_v61  ;;  %v10524_v6 = vmax.bf16 %v16792_v49, %v10523_v1  ;;  %v16865_v49 = vld [vmem:[%s18661_s10 + $0xbe8] ss:$116 sps:$4 sm:$0xff]   ;;  %v16903_v28 = vld [vmem:[%s18661_s10 + $0x498] ss:$116 sps:$4 sm:$0xff]   ;;  %v16880_v44 = vld [vmem:[%s18661_s10 + $0xc10] ss:$116 sps:$4 sm:$0xff]  }
  0xf5   : > { %v10252_v14 = vmax.bf16 %v16824_v2, %v10251_v12  ;;  %v10545_v57 = vmax.bf16 %v16862_v43, %v10544_v50  ;;  %v16905_v34 = vld [vmem:[%s18661_s10 + $0x49c] ss:$116 sps:$4 sm:$0xff]   ;;  %v16940_v50 = vld [vmem:[%s18644_s27 + $0xa8] sm:$0xff]  }
  0xf6   : > { %v10525_v10 = vmax.bf16 %v16794_v56, %v10524_v6  ;;  %v16867_v56 = vld [vmem:[%s18661_s10 + $0xbec] ss:$116 sps:$4 sm:$0xff]   ;;  %v16877_v37 = vld [vmem:[%s18661_s10 + $0xc08] ss:$116 sps:$4 sm:$0xff]  }
  0xf7   : > { %v10253_v21 = vmax.bf16 %v16826_v7, %v10252_v14  ;;  %754 = vmax.xlane.bf16.xlu0 %v752_v58  ;;  %v10546_v1 = vmax.bf16 %v16864_v48, %v10545_v57  ;;  %v16842_v7 = vld [vmem:[%s18661_s10 + $0x3f8] ss:$116 sps:$4 sm:$0xff]   ;;  %v16844_v14 = vld [vmem:[%s18661_s10 + $0x3fc] ss:$116 sps:$4 sm:$0xff]   ;;  %v712_v57 = vsel %vm604_vm0, %v16940_v50, 4286644096  ;;  %v675_v58 = vpop.xlane.xlu0 %674 }
  0xf8   : > { %10241 = vmax.xlane.bf16.xlu1 %v10240_v4  ;;  %v10526_v13 = vmax.bf16 %v16795_v0, %v10525_v10  ;;  %v16868_v0 = vld [vmem:[%s18661_s10 + $0xbf0] ss:$116 sps:$4 sm:$0xff]   ;;  %v16909_v48 = vld [vmem:[%s18661_s10 + $0x4a8] ss:$116 sps:$4 sm:$0xff]   ;;  %16208 = vmatprep.subr.bf16.mxu1 %v675_v58 }
  0xf9   : > { %v10254_v27 = vmax.bf16 %v16827_v11, %v10253_v21  ;;  %v10547_v6 = vmax.bf16 %v16865_v49, %v10546_v1  ;;  %v16885_v1 = vld [vmem:[%s18661_s10 + $0xc1c] ss:$116 sps:$4 sm:$0xff]  }
  0xfa   : > { %v10527_v19 = vmax.bf16 %v16797_v5, %v10526_v13  ;;  %v16870_v5 = vld [vmem:[%s18661_s10 + $0xbf4] ss:$116 sps:$4 sm:$0xff]  }
  0xfb   : > { %v10255_v33 = vmax.bf16 %v16829_v20, %v10254_v27  ;;  %v10548_v10 = vmax.bf16 %v16867_v56, %v10547_v6  ;;  %v16897_v13 = vld [vmem:[%s18661_s10 + $0x488] ss:$116 sps:$4 sm:$0xff]   ;;  %v16845_v20 = vld [vmem:[%s18661_s10 + $0x400] ss:$116 sps:$4 sm:$0xff]  }
  0xfc   : > { %v10528_v25 = vmax.bf16 %v16798_v9, %v10527_v19  ;;  %v16871_v9 = vld [vmem:[%s18661_s10 + $0xbf8] ss:$116 sps:$4 sm:$0xff]   ;;  %v10276_v23 = vmax.bf16 %v16899_v16, %v16897_v13  ;;  %v680_v13 = vpop.xlane.xlu0 %679 }
  0xfd   : > { %v10256_v40 = vmax.bf16 %v16830_v26, %v10255_v33  ;;  %v10549_v12 = vmax.bf16 %v16868_v0, %v10548_v10  ;;  %v16847_v26 = vld [vmem:[%s18661_s10 + $0x404] ss:$116 sps:$4 sm:$0xff]  }
  0xfe   : > { %v10529_v31 = vmax.bf16 %v16800_v18, %v10528_v25  ;;  %v16873_v18 = vld [vmem:[%s18661_s10 + $0xbfc] ss:$116 sps:$4 sm:$0xff]   ;;  %v10277_v29 = vmax.bf16 %v16900_v17, %v10276_v23  ;;  %v16944_v17 = vld [vmem:[%s18661_s10 + $0xcb8] ss:$116 sps:$4 sm:$0xff]  }
  0xff   : > { %v10257_v47 = vmax.bf16 %v16832_v32, %v10256_v40  ;;  %v10550_v19 = vmax.bf16 %v16870_v5, %v10549_v12  ;;  %v16848_v32 = vld [vmem:[%s18661_s10 + $0x408] ss:$116 sps:$4 sm:$0xff]   ;;  %714 = vmax.xlane.bf16.xlu0 %v712_v57  ;;  %v16886_v5 = vld [vmem:[%s18661_s10 + $0xc20] ss:$116 sps:$4 sm:$0xff]  }
 0x100   : > { %v10530_v38 = vmax.bf16 %v16801_v24, %v10529_v31  ;;  %v16874_v24 = vld [vmem:[%s18661_s10 + $0xc00] ss:$116 sps:$4 sm:$0xff]   ;;  %v10278_v35 = vmax.bf16 %v16902_v22, %v10277_v29  ;;  %v16889_v22 = vld [vmem:[%s18661_s10 + $0xc28] ss:$116 sps:$4 sm:$0xff]  }
 0x101   : > { %v10258_v55 = vmax.bf16 %v16833_v39, %v10257_v47  ;;  %v10551_v25 = vmax.bf16 %v16871_v9, %v10550_v19  ;;  %v16850_v39 = vld [vmem:[%s18661_s10 + $0x40c] ss:$116 sps:$4 sm:$0xff]   ;;  %v16943_v12 = vld [vmem:[%s18661_s10 + $0xcb4] ss:$116 sps:$4 sm:$0xff]  }
 0x102   : > { %v10531_v45 = vmax.bf16 %v16803_v30, %v10530_v38  ;;  %v16876_v30 = vld [vmem:[%s18661_s10 + $0xc04] ss:$116 sps:$4 sm:$0xff]   ;;  %v10279_v43 = vmax.bf16 %v16903_v28, %v10278_v35  ;;  %v16891_v28 = vld [vmem:[%s18661_s10 + $0xc2c] ss:$116 sps:$4 sm:$0xff]  }
 0x103   : > { %v10259_v61 = vmax.bf16 %v16835_v42, %v10258_v55  ;;  %v10552_v31 = vmax.bf16 %v16873_v18, %v10551_v25  ;;  %v16906_v42 = vld [vmem:[%s18661_s10 + $0x4a0] ss:$116 sps:$4 sm:$0xff]   ;;  %v16917_v18 = vld [vmem:[%s18661_s10 + $0x4bc] ss:$116 sps:$4 sm:$0xff]   ;;  %v16895_v35 = vld [vmem:[%s18661_s10 + $0xc38] ss:$116 sps:$4 sm:$0xff]  }
 0x104   : > { %v10532_v52 = vmax.bf16 %v16804_v36, %v10531_v45  ;;  %v16851_v36 = vld [vmem:[%s18661_s10 + $0x410] ss:$116 sps:$4 sm:$0xff]   ;;  %v10280_v49 = vmax.bf16 %v16905_v34, %v10279_v43  ;;  %v16911_v55 = vld [vmem:[%s18661_s10 + $0x4ac] ss:$116 sps:$4 sm:$0xff]   ;;  %v16894_v43 = vld [vmem:[%s18661_s10 + $0xc34] ss:$116 sps:$4 sm:$0xff]  }
 0x105   : > { %v10260_v4 = vmax.bf16 %v16836_v46, %v10259_v61  ;;  %v10553_v38 = vmax.bf16 %v16874_v24, %v10552_v31  ;;  %v16908_v46 = vld [vmem:[%s18661_s10 + $0x4a4] ss:$116 sps:$4 sm:$0xff]   ;;  %v10271_v51 = vsel %vm10137_vm1, %v16851_v36, 4286644096  ;;  %v16918_v24 = vld [vmem:[%s18661_s10 + $0x4c0] ss:$116 sps:$4 sm:$0xff]  }
 0x106   : > { %v10533_v59 = vmax.bf16 %v16806_v41, %v10532_v52  ;;  %v16879_v41 = vld [vmem:[%s18661_s10 + $0xc0c] ss:$116 sps:$4 sm:$0xff]   ;;  %v16882_v52 = vld [vmem:[%s18661_s10 + $0xc14] ss:$116 sps:$4 sm:$0xff]   ;;  %v10281_v56 = vmax.bf16 %v16906_v42, %v10280_v49  ;;  %v16892_v34 = vld [vmem:[%s18661_s10 + $0xc30] ss:$116 sps:$4 sm:$0xff]  }
 0x107   : > { %v10261_v8 = vmax.bf16 %v16838_v54, %v10260_v4  ;;  %v10554_v45 = vmax.bf16 %v16876_v30, %v10553_v38  ;;  %v16920_v30 = vld [vmem:[%s18661_s10 + $0x4c4] ss:$116 sps:$4 sm:$0xff]  }
 0x108   : > { %v10537_v2 = vmax.bf16 %v10535_v53, %v10533_v59  ;;  %v635_v59 = vpop.xlane.xlu1 %634  ;;  %v10282_v0 = vmax.bf16 %v16908_v46, %v10281_v56  ;;  %v16952_v46 = vld [vmem:[%s18661_s10 + $0xccc] ss:$116 sps:$4 sm:$0xff]   ;;  %v16953_v49 = vld [vmem:[%s18661_s10 + $0xcd0] ss:$116 sps:$4 sm:$0xff]   ;;  %v16955_v56 = vld [vmem:[%s18661_s10 + $0xcd4] ss:$116 sps:$4 sm:$0xff]  }
 0x109   : > { %v10262_v11 = vmax.bf16 %v16839_v60, %v10261_v8  ;;  %v10555_v53 = vmax.bf16 %v16877_v37, %v10554_v45  ;;  %v16883_v60 = vld [vmem:[%s18661_s10 + $0xc18] ss:$116 sps:$4 sm:$0xff]   ;;  %16210 = vmatpush3.bf16.msra.mxu1 %v635_v59  ;;  %v16921_v37 = vld [vmem:[%s18661_s10 + $0x4c8] ss:$116 sps:$4 sm:$0xff]  }
 0x10a   : > { %10538 = vmax.xlane.bf16.xlu1 %v10537_v2  ;;  %v10283_v4 = vmax.bf16 %v16909_v48, %v10282_v0  ;;  %16212 = vmatprep.subr.bf16.mxu1 %v680_v13  ;;  %v16923_v45 = vld [vmem:[%s18661_s10 + $0x4cc] ss:$116 sps:$4 sm:$0xff]  }
 0x10b   : > { %v10263_v15 = vmax.bf16 %v16841_v3, %v10262_v11  ;;  %v10556_v61 = vmax.bf16 %v16879_v41, %v10555_v53  ;;  %v16914_v3 = vld [vmem:[%s18661_s10 + $0x4b4] ss:$116 sps:$4 sm:$0xff]   ;;  %v16941_v11 = vld [vmem:[%s18661_s10 + $0xcb0] ss:$116 sps:$4 sm:$0xff]   ;;  %v685_v41 = vpop.xlane.xlu0 %684  ;;  %v10568_v53 = vsel %vm10137_vm1, %v16895_v35, 4286644096 }
 0x10c   : > { %v10284_v8 = vmax.bf16 %v16911_v55, %v10283_v4  ;;  %v16988_v13 = vld [vmem:[%s18661_s10 + $0x578] ss:$116 sps:$4 sm:$0xff]   ;;  %v16965_v35 = vld [vmem:[%s18661_s10 + $0xcf0] ss:$116 sps:$4 sm:$0xff]  }
 0x10d   : > { %v10264_v21 = vmax.bf16 %v16842_v7, %v10263_v15  ;;  %v10557_v2 = vmax.bf16 %v16880_v44, %v10556_v61  ;;  %v16915_v7 = vld [vmem:[%s18661_s10 + $0x4b8] ss:$116 sps:$4 sm:$0xff]  }
 0x10e   : > { %v10285_v10 = vmax.bf16 %v16912_v63, %v10284_v8  ;;  %v16888_v15 = vld [vmem:[%s18661_s10 + $0xc24] ss:$116 sps:$4 sm:$0xff]  }
 0x10f   : > { %v10265_v27 = vmax.bf16 %v16844_v14, %v10264_v21  ;;  %v10558_v6 = vmax.bf16 %v16882_v52, %v10557_v2  ;;  %v640_v14 = vpop.xlane.xlu1 %639  ;;  %v10573_v21 = vmax.bf16 %v16943_v12, %v16941_v11  ;;  %v16985_v11 = vld [vmem:[%s18661_s10 + $0x570] ss:$116 sps:$4 sm:$0xff]   ;;  %v16987_v12 = vld [vmem:[%s18661_s10 + $0x574] ss:$116 sps:$4 sm:$0xff]  }
 0x110   : > { %v10286_v19 = vmax.bf16 %v16914_v3, %v10285_v10  ;;  %16214 = vmatpush3.bf16.msra.mxu1 %v640_v14  ;;  %v16958_v3 = vld [vmem:[%s18661_s10 + $0xcdc] ss:$116 sps:$4 sm:$0xff]   ;;  %v16932_v14 = vld [vmem:[%s18661_s10 + $0x4e4] ss:$116 sps:$4 sm:$0xff]  }
 0x111   : > { %v10266_v33 = vmax.bf16 %v16845_v20, %v10265_v27  ;;  %v10559_v9 = vmax.bf16 %v16883_v60, %v10558_v6  ;;  %v16946_v20 = vld [vmem:[%s18661_s10 + $0xcbc] ss:$116 sps:$4 sm:$0xff]   ;;  %v10574_v27 = vmax.bf16 %v16944_v17, %v10573_v21  ;;  %16216 = vmatprep.subr.bf16.mxu1 %v685_v41  ;;  %v16927_v60 = vld [vmem:[%s18661_s10 + $0x4d8] ss:$116 sps:$4 sm:$0xff]  }
 0x112   : > { %v10287_v25 = vmax.bf16 %v16915_v7, %v10286_v19  ;;  %v16959_v7 = vld [vmem:[%s18661_s10 + $0xce0] ss:$116 sps:$4 sm:$0xff]   ;;  %v10309_v19 = vmax.bf16 %v16987_v12, %v16985_v11  ;;  %v17005_v12 = vld [vmem:[%s18661_s10 + $0x5a4] ss:$116 sps:$4 sm:$0xff]  }
 0x113   : > { %v10267_v40 = vmax.bf16 %v16847_v26, %v10266_v33  ;;  %v10560_v16 = vmax.bf16 %v16885_v1, %v10559_v9  ;;  %v16947_v26 = vld [vmem:[%s18661_s10 + $0xcc0] ss:$116 sps:$4 sm:$0xff]   ;;  %v10575_v33 = vmax.bf16 %v16946_v20, %v10574_v27  ;;  %v645_v42 = vpop.xlane.xlu1 %644  ;;  %v16929_v1 = vld [vmem:[%s18661_s10 + $0x4dc] ss:$116 sps:$4 sm:$0xff]  }
 0x114   : > { %v10288_v31 = vmax.bf16 %v16917_v18, %v10287_v25  ;;  %16218 = vmatpush3.bf16.msra.mxu1 %v645_v42  ;;  %v16990_v18 = vld [vmem:[%s18661_s10 + $0x57c] ss:$116 sps:$4 sm:$0xff]   ;;  %v10310_v25 = vmax.bf16 %v16988_v13, %v10309_v19  ;;  %v16968_v42 = vld [vmem:[%s18661_s10 + $0xcf8] ss:$116 sps:$4 sm:$0xff]   ;;  %v17032_v11 = vld [vmem:[%s18661_s10 + $0xda0] ss:$116 sps:$4 sm:$0xff]  }
 0x115   : > { %v10268_v47 = vmax.bf16 %v16848_v32, %v10267_v40  ;;  %v10561_v23 = vmax.bf16 %v16886_v5, %v10560_v16  ;;  %v16949_v32 = vld [vmem:[%s18661_s10 + $0xcc4] ss:$116 sps:$4 sm:$0xff]   ;;  %v10576_v40 = vmax.bf16 %v16947_v26, %v10575_v33  ;;  %v16930_v5 = vld [vmem:[%s18661_s10 + $0x4e0] ss:$116 sps:$4 sm:$0xff]   ;;  %v16933_v20 = vld [vmem:[%s18661_s10 + $0x4e8] ss:$116 sps:$4 sm:$0xff]  }
 0x116   : > { %v10289_v38 = vmax.bf16 %v16918_v24, %v10288_v31  ;;  %v16961_v16 = vld [vmem:[%s18661_s10 + $0xce4] ss:$116 sps:$4 sm:$0xff]   ;;  %v16991_v24 = vld [vmem:[%s18661_s10 + $0x580] ss:$116 sps:$4 sm:$0xff]   ;;  %v10311_v31 = vmax.bf16 %v16990_v18, %v10310_v25  ;;  %v17006_v18 = vld [vmem:[%s18661_s10 + $0x5a8] ss:$116 sps:$4 sm:$0xff]  }
 0x117   : > { %v10269_v54 = vmax.bf16 %v16850_v39, %v10268_v47  ;;  %v10562_v29 = vmax.bf16 %v16888_v15, %v10561_v23  ;;  %v16950_v39 = vld [vmem:[%s18661_s10 + $0xcc8] ss:$116 sps:$4 sm:$0xff]   ;;  %v16924_v47 = vld [vmem:[%s18661_s10 + $0x4d0] ss:$116 sps:$4 sm:$0xff]   ;;  %v10577_v50 = vmax.bf16 %v16949_v32, %v10576_v40  ;;  %v16935_v26 = vld [vmem:[%s18661_s10 + $0x4ec] ss:$116 sps:$4 sm:$0xff]  }
 0x118   : > { %v10290_v48 = vmax.bf16 %v16920_v30, %v10289_v38  ;;  %v16993_v30 = vld [vmem:[%s18661_s10 + $0x584] ss:$116 sps:$4 sm:$0xff]   ;;  %v16967_v38 = vld [vmem:[%s18661_s10 + $0xcf4] ss:$116 sps:$4 sm:$0xff]   ;;  %v10312_v40 = vmax.bf16 %v16991_v24, %v10311_v31  ;;  %v17008_v24 = vld [vmem:[%s18661_s10 + $0x5ac] ss:$116 sps:$4 sm:$0xff]  }
 0x119   : > { %v10273_v62 = vmax.bf16 %v10271_v51, %v10269_v54  ;;  %v10563_v36 = vmax.bf16 %v16889_v22, %v10562_v29  ;;  %v16984_v51 = vld [vmem:[%s18644_s27 + $0xf0] sm:$0xff]   ;;  %v10578_v57 = vmax.bf16 %v16950_v39, %v10577_v50  ;;  %v16962_v22 = vld [vmem:[%s18661_s10 + $0xce8] ss:$116 sps:$4 sm:$0xff]   ;;  %v16939_v33 = vld [vmem:[%s18661_s10 + $0x4f8] ss:$116 sps:$4 sm:$0xff]  }
 0x11a   : > { %v16926_v54 = vld [vmem:[%s18661_s10 + $0x4d4] ss:$116 sps:$4 sm:$0xff]   ;;  %v10291_v55 = vmax.bf16 %v16921_v37, %v10290_v48  ;;  %v757_v58 = vsel %vm604_vm0, %v16984_v51, 4286644096  ;;  %v16936_v32 = vld [vmem:[%s18661_s10 + $0x4f0] ss:$116 sps:$4 sm:$0xff]  }
 0x11b   : > { %10274 = vmax.xlane.bf16.xlu1 %v10273_v62  ;;  %v10564_v44 = vmax.bf16 %v16891_v28, %v10563_v36  ;;  %759 = vmax.xlane.bf16.xlu0 %v757_v58  ;;  %v16956_v62 = vld [vmem:[%s18661_s10 + $0xcd8] ss:$116 sps:$4 sm:$0xff]   ;;  %v10579_v63 = vmax.bf16 %v16952_v46, %v10578_v57  ;;  %v16938_v37 = vld [vmem:[%s18661_s10 + $0x4f4] ss:$116 sps:$4 sm:$0xff]   ;;  %v10313_v46 = vmax.bf16 %v16993_v30, %v10312_v40  ;;  %v16970_v50 = vld [vmem:[%s18661_s10 + $0xcfc] ss:$116 sps:$4 sm:$0xff]  }
 0x11c   : > { %v10292_v61 = vmax.bf16 %v16923_v45, %v10291_v55  ;;  %v16964_v28 = vld [vmem:[%s18661_s10 + $0xcec] ss:$116 sps:$4 sm:$0xff]   ;;  %v16994_v39 = vld [vmem:[%s18661_s10 + $0x588] ss:$116 sps:$4 sm:$0xff]   ;;  %v16997_v45 = vld [vmem:[%s18661_s10 + $0x590] ss:$116 sps:$4 sm:$0xff]  }
 0x11d   : > { %v10565_v52 = vmax.bf16 %v16892_v34, %v10564_v44  ;;  %v10580_v4 = vmax.bf16 %v16953_v49, %v10579_v63  ;;  %v16996_v44 = vld [vmem:[%s18661_s10 + $0x58c] ss:$116 sps:$4 sm:$0xff]   ;;  %v10304_v49 = vsel %vm10137_vm1, %v16939_v33, 4286644096  ;;  %v17002_v63 = vld [vmem:[%s18661_s10 + $0x59c] ss:$116 sps:$4 sm:$0xff]  }
 0x11e   : > { %v10293_v2 = vmax.bf16 %v16924_v47, %v10292_v61  ;;  %v17028_v47 = vld [vmem:[%s18644_s27 + $0xb0] sm:$0xff]   ;;  %v17000_v58 = vld [vmem:[%s18661_s10 + $0x598] ss:$116 sps:$4 sm:$0xff]  }
 0x11f   : > { %v10566_v59 = vmax.bf16 %v16894_v43, %v10565_v52  ;;  %v10581_v8 = vmax.bf16 %v16955_v56, %v10580_v4  ;;  %v16999_v52 = vld [vmem:[%s18661_s10 + $0x594] ss:$116 sps:$4 sm:$0xff]   ;;  %v16973_v61 = vld [vmem:[%s18661_s10 + $0xd04] ss:$116 sps:$4 sm:$0xff]   ;;  %v16982_v33 = vld [vmem:[%s18661_s10 + $0xd1c] ss:$116 sps:$4 sm:$0xff]  }
 0x120   : > { %v10294_v6 = vmax.bf16 %v16926_v54, %v10293_v2  ;;  %v717_v54 = vsel %vm604_vm0, %v17028_v47, 4286644096  ;;  %v16971_v56 = vld [vmem:[%s18661_s10 + $0xd00] ss:$116 sps:$4 sm:$0xff]   ;;  %v17009_v31 = vld [vmem:[%s18661_s10 + $0x5b0] ss:$116 sps:$4 sm:$0xff]  }
 0x121   : > { %v10570_v0 = vmax.bf16 %v10568_v53, %v10566_v59  ;;  %v10582_v10 = vmax.bf16 %v16956_v62, %v10581_v8  ;;  %v10314_v53 = vmax.bf16 %v16994_v39, %v10313_v46  ;;  %v16976_v8 = vld [vmem:[%s18661_s10 + $0xd0c] ss:$116 sps:$4 sm:$0xff]   ;;  %v17040_v40 = vld [vmem:[%s18661_s10 + $0xdb4] ss:$116 sps:$4 sm:$0xff]   ;;  %v17014_v46 = vld [vmem:[%s18661_s10 + $0x5bc] ss:$116 sps:$4 sm:$0xff]  }
 0x122   : > { %v10295_v9 = vmax.bf16 %v16927_v60, %v10294_v6  ;;  %v16983_v30 = vld [vmem:[%s18661_s10 + $0xd20] ss:$116 sps:$4 sm:$0xff]  }
 0x123   : > { %10571 = vmax.xlane.bf16.xlu1 %v10570_v0  ;;  %v10583_v17 = vmax.bf16 %v16958_v3, %v10582_v10  ;;  %719 = vmax.xlane.bf16.xlu0 %v717_v54  ;;  %v10315_v59 = vmax.bf16 %v16996_v44, %v10314_v53  ;;  %v17003_v3 = vld [vmem:[%s18661_s10 + $0x5a0] ss:$116 sps:$4 sm:$0xff]   ;;  %v17031_v10 = vld [vmem:[%s18661_s10 + $0xd9c] ss:$116 sps:$4 sm:$0xff]  }
 0x124   : > { %v10296_v15 = vmax.bf16 %v16929_v1, %v10295_v9  ;;  %v16974_v1 = vld [vmem:[%s18661_s10 + $0xd08] ss:$116 sps:$4 sm:$0xff]  }
 0x125   : > { %v10584_v23 = vmax.bf16 %v16959_v7, %v10583_v17  ;;  %v10316_v0 = vmax.bf16 %v16997_v45, %v10315_v59  ;;  %v17029_v7 = vld [vmem:[%s18661_s10 + $0xd98] ss:$116 sps:$4 sm:$0xff]   ;;  %v10601_v45 = vsel %vm10137_vm1, %v16983_v30, 4286644096 }
 0x126   : > { %v10297_v21 = vmax.bf16 %v16930_v5, %v10296_v15  ;;  %v10606_v17 = vmax.bf16 %v17031_v10, %v17029_v7  ;;  %v17072_v44 = vld [vmem:[%s18644_s27 + $0xf8] sm:$0xff]   ;;  %v17076_v7 = vld [vmem:[%s18661_s10 + $0x660] ss:$116 sps:$4 sm:$0xff]  }
 0x127   : > { %v10585_v29 = vmax.bf16 %v16961_v16, %v10584_v23  ;;  %v10317_v4 = vmax.bf16 %v16999_v52, %v10316_v0  ;;  %v17034_v16 = vld [vmem:[%s18661_s10 + $0xda4] ss:$116 sps:$4 sm:$0xff]   ;;  %v17015_v52 = vld [vmem:[%s18661_s10 + $0x5c0] ss:$116 sps:$4 sm:$0xff]  }
 0x128   : > { %v10298_v27 = vmax.bf16 %v16932_v14, %v10297_v21  ;;  %v16977_v14 = vld [vmem:[%s18661_s10 + $0xd10] ss:$116 sps:$4 sm:$0xff]   ;;  %v10607_v23 = vmax.bf16 %v17032_v11, %v10606_v17 }
 0x129   : > { %v10586_v36 = vmax.bf16 %v16962_v22, %v10585_v29  ;;  %v10318_v6 = vmax.bf16 %v17000_v58, %v10317_v4  ;;  %v17035_v22 = vld [vmem:[%s18661_s10 + $0xda8] ss:$116 sps:$4 sm:$0xff]   ;;  %v17046_v59 = vld [vmem:[%s18661_s10 + $0xdc4] ss:$116 sps:$4 sm:$0xff]  }
 0x12a   : > { %v10299_v34 = vmax.bf16 %v16933_v20, %v10298_v27  ;;  %v16979_v20 = vld [vmem:[%s18661_s10 + $0xd14] ss:$116 sps:$4 sm:$0xff]   ;;  %v10608_v29 = vmax.bf16 %v17034_v16, %v10607_v23  ;;  %v17075_v4 = vld [vmem:[%s18661_s10 + $0x65c] ss:$116 sps:$4 sm:$0xff]   ;;  %v17078_v10 = vld [vmem:[%s18661_s10 + $0x664] ss:$116 sps:$4 sm:$0xff]  }
 0x12b   : > { %v10587_v43 = vmax.bf16 %v16964_v28, %v10586_v36  ;;  %v10319_v13 = vmax.bf16 %v17002_v63, %v10318_v6  ;;  %v17037_v28 = vld [vmem:[%s18661_s10 + $0xdac] ss:$116 sps:$4 sm:$0xff]   ;;  %v17038_v36 = vld [vmem:[%s18661_s10 + $0xdb0] ss:$116 sps:$4 sm:$0xff]   ;;  %v17047_v63 = vld [vmem:[%s18661_s10 + $0xdc8] ss:$116 sps:$4 sm:$0xff]  }
 0x12c   : > { %v10300_v41 = vmax.bf16 %v16935_v26, %v10299_v34  ;;  %v16980_v26 = vld [vmem:[%s18661_s10 + $0xd18] ss:$116 sps:$4 sm:$0xff]   ;;  %v17079_v16 = vld [vmem:[%s18661_s10 + $0x668] ss:$116 sps:$4 sm:$0xff]  }
 0x12d   : > { %v10588_v51 = vmax.bf16 %v16965_v35, %v10587_v43  ;;  %v10320_v19 = vmax.bf16 %v17003_v3, %v10319_v13  ;;  %v17011_v35 = vld [vmem:[%s18661_s10 + $0x5b4] ss:$116 sps:$4 sm:$0xff]   ;;  %v17073_v3 = vld [vmem:[%s18661_s10 + $0x658] ss:$116 sps:$4 sm:$0xff]  }
 0x12e   : > { %v10301_v48 = vmax.bf16 %v16936_v32, %v10300_v41  ;;  %v10342_v11 = vmax.bf16 %v17075_v4, %v17073_v3  ;;  %v10741_v3 = vld [vmem:[%s19163_s14 + $0x230] sm:$0xff] }
 0x12f   : > { %v10589_v57 = vmax.bf16 %v16967_v38, %v10588_v51  ;;  %v10321_v25 = vmax.bf16 %v17005_v12, %v10320_v19  ;;  %v17012_v38 = vld [vmem:[%s18661_s10 + $0x5b8] ss:$116 sps:$4 sm:$0xff]   ;;  %v762_v51 = vsel %vm604_vm0, %v17072_v44, 4286644096  ;;  %v17021_v12 = vld [vmem:[%s18661_s10 + $0x5d0] ss:$116 sps:$4 sm:$0xff]  }
 0x130   : > { %v10302_v55 = vmax.bf16 %v16938_v37, %v10301_v48  ;;  %v10609_v37 = vmax.bf16 %v17035_v22, %v10608_v29  ;;  %764 = vmax.xlane.bf16.xlu0 %v762_v51  ;;  %v10343_v17 = vmax.bf16 %v17076_v7, %v10342_v11  ;;  %v17081_v22 = vld [vmem:[%s18661_s10 + $0x66c] ss:$116 sps:$4 sm:$0xff]   ;;  %v17082_v29 = vld [vmem:[%s18661_s10 + $0x670] ss:$116 sps:$4 sm:$0xff]  }
 0x131   : > { %v10590_v62 = vmax.bf16 %v16968_v42, %v10589_v57  ;;  %v10322_v32 = vmax.bf16 %v17006_v18, %v10321_v25  ;;  %v17041_v42 = vld [vmem:[%s18661_s10 + $0xdb8] ss:$116 sps:$4 sm:$0xff]   ;;  %v17023_v18 = vld [vmem:[%s18661_s10 + $0x5d4] ss:$116 sps:$4 sm:$0xff]   ;;  %v17062_v4 = vld [vmem:[%s18661_s10 + $0xdf0] ss:$116 sps:$4 sm:$0xff]  }
 0x132   : > { %v10306_v60 = vmax.bf16 %v10304_v49, %v10302_v55  ;;  %v10610_v43 = vmax.bf16 %v17037_v28, %v10609_v37  ;;  %v17043_v49 = vld [vmem:[%s18661_s10 + $0xdbc] ss:$116 sps:$4 sm:$0xff]   ;;  %v17044_v55 = vld [vmem:[%s18661_s10 + $0xdc0] ss:$116 sps:$4 sm:$0xff]   ;;  %v17017_v57 = vld [vmem:[%s18661_s10 + $0x5c4] ss:$116 sps:$4 sm:$0xff]   ;;  %v10344_v23 = vmax.bf16 %v17078_v10, %v10343_v17 }
 0x133   : > { %v10591_v2 = vmax.bf16 %v16970_v50, %v10590_v62  ;;  %v10323_v39 = vmax.bf16 %v17008_v24, %v10322_v32  ;;  %v17024_v24 = vld [vmem:[%s18661_s10 + $0x5d8] ss:$116 sps:$4 sm:$0xff]   ;;  %v17027_v25 = vld [vmem:[%s18661_s10 + $0x5e0] ss:$116 sps:$4 sm:$0xff]  }
 0x134   : > { %10307 = vmax.xlane.bf16.xlu1 %v10306_v60  ;;  %v10611_v50 = vmax.bf16 %v17038_v36, %v10610_v43  ;;  %v10345_v30 = vmax.bf16 %v17079_v16, %v10344_v23  ;;  %v17116_v37 = vld [vmem:[%s18644_s27 + $0xb8] sm:$0xff]   ;;  %v10736_v51 = vld [vmem:[%s19163_s14 + $0x208] sm:$0xff]  ;;  %v10671_v16 = vld [vmem:[%s19163_s14] sm:$0xff] }
 0x135   : > { %v10592_v5 = vmax.bf16 %v16971_v56, %v10591_v2  ;;  %v10324_v47 = vmax.bf16 %v17009_v31, %v10323_v39  ;;  %v17026_v31 = vld [vmem:[%s18661_s10 + $0x5dc] ss:$116 sps:$4 sm:$0xff]   ;;  %v10337_v39 = vsel %vm10137_vm1, %v17027_v25, 4286644096  ;;  %v722_v44 = vsel %vm604_vm0, %v17116_v37, 4286644096 }
 0x136   : > { %v10612_v56 = vmax.bf16 %v17040_v40, %v10611_v50  ;;  %v10346_v36 = vmax.bf16 %v17081_v22, %v10345_v30  ;;  %v17056_v40 = vld [vmem:[%s18661_s10 + $0xde0] ss:$116 sps:$4 sm:$0xff]   ;;  %v10676_v25 = vld [vmem:[%s19163_s14 + $0x28] sm:$0xff] }
 0x137   : > { %v10593_v9 = vmax.bf16 %v16973_v61, %v10592_v5  ;;  %v10325_v53 = vmax.bf16 %v17011_v35, %v10324_v47  ;;  %v17018_v61 = vld [vmem:[%s18661_s10 + $0x5c8] ss:$116 sps:$4 sm:$0xff]   ;;  %v17020_v5 = vld [vmem:[%s18661_s10 + $0x5cc] ss:$116 sps:$4 sm:$0xff]   ;;  %v17058_v47 = vld [vmem:[%s18661_s10 + $0xde4] ss:$116 sps:$4 sm:$0xff]  }
 0x138   : > { %v10613_v60 = vmax.bf16 %v17041_v42, %v10612_v56  ;;  %v17085_v42 = vld [vmem:[%s18661_s10 + $0x678] ss:$116 sps:$4 sm:$0xff]   ;;  %v10347_v43 = vmax.bf16 %v17082_v29, %v10346_v36  ;;  %724 = vmax.xlane.bf16.xlu0 %v722_v44  ;;  %v10675_v17 = vld [vmem:[%s19163_s14 + $0x20] sm:$0xff] }
 0x139   : > { %v10594_v15 = vmax.bf16 %v16974_v1, %v10593_v9  ;;  %v10326_v58 = vmax.bf16 %v17012_v38, %v10325_v53  ;;  %v10739_v53 = vld [vmem:[%s19163_s14 + $0x220] sm:$0xff]  ;;  %v15354_v37 = vcombine.low %v10671_v16, %v10675_v17 }
 0x13a   : > { %v10614_v0 = vmax.bf16 %v17043_v49, %v10613_v60  ;;  %v17087_v49 = vld [vmem:[%s18661_s10 + $0x67c] ss:$116 sps:$4 sm:$0xff]   ;;  %v17061_v60 = vld [vmem:[%s18661_s10 + $0xdec] ss:$116 sps:$4 sm:$0xff]  }
 0x13b   : > { %v10595_v21 = vmax.bf16 %v16976_v8, %v10594_v15  ;;  %v10327_v62 = vmax.bf16 %v17014_v46, %v10326_v58  ;;  %v17049_v8 = vld [vmem:[%s18661_s10 + $0xdcc] ss:$116 sps:$4 sm:$0xff]  }
 0x13c   : > { %v10615_v2 = vmax.bf16 %v17044_v55, %v10614_v0  ;;  %v10735_v46 = vld [vmem:[%s19163_s14 + $0x200] sm:$0xff]  ;;  %v17059_v55 = vld [vmem:[%s18661_s10 + $0xde8] ss:$116 sps:$4 sm:$0xff]  }
 0x13d   : > { %v10596_v27 = vmax.bf16 %v16977_v14, %v10595_v21  ;;  %v10328_v1 = vmax.bf16 %v17015_v52, %v10327_v62  ;;  %v17050_v14 = vld [vmem:[%s18661_s10 + $0xdd0] ss:$116 sps:$4 sm:$0xff]   ;;  %v17093_v10 = vld [vmem:[%s18661_s10 + $0x68c] ss:$116 sps:$4 sm:$0xff]  }
 0x13e   : > { %v10616_v9 = vmax.bf16 %v17046_v59, %v10615_v2  ;;  %v15418_v59 = vcombine.low %v10735_v46, %v10739_v53  ;;  %v17090_v0 = vld [vmem:[%s18661_s10 + $0x684] ss:$116 sps:$4 sm:$0xff]   ;;  %v10737_v2 = vld [vmem:[%s19163_s14 + $0x210] sm:$0xff] }
 0x13f   : > { %v10597_v34 = vmax.bf16 %v16979_v20, %v10596_v27  ;;  %v10329_v6 = vmax.bf16 %v17017_v57, %v10328_v1  ;;  %v17052_v20 = vld [vmem:[%s18661_s10 + $0xdd4] ss:$116 sps:$4 sm:$0xff]   ;;  %v17053_v27 = vld [vmem:[%s18661_s10 + $0xdd8] ss:$116 sps:$4 sm:$0xff]   ;;  %v15423_v22 = vcombine.high %v10737_v2, %v10741_v3 }
 0x140   : > { %v10617_v15 = vmax.bf16 %v17047_v63, %v10616_v9  ;;  %v17088_v57 = vld [vmem:[%s18661_s10 + $0x680] ss:$116 sps:$4 sm:$0xff]  }
 0x141   : > { %v10598_v41 = vmax.bf16 %v16980_v26, %v10597_v34  ;;  %v10330_v13 = vmax.bf16 %v17018_v61, %v10329_v6  ;;  %v17084_v34 = vld [vmem:[%s18661_s10 + $0x674] ss:$116 sps:$4 sm:$0xff]   ;;  %v15419_v61 = vcombine.high %v10735_v46, %v10739_v53 }
 0x142   : > { %v10618_v21 = vmax.bf16 %v17049_v8, %v10617_v15  ;;  %v10348_v50 = vmax.bf16 %v17084_v34, %v10347_v43  ;;  %v17064_v8 = vld [vmem:[%s18661_s10 + $0xdf4] ss:$116 sps:$4 sm:$0xff]   ;;  %v17070_v43 = vld [vmem:[%s18661_s10 + $0xe04] ss:$116 sps:$4 sm:$0xff]  }
 0x143   : > { %v10599_v48 = vmax.bf16 %v16982_v33, %v10598_v41  ;;  %v10331_v19 = vmax.bf16 %v17020_v5, %v10330_v13  ;;  %v17055_v33 = vld [vmem:[%s18661_s10 + $0xddc] ss:$116 sps:$4 sm:$0xff]   ;;  %v12272_v7 = vmax.bf16 %v15419_v61, %v15418_v59  ;;  %v17100_v53 = vld [vmem:[%s18661_s10 + $0x6a0] ss:$116 sps:$4 sm:$0xff]   ;;  %v17102_v61 = vld [vmem:[%s18661_s10 + $0x6a4] ss:$116 sps:$4 sm:$0xff]  }
 0x144   : > { %v10619_v28 = vmax.bf16 %v17050_v14, %v10618_v21  ;;  %v10349_v58 = vmax.bf16 %v17085_v42, %v10348_v50  ;;  %v17091_v5 = vld [vmem:[%s18661_s10 + $0x688] ss:$116 sps:$4 sm:$0xff]   ;;  %v15422_v14 = vcombine.low %v10737_v2, %v10741_v3  ;;  %v10677_v42 = vld [vmem:[%s19163_s14 + $0x30] sm:$0xff] }
 0x145   : > { %v10603_v54 = vmax.bf16 %v10601_v45, %v10599_v48  ;;  %v10332_v26 = vmax.bf16 %v17021_v12, %v10331_v19  ;;  %v10738_v12 = vld [vmem:[%s19163_s14 + $0x218] sm:$0xff] }
 0x146   : > { %v10620_v35 = vmax.bf16 %v17052_v20, %v10619_v28  ;;  %v10350_v1 = vmax.bf16 %v17087_v49, %v10349_v58  ;;  %v10742_v13 = vld [vmem:[%s19163_s14 + $0x238] sm:$0xff]  ;;  %v17094_v20 = vld [vmem:[%s18661_s10 + $0x690] ss:$116 sps:$4 sm:$0xff]   ;;  %v17096_v28 = vld [vmem:[%s18661_s10 + $0x694] ss:$116 sps:$4 sm:$0xff]  }
 0x147   : > { %10604 = vmax.xlane.bf16.xlu1 %v10603_v54  ;;  %v10333_v32 = vmax.bf16 %v17023_v18, %v10332_v26  ;;  %v10740_v54 = vld [vmem:[%s19163_s14 + $0x228] sm:$0xff]  ;;  %v17067_v26 = vld [vmem:[%s18661_s10 + $0xdfc] ss:$116 sps:$4 sm:$0xff]   ;;  %v15425_v30 = vcombine.high %v10738_v12, %v10742_v13 }
 0x148   : > { %v10621_v41 = vmax.bf16 %v17053_v27, %v10620_v35  ;;  %v15420_v62 = vcombine.low %v10736_v51, %v10740_v54  ;;  %v15421_v6 = vcombine.high %v10736_v51, %v10740_v54  ;;  %v10351_v11 = vmax.bf16 %v17088_v57, %v10350_v1  ;;  %v17065_v18 = vld [vmem:[%s18661_s10 + $0xdf8] ss:$116 sps:$4 sm:$0xff]  }
 0x149   : > { %v10334_v38 = vmax.bf16 %v17024_v24, %v10333_v32  ;;  %v10672_v24 = vld [vmem:[%s19163_s14 + $0x8] sm:$0xff]  ;;  %v12279_v49 = vsel %vm12181_vm2, %v15425_v30, 4286644096 }
 0x14a   : > { %v10622_v48 = vmax.bf16 %v17055_v33, %v10621_v41  ;;  %v12273_v15 = vmax.bf16 %v15420_v62, %v12272_v7  ;;  %v10352_v21 = vmax.bf16 %v17090_v0, %v10351_v11  ;;  %v17068_v33 = vld [vmem:[%s18661_s10 + $0xe00] ss:$116 sps:$4 sm:$0xff]   ;;  %v17097_v35 = vld [vmem:[%s18661_s10 + $0x698] ss:$116 sps:$4 sm:$0xff]   ;;  %v15356_v50 = vcombine.low %v10672_v24, %v10676_v25  ;;  %v17103_v7 = vld [vmem:[%s18661_s10 + $0x6a8] ss:$116 sps:$4 sm:$0xff]  }
 0x14b   : > { %v10335_v45 = vmax.bf16 %v17026_v31, %v10334_v38  ;;  %v15424_v31 = vcombine.low %v10738_v12, %v10742_v13  ;;  %v15355_v38 = vcombine.high %v10671_v16, %v10675_v17  ;;  %v10673_v41 = vld [vmem:[%s19163_s14 + $0x10] sm:$0xff]  ;;  %v15357_v57 = vcombine.high %v10672_v24, %v10676_v25  ;;  %v10868_v0 = vld [vmem:[%s19163_s14 + $0x628] sm:$0xff] }
 0x14c   : > { %v10623_v56 = vmax.bf16 %v17056_v40, %v10622_v48  ;;  %v12274_v23 = vmax.bf16 %v15421_v6, %v12273_v15  ;;  %v10353_v29 = vmax.bf16 %v17091_v5, %v10352_v21  ;;  %v10867_v48 = vld [vmem:[%s19163_s14 + $0x620] sm:$0xff]  ;;  %v15358_v1 = vcombine.low %v10673_v41, %v10677_v42  ;;  %v17108_v25 = vld [vmem:[%s18661_s10 + $0x6b4] ss:$116 sps:$4 sm:$0xff]  }
 0x14d   : > { %v10339_v52 = vmax.bf16 %v10337_v39, %v10335_v45  ;;  %v17071_v39 = vld [vmem:[%s18661_s10 + $0xe08] ss:$116 sps:$4 sm:$0xff]   ;;  %v12175_v58 = vmax.bf16 %v15355_v38, %v15354_v37  ;;  %v17105_v13 = vld [vmem:[%s18661_s10 + $0x6ac] ss:$116 sps:$4 sm:$0xff]   ;;  %v17106_v21 = vld [vmem:[%s18661_s10 + $0x6b0] ss:$116 sps:$4 sm:$0xff]  }
 0x14e   : > { %v10624_v63 = vmax.bf16 %v17058_v47, %v10623_v56  ;;  %v12275_v32 = vmax.bf16 %v15422_v14, %v12274_v23  ;;  %v10354_v36 = vmax.bf16 %v17093_v10, %v10353_v29  ;;  %v17099_v45 = vld [vmem:[%s18661_s10 + $0x69c] ss:$116 sps:$4 sm:$0xff]   ;;  %v10863_v47 = vld [vmem:[%s19163_s14 + $0x600] sm:$0xff]  ;;  %v10634_v3 = vsel %vm10137_vm1, %v17071_v39, 4286644096 }
 0x14f   : > { %10340 = vmax.xlane.bf16.xlu1 %v10339_v52  ;;  %v10678_v56 = vld [vmem:[%s19163_s14 + $0x38] sm:$0xff]  ;;  %v12176_v2 = vmax.bf16 %v15356_v50, %v12175_v58  ;;  %v15547_v5 = vcombine.high %v10863_v47, %v10867_v48 }
 0x150   : > { %v10625_v9 = vmax.bf16 %v17059_v55, %v10624_v63  ;;  %v12276_v40 = vmax.bf16 %v15423_v22, %v12275_v32  ;;  %v10355_v46 = vmax.bf16 %v17094_v20, %v10354_v36  ;;  %v10674_v55 = vld [vmem:[%s19163_s14 + $0x18] sm:$0xff]  ;;  %v10864_v63 = vld [vmem:[%s19163_s14 + $0x608] sm:$0xff]  ;;  %v10803_v20 = vld [vmem:[%s19163_s14 + $0x420] sm:$0xff] }
 0x151   : > { %v12177_v10 = vmax.bf16 %v15357_v57, %v12176_v2  ;;  %v15361_v11 = vcombine.high %v10674_v55, %v10678_v56  ;;  %v15360_v15 = vcombine.low %v10674_v55, %v10678_v56  ;;  %v15548_v17 = vcombine.low %v10864_v63, %v10868_v0  ;;  %v10800_v32 = vld [vmem:[%s19163_s14 + $0x408] sm:$0xff]  ;;  %v17111_v39 = vld [vmem:[%s18661_s10 + $0x6bc] ss:$116 sps:$4 sm:$0xff]  }
 0x152   : > { %v10626_v19 = vmax.bf16 %v17061_v60, %v10625_v9  ;;  %v12277_v51 = vmax.bf16 %v15424_v31, %v12276_v40  ;;  %v10356_v54 = vmax.bf16 %v17096_v28, %v10355_v46  ;;  %v15359_v9 = vcombine.high %v10673_v41, %v10677_v42  ;;  %v10869_v28 = vld [vmem:[%s19163_s14 + $0x630] sm:$0xff]  ;;  %v10866_v50 = vld [vmem:[%s19163_s14 + $0x618] sm:$0xff] }
 0x153   : > { %v12178_v16 = vmax.bf16 %v15358_v1, %v12177_v10  ;;  %v12183_v24 = vsel %vm12181_vm2, %v15361_v11, 4286644096  ;;  %v15549_v30 = vcombine.high %v10864_v63, %v10868_v0  ;;  %v17112_v42 = vld [vmem:[%s18661_s10 + $0x6c0] ss:$116 sps:$4 sm:$0xff]   ;;  %v17122_v11 = vld [vmem:[%s19188_s18 + $0x3a4] ss:$460 sps:$4 sm:$0xff]  }
 0x154   : > { %v10627_v27 = vmax.bf16 %v17062_v4, %v10626_v19  ;;  %v12281_v59 = vmax.bf16 %v12279_v49, %v12277_v51  ;;  %v10357_v62 = vmax.bf16 %v17097_v35, %v10356_v54  ;;  %v15546_v4 = vcombine.low %v10863_v47, %v10867_v48  ;;  %v10799_v19 = vld [vmem:[%s19163_s14 + $0x400] sm:$0xff]  ;;  %v17115_v47 = vld [vmem:[%s18661_s10 + $0x6c8] ss:$116 sps:$4 sm:$0xff]   ;;  %v10805_v54 = vld [vmem:[%s19163_s14 + $0x430] sm:$0xff] }
 0x155   : > { %v12179_v23 = vmax.bf16 %v15359_v9, %v12178_v16  ;;  %v15482_v36 = vcombine.low %v10799_v19, %v10803_v20  ;;  %v15483_v37 = vcombine.high %v10799_v19, %v10803_v20  ;;  %v17114_v48 = vld [vmem:[%s18661_s10 + $0x6c4] ss:$116 sps:$4 sm:$0xff]   ;;  %v17120_v10 = vld [vmem:[%s19188_s18 + $0x3a0] ss:$460 sps:$4 sm:$0xff]  }
 0x156   : > { %v10628_v34 = vmax.bf16 %v17064_v8, %v10627_v27  ;;  %12282 = vmax.xlane.bf16.xlu0 %v12281_v59  ;;  %v10358_v8 = vmax.bf16 %v17099_v45, %v10357_v62  ;;  %v10865_v27 = vld [vmem:[%s19163_s14 + $0x610] sm:$0xff]  ;;  %v10870_v51 = vld [vmem:[%s19163_s14 + $0x638] sm:$0xff] }
 0x157   : > { %v12180_v29 = vmax.bf16 %v15360_v15, %v12179_v23  ;;  %v15550_v41 = vcombine.low %v10865_v27, %v10869_v28  ;;  %v12368_v46 = vmax.bf16 %v15483_v37, %v15482_v36  ;;  %v15553_v2 = vcombine.high %v10866_v50, %v10870_v51  ;;  %v17123_v15 = vld [vmem:[%s19188_s18 + $0x3a8] ss:$460 sps:$4 sm:$0xff]   ;;  %v17137_v37 = vld [vmem:[%s19188_s18 + $0x3cc] ss:$460 sps:$4 sm:$0xff]  }
 0x158   : > { %v10629_v44 = vmax.bf16 %v17065_v18, %v10628_v34  ;;  %v10359_v14 = vmax.bf16 %v17100_v53, %v10358_v8  ;;  %v12464_v18 = vmax.bf16 %v15547_v5, %v15546_v4  ;;  %v17109_v34 = vld [vmem:[%s18661_s10 + $0x6b8] ss:$116 sps:$4 sm:$0xff]   ;;  %v10801_v53 = vld [vmem:[%s19163_s14 + $0x410] sm:$0xff] }
 0x159   : > { %v12185_v38 = vmax.bf16 %v12183_v24, %v12180_v29  ;;  %v15486_v0 = vcombine.low %v10801_v53, %v10805_v54  ;;  %v10802_v4 = vld [vmem:[%s19163_s14 + $0x418] sm:$0xff]  ;;  %v12471_v9 = vsel %vm12181_vm2, %v15553_v2, 4286644096  ;;  %v17128_v24 = vld [vmem:[%s19188_s18 + $0x3b4] ss:$460 sps:$4 sm:$0xff]  }
 0x15a   : > { %v10630_v52 = vmax.bf16 %v17067_v26, %v10629_v44  ;;  %v10360_v22 = vmax.bf16 %v17102_v61, %v10359_v14  ;;  %v12465_v31 = vmax.bf16 %v15548_v17, %v12464_v18  ;;  %v15552_v61 = vcombine.low %v10866_v50, %v10870_v51  ;;  %v10806_v5 = vld [vmem:[%s19163_s14 + $0x438] sm:$0xff]  ;;  %v17147_v51 = vld [vmem:[%s19188_s18 + $0x3e8] ss:$460 sps:$4 sm:$0xff]  }
 0x15b   : > { %v15489_v16 = vcombine.high %v10802_v4, %v10806_v5  ;;  %v6483_v17 = vmax.bf16 %v17122_v11, %v17120_v10  ;;  %v17125_v18 = vld [vmem:[%s19188_s18 + $0x3ac] ss:$460 sps:$4 sm:$0xff]   ;;  %v17131_v29 = vld [vmem:[%s19188_s18 + $0x3bc] ss:$460 sps:$4 sm:$0xff]  }
 0x15c   : > { %v10631_v60 = vmax.bf16 %v17068_v33, %v10630_v52  ;;  %v10361_v26 = vmax.bf16 %v17103_v7, %v10360_v22  ;;  %v10804_v33 = vld [vmem:[%s19163_s14 + $0x428] sm:$0xff]  ;;  %v12466_v44 = vmax.bf16 %v15549_v30, %v12465_v31  ;;  %v15551_v52 = vcombine.high %v10865_v27, %v10869_v28  ;;  %v17129_v27 = vld [vmem:[%s19188_s18 + $0x3b8] ss:$460 sps:$4 sm:$0xff]  }
 0x15d   : > { %v15484_v45 = vcombine.low %v10800_v32, %v10804_v33  ;;  %v15485_v57 = vcombine.high %v10800_v32, %v10804_v33  ;;  %v15487_v7 = vcombine.high %v10801_v53, %v10805_v54  ;;  %v6484_v19 = vmax.bf16 %v17123_v15, %v6483_v17  ;;  %v17132_v31 = vld [vmem:[%s19188_s18 + $0x3c0] ss:$460 sps:$4 sm:$0xff]   ;;  %v17134_v33 = vld [vmem:[%s19188_s18 + $0x3c4] ss:$460 sps:$4 sm:$0xff]  }
 0x15e   : > { %v10632_v6 = vmax.bf16 %v17070_v43, %v10631_v60  ;;  %v10362_v35 = vmax.bf16 %v17105_v13, %v10361_v26  ;;  %12186 = vmax.xlane.bf16.xlu0 %v12185_v38  ;;  %v12467_v56 = vmax.bf16 %v15550_v41, %v12466_v44  ;;  %v10370_v60 = vsel %vm10137_vm1, %v17115_v47, 4286644096  ;;  %v17140_v41 = vld [vmem:[%s19188_s18 + $0x3d4] ss:$460 sps:$4 sm:$0xff]   ;;  %v17149_v53 = vld [vmem:[%s19188_s18 + $0x3ec] ss:$460 sps:$4 sm:$0xff]  }
 0x15f   : > { %v12369_v58 = vmax.bf16 %v15484_v45, %v12368_v46  ;;  %v15488_v13 = vcombine.low %v10802_v4, %v10806_v5  ;;  %v12375_v22 = vsel %vm12181_vm2, %v15489_v16, 4286644096  ;;  %v6485_v23 = vmax.bf16 %v17125_v18, %v6484_v19  ;;  %v17143_v45 = vld [vmem:[%s19188_s18 + $0x3dc] ss:$460 sps:$4 sm:$0xff]   ;;  %v17144_v47 = vld [vmem:[%s19188_s18 + $0x3e0] ss:$460 sps:$4 sm:$0xff]  }
 0x160   : > { %v10636_v12 = vmax.bf16 %v10634_v3, %v10632_v6  ;;  %v10363_v40 = vmax.bf16 %v17106_v21, %v10362_v35  ;;  %v12468_v63 = vmax.bf16 %v15551_v52, %v12467_v56  ;;  %v17126_v21 = vld [vmem:[%s19188_s18 + $0x3b0] ss:$460 sps:$4 sm:$0xff]   ;;  %v17135_v35 = vld [vmem:[%s19188_s18 + $0x3c8] ss:$460 sps:$4 sm:$0xff]   ;;  %v17161_v5 = vld [vmem:[%s19188_s18 + $0x40c] ss:$460 sps:$4 sm:$0xff]  }
 0x161   : > { %v12370_v1 = vmax.bf16 %v15485_v57, %v12369_v58  ;;  %v17152_v57 = vld [vmem:[%s19188_s18 + $0x3f4] ss:$460 sps:$4 sm:$0xff]   ;;  %v17165_v11 = vld [vmem:[%s19188_s18 + $0x418] ss:$460 sps:$4 sm:$0xff]  }
 0x162   : > { %10637 = vmax.xlane.bf16.xlu1 %v10636_v12  ;;  %v10364_v43 = vmax.bf16 %v17108_v25, %v10363_v40  ;;  %v12469_v6 = vmax.bf16 %v15552_v61, %v12468_v63  ;;  %v6486_v25 = vmax.bf16 %v17126_v21, %v6485_v23  ;;  %v17155_v61 = vld [vmem:[%s19188_s18 + $0x3fc] ss:$460 sps:$4 sm:$0xff]   ;;  %v17156_v63 = vld [vmem:[%s19188_s18 + $0x400] ss:$460 sps:$4 sm:$0xff]   ;;  %v17170_v17 = vld [vmem:[%s19188_s18 + $0x424] ss:$460 sps:$4 sm:$0xff]  }
 0x163   : > { %v12371_v8 = vmax.bf16 %v15486_v0, %v12370_v1  ;;  %v17158_v1 = vld [vmem:[%s19188_s18 + $0x404] ss:$460 sps:$4 sm:$0xff]   ;;  %v17168_v15 = vld [vmem:[%s19188_s18 + $0x420] ss:$460 sps:$4 sm:$0xff]   ;;  %v17171_v19 = vld [vmem:[%s19188_s18 + $0x428] ss:$460 sps:$4 sm:$0xff]  }
 0x164   : > { %v10365_v49 = vmax.bf16 %v17109_v34, %v10364_v43  ;;  %v12473_v12 = vmax.bf16 %v12471_v9, %v12469_v6  ;;  %v6487_v28 = vmax.bf16 %v17128_v24, %v6486_v25  ;;  %v17141_v43 = vld [vmem:[%s19188_s18 + $0x3d8] ss:$460 sps:$4 sm:$0xff]   ;;  %v17164_v9 = vld [vmem:[%s19188_s18 + $0x414] ss:$460 sps:$4 sm:$0xff]   ;;  %v17174_v23 = vld [vmem:[%s19188_s18 + $0x430] ss:$460 sps:$4 sm:$0xff]  }
 0x165   : > { %v12372_v14 = vmax.bf16 %v15487_v7, %v12371_v8  ;;  %v17162_v7 = vld [vmem:[%s19188_s18 + $0x410] ss:$460 sps:$4 sm:$0xff]   ;;  %v17173_v21 = vld [vmem:[%s19188_s18 + $0x42c] ss:$460 sps:$4 sm:$0xff]   ;;  %v17176_v25 = vld [vmem:[%s19188_s18 + $0x434] ss:$460 sps:$4 sm:$0xff]  }
 0x166   : > { %v10366_v55 = vmax.bf16 %v17111_v39, %v10365_v49  ;;  %v6488_v30 = vmax.bf16 %v17129_v27, %v6487_v28  ;;  %v17138_v39 = vld [vmem:[%s19188_s18 + $0x3d0] ss:$460 sps:$4 sm:$0xff]   ;;  %v17292_v27 = vld [vmem:[%s19188_s18 + $0x8] ss:$460 sps:$4 sm:$0xff]   ;;  %v17177_v28 = vld [vmem:[%s19188_s18 + $0x438] ss:$460 sps:$4 sm:$0xff]  }
 0x167   : > { %v12373_v20 = vmax.bf16 %v15488_v13, %v12372_v14  ;;  %v17146_v49 = vld [vmem:[%s19188_s18 + $0x3e4] ss:$460 sps:$4 sm:$0xff]   ;;  %v17167_v13 = vld [vmem:[%s19188_s18 + $0x41c] ss:$460 sps:$4 sm:$0xff]  }
 0x168   : > { %v10367_v59 = vmax.bf16 %v17112_v42, %v10366_v55  ;;  %v6489_v32 = vmax.bf16 %v17131_v29, %v6488_v30  ;;  %v17150_v55 = vld [vmem:[%s19188_s18 + $0x3f0] ss:$460 sps:$4 sm:$0xff]   ;;  %v17294_v29 = vld [vmem:[%s19188_s18 + $0xc] ss:$460 sps:$4 sm:$0xff]  }
 0x169   : > { %v12377_v26 = vmax.bf16 %v12375_v22, %v12373_v20  ;;  %v17295_v30 = vld [vmem:[%s19188_s18 + $0x10] ss:$460 sps:$4 sm:$0xff]  }
 0x16a   : > { %v10368_v62 = vmax.bf16 %v17114_v48, %v10367_v59  ;;  %v6490_v34 = vmax.bf16 %v17132_v31, %v6489_v32  ;;  %v17153_v59 = vld [vmem:[%s19188_s18 + $0x3f8] ss:$460 sps:$4 sm:$0xff]   ;;  %v6367_v32 = vmax.bf16 %v17294_v29, %v17292_v27 }
 0x16b   : > { %v17318_v27 = vld [vmem:[%s19188_s18 + $0x4c] ss:$460 sps:$4 sm:$0xff]  }
 0x16c   : > { %v10372_v3 = vmax.bf16 %v10370_v60, %v10368_v62  ;;  %v6491_v36 = vmax.bf16 %v17134_v33, %v6490_v34  ;;  %v17179_v33 = vld [vmem:[%s19188_s18 + $0x43c] ss:$460 sps:$4 sm:$0xff]   ;;  %v17297_v34 = vld [vmem:[%s19188_s18 + $0x14] ss:$460 sps:$4 sm:$0xff]  }
 0x16e   : > { %10373 = vmax.xlane.bf16.xlu1 %v10372_v3  ;;  %v6492_v38 = vmax.bf16 %v17135_v35, %v6491_v36  ;;  %v17159_v3 = vld [vmem:[%s19188_s18 + $0x408] ss:$460 sps:$4 sm:$0xff]   ;;  %v6368_v36 = vmax.bf16 %v17295_v30, %v6367_v32  ;;  %v17319_v30 = vld [vmem:[%s19188_s18 + $0x50] ss:$460 sps:$4 sm:$0xff]  }
 0x170   : > { %v6493_v40 = vmax.bf16 %v17137_v37, %v6492_v38  ;;  %v17180_v37 = vld [vmem:[%s19188_s18 + $0x440] ss:$460 sps:$4 sm:$0xff]   ;;  %v17298_v38 = vld [vmem:[%s19188_s18 + $0x18] ss:$460 sps:$4 sm:$0xff]  }
 0x172   : > { %v6494_v42 = vmax.bf16 %v17138_v39, %v6493_v40  ;;  %v6369_v40 = vmax.bf16 %v17297_v34, %v6368_v36  ;;  %v17321_v34 = vld [vmem:[%s19188_s18 + $0x54] ss:$460 sps:$4 sm:$0xff]  }
 0x174   : > { %v6495_v44 = vmax.bf16 %v17140_v41, %v6494_v42  ;;  %v17182_v41 = vld [vmem:[%s19188_s18 + $0x444] ss:$460 sps:$4 sm:$0xff]   ;;  %v17300_v42 = vld [vmem:[%s19188_s18 + $0x1c] ss:$460 sps:$4 sm:$0xff]  }
 0x176   : > { %12474 = vmax.xlane.bf16.xlu1 %v12473_v12  ;;  %v6496_v46 = vmax.bf16 %v17141_v43, %v6495_v44  ;;  %v6370_v44 = vmax.bf16 %v17298_v38, %v6369_v40  ;;  %v17322_v38 = vld [vmem:[%s19188_s18 + $0x58] ss:$460 sps:$4 sm:$0xff]  }
 0x178   : > { %v6497_v48 = vmax.bf16 %v17143_v45, %v6496_v46  ;;  %v17183_v45 = vld [vmem:[%s19188_s18 + $0x448] ss:$460 sps:$4 sm:$0xff]   ;;  %v17301_v46 = vld [vmem:[%s19188_s18 + $0x20] ss:$460 sps:$4 sm:$0xff]  }
 0x17a   : > { %v6498_v50 = vmax.bf16 %v17144_v47, %v6497_v48  ;;  %v6371_v48 = vmax.bf16 %v17300_v42, %v6370_v44  ;;  %v17324_v42 = vld [vmem:[%s19188_s18 + $0x5c] ss:$460 sps:$4 sm:$0xff]  }
 0x17c   : > { %v6499_v52 = vmax.bf16 %v17146_v49, %v6498_v50  ;;  %v17185_v49 = vld [vmem:[%s19188_s18 + $0x44c] ss:$460 sps:$4 sm:$0xff]   ;;  %v17303_v50 = vld [vmem:[%s19188_s18 + $0x24] ss:$460 sps:$4 sm:$0xff]  }
 0x17e   : > { %12378 = vmax.xlane.bf16.xlu1 %v12377_v26  ;;  %v6500_v54 = vmax.bf16 %v17147_v51, %v6499_v52  ;;  %v6372_v52 = vmax.bf16 %v17301_v46, %v6371_v48  ;;  %v17325_v46 = vld [vmem:[%s19188_s18 + $0x60] ss:$460 sps:$4 sm:$0xff]  }
 0x180   : > { %v6501_v56 = vmax.bf16 %v17149_v53, %v6500_v54  ;;  %v17186_v53 = vld [vmem:[%s19188_s18 + $0x450] ss:$460 sps:$4 sm:$0xff]   ;;  %v17304_v54 = vld [vmem:[%s19188_s18 + $0x28] ss:$460 sps:$4 sm:$0xff]  }
 0x182   : > { %v6502_v58 = vmax.bf16 %v17150_v55, %v6501_v56  ;;  %v6373_v56 = vmax.bf16 %v17303_v50, %v6372_v52  ;;  %v17327_v50 = vld [vmem:[%s19188_s18 + $0x64] ss:$460 sps:$4 sm:$0xff]  }
 0x184   : > { %v6503_v60 = vmax.bf16 %v17152_v57, %v6502_v58  ;;  %v17188_v57 = vld [vmem:[%s19188_s18 + $0x454] ss:$460 sps:$4 sm:$0xff]   ;;  %v17306_v58 = vld [vmem:[%s19188_s18 + $0x2c] ss:$460 sps:$4 sm:$0xff]  }
 0x186   : > { %v6504_v62 = vmax.bf16 %v17153_v59, %v6503_v60  ;;  %v6374_v60 = vmax.bf16 %v17304_v54, %v6373_v56  ;;  %v17328_v54 = vld [vmem:[%s19188_s18 + $0x68] ss:$460 sps:$4 sm:$0xff]  }
 0x188   : > { %v6505_v0 = vmax.bf16 %v17155_v61, %v6504_v62  ;;  %v17189_v61 = vld [vmem:[%s19188_s18 + $0x458] ss:$460 sps:$4 sm:$0xff]   ;;  %v17307_v62 = vld [vmem:[%s19188_s18 + $0x30] ss:$460 sps:$4 sm:$0xff]  }
 0x18a   : > { %v6506_v2 = vmax.bf16 %v17156_v63, %v6505_v0  ;;  %v6375_v0 = vmax.bf16 %v17306_v58, %v6374_v60  ;;  %v17330_v58 = vld [vmem:[%s19188_s18 + $0x6c] ss:$460 sps:$4 sm:$0xff]  }
 0x18c   : > { %v6507_v4 = vmax.bf16 %v17158_v1, %v6506_v2  ;;  %v17191_v1 = vld [vmem:[%s19188_s18 + $0x45c] ss:$460 sps:$4 sm:$0xff]   ;;  %v17309_v2 = vld [vmem:[%s19188_s18 + $0x34] ss:$460 sps:$4 sm:$0xff]  }
 0x18e   : > { %v6508_v6 = vmax.bf16 %v17159_v3, %v6507_v4  ;;  %v6376_v4 = vmax.bf16 %v17307_v62, %v6375_v0  ;;  %v17331_v62 = vld [vmem:[%s19188_s18 + $0x70] ss:$460 sps:$4 sm:$0xff]  }
 0x190   : > { %v6509_v8 = vmax.bf16 %v17161_v5, %v6508_v6  ;;  %v17192_v5 = vld [vmem:[%s19188_s18 + $0x460] ss:$460 sps:$4 sm:$0xff]   ;;  %v17310_v6 = vld [vmem:[%s19188_s18 + $0x38] ss:$460 sps:$4 sm:$0xff]  }
 0x192   : > { %v6510_v10 = vmax.bf16 %v17162_v7, %v6509_v8  ;;  %v6377_v8 = vmax.bf16 %v17309_v2, %v6376_v4  ;;  %v17333_v2 = vld [vmem:[%s19188_s18 + $0x74] ss:$460 sps:$4 sm:$0xff]  }
 0x194   : > { %v6511_v12 = vmax.bf16 %v17164_v9, %v6510_v10  ;;  %v17194_v9 = vld [vmem:[%s19188_s18 + $0x464] ss:$460 sps:$4 sm:$0xff]   ;;  %v17312_v10 = vld [vmem:[%s19188_s18 + $0x3c] ss:$460 sps:$4 sm:$0xff]  }
 0x196   : > { %v6512_v14 = vmax.bf16 %v17165_v11, %v6511_v12  ;;  %v6378_v12 = vmax.bf16 %v17310_v6, %v6377_v8  ;;  %v17334_v6 = vld [vmem:[%s19188_s18 + $0x78] ss:$460 sps:$4 sm:$0xff]  }
 0x198   : > { %v6513_v16 = vmax.bf16 %v17167_v13, %v6512_v14  ;;  %v17195_v13 = vld [vmem:[%s19188_s18 + $0x468] ss:$460 sps:$4 sm:$0xff]   ;;  %v17313_v14 = vld [vmem:[%s19188_s18 + $0x40] ss:$460 sps:$4 sm:$0xff]  }
 0x19a   : > { %v6514_v18 = vmax.bf16 %v17168_v15, %v6513_v16  ;;  %v6379_v16 = vmax.bf16 %v17312_v10, %v6378_v12  ;;  %v17336_v10 = vld [vmem:[%s19188_s18 + $0x7c] ss:$460 sps:$4 sm:$0xff]  }
 0x19c   : > { %v6515_v20 = vmax.bf16 %v17170_v17, %v6514_v18  ;;  %v17197_v17 = vld [vmem:[%s19188_s18 + $0x46c] ss:$460 sps:$4 sm:$0xff]   ;;  %v17315_v18 = vld [vmem:[%s19188_s18 + $0x44] ss:$460 sps:$4 sm:$0xff]  }
 0x19e   : > { %v6516_v22 = vmax.bf16 %v17171_v19, %v6515_v20  ;;  %v6380_v20 = vmax.bf16 %v17313_v14, %v6379_v16  ;;  %v17337_v14 = vld [vmem:[%s19188_s18 + $0x80] ss:$460 sps:$4 sm:$0xff]  }
 0x1a0   : > { %v6517_v24 = vmax.bf16 %v17173_v21, %v6516_v22  ;;  %v17198_v21 = vld [vmem:[%s19188_s18 + $0x470] ss:$460 sps:$4 sm:$0xff]   ;;  %v17316_v22 = vld [vmem:[%s19188_s18 + $0x48] ss:$460 sps:$4 sm:$0xff]  }
 0x1a2   : > { %v6518_v26 = vmax.bf16 %v17174_v23, %v6517_v24  ;;  %v6381_v24 = vmax.bf16 %v17315_v18, %v6380_v20  ;;  %v17339_v18 = vld [vmem:[%s19188_s18 + $0x84] ss:$460 sps:$4 sm:$0xff]  }
 0x1a4   : > { %v6519_v31 = vmax.bf16 %v17176_v25, %v6518_v26  ;;  %v17200_v25 = vld [vmem:[%s19188_s18 + $0x474] ss:$460 sps:$4 sm:$0xff]   ;;  %v17201_v26 = vld [vmem:[%s19188_s18 + $0x478] ss:$460 sps:$4 sm:$0xff]   ;;  %v6382_v29 = vmax.bf16 %v17316_v22, %v6381_v24 }
 0x1a5   : > { %v17340_v22 = vld [vmem:[%s19188_s18 + $0x88] ss:$460 sps:$4 sm:$0xff]  }
 0x1a6   : > { %v6520_v35 = vmax.bf16 %v17177_v28, %v6519_v31  ;;  %v17203_v31 = vld [vmem:[%s19188_s18 + $0x47c] ss:$460 sps:$4 sm:$0xff]  }
 0x1a8   : > { %v6521_v39 = vmax.bf16 %v17179_v33, %v6520_v35  ;;  %v6383_v33 = vmax.bf16 %v17318_v27, %v6382_v29  ;;  %v17204_v35 = vld [vmem:[%s19188_s18 + $0x480] ss:$460 sps:$4 sm:$0xff]   ;;  %v17225_v27 = vld [vmem:[%s19188_s18 + $0x4b8] ss:$460 sps:$4 sm:$0xff]  }
 0x1aa   : > { %v6522_v43 = vmax.bf16 %v17180_v37, %v6521_v39  ;;  %v6384_v37 = vmax.bf16 %v17319_v30, %v6383_v33  ;;  %v17206_v39 = vld [vmem:[%s19188_s18 + $0x484] ss:$460 sps:$4 sm:$0xff]  }
 0x1ab   : > { %v17343_v30 = vld [vmem:[%s19188_s18 + $0x90] ss:$460 sps:$4 sm:$0xff]  }
 0x1ac   : > { %v6523_v47 = vmax.bf16 %v17182_v41, %v6522_v43  ;;  %v6385_v41 = vmax.bf16 %v17321_v34, %v6384_v37  ;;  %v17207_v43 = vld [vmem:[%s19188_s18 + $0x488] ss:$460 sps:$4 sm:$0xff]  }
 0x1ad   : > { %v17345_v34 = vld [vmem:[%s19188_s18 + $0x94] ss:$460 sps:$4 sm:$0xff]  }
 0x1ae   : > { %v6524_v51 = vmax.bf16 %v17183_v45, %v6523_v47  ;;  %v6386_v45 = vmax.bf16 %v17322_v38, %v6385_v41  ;;  %v17209_v47 = vld [vmem:[%s19188_s18 + $0x48c] ss:$460 sps:$4 sm:$0xff]  }
 0x1af   : > { %v17346_v38 = vld [vmem:[%s19188_s18 + $0x98] ss:$460 sps:$4 sm:$0xff]  }
 0x1b0   : > { %v6525_v55 = vmax.bf16 %v17185_v49, %v6524_v51  ;;  %v6387_v49 = vmax.bf16 %v17324_v42, %v6386_v45  ;;  %v17210_v51 = vld [vmem:[%s19188_s18 + $0x490] ss:$460 sps:$4 sm:$0xff]  }
 0x1b1   : > { %v17348_v42 = vld [vmem:[%s19188_s18 + $0x9c] ss:$460 sps:$4 sm:$0xff]  }
 0x1b2   : > { %v6526_v59 = vmax.bf16 %v17186_v53, %v6525_v55  ;;  %v6388_v53 = vmax.bf16 %v17325_v46, %v6387_v49  ;;  %v17212_v55 = vld [vmem:[%s19188_s18 + $0x494] ss:$460 sps:$4 sm:$0xff]  }
 0x1b3   : > { %v17349_v46 = vld [vmem:[%s19188_s18 + $0xa0] ss:$460 sps:$4 sm:$0xff]  }
 0x1b4   : > { %v6527_v63 = vmax.bf16 %v17188_v57, %v6526_v59  ;;  %v6389_v57 = vmax.bf16 %v17327_v50, %v6388_v53  ;;  %v17213_v59 = vld [vmem:[%s19188_s18 + $0x498] ss:$460 sps:$4 sm:$0xff]  }
 0x1b5   : > { %v17351_v50 = vld [vmem:[%s19188_s18 + $0xa4] ss:$460 sps:$4 sm:$0xff]  }
 0x1b6   : > { %v6528_v3 = vmax.bf16 %v17189_v61, %v6527_v63  ;;  %v6390_v61 = vmax.bf16 %v17328_v54, %v6389_v57  ;;  %v17215_v63 = vld [vmem:[%s19188_s18 + $0x49c] ss:$460 sps:$4 sm:$0xff]  }
 0x1b7   : > { %v17352_v54 = vld [vmem:[%s19188_s18 + $0xa8] ss:$460 sps:$4 sm:$0xff]  }
 0x1b8   : > { %v6529_v7 = vmax.bf16 %v17191_v1, %v6528_v3  ;;  %v6391_v1 = vmax.bf16 %v17330_v58, %v6390_v61  ;;  %v17216_v3 = vld [vmem:[%s19188_s18 + $0x4a0] ss:$460 sps:$4 sm:$0xff]   ;;  %v17464_v58 = vld [vmem:[%s19188_s18 + $0xad0] ss:$460 sps:$4 sm:$0xff]   ;;  %v17467_v61 = vld [vmem:[%s19188_s18 + $0xad8] ss:$460 sps:$4 sm:$0xff]  }
 0x1ba   : > { %v6530_v11 = vmax.bf16 %v17192_v5, %v6529_v7  ;;  %v6392_v5 = vmax.bf16 %v17331_v62, %v6391_v1  ;;  %v17218_v7 = vld [vmem:[%s19188_s18 + $0x4a4] ss:$460 sps:$4 sm:$0xff]  }
 0x1bb   : > { %v17237_v1 = vld [vmem:[%s19188_s18 + $0x4d8] ss:$460 sps:$4 sm:$0xff]  }
 0x1bc   : > { %v6531_v15 = vmax.bf16 %v17194_v9, %v6530_v11  ;;  %v6393_v9 = vmax.bf16 %v17333_v2, %v6392_v5  ;;  %v17219_v11 = vld [vmem:[%s19188_s18 + $0x4a8] ss:$460 sps:$4 sm:$0xff]   ;;  %v17355_v2 = vld [vmem:[%s19188_s18 + $0xb0] ss:$460 sps:$4 sm:$0xff]  }
 0x1be   : > { %v6532_v19 = vmax.bf16 %v17195_v13, %v6531_v15  ;;  %v6394_v13 = vmax.bf16 %v17334_v6, %v6393_v9  ;;  %v17221_v15 = vld [vmem:[%s19188_s18 + $0x4ac] ss:$460 sps:$4 sm:$0xff]  }
 0x1bf   : > { %v17470_v9 = vld [vmem:[%s19188_s18 + $0xae0] ss:$460 sps:$4 sm:$0xff]  }
 0x1c0   : > { %v6533_v23 = vmax.bf16 %v17197_v17, %v6532_v19  ;;  %v6395_v17 = vmax.bf16 %v17336_v10, %v6394_v13  ;;  %v17222_v19 = vld [vmem:[%s19188_s18 + $0x4b0] ss:$460 sps:$4 sm:$0xff]   ;;  %v17240_v13 = vld [vmem:[%s19188_s18 + $0x4e0] ss:$460 sps:$4 sm:$0xff]  }
 0x1c2   : > { %v6534_v28 = vmax.bf16 %v17198_v21, %v6533_v23  ;;  %v6396_v21 = vmax.bf16 %v17337_v14, %v6395_v17  ;;  %v17224_v23 = vld [vmem:[%s19188_s18 + $0x4b4] ss:$460 sps:$4 sm:$0xff]   ;;  %v17358_v14 = vld [vmem:[%s19188_s18 + $0xb8] ss:$460 sps:$4 sm:$0xff]  }
 0x1c4   : > { %v6535_v32 = vmax.bf16 %v17200_v25, %v6534_v28  ;;  %v6397_v25 = vmax.bf16 %v17339_v18, %v6396_v21  ;;  %v17473_v21 = vld [vmem:[%s19188_s18 + $0xae8] ss:$460 sps:$4 sm:$0xff]  }
 0x1c6   : > { %v6536_v36 = vmax.bf16 %v17201_v26, %v6535_v32  ;;  %v17342_v26 = vld [vmem:[%s19188_s18 + $0x8c] ss:$460 sps:$4 sm:$0xff]   ;;  %v6398_v29 = vmax.bf16 %v17340_v22, %v6397_v25  ;;  %v17243_v25 = vld [vmem:[%s19188_s18 + $0x4e8] ss:$460 sps:$4 sm:$0xff]  }
 0x1c8   : > { %v6537_v40 = vmax.bf16 %v17203_v31, %v6536_v36  ;;  %v17227_v31 = vld [vmem:[%s19188_s18 + $0x4bc] ss:$460 sps:$4 sm:$0xff]   ;;  %v6399_v33 = vmax.bf16 %v17342_v26, %v6398_v29  ;;  %v17361_v26 = vld [vmem:[%s19188_s18 + $0xc0] ss:$460 sps:$4 sm:$0xff]  }
 0x1ca   : > { %v6538_v44 = vmax.bf16 %v17204_v35, %v6537_v40  ;;  %v17228_v35 = vld [vmem:[%s19188_s18 + $0x4c0] ss:$460 sps:$4 sm:$0xff]   ;;  %v6400_v37 = vmax.bf16 %v17343_v30, %v6399_v33  ;;  %v17476_v33 = vld [vmem:[%s19188_s18 + $0xaf0] ss:$460 sps:$4 sm:$0xff]  }
 0x1cc   : > { %v6539_v48 = vmax.bf16 %v17206_v39, %v6538_v44  ;;  %v17230_v39 = vld [vmem:[%s19188_s18 + $0x4c4] ss:$460 sps:$4 sm:$0xff]   ;;  %v6401_v41 = vmax.bf16 %v17345_v34, %v6400_v37 }
 0x1cd   : > { %v17246_v37 = vld [vmem:[%s19188_s18 + $0x4f0] ss:$460 sps:$4 sm:$0xff]  }
 0x1ce   : > { %v6540_v52 = vmax.bf16 %v17207_v43, %v6539_v48  ;;  %v17231_v43 = vld [vmem:[%s19188_s18 + $0x4c8] ss:$460 sps:$4 sm:$0xff]   ;;  %v6402_v45 = vmax.bf16 %v17346_v38, %v6401_v41 }
 0x1cf   : > { %v17364_v38 = vld [vmem:[%s19188_s18 + $0xc8] ss:$460 sps:$4 sm:$0xff]  }
 0x1d0   : > { %v6541_v56 = vmax.bf16 %v17209_v47, %v6540_v52  ;;  %v17233_v47 = vld [vmem:[%s19188_s18 + $0x4cc] ss:$460 sps:$4 sm:$0xff]   ;;  %v6403_v49 = vmax.bf16 %v17348_v42, %v6402_v45 }
 0x1d1   : > { %v17479_v45 = vld [vmem:[%s19188_s18 + $0xaf8] ss:$460 sps:$4 sm:$0xff]  }
 0x1d2   : > { %v6542_v60 = vmax.bf16 %v17210_v51, %v6541_v56  ;;  %v17234_v51 = vld [vmem:[%s19188_s18 + $0x4d0] ss:$460 sps:$4 sm:$0xff]   ;;  %v6404_v53 = vmax.bf16 %v17349_v46, %v6403_v49  ;;  %v17236_v56 = vld [vmem:[%s19188_s18 + $0x4d4] ss:$460 sps:$4 sm:$0xff]   ;;  %v17249_v49 = vld [vmem:[%s19188_s18 + $0x4f8] ss:$460 sps:$4 sm:$0xff]  }
 0x1d4   : > { %v6543_v0 = vmax.bf16 %v17212_v55, %v6542_v60  ;;  %v6405_v57 = vmax.bf16 %v17351_v50, %v6404_v53  ;;  %v17466_v60 = vld [vmem:[%s19188_s18 + $0xad4] ss:$460 sps:$4 sm:$0xff]   ;;  %v17367_v50 = vld [vmem:[%s19188_s18 + $0xd0] ss:$460 sps:$4 sm:$0xff]  }
 0x1d6   : > { %v6544_v4 = vmax.bf16 %v17213_v59, %v6543_v0  ;;  %v17354_v59 = vld [vmem:[%s19188_s18 + $0xac] ss:$460 sps:$4 sm:$0xff]   ;;  %v6715_v0 = vmax.bf16 %v17466_v60, %v17464_v58  ;;  %v10407_v60 = vpop.xlane.xlu1 %10406 }
 0x1d7   : > { %16252 = vmatprep.subr.bf16.mxu1 %v10407_v60  ;;  %v17499_v60 = vld [vmem:[%s19188_s18 + $0xb2c] ss:$460 sps:$4 sm:$0xff]  }
 0x1d8   : > { %v6545_v8 = vmax.bf16 %v17215_v63, %v6544_v4  ;;  %v6406_v63 = vmax.bf16 %v17352_v54, %v6405_v57  ;;  %v6716_v6 = vmax.bf16 %v17467_v61, %v6715_v0  ;;  %v17482_v57 = vld [vmem:[%s19188_s18 + $0xb00] ss:$460 sps:$4 sm:$0xff]   ;;  %v17484_v0 = vld [vmem:[%s19188_s18 + $0xb04] ss:$460 sps:$4 sm:$0xff]  }
 0x1da   : > { %v6546_v12 = vmax.bf16 %v17216_v3, %v6545_v8  ;;  %v17469_v3 = vld [vmem:[%s19188_s18 + $0xadc] ss:$460 sps:$4 sm:$0xff]   ;;  %v6407_v5 = vmax.bf16 %v17354_v59, %v6406_v63  ;;  %v17357_v8 = vld [vmem:[%s19188_s18 + $0xb4] ss:$460 sps:$4 sm:$0xff]   ;;  %v17370_v63 = vld [vmem:[%s19188_s18 + $0xd8] ss:$460 sps:$4 sm:$0xff]  }
 0x1dc   : > { %v6547_v16 = vmax.bf16 %v17218_v7, %v6546_v12  ;;  %v17239_v7 = vld [vmem:[%s19188_s18 + $0x4dc] ss:$460 sps:$4 sm:$0xff]   ;;  %v6717_v12 = vmax.bf16 %v17469_v3, %v6716_v6 }
 0x1dd   : > { %v17485_v6 = vld [vmem:[%s19188_s18 + $0xb08] ss:$460 sps:$4 sm:$0xff]  }
 0x1de   : > { %v6548_v20 = vmax.bf16 %v17219_v11, %v6547_v16  ;;  %v6408_v11 = vmax.bf16 %v17355_v2, %v6407_v5  ;;  %v6718_v18 = vmax.bf16 %v17470_v9, %v6717_v12  ;;  %v17372_v5 = vld [vmem:[%s19188_s18 + $0xdc] ss:$460 sps:$4 sm:$0xff]   ;;  %v17487_v12 = vld [vmem:[%s19188_s18 + $0xb0c] ss:$460 sps:$4 sm:$0xff]  }
 0x1e0   : > { %v6549_v24 = vmax.bf16 %v17221_v15, %v6548_v20  ;;  %v17472_v15 = vld [vmem:[%s19188_s18 + $0xae4] ss:$460 sps:$4 sm:$0xff]   ;;  %v6409_v17 = vmax.bf16 %v17357_v8, %v6408_v11  ;;  %v17360_v20 = vld [vmem:[%s19188_s18 + $0xbc] ss:$460 sps:$4 sm:$0xff]   ;;  %v17373_v11 = vld [vmem:[%s19188_s18 + $0xe0] ss:$460 sps:$4 sm:$0xff]  }
 0x1e2   : > { %v6550_v28 = vmax.bf16 %v17222_v19, %v6549_v24  ;;  %v17242_v19 = vld [vmem:[%s19188_s18 + $0x4e4] ss:$460 sps:$4 sm:$0xff]   ;;  %v6719_v24 = vmax.bf16 %v17472_v15, %v6718_v18 }
 0x1e3   : > { %v17488_v18 = vld [vmem:[%s19188_s18 + $0xb10] ss:$460 sps:$4 sm:$0xff]  }
 0x1e4   : > { %v6551_v32 = vmax.bf16 %v17224_v23, %v6550_v28  ;;  %v6410_v23 = vmax.bf16 %v17358_v14, %v6409_v17  ;;  %v6720_v30 = vmax.bf16 %v17473_v21, %v6719_v24  ;;  %v17375_v17 = vld [vmem:[%s19188_s18 + $0xe4] ss:$460 sps:$4 sm:$0xff]   ;;  %v17490_v24 = vld [vmem:[%s19188_s18 + $0xb14] ss:$460 sps:$4 sm:$0xff]  }
 0x1e6   : > { %v6552_v36 = vmax.bf16 %v17225_v27, %v6551_v32  ;;  %v17475_v27 = vld [vmem:[%s19188_s18 + $0xaec] ss:$460 sps:$4 sm:$0xff]   ;;  %v6411_v29 = vmax.bf16 %v17360_v20, %v6410_v23  ;;  %v17363_v32 = vld [vmem:[%s19188_s18 + $0xc4] ss:$460 sps:$4 sm:$0xff]  }
 0x1e7   : > { %v17258_v20 = vld [vmem:[%s19188_s18 + $0x510] ss:$460 sps:$4 sm:$0xff]  }
 0x1e8   : > { %v6553_v40 = vmax.bf16 %v17227_v31, %v6552_v36  ;;  %v17245_v31 = vld [vmem:[%s19188_s18 + $0x4ec] ss:$460 sps:$4 sm:$0xff]   ;;  %v6721_v36 = vmax.bf16 %v17475_v27, %v6720_v30 }
 0x1e9   : > { %v17491_v30 = vld [vmem:[%s19188_s18 + $0xb18] ss:$460 sps:$4 sm:$0xff]  }
 0x1ea   : > { %v6554_v44 = vmax.bf16 %v17228_v35, %v6553_v40  ;;  %v6412_v35 = vmax.bf16 %v17361_v26, %v6411_v29  ;;  %v6722_v42 = vmax.bf16 %v17476_v33, %v6721_v36  ;;  %v17378_v26 = vld [vmem:[%s19188_s18 + $0xec] ss:$460 sps:$4 sm:$0xff]   ;;  %v17493_v36 = vld [vmem:[%s19188_s18 + $0xb1c] ss:$460 sps:$4 sm:$0xff]  }
 0x1ec   : > { %v6555_v48 = vmax.bf16 %v17230_v39, %v6554_v44  ;;  %v17478_v39 = vld [vmem:[%s19188_s18 + $0xaf4] ss:$460 sps:$4 sm:$0xff]   ;;  %v6413_v41 = vmax.bf16 %v17363_v32, %v6412_v35  ;;  %v17366_v44 = vld [vmem:[%s19188_s18 + $0xcc] ss:$460 sps:$4 sm:$0xff]   ;;  %v17379_v32 = vld [vmem:[%s19188_s18 + $0xf0] ss:$460 sps:$4 sm:$0xff]  }
 0x1ee   : > { %v6556_v52 = vmax.bf16 %v17231_v43, %v6555_v48  ;;  %v17248_v43 = vld [vmem:[%s19188_s18 + $0x4f4] ss:$460 sps:$4 sm:$0xff]   ;;  %v6723_v48 = vmax.bf16 %v17478_v39, %v6722_v42 }
 0x1ef   : > { %v17494_v42 = vld [vmem:[%s19188_s18 + $0xb20] ss:$460 sps:$4 sm:$0xff]  }
 0x1f0   : > { %v6557_v55 = vmax.bf16 %v17233_v47, %v6556_v52  ;;  %v6414_v47 = vmax.bf16 %v17364_v38, %v6413_v41  ;;  %v6724_v54 = vmax.bf16 %v17479_v45, %v6723_v48  ;;  %v17381_v38 = vld [vmem:[%s19188_s18 + $0xf4] ss:$460 sps:$4 sm:$0xff]   ;;  %v17496_v48 = vld [vmem:[%s19188_s18 + $0xb24] ss:$460 sps:$4 sm:$0xff]  }
 0x1f2   : > { %v6558_v62 = vmax.bf16 %v17234_v51, %v6557_v55  ;;  %v17481_v51 = vld [vmem:[%s19188_s18 + $0xafc] ss:$460 sps:$4 sm:$0xff]   ;;  %v6415_v53 = vmax.bf16 %v17366_v44, %v6414_v47  ;;  %v17382_v44 = vld [vmem:[%s19188_s18 + $0xf8] ss:$460 sps:$4 sm:$0xff]  }
 0x1f3   : > { %v17251_v55 = vld [vmem:[%s19188_s18 + $0x4fc] ss:$460 sps:$4 sm:$0xff]   ;;  %v6725_v61 = vmax.bf16 %v17481_v51, %v6724_v54 }
 0x1f4   : > { %v6559_v4 = vmax.bf16 %v17236_v56, %v6558_v62  ;;  %v17369_v56 = vld [vmem:[%s19188_s18 + $0xd4] ss:$460 sps:$4 sm:$0xff]   ;;  %v6416_v59 = vmax.bf16 %v17367_v50, %v6415_v53  ;;  %v17384_v50 = vld [vmem:[%s19188_s18 + $0xfc] ss:$460 sps:$4 sm:$0xff]  }
 0x1f5   : > { %v17252_v62 = vld [vmem:[%s19188_s18 + $0x500] ss:$460 sps:$4 sm:$0xff]   ;;  %v6726_v3 = vmax.bf16 %v17482_v57, %v6725_v61  ;;  %v17497_v54 = vld [vmem:[%s19188_s18 + $0xb28] ss:$460 sps:$4 sm:$0xff]  }
 0x1f6   : > { %v6560_v10 = vmax.bf16 %v17237_v1, %v6559_v4  ;;  %v6417_v2 = vmax.bf16 %v17369_v56, %v6416_v59  ;;  %v17254_v4 = vld [vmem:[%s19188_s18 + $0x504] ss:$460 sps:$4 sm:$0xff]   ;;  %v17385_v56 = vld [vmem:[%s19188_s18 + $0x100] ss:$460 sps:$4 sm:$0xff]  }
 0x1f7   : > { %v6727_v9 = vmax.bf16 %v17484_v0, %v6726_v3  ;;  %v17269_v61 = vld [vmem:[%s19188_s18 + $0x52c] ss:$460 sps:$4 sm:$0xff]   ;;  %v17270_v3 = vld [vmem:[%s19188_s18 + $0x530] ss:$460 sps:$4 sm:$0xff]  }
 0x1f8   : > { %v6561_v16 = vmax.bf16 %v17239_v7, %v6560_v10  ;;  %v6418_v8 = vmax.bf16 %v17370_v63, %v6417_v2  ;;  %v17255_v10 = vld [vmem:[%s19188_s18 + $0x508] ss:$460 sps:$4 sm:$0xff]   ;;  %v17500_v2 = vld [vmem:[%s19188_s18 + $0xb30] ss:$460 sps:$4 sm:$0xff]  }
 0x1f9   : > { %v6728_v15 = vmax.bf16 %v17485_v6, %v6727_v9  ;;  %v17272_v9 = vld [vmem:[%s19188_s18 + $0x534] ss:$460 sps:$4 sm:$0xff]  }
 0x1fa   : > { %v6562_v22 = vmax.bf16 %v17240_v13, %v6561_v16  ;;  %v6419_v14 = vmax.bf16 %v17372_v5, %v6418_v8  ;;  %v17257_v16 = vld [vmem:[%s19188_s18 + $0x50c] ss:$460 sps:$4 sm:$0xff]   ;;  %v17502_v8 = vld [vmem:[%s19188_s18 + $0xb34] ss:$460 sps:$4 sm:$0xff]  }
 0x1fb   : > { %v6729_v23 = vmax.bf16 %v17487_v12, %v6728_v15  ;;  %v17273_v15 = vld [vmem:[%s19188_s18 + $0x538] ss:$460 sps:$4 sm:$0xff]  }
 0x1fc   : > { %v6563_v28 = vmax.bf16 %v17242_v19, %v6562_v22  ;;  %v6420_v21 = vmax.bf16 %v17373_v11, %v6419_v14  ;;  %v17376_v22 = vld [vmem:[%s19188_s18 + $0xe8] ss:$460 sps:$4 sm:$0xff]   ;;  %v17503_v14 = vld [vmem:[%s19188_s18 + $0xb38] ss:$460 sps:$4 sm:$0xff]  }
 0x1fd   : > { %v6730_v29 = vmax.bf16 %v17488_v18, %v6729_v23 }
 0x1fe   : > { %v6564_v34 = vmax.bf16 %v17243_v25, %v6563_v28  ;;  %v17260_v25 = vld [vmem:[%s19188_s18 + $0x514] ss:$460 sps:$4 sm:$0xff]   ;;  %v6421_v28 = vmax.bf16 %v17375_v17, %v6420_v21  ;;  %v17275_v21 = vld [vmem:[%s19188_s18 + $0x53c] ss:$460 sps:$4 sm:$0xff]  }
 0x1ff   : > { %v6731_v35 = vmax.bf16 %v17490_v24, %v6730_v29 }
 0x200   : > { %v6565_v40 = vmax.bf16 %v17245_v31, %v6564_v34  ;;  %v17261_v31 = vld [vmem:[%s19188_s18 + $0x518] ss:$460 sps:$4 sm:$0xff]   ;;  %v6422_v34 = vmax.bf16 %v17376_v22, %v6421_v28  ;;  %v17393_v22 = vld [vmem:[%s19188_s18 + $0x114] ss:$460 sps:$4 sm:$0xff]  }
 0x201   : > { %v6732_v41 = vmax.bf16 %v17491_v30, %v6731_v35  ;;  %v17394_v28 = vld [vmem:[%s19188_s18 + $0x118] ss:$460 sps:$4 sm:$0xff]  }
 0x202   : > { %v6566_v46 = vmax.bf16 %v17246_v37, %v6565_v40  ;;  %v17263_v37 = vld [vmem:[%s19188_s18 + $0x51c] ss:$460 sps:$4 sm:$0xff]   ;;  %v6423_v40 = vmax.bf16 %v17378_v26, %v6422_v34  ;;  %v17506_v26 = vld [vmem:[%s19188_s18 + $0xb40] ss:$460 sps:$4 sm:$0xff]  }
 0x203   : > { %v6733_v47 = vmax.bf16 %v17493_v36, %v6732_v41  ;;  %v17396_v34 = vld [vmem:[%s19188_s18 + $0x11c] ss:$460 sps:$4 sm:$0xff]  }
 0x204   : > { %v6567_v52 = vmax.bf16 %v17248_v43, %v6566_v46  ;;  %v17264_v43 = vld [vmem:[%s19188_s18 + $0x520] ss:$460 sps:$4 sm:$0xff]   ;;  %v6424_v46 = vmax.bf16 %v17379_v32, %v6423_v40  ;;  %v17508_v32 = vld [vmem:[%s19188_s18 + $0xb44] ss:$460 sps:$4 sm:$0xff]  }
 0x205   : > { %v6734_v53 = vmax.bf16 %v17494_v42, %v6733_v47  ;;  %v17397_v40 = vld [vmem:[%s19188_s18 + $0x120] ss:$460 sps:$4 sm:$0xff]  }
 0x206   : > { %v6568_v58 = vmax.bf16 %v17249_v49, %v6567_v52  ;;  %v17266_v49 = vld [vmem:[%s19188_s18 + $0x524] ss:$460 sps:$4 sm:$0xff]   ;;  %v6425_v52 = vmax.bf16 %v17381_v38, %v6424_v46  ;;  %v17509_v38 = vld [vmem:[%s19188_s18 + $0xb48] ss:$460 sps:$4 sm:$0xff]  }
 0x207   : > { %v6735_v59 = vmax.bf16 %v17496_v48, %v6734_v53  ;;  %v17399_v46 = vld [vmem:[%s19188_s18 + $0x124] ss:$460 sps:$4 sm:$0xff]  }
 0x208   : > { %v6569_v1 = vmax.bf16 %v17251_v55, %v6568_v58  ;;  %v17267_v55 = vld [vmem:[%s19188_s18 + $0x528] ss:$460 sps:$4 sm:$0xff]   ;;  %v6426_v58 = vmax.bf16 %v17382_v44, %v6425_v52  ;;  %v17511_v44 = vld [vmem:[%s19188_s18 + $0xb4c] ss:$460 sps:$4 sm:$0xff]  }
 0x209   : > { %v17400_v52 = vld [vmem:[%s19188_s18 + $0x128] ss:$460 sps:$4 sm:$0xff]  }
 0x20a   : > { %v6570_v7 = vmax.bf16 %v17252_v62, %v6569_v1  ;;  %v17387_v62 = vld [vmem:[%s19188_s18 + $0x104] ss:$460 sps:$4 sm:$0xff]   ;;  %v6427_v0 = vmax.bf16 %v17384_v50, %v6426_v58  ;;  %v6736_v1 = vmax.bf16 %v17497_v54, %v6735_v59  ;;  %v17402_v58 = vld [vmem:[%s19188_s18 + $0x12c] ss:$460 sps:$4 sm:$0xff]  }
 0x20b   : > { %v17512_v50 = vld [vmem:[%s19188_s18 + $0xb50] ss:$460 sps:$4 sm:$0xff]  }
 0x20c   : > { %v6571_v13 = vmax.bf16 %v17254_v4, %v6570_v7  ;;  %v17388_v4 = vld [vmem:[%s19188_s18 + $0x108] ss:$460 sps:$4 sm:$0xff]   ;;  %v6428_v6 = vmax.bf16 %v17385_v56, %v6427_v0  ;;  %v6737_v7 = vmax.bf16 %v17499_v60, %v6736_v1  ;;  %v17403_v0 = vld [vmem:[%s19188_s18 + $0x130] ss:$460 sps:$4 sm:$0xff]   ;;  %v17117_v1 = vld [vmem:[%s19188_s18 + $0x398] ss:$460 sps:$4 sm:$0xff]  }
 0x20d   : > { %v17514_v56 = vld [vmem:[%s19188_s18 + $0xb54] ss:$460 sps:$4 sm:$0xff]  }
 0x20e   : > { %v6572_v19 = vmax.bf16 %v17255_v10, %v6571_v13  ;;  %v17390_v10 = vld [vmem:[%s19188_s18 + $0x10c] ss:$460 sps:$4 sm:$0xff]   ;;  %v6429_v12 = vmax.bf16 %v17387_v62, %v6428_v6  ;;  %v6738_v13 = vmax.bf16 %v17500_v2, %v6737_v7  ;;  %v17119_v2 = vld [vmem:[%s19188_s18 + $0x39c] ss:$460 sps:$4 sm:$0xff]  }
 0x20f   : > { %v17515_v62 = vld [vmem:[%s19188_s18 + $0xb58] ss:$460 sps:$4 sm:$0xff]   ;;  %v17517_v6 = vld [vmem:[%s19188_s18 + $0xb5c] ss:$460 sps:$4 sm:$0xff]  }
 0x210   : > { %v6573_v27 = vmax.bf16 %v17257_v16, %v6572_v19  ;;  %v17391_v16 = vld [vmem:[%s19188_s18 + $0x110] ss:$460 sps:$4 sm:$0xff]   ;;  %v6430_v18 = vmax.bf16 %v17388_v4, %v6429_v12  ;;  %v6739_v19 = vmax.bf16 %v17502_v8, %v6738_v13  ;;  %v17405_v8 = vld [vmem:[%s19188_s18 + $0x134] ss:$460 sps:$4 sm:$0xff]  }
 0x211   : > { %v17287_v7 = vld [vmem:[%s19188_s18 + $0x55c] ss:$460 sps:$4 sm:$0xff]   ;;  %v17518_v12 = vld [vmem:[%s19188_s18 + $0xb60] ss:$460 sps:$4 sm:$0xff]  }
 0x212   : > { %v6574_v33 = vmax.bf16 %v17258_v20, %v6573_v27  ;;  %v17505_v20 = vld [vmem:[%s19188_s18 + $0xb3c] ss:$460 sps:$4 sm:$0xff]   ;;  %v6431_v24 = vmax.bf16 %v17390_v10, %v6430_v18  ;;  %v17276_v27 = vld [vmem:[%s19188_s18 + $0x540] ss:$460 sps:$4 sm:$0xff]   ;;  %v17520_v18 = vld [vmem:[%s19188_s18 + $0xb64] ss:$460 sps:$4 sm:$0xff]  }
 0x213   : > { %v17288_v13 = vld [vmem:[%s19188_s18 + $0x560] ss:$460 sps:$4 sm:$0xff]  }
 0x214   : > { %v6575_v39 = vmax.bf16 %v17260_v25, %v6574_v33  ;;  %v6740_v25 = vmax.bf16 %v17503_v14, %v6739_v19  ;;  %v6432_v30 = vmax.bf16 %v17391_v16, %v6431_v24  ;;  %v17278_v33 = vld [vmem:[%s19188_s18 + $0x544] ss:$460 sps:$4 sm:$0xff]   ;;  %v17408_v19 = vld [vmem:[%s19188_s18 + $0x13c] ss:$460 sps:$4 sm:$0xff]  }
 0x215   : > { %v17406_v14 = vld [vmem:[%s19188_s18 + $0x138] ss:$460 sps:$4 sm:$0xff]   ;;  %v17521_v24 = vld [vmem:[%s19188_s18 + $0xb68] ss:$460 sps:$4 sm:$0xff]  }
 0x216   : > { %v6576_v45 = vmax.bf16 %v17261_v31, %v6575_v39  ;;  %v6741_v31 = vmax.bf16 %v17505_v20, %v6740_v25  ;;  %v6433_v36 = vmax.bf16 %v17393_v22, %v6432_v30  ;;  %v17279_v39 = vld [vmem:[%s19188_s18 + $0x548] ss:$460 sps:$4 sm:$0xff]   ;;  %v17409_v25 = vld [vmem:[%s19188_s18 + $0x140] ss:$460 sps:$4 sm:$0xff]   ;;  %v17411_v30 = vld [vmem:[%s19188_s18 + $0x144] ss:$460 sps:$4 sm:$0xff]  }
 0x218   : > { %v6577_v51 = vmax.bf16 %v17263_v37, %v6576_v45  ;;  %v6742_v37 = vmax.bf16 %v17506_v26, %v6741_v31  ;;  %v6434_v42 = vmax.bf16 %v17394_v28, %v6433_v36  ;;  %v17281_v45 = vld [vmem:[%s19188_s18 + $0x54c] ss:$460 sps:$4 sm:$0xff]   ;;  %v17638_v36 = vld [vmem:[%s19188_s18 + $0x73c] ss:$460 sps:$4 sm:$0xff]  }
 0x21a   : > { %v6578_v57 = vmax.bf16 %v17264_v43, %v6577_v51  ;;  %v6743_v43 = vmax.bf16 %v17508_v32, %v6742_v37  ;;  %v6435_v48 = vmax.bf16 %v17396_v34, %v6434_v42  ;;  %v17282_v51 = vld [vmem:[%s19188_s18 + $0x550] ss:$460 sps:$4 sm:$0xff]  }
 0x21b   : > { %v17524_v34 = vld [vmem:[%s19188_s18 + $0xb70] ss:$460 sps:$4 sm:$0xff]  }
 0x21c   : > { %v6579_v63 = vmax.bf16 %v17266_v49, %v6578_v57  ;;  %v6744_v49 = vmax.bf16 %v17509_v38, %v6743_v43  ;;  %v6436_v54 = vmax.bf16 %v17397_v40, %v6435_v48  ;;  %v17284_v57 = vld [vmem:[%s19188_s18 + $0x554] ss:$460 sps:$4 sm:$0xff]  }
 0x21d   : > { %v17412_v40 = vld [vmem:[%s19188_s18 + $0x148] ss:$460 sps:$4 sm:$0xff]  }
 0x21e   : > { %v6580_v5 = vmax.bf16 %v17267_v55, %v6579_v63  ;;  %v6745_v55 = vmax.bf16 %v17511_v44, %v6744_v49  ;;  %v6437_v60 = vmax.bf16 %v17399_v46, %v6436_v54  ;;  %v17285_v63 = vld [vmem:[%s19188_s18 + $0x558] ss:$460 sps:$4 sm:$0xff]  }
 0x21f   : > { %v17414_v46 = vld [vmem:[%s19188_s18 + $0x14c] ss:$460 sps:$4 sm:$0xff]  }
 0x220   : > { %v6581_v11 = vmax.bf16 %v17269_v61, %v6580_v5  ;;  %v6746_v61 = vmax.bf16 %v17512_v50, %v6745_v55  ;;  %v6438_v4 = vmax.bf16 %v17400_v52, %v6437_v60  ;;  %v17415_v52 = vld [vmem:[%s19188_s18 + $0x150] ss:$460 sps:$4 sm:$0xff]  }
 0x222   : > { %v6582_v17 = vmax.bf16 %v17270_v3, %v6581_v11  ;;  %v6747_v5 = vmax.bf16 %v17514_v56, %v6746_v61  ;;  %v6439_v10 = vmax.bf16 %v17402_v58, %v6438_v4  ;;  %v17417_v58 = vld [vmem:[%s19188_s18 + $0x154] ss:$460 sps:$4 sm:$0xff]  }
 0x224   : > { %v6583_v23 = vmax.bf16 %v17272_v9, %v6582_v17  ;;  %v6748_v11 = vmax.bf16 %v17515_v62, %v6747_v5  ;;  %v6440_v16 = vmax.bf16 %v17403_v0, %v6439_v10  ;;  %v17418_v0 = vld [vmem:[%s19188_s18 + $0x158] ss:$460 sps:$4 sm:$0xff]   ;;  %v17647_v5 = vld [vmem:[%s19188_s18 + $0x754] ss:$460 sps:$4 sm:$0xff]  }
 0x226   : > { %v6584_v29 = vmax.bf16 %v17273_v15, %v6583_v23  ;;  %v6749_v17 = vmax.bf16 %v17517_v6, %v6748_v11  ;;  %v6441_v22 = vmax.bf16 %v17405_v8, %v6440_v16  ;;  %v17420_v6 = vld [vmem:[%s19188_s18 + $0x15c] ss:$460 sps:$4 sm:$0xff]   ;;  %v17648_v11 = vld [vmem:[%s19188_s18 + $0x758] ss:$460 sps:$4 sm:$0xff]  }
 0x228   : > { %v6585_v35 = vmax.bf16 %v17275_v21, %v6584_v29  ;;  %v6482_v21 = vmax.bf16 %v17119_v2, %v17117_v1  ;;  %v6750_v23 = vmax.bf16 %v17518_v12, %v6749_v17  ;;  %v17523_v29 = vld [vmem:[%s19188_s18 + $0xb6c] ss:$460 sps:$4 sm:$0xff]   ;;  %v17532_v1 = vld [vmem:[%s19188_s18 + $0xb84] ss:$460 sps:$4 sm:$0xff]   ;;  %v17650_v17 = vld [vmem:[%s19188_s18 + $0x75c] ss:$460 sps:$4 sm:$0xff]  }
 0x229   : > { %v17421_v12 = vld [vmem:[%s19188_s18 + $0x160] ss:$460 sps:$4 sm:$0xff]  }
 0x22a   : > { %v6586_v41 = vmax.bf16 %v17276_v27, %v6585_v35  ;;  %v6442_v27 = vmax.bf16 %v17406_v14, %v6441_v22  ;;  %v6751_v28 = vmax.bf16 %v17520_v18, %v6750_v23  ;;  %v17636_v35 = vld [vmem:[%s19188_s18 + $0x738] ss:$460 sps:$4 sm:$0xff]   ;;  %v17651_v23 = vld [vmem:[%s19188_s18 + $0x760] ss:$460 sps:$4 sm:$0xff]  }
 0x22b   : > { %v6599_v42 = vmax.bf16 %v17638_v36, %v17636_v35  ;;  %v17423_v18 = vld [vmem:[%s19188_s18 + $0x164] ss:$460 sps:$4 sm:$0xff]   ;;  %v17654_v35 = vld [vmem:[%s19188_s18 + $0x768] ss:$460 sps:$4 sm:$0xff]  }
 0x22c   : > { %v6587_v47 = vmax.bf16 %v17278_v33, %v6586_v41  ;;  %v6443_v32 = vmax.bf16 %v17408_v19, %v6442_v27  ;;  %v6752_v33 = vmax.bf16 %v17521_v24, %v6751_v28  ;;  %v17526_v41 = vld [vmem:[%s19188_s18 + $0xb74] ss:$460 sps:$4 sm:$0xff]   ;;  %v17536_v19 = vld [vmem:[%s19188_s18 + $0xb90] ss:$460 sps:$4 sm:$0xff]  }
 0x22d   : > { %v17424_v24 = vld [vmem:[%s19188_s18 + $0x168] ss:$460 sps:$4 sm:$0xff]   ;;  %v17427_v36 = vld [vmem:[%s19188_s18 + $0x170] ss:$460 sps:$4 sm:$0xff]  }
 0x22e   : > { %v6588_v53 = vmax.bf16 %v17279_v39, %v6587_v47  ;;  %v6444_v37 = vmax.bf16 %v17409_v25, %v6443_v32  ;;  %v6753_v38 = vmax.bf16 %v17523_v29, %v6752_v33  ;;  %v17639_v39 = vld [vmem:[%s19188_s18 + $0x740] ss:$460 sps:$4 sm:$0xff]   ;;  %v17527_v47 = vld [vmem:[%s19188_s18 + $0xb78] ss:$460 sps:$4 sm:$0xff]  }
 0x22f   : > { %v6600_v48 = vmax.bf16 %v17639_v39, %v6599_v42  ;;  %v17538_v25 = vld [vmem:[%s19188_s18 + $0xb94] ss:$460 sps:$4 sm:$0xff]   ;;  %v17653_v29 = vld [vmem:[%s19188_s18 + $0x764] ss:$460 sps:$4 sm:$0xff]  }
 0x230   : > { %v6589_v59 = vmax.bf16 %v17281_v45, %v6588_v53  ;;  %v6445_v43 = vmax.bf16 %v17411_v30, %v6444_v37  ;;  %v6754_v44 = vmax.bf16 %v17524_v34, %v6753_v38  ;;  %v17641_v45 = vld [vmem:[%s19188_s18 + $0x744] ss:$460 sps:$4 sm:$0xff]   ;;  %v17529_v53 = vld [vmem:[%s19188_s18 + $0xb7c] ss:$460 sps:$4 sm:$0xff]   ;;  %v17426_v30 = vld [vmem:[%s19188_s18 + $0x16c] ss:$460 sps:$4 sm:$0xff]  }
 0x231   : > { %v6601_v54 = vmax.bf16 %v17641_v45, %v6600_v48  ;;  %v17541_v37 = vld [vmem:[%s19188_s18 + $0xb9c] ss:$460 sps:$4 sm:$0xff]   ;;  %v17429_v42 = vld [vmem:[%s19188_s18 + $0x174] ss:$460 sps:$4 sm:$0xff]   ;;  %v17430_v48 = vld [vmem:[%s19188_s18 + $0x178] ss:$460 sps:$4 sm:$0xff]  }
 0x232   : > { %v6590_v3 = vmax.bf16 %v17282_v51, %v6589_v59  ;;  %v6446_v49 = vmax.bf16 %v17412_v40, %v6445_v43  ;;  %v6755_v50 = vmax.bf16 %v17526_v41, %v6754_v44  ;;  %v17642_v51 = vld [vmem:[%s19188_s18 + $0x748] ss:$460 sps:$4 sm:$0xff]   ;;  %v17530_v59 = vld [vmem:[%s19188_s18 + $0xb80] ss:$460 sps:$4 sm:$0xff]  }
 0x233   : > { %v6602_v60 = vmax.bf16 %v17642_v51, %v6601_v54  ;;  %v17656_v41 = vld [vmem:[%s19188_s18 + $0x76c] ss:$460 sps:$4 sm:$0xff]   ;;  %v17432_v54 = vld [vmem:[%s19188_s18 + $0x17c] ss:$460 sps:$4 sm:$0xff]  }
 0x234   : > { %v6591_v9 = vmax.bf16 %v17284_v57, %v6590_v3  ;;  %v6447_v55 = vmax.bf16 %v17414_v46, %v6446_v49  ;;  %v6756_v56 = vmax.bf16 %v17527_v47, %v6755_v50  ;;  %v17644_v57 = vld [vmem:[%s19188_s18 + $0x74c] ss:$460 sps:$4 sm:$0xff]   ;;  %v17657_v47 = vld [vmem:[%s19188_s18 + $0x770] ss:$460 sps:$4 sm:$0xff]  }
 0x235   : > { %v6603_v2 = vmax.bf16 %v17644_v57, %v6602_v60  ;;  %v17542_v43 = vld [vmem:[%s19188_s18 + $0xba0] ss:$460 sps:$4 sm:$0xff]   ;;  %v17544_v49 = vld [vmem:[%s19188_s18 + $0xba4] ss:$460 sps:$4 sm:$0xff]  }
 0x236   : > { %v6592_v15 = vmax.bf16 %v17285_v63, %v6591_v9  ;;  %v6448_v61 = vmax.bf16 %v17415_v52, %v6447_v55  ;;  %v6757_v62 = vmax.bf16 %v17529_v53, %v6756_v56  ;;  %v17645_v63 = vld [vmem:[%s19188_s18 + $0x750] ss:$460 sps:$4 sm:$0xff]   ;;  %v17659_v53 = vld [vmem:[%s19188_s18 + $0x774] ss:$460 sps:$4 sm:$0xff]   ;;  %v17660_v60 = vld [vmem:[%s19188_s18 + $0x778] ss:$460 sps:$4 sm:$0xff]  }
 0x237   : > { %v6604_v8 = vmax.bf16 %v17645_v63, %v6603_v2  ;;  %v17545_v55 = vld [vmem:[%s19188_s18 + $0xba8] ss:$460 sps:$4 sm:$0xff]   ;;  %v17548_v63 = vld [vmem:[%s19188_s18 + $0xbb0] ss:$460 sps:$4 sm:$0xff]  }
 0x238   : > { %v6593_v20 = vmax.bf16 %v17287_v7, %v6592_v15  ;;  %v6449_v3 = vmax.bf16 %v17417_v58, %v6448_v61  ;;  %v6758_v4 = vmax.bf16 %v17530_v59, %v6757_v62  ;;  %v17533_v7 = vld [vmem:[%s19188_s18 + $0xb88] ss:$460 sps:$4 sm:$0xff]   ;;  %v17433_v58 = vld [vmem:[%s19188_s18 + $0x180] ss:$460 sps:$4 sm:$0xff]   ;;  %v17435_v61 = vld [vmem:[%s19188_s18 + $0x184] ss:$460 sps:$4 sm:$0xff]  }
 0x239   : > { %v6605_v14 = vmax.bf16 %v17647_v5, %v6604_v8  ;;  %v17547_v62 = vld [vmem:[%s19188_s18 + $0xbac] ss:$460 sps:$4 sm:$0xff]   ;;  %v17550_v5 = vld [vmem:[%s19188_s18 + $0xbb4] ss:$460 sps:$4 sm:$0xff]  }
 0x23a   : > { %v6594_v26 = vmax.bf16 %v17288_v13, %v6593_v20  ;;  %v6450_v9 = vmax.bf16 %v17418_v0, %v6449_v3  ;;  %v6759_v10 = vmax.bf16 %v17532_v1, %v6758_v4  ;;  %v17535_v13 = vld [vmem:[%s19188_s18 + $0xb8c] ss:$460 sps:$4 sm:$0xff]   ;;  %v17662_v1 = vld [vmem:[%s19188_s18 + $0x77c] ss:$460 sps:$4 sm:$0xff]  }
 0x23b   : > { %v6606_v20 = vmax.bf16 %v17648_v11, %v6605_v14  ;;  %v17436_v4 = vld [vmem:[%s19188_s18 + $0x188] ss:$460 sps:$4 sm:$0xff]   ;;  %v17551_v11 = vld [vmem:[%s19188_s18 + $0xbb8] ss:$460 sps:$4 sm:$0xff]  }
 0x23c   : > { %v6595_v31 = vmax.bf16 %v6594_v26, %v6482_v21  ;;  %v6451_v15 = vmax.bf16 %v17420_v6, %v6450_v9  ;;  %v6760_v16 = vmax.bf16 %v17533_v7, %v6759_v10  ;;  %v17663_v7 = vld [vmem:[%s19188_s18 + $0x780] ss:$460 sps:$4 sm:$0xff]  }
 0x23d   : > { %v6607_v26 = vmax.bf16 %v17650_v17, %v6606_v20  ;;  %v17438_v10 = vld [vmem:[%s19188_s18 + $0x18c] ss:$460 sps:$4 sm:$0xff]   ;;  %v17553_v17 = vld [vmem:[%s19188_s18 + $0xbbc] ss:$460 sps:$4 sm:$0xff]  }
 0x23e   : > { %6596 = vmax.xlane.bf16.xlu1 %v6595_v31  ;;  %v6452_v21 = vmax.bf16 %v17421_v12, %v6451_v15  ;;  %v6761_v22 = vmax.bf16 %v17535_v13, %v6760_v16  ;;  %v17539_v31 = vld [vmem:[%s19188_s18 + $0xb98] ss:$460 sps:$4 sm:$0xff]   ;;  %v17439_v16 = vld [vmem:[%s19188_s18 + $0x190] ss:$460 sps:$4 sm:$0xff]  }
 0x23f   : > { %v6608_v32 = vmax.bf16 %v17651_v23, %v6607_v26  ;;  %v17665_v13 = vld [vmem:[%s19188_s18 + $0x784] ss:$460 sps:$4 sm:$0xff]   ;;  %v17554_v23 = vld [vmem:[%s19188_s18 + $0xbc0] ss:$460 sps:$4 sm:$0xff]  }
 0x240   : > { %v6453_v27 = vmax.bf16 %v17423_v18, %v6452_v21  ;;  %v6762_v28 = vmax.bf16 %v17536_v19, %v6761_v22  ;;  %v17666_v19 = vld [vmem:[%s19188_s18 + $0x788] ss:$460 sps:$4 sm:$0xff]  }
 0x241   : > { %v6609_v38 = vmax.bf16 %v17653_v29, %v6608_v32  ;;  %v17441_v22 = vld [vmem:[%s19188_s18 + $0x194] ss:$460 sps:$4 sm:$0xff]   ;;  %v17556_v29 = vld [vmem:[%s19188_s18 + $0xbc4] ss:$460 sps:$4 sm:$0xff]  }
 0x242   : > { %v6454_v33 = vmax.bf16 %v17424_v24, %v6453_v27  ;;  %v6763_v34 = vmax.bf16 %v17538_v25, %v6762_v28  ;;  %v17668_v25 = vld [vmem:[%s19188_s18 + $0x78c] ss:$460 sps:$4 sm:$0xff]  }
 0x243   : > { %v6610_v44 = vmax.bf16 %v17654_v35, %v6609_v38  ;;  %v17442_v28 = vld [vmem:[%s19188_s18 + $0x198] ss:$460 sps:$4 sm:$0xff]   ;;  %v17557_v35 = vld [vmem:[%s19188_s18 + $0xbc8] ss:$460 sps:$4 sm:$0xff]  }
 0x244   : > { %v6455_v39 = vmax.bf16 %v17426_v30, %v6454_v33  ;;  %v6764_v40 = vmax.bf16 %v17539_v31, %v6763_v34  ;;  %v17669_v31 = vld [vmem:[%s19188_s18 + $0x790] ss:$460 sps:$4 sm:$0xff]  }
 0x245   : > { %v6611_v50 = vmax.bf16 %v17656_v41, %v6610_v44  ;;  %v17444_v34 = vld [vmem:[%s19188_s18 + $0x19c] ss:$460 sps:$4 sm:$0xff]   ;;  %v17559_v41 = vld [vmem:[%s19188_s18 + $0xbcc] ss:$460 sps:$4 sm:$0xff]  }
 0x246   : > { %v6456_v45 = vmax.bf16 %v17427_v36, %v6455_v39  ;;  %v6765_v46 = vmax.bf16 %v17541_v37, %v6764_v40  ;;  %v17671_v37 = vld [vmem:[%s19188_s18 + $0x794] ss:$460 sps:$4 sm:$0xff]  }
 0x247   : > { %v6612_v56 = vmax.bf16 %v17657_v47, %v6611_v50  ;;  %v17445_v40 = vld [vmem:[%s19188_s18 + $0x1a0] ss:$460 sps:$4 sm:$0xff]   ;;  %v17560_v47 = vld [vmem:[%s19188_s18 + $0xbd0] ss:$460 sps:$4 sm:$0xff]  }
 0x248   : > { %v6457_v51 = vmax.bf16 %v17429_v42, %v6456_v45  ;;  %v6766_v52 = vmax.bf16 %v17542_v43, %v6765_v46  ;;  %v17672_v43 = vld [vmem:[%s19188_s18 + $0x798] ss:$460 sps:$4 sm:$0xff]  }
 0x249   : > { %v6613_v0 = vmax.bf16 %v17659_v53, %v6612_v56  ;;  %v17447_v46 = vld [vmem:[%s19188_s18 + $0x1a4] ss:$460 sps:$4 sm:$0xff]   ;;  %v17562_v53 = vld [vmem:[%s19188_s18 + $0xbd4] ss:$460 sps:$4 sm:$0xff]  }
 0x24a   : > { %v6458_v57 = vmax.bf16 %v17430_v48, %v6457_v51  ;;  %v6767_v59 = vmax.bf16 %v17544_v49, %v6766_v52  ;;  %v17674_v49 = vld [vmem:[%s19188_s18 + $0x79c] ss:$460 sps:$4 sm:$0xff]  }
 0x24b   : > { %v6614_v6 = vmax.bf16 %v17660_v60, %v6613_v0  ;;  %v17448_v52 = vld [vmem:[%s19188_s18 + $0x1a8] ss:$460 sps:$4 sm:$0xff]   ;;  %v17451_v0 = vld [vmem:[%s19188_s18 + $0x1b0] ss:$460 sps:$4 sm:$0xff]  }
 0x24c   : > { %v6459_v2 = vmax.bf16 %v17432_v54, %v6458_v57  ;;  %v6768_v3 = vmax.bf16 %v17545_v55, %v6767_v59  ;;  %v17675_v55 = vld [vmem:[%s19188_s18 + $0x7a0] ss:$460 sps:$4 sm:$0xff]   ;;  %v17563_v59 = vld [vmem:[%s19188_s18 + $0xbd8] ss:$460 sps:$4 sm:$0xff]  }
 0x24d   : > { %v6615_v12 = vmax.bf16 %v17662_v1, %v6614_v6  ;;  %v17565_v1 = vld [vmem:[%s19188_s18 + $0xbdc] ss:$460 sps:$4 sm:$0xff]   ;;  %v17453_v6 = vld [vmem:[%s19188_s18 + $0x1b4] ss:$460 sps:$4 sm:$0xff]  }
 0x24e   : > { %v6460_v8 = vmax.bf16 %v17433_v58, %v6459_v2  ;;  %v6769_v9 = vmax.bf16 %v17547_v62, %v6768_v3  ;;  %v17450_v58 = vld [vmem:[%s19188_s18 + $0x1ac] ss:$460 sps:$4 sm:$0xff]   ;;  %v17678_v3 = vld [vmem:[%s19188_s18 + $0x7a8] ss:$460 sps:$4 sm:$0xff]  }
 0x24f   : > { %v6616_v18 = vmax.bf16 %v17663_v7, %v6615_v12  ;;  %v17566_v7 = vld [vmem:[%s19188_s18 + $0xbe0] ss:$460 sps:$4 sm:$0xff]   ;;  %v17454_v12 = vld [vmem:[%s19188_s18 + $0x1b8] ss:$460 sps:$4 sm:$0xff]  }
 0x250   : > { %v6461_v14 = vmax.bf16 %v17435_v61, %v6460_v8  ;;  %v6770_v15 = vmax.bf16 %v17548_v63, %v6769_v9  ;;  %v17677_v61 = vld [vmem:[%s19188_s18 + $0x7a4] ss:$460 sps:$4 sm:$0xff]   ;;  %v17680_v9 = vld [vmem:[%s19188_s18 + $0x7ac] ss:$460 sps:$4 sm:$0xff]  }
 0x251   : > { %v6617_v24 = vmax.bf16 %v17665_v13, %v6616_v18  ;;  %v17568_v13 = vld [vmem:[%s19188_s18 + $0xbe4] ss:$460 sps:$4 sm:$0xff]   ;;  %v17456_v18 = vld [vmem:[%s19188_s18 + $0x1bc] ss:$460 sps:$4 sm:$0xff]  }
 0x252   : > { %v6462_v20 = vmax.bf16 %v17436_v4, %v6461_v14  ;;  %v6771_v21 = vmax.bf16 %v17550_v5, %v6770_v15  ;;  %v17681_v15 = vld [vmem:[%s19188_s18 + $0x7b0] ss:$460 sps:$4 sm:$0xff]  }
 0x253   : > { %v6618_v30 = vmax.bf16 %v17666_v19, %v6617_v24  ;;  %v17569_v19 = vld [vmem:[%s19188_s18 + $0xbe8] ss:$460 sps:$4 sm:$0xff]   ;;  %v17457_v24 = vld [vmem:[%s19188_s18 + $0x1c0] ss:$460 sps:$4 sm:$0xff]  }
 0x254   : > { %v6463_v26 = vmax.bf16 %v17438_v10, %v6462_v20  ;;  %v6772_v27 = vmax.bf16 %v17551_v11, %v6771_v21  ;;  %v17683_v21 = vld [vmem:[%s19188_s18 + $0x7b4] ss:$460 sps:$4 sm:$0xff]  }
 0x255   : > { %v6619_v36 = vmax.bf16 %v17668_v25, %v6618_v30  ;;  %v17571_v25 = vld [vmem:[%s19188_s18 + $0xbec] ss:$460 sps:$4 sm:$0xff]  }
 0x256   : > { %v6464_v32 = vmax.bf16 %v17439_v16, %v6463_v26  ;;  %v6773_v33 = vmax.bf16 %v17553_v17, %v6772_v27  ;;  %v17684_v27 = vld [vmem:[%s19188_s18 + $0x7b8] ss:$460 sps:$4 sm:$0xff]  }
 0x257   : > { %v6620_v42 = vmax.bf16 %v17669_v31, %v6619_v36 }
 0x258   : > { %v6465_v38 = vmax.bf16 %v17441_v22, %v6464_v32  ;;  %v6774_v39 = vmax.bf16 %v17554_v23, %v6773_v33  ;;  %v17459_v32 = vld [vmem:[%s19188_s18 + $0x1c4] ss:$460 sps:$4 sm:$0xff]  }
 0x259   : > { %v6621_v48 = vmax.bf16 %v17671_v37, %v6620_v42  ;;  %v17572_v33 = vld [vmem:[%s19188_s18 + $0xbf0] ss:$460 sps:$4 sm:$0xff]  }
 0x25a   : > { %v6466_v44 = vmax.bf16 %v17442_v28, %v6465_v38  ;;  %v6775_v45 = vmax.bf16 %v17556_v29, %v6774_v39  ;;  %v17289_v28 = vld [vmem:[%s19188_s18] ss:$460 sps:$4 sm:$0xff]   ;;  %v17291_v29 = vld [vmem:[%s19188_s18 + $0x4] ss:$460 sps:$4 sm:$0xff]   ;;  %v17460_v38 = vld [vmem:[%s19188_s18 + $0x1c8] ss:$460 sps:$4 sm:$0xff]  }
 0x25b   : > { %v6622_v54 = vmax.bf16 %v17672_v43, %v6621_v48  ;;  %v17574_v39 = vld [vmem:[%s19188_s18 + $0xbf4] ss:$460 sps:$4 sm:$0xff]   ;;  %v6366_v48 = vmax.bf16 %v17291_v29, %v17289_v28 }
 0x25c   : > { %v6467_v50 = vmax.bf16 %v17444_v34, %v6466_v44  ;;  %v6776_v51 = vmax.bf16 %v17557_v35, %v6775_v45  ;;  %v17686_v35 = vld [vmem:[%s19188_s18 + $0x7bc] ss:$460 sps:$4 sm:$0xff]   ;;  %v17575_v44 = vld [vmem:[%s19188_s18 + $0xbf8] ss:$460 sps:$4 sm:$0xff]   ;;  %v17816_v29 = vld [vmem:[%s19188_s18 + $0x1214] ss:$460 sps:$4 sm:$0xff]  }
 0x25d   : > { %v6623_v60 = vmax.bf16 %v17674_v49, %v6622_v54 }
 0x25e   : > { %v6468_v56 = vmax.bf16 %v17445_v40, %v6467_v50  ;;  %v6777_v57 = vmax.bf16 %v17559_v41, %v6776_v51  ;;  %v17687_v41 = vld [vmem:[%s19188_s18 + $0x7c0] ss:$460 sps:$4 sm:$0xff]   ;;  %v17577_v50 = vld [vmem:[%s19188_s18 + $0xbfc] ss:$460 sps:$4 sm:$0xff]  }
 0x25f   : > { %v6624_v2 = vmax.bf16 %v17675_v55, %v6623_v60  ;;  %v17578_v55 = vld [vmem:[%s19188_s18 + $0xc00] ss:$460 sps:$4 sm:$0xff]   ;;  %v17580_v60 = vld [vmem:[%s19188_s18 + $0xc04] ss:$460 sps:$4 sm:$0xff]  }
 0x260   : > { %v6469_v62 = vmax.bf16 %v17447_v46, %v6468_v56  ;;  %v6778_v63 = vmax.bf16 %v17560_v47, %v6777_v57  ;;  %v17689_v46 = vld [vmem:[%s19188_s18 + $0x7c4] ss:$460 sps:$4 sm:$0xff]   ;;  %v17692_v57 = vld [vmem:[%s19188_s18 + $0x7cc] ss:$460 sps:$4 sm:$0xff]  }
 0x261   : > { %v6625_v8 = vmax.bf16 %v17677_v61, %v6624_v2  ;;  %v17695_v2 = vld [vmem:[%s19188_s18 + $0x7d4] ss:$460 sps:$4 sm:$0xff]  }
 0x262   : > { %v6470_v4 = vmax.bf16 %v17448_v52, %v6469_v62  ;;  %v6779_v5 = vmax.bf16 %v17562_v53, %v6778_v63  ;;  %v17690_v52 = vld [vmem:[%s19188_s18 + $0x7c8] ss:$460 sps:$4 sm:$0xff]   ;;  %v17693_v62 = vld [vmem:[%s19188_s18 + $0x7d0] ss:$460 sps:$4 sm:$0xff]  }
 0x263   : > { %v6626_v14 = vmax.bf16 %v17678_v3, %v6625_v8  ;;  %v17810_v8 = vld [vmem:[%s19188_s18 + $0x1204] ss:$460 sps:$4 sm:$0xff]  }
 0x264   : > { %v6471_v10 = vmax.bf16 %v17450_v58, %v6470_v4  ;;  %v6780_v11 = vmax.bf16 %v17563_v59, %v6779_v5  ;;  %v17696_v5 = vld [vmem:[%s19188_s18 + $0x7d8] ss:$460 sps:$4 sm:$0xff]  }
 0x265   : > { %v6627_v20 = vmax.bf16 %v17680_v9, %v6626_v14  ;;  %v17583_v9 = vld [vmem:[%s19188_s18 + $0xc0c] ss:$460 sps:$4 sm:$0xff]  }
 0x266   : > { %v6472_v16 = vmax.bf16 %v17451_v0, %v6471_v10  ;;  %v6781_v17 = vmax.bf16 %v17565_v1, %v6780_v11  ;;  %v17581_v0 = vld [vmem:[%s19188_s18 + $0xc08] ss:$460 sps:$4 sm:$0xff]  }
 0x267   : > { %v6628_v26 = vmax.bf16 %v17681_v15, %v6627_v20  ;;  %v17811_v11 = vld [vmem:[%s19188_s18 + $0x1208] ss:$460 sps:$4 sm:$0xff]   ;;  %v17584_v15 = vld [vmem:[%s19188_s18 + $0xc10] ss:$460 sps:$4 sm:$0xff]  }
 0x268   : > { %v6473_v22 = vmax.bf16 %v17453_v6, %v6472_v16  ;;  %v6782_v23 = vmax.bf16 %v17566_v7, %v6781_v17  ;;  %v17808_v7 = vld [vmem:[%s19188_s18 + $0x1200] ss:$460 sps:$4 sm:$0xff]  }
 0x269   : > { %v6629_v34 = vmax.bf16 %v17683_v21, %v6628_v26  ;;  %v6947_v14 = vmax.bf16 %v17810_v8, %v17808_v7  ;;  %v17813_v17 = vld [vmem:[%s19188_s18 + $0x120c] ss:$460 sps:$4 sm:$0xff]   ;;  %v17586_v21 = vld [vmem:[%s19188_s18 + $0xc14] ss:$460 sps:$4 sm:$0xff]   ;;  %v17826_v7 = vld [vmem:[%s19188_s18 + $0x1230] ss:$460 sps:$4 sm:$0xff]  }
 0x26a   : > { %v6474_v30 = vmax.bf16 %v17454_v12, %v6473_v22  ;;  %v6783_v31 = vmax.bf16 %v17568_v13, %v6782_v23  ;;  %v17698_v13 = vld [vmem:[%s19188_s18 + $0x7dc] ss:$460 sps:$4 sm:$0xff]  }
 0x26b   : > { %v6630_v40 = vmax.bf16 %v17684_v27, %v6629_v34  ;;  %v6948_v20 = vmax.bf16 %v17811_v11, %v6947_v14  ;;  %v17814_v23 = vld [vmem:[%s19188_s18 + $0x1210] ss:$460 sps:$4 sm:$0xff]   ;;  %v17587_v27 = vld [vmem:[%s19188_s18 + $0xc18] ss:$460 sps:$4 sm:$0xff]   ;;  %v10143_v14 = vpop.xlane.xlu1 %10142 }
 0x26c   : > { %v6475_v36 = vmax.bf16 %v17456_v18, %v6474_v30  ;;  %v6784_v37 = vmax.bf16 %v17569_v19, %v6783_v31  ;;  %v17699_v19 = vld [vmem:[%s19188_s18 + $0x7e0] ss:$460 sps:$4 sm:$0xff]   ;;  %v17702_v31 = vld [vmem:[%s19188_s18 + $0x7e8] ss:$460 sps:$4 sm:$0xff]  }
 0x26d   : > { %v6631_v45 = vmax.bf16 %v17686_v35, %v6630_v40  ;;  %v6949_v26 = vmax.bf16 %v17813_v17, %v6948_v20  ;;  %v17817_v35 = vld [vmem:[%s19188_s18 + $0x1218] ss:$460 sps:$4 sm:$0xff]   ;;  %v17601_v20 = vld [vmem:[%s19188_s18 + $0xc3c] ss:$460 sps:$4 sm:$0xff]  }
 0x26e   : > { %v6476_v42 = vmax.bf16 %v17457_v24, %v6475_v36  ;;  %v6785_v43 = vmax.bf16 %v17571_v25, %v6784_v37  ;;  %v17701_v25 = vld [vmem:[%s19188_s18 + $0x7e4] ss:$460 sps:$4 sm:$0xff]   ;;  %v17704_v37 = vld [vmem:[%s19188_s18 + $0x7ec] ss:$460 sps:$4 sm:$0xff]  }
 0x26f   : > { %v6632_v51 = vmax.bf16 %v17687_v41, %v6631_v45  ;;  %v17819_v41 = vld [vmem:[%s19188_s18 + $0x121c] ss:$460 sps:$4 sm:$0xff]   ;;  %v17592_v45 = vld [vmem:[%s19188_s18 + $0xc24] ss:$460 sps:$4 sm:$0xff]  }
 0x270   : > { %v6477_v47 = vmax.bf16 %v17459_v32, %v6476_v42  ;;  %v6786_v49 = vmax.bf16 %v17572_v33, %v6785_v43  ;;  %v6950_v32 = vmax.bf16 %v17814_v23, %v6949_v26  ;;  %v17589_v33 = vld [vmem:[%s19188_s18 + $0xc1c] ss:$460 sps:$4 sm:$0xff]   ;;  %v17602_v26 = vld [vmem:[%s19188_s18 + $0xc40] ss:$460 sps:$4 sm:$0xff]  }
 0x271   : > { %v6633_v56 = vmax.bf16 %v17689_v46, %v6632_v51  ;;  %v17705_v43 = vld [vmem:[%s19188_s18 + $0x7f0] ss:$460 sps:$4 sm:$0xff]   ;;  %v17593_v51 = vld [vmem:[%s19188_s18 + $0xc28] ss:$460 sps:$4 sm:$0xff]  }
 0x272   : > { %v6478_v53 = vmax.bf16 %v17460_v38, %v6477_v47  ;;  %v6787_v54 = vmax.bf16 %v17574_v39, %v6786_v49  ;;  %v6951_v38 = vmax.bf16 %v17816_v29, %v6950_v32  ;;  %v17590_v39 = vld [vmem:[%s19188_s18 + $0xc20] ss:$460 sps:$4 sm:$0xff]   ;;  %v17604_v32 = vld [vmem:[%s19188_s18 + $0xc44] ss:$460 sps:$4 sm:$0xff]  }
 0x273   : > { %v6634_v61 = vmax.bf16 %v17690_v52, %v6633_v56  ;;  %v17820_v47 = vld [vmem:[%s19188_s18 + $0x1220] ss:$460 sps:$4 sm:$0xff]  }
 0x274   : > { %v6479_v58 = vmax.bf16 %v6478_v53, %v6366_v48  ;;  %v6788_v59 = vmax.bf16 %v17575_v44, %v6787_v54  ;;  %v6952_v44 = vmax.bf16 %v17817_v35, %v6951_v38  ;;  %v17707_v49 = vld [vmem:[%s19188_s18 + $0x7f4] ss:$460 sps:$4 sm:$0xff]   ;;  %v17822_v53 = vld [vmem:[%s19188_s18 + $0x1224] ss:$460 sps:$4 sm:$0xff]  }
 0x275   : > { %v6635_v1 = vmax.bf16 %v17692_v57, %v6634_v61  ;;  %v17595_v57 = vld [vmem:[%s19188_s18 + $0xc2c] ss:$460 sps:$4 sm:$0xff]   ;;  %v17710_v61 = vld [vmem:[%s19188_s18 + $0x7fc] ss:$460 sps:$4 sm:$0xff]  }
 0x276   : > { %6480 = vmax.xlane.bf16.xlu0 %v6479_v58  ;;  %v6789_v63 = vmax.bf16 %v17577_v50, %v6788_v59  ;;  %v6953_v50 = vmax.bf16 %v17819_v41, %v6952_v44  ;;  %v17823_v59 = vld [vmem:[%s19188_s18 + $0x1228] ss:$460 sps:$4 sm:$0xff]   ;;  %v17720_v41 = vld [vmem:[%s19188_s18 + $0x818] ss:$460 sps:$4 sm:$0xff]  }
 0x277   : > { %v6636_v4 = vmax.bf16 %v17693_v62, %v6635_v1  ;;  %v17825_v1 = vld [vmem:[%s19188_s18 + $0x122c] ss:$460 sps:$4 sm:$0xff]   ;;  %v17722_v44 = vld [vmem:[%s19188_s18 + $0x81c] ss:$460 sps:$4 sm:$0xff]  }
 0x278   : > { %v6790_v3 = vmax.bf16 %v17578_v55, %v6789_v63  ;;  %v17708_v55 = vld [vmem:[%s19188_s18 + $0x7f8] ss:$460 sps:$4 sm:$0xff]   ;;  %v6954_v56 = vmax.bf16 %v17820_v47, %v6953_v50  ;;  %v17596_v63 = vld [vmem:[%s19188_s18 + $0xc30] ss:$460 sps:$4 sm:$0xff]   ;;  %v17723_v50 = vld [vmem:[%s19188_s18 + $0x820] ss:$460 sps:$4 sm:$0xff]  }
 0x279   : > { %v6637_v10 = vmax.bf16 %v17695_v2, %v6636_v4  ;;  %v17608_v47 = vld [vmem:[%s19188_s18 + $0xc50] ss:$460 sps:$4 sm:$0xff]  }
 0x27a   : > { %v6791_v6 = vmax.bf16 %v17580_v60, %v6790_v3  ;;  %v6955_v62 = vmax.bf16 %v17822_v53, %v6954_v56  ;;  %v17711_v3 = vld [vmem:[%s19188_s18 + $0x800] ss:$460 sps:$4 sm:$0xff]   ;;  %v17725_v56 = vld [vmem:[%s19188_s18 + $0x824] ss:$460 sps:$4 sm:$0xff]  }
 0x27b   : > { %v6638_v16 = vmax.bf16 %v17696_v5, %v6637_v10  ;;  %v17598_v5 = vld [vmem:[%s19188_s18 + $0xc34] ss:$460 sps:$4 sm:$0xff]   ;;  %v17713_v10 = vld [vmem:[%s19188_s18 + $0x804] ss:$460 sps:$4 sm:$0xff]  }
 0x27c   : > { %v6792_v12 = vmax.bf16 %v17581_v0, %v6791_v6  ;;  %v6956_v4 = vmax.bf16 %v17823_v59, %v6955_v62  ;;  %v17610_v53 = vld [vmem:[%s19188_s18 + $0xc54] ss:$460 sps:$4 sm:$0xff]   ;;  %v17611_v59 = vld [vmem:[%s19188_s18 + $0xc58] ss:$460 sps:$4 sm:$0xff]  }
 0x27d   : > { %v6639_v22 = vmax.bf16 %v17698_v13, %v6638_v16  ;;  %v12625_v13 = vld [vmem:[#allocation3 + $0x8] sm:$0xff]  ;;  %v17828_v16 = vld [vmem:[%s19188_s18 + $0x1234] ss:$460 sps:$4 sm:$0xff]  }
 0x27e   : > { %v6793_v18 = vmax.bf16 %v17583_v9, %v6792_v12  ;;  %v17599_v9 = vld [vmem:[%s19188_s18 + $0xc38] ss:$460 sps:$4 sm:$0xff]   ;;  %v6957_v11 = vmax.bf16 %v17825_v1, %v6956_v4  ;;  %12913 = vmatprep.mubr.f32.mxu1 %v12625_v13  ;;  %v17726_v62 = vld [vmem:[%s19188_s18 + $0x828] ss:$460 sps:$4 sm:$0xff]  }
 0x27f   : > { %v6640_v28 = vmax.bf16 %v17699_v19, %v6639_v22  ;;  %v17829_v22 = vld [vmem:[%s19188_s18 + $0x1238] ss:$460 sps:$4 sm:$0xff]   ;;  %v17613_v1 = vld [vmem:[%s19188_s18 + $0xc5c] ss:$460 sps:$4 sm:$0xff]  }
 0x280   : > { %v6794_v24 = vmax.bf16 %v17584_v15, %v6793_v18  ;;  %v12624_v15 = vld [vmem:[#allocation3] sm:$0xff]  ;;  %v6958_v19 = vmax.bf16 %v17826_v7, %v6957_v11  ;;  %v17728_v4 = vld [vmem:[%s19188_s18 + $0x82c] ss:$460 sps:$4 sm:$0xff]  }
 0x281   : > { %v6641_v34 = vmax.bf16 %v17701_v25, %v6640_v28  ;;  %v17714_v18 = vld [vmem:[%s19188_s18 + $0x808] ss:$460 sps:$4 sm:$0xff]   ;;  %12914 = vmatmul.mubr.f32.vlgmr.msra.gmra.mrb[0].mxu1 %v12624_v15  ;;  %v17614_v7 = vld [vmem:[%s19188_s18 + $0xc60] ss:$460 sps:$4 sm:$0xff]   ;;  %v17616_v13 = vld [vmem:[%s19188_s18 + $0xc64] ss:$460 sps:$4 sm:$0xff]  }
 0x282   : > { %v6795_v30 = vmax.bf16 %v17586_v21, %v6794_v24  ;;  %v17716_v24 = vld [vmem:[%s19188_s18 + $0x80c] ss:$460 sps:$4 sm:$0xff]   ;;  %16254 = vmatpush3.bf16.msra.mxu1 %v10143_v14  ;;  %v6959_v25 = vmax.bf16 %v17828_v16, %v6958_v19  ;;  %v17831_v28 = vld [vmem:[%s19188_s18 + $0x123c] ss:$460 sps:$4 sm:$0xff]   ;;  %v17731_v16 = vld [vmem:[%s19188_s18 + $0x834] ss:$460 sps:$4 sm:$0xff]  }
 0x283   : > { %v6642_v40 = vmax.bf16 %v17702_v31, %v6641_v34  ;;  %v17832_v34 = vld [vmem:[%s19188_s18 + $0x1240] ss:$460 sps:$4 sm:$0xff]   ;;  %v17617_v19 = vld [vmem:[%s19188_s18 + $0xc68] ss:$460 sps:$4 sm:$0xff]  }
 0x284   : > { %v6796_v36 = vmax.bf16 %v17587_v27, %v6795_v30  ;;  %v17717_v30 = vld [vmem:[%s19188_s18 + $0x810] ss:$460 sps:$4 sm:$0xff]   ;;  %v6960_v31 = vmax.bf16 %v17829_v22, %v6959_v25  ;;  %v17732_v22 = vld [vmem:[%s19188_s18 + $0x838] ss:$460 sps:$4 sm:$0xff]  }
 0x285   : > { %v6643_v46 = vmax.bf16 %v17704_v37, %v6642_v40  ;;  %v17719_v37 = vld [vmem:[%s19188_s18 + $0x814] ss:$460 sps:$4 sm:$0xff]   ;;  %v17619_v25 = vld [vmem:[%s19188_s18 + $0xc6c] ss:$460 sps:$4 sm:$0xff]  }
 0x286   : > { %v6797_v42 = vmax.bf16 %v17589_v33, %v6796_v36  ;;  %v17605_v36 = vld [vmem:[%s19188_s18 + $0xc48] ss:$460 sps:$4 sm:$0xff]   ;;  %v6961_v38 = vmax.bf16 %v17831_v28, %v6960_v31  ;;  %v17620_v31 = vld [vmem:[%s19188_s18 + $0xc70] ss:$460 sps:$4 sm:$0xff]  }
 0x287   : > { %v6644_v52 = vmax.bf16 %v17705_v43, %v6643_v46  ;;  %v17835_v46 = vld [vmem:[%s19188_s18 + $0x1248] ss:$460 sps:$4 sm:$0xff]  }
 0x288   : > { %v6798_v48 = vmax.bf16 %v17590_v39, %v6797_v42  ;;  %v17607_v39 = vld [vmem:[%s19188_s18 + $0xc4c] ss:$460 sps:$4 sm:$0xff]   ;;  %v17834_v42 = vld [vmem:[%s19188_s18 + $0x1244] ss:$460 sps:$4 sm:$0xff]   ;;  %v17734_v28 = vld [vmem:[%s19188_s18 + $0x83c] ss:$460 sps:$4 sm:$0xff]  }
 0x289   : > { %v6645_v58 = vmax.bf16 %v17707_v49, %v6644_v52  ;;  %v17837_v52 = vld [vmem:[%s19188_s18 + $0x124c] ss:$460 sps:$4 sm:$0xff]  }
 0x28a   : > { %v6799_v54 = vmax.bf16 %v17592_v45, %v6798_v48  ;;  %v6962_v45 = vmax.bf16 %v17832_v34, %v6961_v38  ;;  %v17735_v34 = vld [vmem:[%s19188_s18 + $0x840] ss:$460 sps:$4 sm:$0xff]  }
 0x28b   : > { %v6646_v0 = vmax.bf16 %v17708_v55, %v6645_v58  ;;  %v17838_v58 = vld [vmem:[%s19188_s18 + $0x1250] ss:$460 sps:$4 sm:$0xff]  }
 0x28c   : > { %v6800_v60 = vmax.bf16 %v17593_v51, %v6799_v54  ;;  %v6963_v51 = vmax.bf16 %v17834_v42, %v6962_v45  ;;  %v17850_v42 = vld [vmem:[%s19188_s18 + $0x1270] ss:$460 sps:$4 sm:$0xff]  }
 0x28d   : > { %v6647_v6 = vmax.bf16 %v17710_v61, %v6646_v0  ;;  %v17840_v0 = vld [vmem:[%s19188_s18 + $0x1254] ss:$460 sps:$4 sm:$0xff]  }
 0x28e   : > { %v6801_v2 = vmax.bf16 %v17595_v57, %v6800_v60  ;;  %v6964_v57 = vmax.bf16 %v17835_v46, %v6963_v51  ;;  %v17738_v46 = vld [vmem:[%s19188_s18 + $0x848] ss:$460 sps:$4 sm:$0xff]  }
 0x28f   : > { %v6648_v12 = vmax.bf16 %v17711_v3, %v6647_v6  ;;  %v17841_v6 = vld [vmem:[%s19188_s18 + $0x1258] ss:$460 sps:$4 sm:$0xff]  }
 0x290   : > { %v6802_v8 = vmax.bf16 %v17596_v63, %v6801_v2  ;;  %v6965_v63 = vmax.bf16 %v17837_v52, %v6964_v57  ;;  %v17740_v52 = vld [vmem:[%s19188_s18 + $0x84c] ss:$460 sps:$4 sm:$0xff]  }
 0x291   : > { %v6649_v21 = vmax.bf16 %v17713_v10, %v6648_v12  ;;  %v17729_v10 = vld [vmem:[%s19188_s18 + $0x830] ss:$460 sps:$4 sm:$0xff]  }
 0x292   : > { %v6803_v17 = vmax.bf16 %v17598_v5, %v6802_v8  ;;  %v6966_v5 = vmax.bf16 %v17838_v58, %v6965_v63  ;;  %v17843_v12 = vld [vmem:[%s19188_s18 + $0x125c] ss:$460 sps:$4 sm:$0xff]  }
 0x293   : > { %v6650_v27 = vmax.bf16 %v17714_v18, %v6649_v21  ;;  %v17844_v18 = vld [vmem:[%s19188_s18 + $0x1260] ss:$460 sps:$4 sm:$0xff]   ;;  %v17741_v58 = vld [vmem:[%s19188_s18 + $0x850] ss:$460 sps:$4 sm:$0xff]  }
 0x294   : > { %v6804_v23 = vmax.bf16 %v17599_v9, %v6803_v17  ;;  %v6967_v11 = vmax.bf16 %v17840_v0, %v6966_v5  ;;  %v17743_v0 = vld [vmem:[%s19188_s18 + $0x854] ss:$460 sps:$4 sm:$0xff]  }
 0x295   : > { %v6651_v33 = vmax.bf16 %v17716_v24, %v6650_v27  ;;  %v17846_v24 = vld [vmem:[%s19188_s18 + $0x1264] ss:$460 sps:$4 sm:$0xff]   ;;  %v17461_v5 = vld [vmem:[%s19188_s18 + $0xac8] ss:$460 sps:$4 sm:$0xff]  }
 0x296   : > { %v6805_v29 = vmax.bf16 %v17601_v20, %v6804_v23  ;;  %v6968_v17 = vmax.bf16 %v17841_v6, %v6967_v11  ;;  %v17463_v6 = vld [vmem:[%s19188_s18 + $0xacc] ss:$460 sps:$4 sm:$0xff]  }
 0x297   : > { %v6652_v40 = vmax.bf16 %v17717_v30, %v6651_v33  ;;  %v17847_v30 = vld [vmem:[%s19188_s18 + $0x1268] ss:$460 sps:$4 sm:$0xff]   ;;  %v17631_v11 = vld [vmem:[%s19188_s18 + $0xc8c] ss:$460 sps:$4 sm:$0xff]  }
 0x298   : > { %v6806_v35 = vmax.bf16 %v17602_v26, %v6805_v29  ;;  %v6969_v23 = vmax.bf16 %v17843_v12, %v6968_v17  ;;  %v17632_v17 = vld [vmem:[%s19188_s18 + $0xc90] ss:$460 sps:$4 sm:$0xff]  }
 0x299   : > { %v6653_v48 = vmax.bf16 %v17719_v37, %v6652_v40  ;;  %v17622_v37 = vld [vmem:[%s19188_s18 + $0xc74] ss:$460 sps:$4 sm:$0xff]   ;;  %v17737_v40 = vld [vmem:[%s19188_s18 + $0x844] ss:$460 sps:$4 sm:$0xff]  }
 0x29a   : > { %v6807_v43 = vmax.bf16 %v17604_v32, %v6806_v35  ;;  %v6970_v29 = vmax.bf16 %v17844_v18, %v6969_v23 }
 0x29b   : > { %v6654_v54 = vmax.bf16 %v17720_v41, %v6653_v48  ;;  %v17852_v48 = vld [vmem:[%s19188_s18 + $0x1274] ss:$460 sps:$4 sm:$0xff]  }
 0x29c   : > { %v6808_v49 = vmax.bf16 %v17605_v36, %v6807_v43  ;;  %v6971_v35 = vmax.bf16 %v17846_v24, %v6970_v29  ;;  %v17849_v36 = vld [vmem:[%s19188_s18 + $0x126c] ss:$460 sps:$4 sm:$0xff]  }
 0x29d   : > { %v6655_v60 = vmax.bf16 %v17722_v44, %v6654_v54  ;;  %v17623_v43 = vld [vmem:[%s19188_s18 + $0xc78] ss:$460 sps:$4 sm:$0xff]  }
 0x29e   : > { %v6809_v55 = vmax.bf16 %v17607_v39, %v6808_v49  ;;  %v6972_v41 = vmax.bf16 %v17847_v30, %v6971_v35  ;;  %v17625_v49 = vld [vmem:[%s19188_s18 + $0xc7c] ss:$460 sps:$4 sm:$0xff]   ;;  %v17853_v54 = vld [vmem:[%s19188_s18 + $0x1278] ss:$460 sps:$4 sm:$0xff]  }
 0x29f   : > { %v6656_v2 = vmax.bf16 %v17723_v50, %v6655_v60  ;;  %v17855_v60 = vld [vmem:[%s19188_s18 + $0x127c] ss:$460 sps:$4 sm:$0xff]  }
 0x2a0   : > { %v6810_v61 = vmax.bf16 %v17608_v47, %v6809_v55  ;;  %v6973_v47 = vmax.bf16 %v17849_v36, %v6972_v41  ;;  %v17626_v55 = vld [vmem:[%s19188_s18 + $0xc80] ss:$460 sps:$4 sm:$0xff]  }
 0x2a1   : > { %v6657_v8 = vmax.bf16 %v17725_v56, %v6656_v2  ;;  %v17856_v2 = vld [vmem:[%s19188_s18 + $0x1280] ss:$460 sps:$4 sm:$0xff]  }
 0x2a2   : > { %v6811_v3 = vmax.bf16 %v17610_v53, %v6810_v61  ;;  %v6974_v53 = vmax.bf16 %v17850_v42, %v6973_v47  ;;  %v17628_v61 = vld [vmem:[%s19188_s18 + $0xc84] ss:$460 sps:$4 sm:$0xff]   ;;  %v17752_v36 = vld [vmem:[%s19188_s18 + $0x86c] ss:$460 sps:$4 sm:$0xff]   ;;  %v17867_v42 = vld [vmem:[%s19188_s18 + $0x129c] ss:$460 sps:$4 sm:$0xff]  }
 0x2a3   : > { %v6658_v14 = vmax.bf16 %v17726_v62, %v6657_v8  ;;  %v17744_v8 = vld [vmem:[%s19188_s18 + $0x858] ss:$460 sps:$4 sm:$0xff]   ;;  %v17755_v47 = vld [vmem:[%s19188_s18 + $0x874] ss:$460 sps:$4 sm:$0xff]  }
 0x2a4   : > { %v6812_v9 = vmax.bf16 %v17611_v59, %v6811_v3  ;;  %v6975_v59 = vmax.bf16 %v17852_v48, %v6974_v53  ;;  %v17629_v3 = vld [vmem:[%s19188_s18 + $0xc88] ss:$460 sps:$4 sm:$0xff]   ;;  %v17983_v53 = vld [vmem:[%s19188_s18 + $0xe70] ss:$460 sps:$4 sm:$0xff]  }
 0x2a5   : > { %v6659_v20 = vmax.bf16 %v17728_v4, %v6658_v14  ;;  %v17746_v14 = vld [vmem:[%s19188_s18 + $0x85c] ss:$460 sps:$4 sm:$0xff]  }
 0x2a6   : > { %v6813_v15 = vmax.bf16 %v17613_v1, %v6812_v9  ;;  %v6976_v1 = vmax.bf16 %v17853_v54, %v6975_v59  ;;  %v17756_v54 = vld [vmem:[%s19188_s18 + $0x878] ss:$460 sps:$4 sm:$0xff]   ;;  %v17985_v59 = vld [vmem:[%s19188_s18 + $0xe74] ss:$460 sps:$4 sm:$0xff]  }
 0x2a7   : > { %v6660_v26 = vmax.bf16 %v17729_v10, %v6659_v20  ;;  %v17858_v10 = vld [vmem:[%s19188_s18 + $0x1284] ss:$460 sps:$4 sm:$0xff]   ;;  %v17747_v20 = vld [vmem:[%s19188_s18 + $0x860] ss:$460 sps:$4 sm:$0xff]  }
 0x2a8   : > { %v6814_v21 = vmax.bf16 %v17614_v7, %v6813_v15  ;;  %v6977_v9 = vmax.bf16 %v17855_v60, %v6976_v1  ;;  %v17758_v60 = vld [vmem:[%s19188_s18 + $0x87c] ss:$460 sps:$4 sm:$0xff]   ;;  %v17986_v1 = vld [vmem:[%s19188_s18 + $0xe78] ss:$460 sps:$4 sm:$0xff]  }
 0x2a9   : > { %v6661_v32 = vmax.bf16 %v17731_v16, %v6660_v26  ;;  %v17859_v16 = vld [vmem:[%s19188_s18 + $0x1288] ss:$460 sps:$4 sm:$0xff]   ;;  %v17749_v26 = vld [vmem:[%s19188_s18 + $0x864] ss:$460 sps:$4 sm:$0xff]  }
 0x2aa   : > { %v6815_v27 = vmax.bf16 %v17616_v13, %v6814_v21  ;;  %v6978_v15 = vmax.bf16 %v17856_v2, %v6977_v9  ;;  %v17759_v2 = vld [vmem:[%s19188_s18 + $0x880] ss:$460 sps:$4 sm:$0xff]  }
 0x2ab   : > { %v6662_v38 = vmax.bf16 %v17732_v22, %v6661_v32  ;;  %v17861_v22 = vld [vmem:[%s19188_s18 + $0x128c] ss:$460 sps:$4 sm:$0xff]  }
 0x2ac   : > { %v6816_v33 = vmax.bf16 %v17617_v19, %v6815_v27  ;;  %v6979_v21 = vmax.bf16 %v17858_v10, %v6978_v15 }
 0x2ad   : > { %v6663_v44 = vmax.bf16 %v17734_v28, %v6662_v38  ;;  %v17862_v28 = vld [vmem:[%s19188_s18 + $0x1290] ss:$460 sps:$4 sm:$0xff]   ;;  %v17865_v38 = vld [vmem:[%s19188_s18 + $0x1298] ss:$460 sps:$4 sm:$0xff]  }
 0x2ae   : > { %v6817_v39 = vmax.bf16 %v17619_v25, %v6816_v33  ;;  %v6714_v25 = vmax.bf16 %v17463_v6, %v17461_v5  ;;  %v6980_v27 = vmax.bf16 %v17859_v16, %v6979_v21  ;;  %v17864_v33 = vld [vmem:[%s19188_s18 + $0x1294] ss:$460 sps:$4 sm:$0xff]   ;;  %v17874_v6 = vld [vmem:[%s19188_s18 + $0x12b0] ss:$460 sps:$4 sm:$0xff]  }
 0x2af   : > { %v6664_v50 = vmax.bf16 %v17735_v34, %v6663_v44 }
 0x2b0   : > { %v6818_v45 = vmax.bf16 %v17620_v31, %v6817_v39  ;;  %v17750_v31 = vld [vmem:[%s19188_s18 + $0x868] ss:$460 sps:$4 sm:$0xff]   ;;  %v6981_v32 = vmax.bf16 %v17861_v22, %v6980_v27 }
 0x2b1   : > { %v6665_v56 = vmax.bf16 %v17737_v40, %v6664_v50  ;;  %v17753_v40 = vld [vmem:[%s19188_s18 + $0x870] ss:$460 sps:$4 sm:$0xff]   ;;  %v17982_v50 = vld [vmem:[%s19188_s18 + $0xe6c] ss:$460 sps:$4 sm:$0xff]  }
 0x2b2   : > { %v6819_v51 = vmax.bf16 %v17622_v37, %v6818_v45  ;;  %v6982_v37 = vmax.bf16 %v17862_v28, %v6981_v32  ;;  %v17868_v45 = vld [vmem:[%s19188_s18 + $0x12a0] ss:$460 sps:$4 sm:$0xff]  }
 0x2b3   : > { %v6666_v62 = vmax.bf16 %v17738_v46, %v6665_v56  ;;  %v17767_v32 = vld [vmem:[%s19188_s18 + $0x894] ss:$460 sps:$4 sm:$0xff]  }
 0x2b4   : > { %v6820_v57 = vmax.bf16 %v17623_v43, %v6819_v51  ;;  %v6983_v41 = vmax.bf16 %v17864_v33, %v6982_v37  ;;  %v17995_v37 = vld [vmem:[%s19188_s18 + $0xe90] ss:$460 sps:$4 sm:$0xff]  }
 0x2b5   : > { %v6667_v4 = vmax.bf16 %v17740_v52, %v6666_v62  ;;  %v17870_v52 = vld [vmem:[%s19188_s18 + $0x12a4] ss:$460 sps:$4 sm:$0xff]  }
 0x2b6   : > { %v6821_v63 = vmax.bf16 %v17625_v49, %v6820_v57  ;;  %v6984_v44 = vmax.bf16 %v17865_v38, %v6983_v41  ;;  %v17980_v49 = vld [vmem:[%s19188_s18 + $0xe68] ss:$460 sps:$4 sm:$0xff]   ;;  %v17768_v38 = vld [vmem:[%s19188_s18 + $0x898] ss:$460 sps:$4 sm:$0xff]  }
 0x2b7   : > { %v6668_v12 = vmax.bf16 %v17741_v58, %v6667_v4  ;;  %v6831_v56 = vmax.bf16 %v17982_v50, %v17980_v49  ;;  %v17871_v58 = vld [vmem:[%s19188_s18 + $0x12a8] ss:$460 sps:$4 sm:$0xff]   ;;  %v17998_v49 = vld [vmem:[%s19188_s18 + $0xe98] ss:$460 sps:$4 sm:$0xff]   ;;  %v17771_v50 = vld [vmem:[%s19188_s18 + $0x8a0] ss:$460 sps:$4 sm:$0xff]  }
 0x2b8   : > { %v6822_v7 = vmax.bf16 %v17626_v55, %v6821_v63  ;;  %v6985_v48 = vmax.bf16 %v17867_v42, %v6984_v44  ;;  %v17883_v42 = vld [vmem:[%s19188_s18 + $0x12c8] ss:$460 sps:$4 sm:$0xff]  }
 0x2b9   : > { %v6669_v18 = vmax.bf16 %v17743_v0, %v6668_v12  ;;  %v6832_v62 = vmax.bf16 %v17983_v53, %v6831_v56  ;;  %v17873_v0 = vld [vmem:[%s19188_s18 + $0x12ac] ss:$460 sps:$4 sm:$0xff]   ;;  %v17876_v12 = vld [vmem:[%s19188_s18 + $0x12b4] ss:$460 sps:$4 sm:$0xff]   ;;  %v17770_v44 = vld [vmem:[%s19188_s18 + $0x89c] ss:$460 sps:$4 sm:$0xff]  }
 0x2ba   : > { %v6823_v13 = vmax.bf16 %v17628_v61, %v6822_v7  ;;  %v6986_v55 = vmax.bf16 %v17868_v45, %v6985_v48  ;;  %v17988_v7 = vld [vmem:[%s19188_s18 + $0xe7c] ss:$460 sps:$4 sm:$0xff]   ;;  %v17885_v48 = vld [vmem:[%s19188_s18 + $0x12cc] ss:$460 sps:$4 sm:$0xff]   ;;  %v17773_v56 = vld [vmem:[%s19188_s18 + $0x8a4] ss:$460 sps:$4 sm:$0xff]  }
 0x2bb   : > { %v6670_v23 = vmax.bf16 %v17744_v8, %v6669_v18  ;;  %v6833_v4 = vmax.bf16 %v17985_v59, %v6832_v62  ;;  %v17761_v8 = vld [vmem:[%s19188_s18 + $0x884] ss:$460 sps:$4 sm:$0xff]   ;;  %v17774_v62 = vld [vmem:[%s19188_s18 + $0x8a8] ss:$460 sps:$4 sm:$0xff]  }
 0x2bc   : > { %v6824_v19 = vmax.bf16 %v17629_v3, %v6823_v13  ;;  %v6987_v61 = vmax.bf16 %v17870_v52, %v6986_v55  ;;  %v17989_v13 = vld [vmem:[%s19188_s18 + $0xe80] ss:$460 sps:$4 sm:$0xff]   ;;  %v17877_v18 = vld [vmem:[%s19188_s18 + $0x12b8] ss:$460 sps:$4 sm:$0xff]   ;;  %v18000_v55 = vld [vmem:[%s19188_s18 + $0xe9c] ss:$460 sps:$4 sm:$0xff]  }
 0x2bd   : > { %v6671_v29 = vmax.bf16 %v17746_v14, %v6670_v23  ;;  %v6834_v10 = vmax.bf16 %v17986_v1, %v6833_v4  ;;  %v17762_v14 = vld [vmem:[%s19188_s18 + $0x888] ss:$460 sps:$4 sm:$0xff]   ;;  %v17776_v4 = vld [vmem:[%s19188_s18 + $0x8ac] ss:$460 sps:$4 sm:$0xff]  }
 0x2be   : > { %v6825_v24 = vmax.bf16 %v17631_v11, %v6824_v19  ;;  %v6988_v3 = vmax.bf16 %v17871_v58, %v6987_v61  ;;  %v17991_v19 = vld [vmem:[%s19188_s18 + $0xe84] ss:$460 sps:$4 sm:$0xff]   ;;  %v18001_v61 = vld [vmem:[%s19188_s18 + $0xea0] ss:$460 sps:$4 sm:$0xff]  }
 0x2bf   : > { %v6672_v34 = vmax.bf16 %v17747_v20, %v6671_v29  ;;  %v6835_v16 = vmax.bf16 %v17988_v7, %v6834_v10  ;;  %v17764_v20 = vld [vmem:[%s19188_s18 + $0x88c] ss:$460 sps:$4 sm:$0xff]   ;;  %v18004_v10 = vld [vmem:[%s19188_s18 + $0xea8] ss:$460 sps:$4 sm:$0xff]  }
 0x2c0   : > { %v6826_v30 = vmax.bf16 %v17632_v17, %v6825_v24  ;;  %v6989_v9 = vmax.bf16 %v17873_v0, %v6988_v3  ;;  %v17879_v24 = vld [vmem:[%s19188_s18 + $0x12bc] ss:$460 sps:$4 sm:$0xff]   ;;  %v18003_v3 = vld [vmem:[%s19188_s18 + $0xea4] ss:$460 sps:$4 sm:$0xff]  }
 0x2c1   : > { %v6673_v39 = vmax.bf16 %v17749_v26, %v6672_v34  ;;  %v6836_v22 = vmax.bf16 %v17989_v13, %v6835_v16  ;;  %v17765_v26 = vld [vmem:[%s19188_s18 + $0x890] ss:$460 sps:$4 sm:$0xff]   ;;  %v17892_v13 = vld [vmem:[%s19188_s18 + $0x12e0] ss:$460 sps:$4 sm:$0xff]  }
 0x2c2   : > { %v6827_v35 = vmax.bf16 %v6826_v30, %v6714_v25  ;;  %v6990_v15 = vmax.bf16 %v17874_v6, %v6989_v9  ;;  %v17992_v25 = vld [vmem:[%s19188_s18 + $0xe88] ss:$460 sps:$4 sm:$0xff]   ;;  %v17880_v30 = vld [vmem:[%s19188_s18 + $0x12c0] ss:$460 sps:$4 sm:$0xff]  }
 0x2c3   : > { %v6674_v43 = vmax.bf16 %v17750_v31, %v6673_v39  ;;  %v6837_v28 = vmax.bf16 %v17991_v19, %v6836_v22  ;;  %v17994_v31 = vld [vmem:[%s19188_s18 + $0xe8c] ss:$460 sps:$4 sm:$0xff]   ;;  %v17891_v9 = vld [vmem:[%s19188_s18 + $0x12dc] ss:$460 sps:$4 sm:$0xff]  }
 0x2c4   : > { %6828 = vmax.xlane.bf16.xlu1 %v6827_v35  ;;  %v6991_v21 = vmax.bf16 %v17876_v12, %v6990_v15  ;;  %v18006_v15 = vld [vmem:[%s19188_s18 + $0xeac] ss:$460 sps:$4 sm:$0xff]  }
 0x2c5   : > { %v6675_v46 = vmax.bf16 %v17752_v36, %v6674_v43  ;;  %v6838_v34 = vmax.bf16 %v17992_v25, %v6837_v28  ;;  %v17882_v36 = vld [vmem:[%s19188_s18 + $0x12c4] ss:$460 sps:$4 sm:$0xff]   ;;  %v17997_v43 = vld [vmem:[%s19188_s18 + $0xe94] ss:$460 sps:$4 sm:$0xff]  }
 0x2c6   : > { %v6992_v27 = vmax.bf16 %v17877_v18, %v6991_v21  ;;  %v17780_v18 = vld [vmem:[%s19188_s18 + $0x8b8] ss:$460 sps:$4 sm:$0xff]   ;;  %v18007_v21 = vld [vmem:[%s19188_s18 + $0xeb0] ss:$460 sps:$4 sm:$0xff]  }
 0x2c7   : > { %v6676_v51 = vmax.bf16 %v17753_v40, %v6675_v46  ;;  %v6839_v40 = vmax.bf16 %v17994_v31, %v6838_v34 }
 0x2c8   : > { %v6993_v33 = vmax.bf16 %v17879_v24, %v6992_v27  ;;  %v17782_v24 = vld [vmem:[%s19188_s18 + $0x8bc] ss:$460 sps:$4 sm:$0xff]   ;;  %v18009_v27 = vld [vmem:[%s19188_s18 + $0xeb4] ss:$460 sps:$4 sm:$0xff]  }
 0x2c9   : > { %v6677_v57 = vmax.bf16 %v17755_v47, %v6676_v51  ;;  %v6840_v46 = vmax.bf16 %v17995_v37, %v6839_v40 }
 0x2ca   : > { %v6994_v39 = vmax.bf16 %v17880_v30, %v6993_v33  ;;  %v17783_v30 = vld [vmem:[%s19188_s18 + $0x8c0] ss:$460 sps:$4 sm:$0xff]   ;;  %v18010_v33 = vld [vmem:[%s19188_s18 + $0xeb8] ss:$460 sps:$4 sm:$0xff]  }
 0x2cb   : > { %v6678_v63 = vmax.bf16 %v17756_v54, %v6677_v57  ;;  %v6841_v52 = vmax.bf16 %v17997_v43, %v6840_v46  ;;  %v17886_v54 = vld [vmem:[%s19188_s18 + $0x12d0] ss:$460 sps:$4 sm:$0xff]  }
 0x2cc   : > { %v6995_v45 = vmax.bf16 %v17882_v36, %v6994_v39  ;;  %v17785_v36 = vld [vmem:[%s19188_s18 + $0x8c4] ss:$460 sps:$4 sm:$0xff]   ;;  %v18012_v39 = vld [vmem:[%s19188_s18 + $0xebc] ss:$460 sps:$4 sm:$0xff]  }
 0x2cd   : > { %v6679_v5 = vmax.bf16 %v17758_v60, %v6678_v63  ;;  %v6842_v58 = vmax.bf16 %v17998_v49, %v6841_v52  ;;  %v17888_v60 = vld [vmem:[%s19188_s18 + $0x12d4] ss:$460 sps:$4 sm:$0xff]  }
 0x2ce   : > { %v6996_v51 = vmax.bf16 %v17883_v42, %v6995_v45  ;;  %v17786_v42 = vld [vmem:[%s19188_s18 + $0x8c8] ss:$460 sps:$4 sm:$0xff]   ;;  %v18013_v45 = vld [vmem:[%s19188_s18 + $0xec0] ss:$460 sps:$4 sm:$0xff]  }
 0x2cf   : > { %v6680_v11 = vmax.bf16 %v17759_v2, %v6679_v5  ;;  %v6843_v0 = vmax.bf16 %v18000_v55, %v6842_v58  ;;  %v17889_v2 = vld [vmem:[%s19188_s18 + $0x12d8] ss:$460 sps:$4 sm:$0xff]  }
 0x2d0   : > { %v6997_v57 = vmax.bf16 %v17885_v48, %v6996_v51  ;;  %v17788_v48 = vld [vmem:[%s19188_s18 + $0x8cc] ss:$460 sps:$4 sm:$0xff]   ;;  %v18015_v51 = vld [vmem:[%s19188_s18 + $0xec4] ss:$460 sps:$4 sm:$0xff]  }
 0x2d1   : > { %v6681_v17 = vmax.bf16 %v17761_v8, %v6680_v11  ;;  %v6844_v6 = vmax.bf16 %v18001_v61, %v6843_v0  ;;  %v17777_v8 = vld [vmem:[%s19188_s18 + $0x8b0] ss:$460 sps:$4 sm:$0xff]   ;;  %v17779_v11 = vld [vmem:[%s19188_s18 + $0x8b4] ss:$460 sps:$4 sm:$0xff]  }
 0x2d2   : > { %v6998_v63 = vmax.bf16 %v17886_v54, %v6997_v57  ;;  %v17789_v54 = vld [vmem:[%s19188_s18 + $0x8d0] ss:$460 sps:$4 sm:$0xff]   ;;  %v18016_v57 = vld [vmem:[%s19188_s18 + $0xec8] ss:$460 sps:$4 sm:$0xff]  }
 0x2d3   : > { %v6682_v23 = vmax.bf16 %v17762_v14, %v6681_v17  ;;  %v6845_v14 = vmax.bf16 %v18003_v3, %v6844_v6  ;;  %v17894_v17 = vld [vmem:[%s19188_s18 + $0x12e4] ss:$460 sps:$4 sm:$0xff]  }
 0x2d4   : > { %v6999_v5 = vmax.bf16 %v17888_v60, %v6998_v63  ;;  %v17791_v60 = vld [vmem:[%s19188_s18 + $0x8d4] ss:$460 sps:$4 sm:$0xff]   ;;  %v18018_v63 = vld [vmem:[%s19188_s18 + $0xecc] ss:$460 sps:$4 sm:$0xff]  }
 0x2d5   : > { %v6683_v29 = vmax.bf16 %v17764_v20, %v6682_v23  ;;  %v6846_v20 = vmax.bf16 %v18004_v10, %v6845_v14  ;;  %v17895_v23 = vld [vmem:[%s19188_s18 + $0x12e8] ss:$460 sps:$4 sm:$0xff]   ;;  %v17795_v14 = vld [vmem:[%s19188_s18 + $0x8e0] ss:$460 sps:$4 sm:$0xff]  }
 0x2d6   : > { %v7000_v12 = vmax.bf16 %v17889_v2, %v6999_v5  ;;  %v17792_v2 = vld [vmem:[%s19188_s18 + $0x8d8] ss:$460 sps:$4 sm:$0xff]   ;;  %v18019_v5 = vld [vmem:[%s19188_s18 + $0xed0] ss:$460 sps:$4 sm:$0xff]  }
 0x2d7   : > { %v6684_v35 = vmax.bf16 %v17765_v26, %v6683_v29  ;;  %v6847_v26 = vmax.bf16 %v18006_v15, %v6846_v20  ;;  %v17897_v29 = vld [vmem:[%s19188_s18 + $0x12ec] ss:$460 sps:$4 sm:$0xff]   ;;  %v17797_v20 = vld [vmem:[%s19188_s18 + $0x8e4] ss:$460 sps:$4 sm:$0xff]  }
 0x2d8   : > { %v7001_v19 = vmax.bf16 %v17891_v9, %v7000_v12 }
 0x2d9   : > { %v6685_v41 = vmax.bf16 %v17767_v32, %v6684_v35  ;;  %v6848_v32 = vmax.bf16 %v18007_v21, %v6847_v26  ;;  %v17898_v35 = vld [vmem:[%s19188_s18 + $0x12f0] ss:$460 sps:$4 sm:$0xff]   ;;  %v17798_v26 = vld [vmem:[%s19188_s18 + $0x8e8] ss:$460 sps:$4 sm:$0xff]  }
 0x2da   : > { %v7002_v25 = vmax.bf16 %v17892_v13, %v7001_v19  ;;  %v17909_v13 = vld [vmem:[%s19188_s18 + $0x130c] ss:$460 sps:$4 sm:$0xff]   ;;  %v17910_v19 = vld [vmem:[%s19188_s18 + $0x1310] ss:$460 sps:$4 sm:$0xff]  }
 0x2db   : > { %v6686_v47 = vmax.bf16 %v17768_v38, %v6685_v41  ;;  %v6849_v38 = vmax.bf16 %v18009_v27, %v6848_v32  ;;  %v17900_v41 = vld [vmem:[%s19188_s18 + $0x12f4] ss:$460 sps:$4 sm:$0xff]   ;;  %v17800_v32 = vld [vmem:[%s19188_s18 + $0x8ec] ss:$460 sps:$4 sm:$0xff]  }
 0x2dc   : > { %v7003_v31 = vmax.bf16 %v17894_v17, %v7002_v25  ;;  %v18022_v17 = vld [vmem:[%s19188_s18 + $0xed8] ss:$460 sps:$4 sm:$0xff]   ;;  %v17912_v25 = vld [vmem:[%s19188_s18 + $0x1314] ss:$460 sps:$4 sm:$0xff]  }
 0x2dd   : > { %v6687_v53 = vmax.bf16 %v17770_v44, %v6686_v47  ;;  %v6850_v44 = vmax.bf16 %v18010_v33, %v6849_v38  ;;  %v17901_v47 = vld [vmem:[%s19188_s18 + $0x12f8] ss:$460 sps:$4 sm:$0xff]   ;;  %v17801_v38 = vld [vmem:[%s19188_s18 + $0x8f0] ss:$460 sps:$4 sm:$0xff]  }
 0x2de   : > { %v7004_v37 = vmax.bf16 %v17895_v23, %v7003_v31  ;;  %v18024_v23 = vld [vmem:[%s19188_s18 + $0xedc] ss:$460 sps:$4 sm:$0xff]   ;;  %v17913_v31 = vld [vmem:[%s19188_s18 + $0x1318] ss:$460 sps:$4 sm:$0xff]  }
 0x2df   : > { %v6688_v59 = vmax.bf16 %v17771_v50, %v6687_v53  ;;  %v6851_v50 = vmax.bf16 %v18012_v39, %v6850_v44  ;;  %v17903_v53 = vld [vmem:[%s19188_s18 + $0x12fc] ss:$460 sps:$4 sm:$0xff]  }
 0x2e0   : > { %v7005_v43 = vmax.bf16 %v17897_v29, %v7004_v37  ;;  %v18025_v29 = vld [vmem:[%s19188_s18 + $0xee0] ss:$460 sps:$4 sm:$0xff]   ;;  %v17915_v37 = vld [vmem:[%s19188_s18 + $0x131c] ss:$460 sps:$4 sm:$0xff]  }
 0x2e1   : > { %v6689_v1 = vmax.bf16 %v17773_v56, %v6688_v59  ;;  %v6852_v56 = vmax.bf16 %v18013_v45, %v6851_v50  ;;  %v17904_v59 = vld [vmem:[%s19188_s18 + $0x1300] ss:$460 sps:$4 sm:$0xff]  }
 0x2e2   : > { %v7006_v49 = vmax.bf16 %v17898_v35, %v7005_v43  ;;  %v18027_v35 = vld [vmem:[%s19188_s18 + $0xee4] ss:$460 sps:$4 sm:$0xff]   ;;  %v17635_v43 = vld [vmem:[%s19188_s18 + $0x734] ss:$460 sps:$4 sm:$0xff]  }
 0x2e3   : > { %v6690_v7 = vmax.bf16 %v17774_v62, %v6689_v1  ;;  %v6853_v62 = vmax.bf16 %v18015_v51, %v6852_v56  ;;  %v17906_v1 = vld [vmem:[%s19188_s18 + $0x1304] ss:$460 sps:$4 sm:$0xff]   ;;  %v17916_v45 = vld [vmem:[%s19188_s18 + $0x1320] ss:$460 sps:$4 sm:$0xff]  }
 0x2e4   : > { %v7007_v55 = vmax.bf16 %v17900_v41, %v7006_v49  ;;  %v18028_v41 = vld [vmem:[%s19188_s18 + $0xee8] ss:$460 sps:$4 sm:$0xff]   ;;  %v18030_v49 = vld [vmem:[%s19188_s18 + $0xeec] ss:$460 sps:$4 sm:$0xff]   ;;  %v17918_v51 = vld [vmem:[%s19188_s18 + $0x1324] ss:$460 sps:$4 sm:$0xff]  }
 0x2e5   : > { %v6691_v16 = vmax.bf16 %v17776_v4, %v6690_v7  ;;  %v6854_v4 = vmax.bf16 %v18016_v57, %v6853_v62  ;;  %v17907_v7 = vld [vmem:[%s19188_s18 + $0x1308] ss:$460 sps:$4 sm:$0xff]  }
 0x2e6   : > { %v7008_v61 = vmax.bf16 %v17901_v47, %v7007_v55  ;;  %v18031_v55 = vld [vmem:[%s19188_s18 + $0xef0] ss:$460 sps:$4 sm:$0xff]   ;;  %v17919_v57 = vld [vmem:[%s19188_s18 + $0x1328] ss:$460 sps:$4 sm:$0xff]  }
 0x2e7   : > { %v6692_v22 = vmax.bf16 %v17777_v8, %v6691_v16  ;;  %v17794_v8 = vld [vmem:[%s19188_s18 + $0x8dc] ss:$460 sps:$4 sm:$0xff]   ;;  %v6855_v10 = vmax.bf16 %v18018_v63, %v6854_v4  ;;  %v17921_v63 = vld [vmem:[%s19188_s18 + $0x132c] ss:$460 sps:$4 sm:$0xff]  }
 0x2e8   : > { %v7009_v3 = vmax.bf16 %v17903_v53, %v7008_v61  ;;  %v17922_v4 = vld [vmem:[%s19188_s18 + $0x1330] ss:$460 sps:$4 sm:$0xff]  }
 0x2e9   : > { %v6693_v28 = vmax.bf16 %v17779_v11, %v6692_v22  ;;  %v18021_v11 = vld [vmem:[%s19188_s18 + $0xed4] ss:$460 sps:$4 sm:$0xff]   ;;  %v6856_v16 = vmax.bf16 %v18019_v5, %v6855_v10 }
 0x2ea   : > { %v7010_v9 = vmax.bf16 %v17904_v59, %v7009_v3 }
 0x2eb   : > { %v6694_v34 = vmax.bf16 %v17780_v18, %v6693_v28  ;;  %v6857_v22 = vmax.bf16 %v18021_v11, %v6856_v16  ;;  %v18039_v16 = vld [vmem:[%s19188_s18 + $0xf04] ss:$460 sps:$4 sm:$0xff]  }
 0x2ec   : > { %v7011_v15 = vmax.bf16 %v17906_v1, %v7010_v9  ;;  %v17924_v9 = vld [vmem:[%s19188_s18 + $0x1334] ss:$460 sps:$4 sm:$0xff]  }
 0x2ed   : > { %v6695_v40 = vmax.bf16 %v17782_v24, %v6694_v34  ;;  %v6858_v28 = vmax.bf16 %v18022_v17, %v6857_v22  ;;  %v18154_v22 = vld [vmem:[%s19188_s18 + $0x1934] ss:$460 sps:$4 sm:$0xff]  }
 0x2ee   : > { %v7012_v21 = vmax.bf16 %v17907_v7, %v7011_v15  ;;  %v18036_v7 = vld [vmem:[%s19188_s18 + $0xefc] ss:$460 sps:$4 sm:$0xff]  }
 0x2ef   : > { %v6696_v46 = vmax.bf16 %v17783_v30, %v6695_v40  ;;  %v6859_v34 = vmax.bf16 %v18024_v23, %v6858_v28 }
 0x2f0   : > { %v7013_v27 = vmax.bf16 %v17909_v13, %v7012_v21  ;;  %v17925_v13 = vld [vmem:[%s19188_s18 + $0x1338] ss:$460 sps:$4 sm:$0xff]   ;;  %v18152_v21 = vld [vmem:[%s19188_s18 + $0x1930] ss:$460 sps:$4 sm:$0xff]  }
 0x2f1   : > { %v6697_v52 = vmax.bf16 %v17785_v36, %v6696_v46  ;;  %v6860_v40 = vmax.bf16 %v18025_v29, %v6859_v34  ;;  %v17803_v46 = vld [vmem:[%s19188_s18 + $0x8f4] ss:$460 sps:$4 sm:$0xff]   ;;  %v7179_v28 = vmax.bf16 %v18154_v22, %v18152_v21 }
 0x2f2   : > { %v7014_v33 = vmax.bf16 %v17910_v19, %v7013_v27  ;;  %v18042_v27 = vld [vmem:[%s19188_s18 + $0xf0c] ss:$460 sps:$4 sm:$0xff]   ;;  %v17943_v22 = vld [vmem:[%s19188_s18 + $0x1368] ss:$460 sps:$4 sm:$0xff]  }
 0x2f3   : > { %v6698_v58 = vmax.bf16 %v17786_v42, %v6697_v52  ;;  %v17633_v42 = vld [vmem:[%s19188_s18 + $0x730] ss:$460 sps:$4 sm:$0xff]   ;;  %v17804_v52 = vld [vmem:[%s19188_s18 + $0x8f8] ss:$460 sps:$4 sm:$0xff]   ;;  %v18170_v21 = vld [vmem:[%s19188_s18 + $0x1960] ss:$460 sps:$4 sm:$0xff]  }
 0x2f4   : > { %v7015_v39 = vmax.bf16 %v17912_v25, %v7014_v33  ;;  %v6598_v62 = vmax.bf16 %v17635_v43, %v17633_v42  ;;  %v18155_v25 = vld [vmem:[%s19188_s18 + $0x1938] ss:$460 sps:$4 sm:$0xff]   ;;  %v18043_v33 = vld [vmem:[%s19188_s18 + $0xf10] ss:$460 sps:$4 sm:$0xff]  }
 0x2f5   : > { %v6699_v0 = vmax.bf16 %v17788_v48, %v6698_v58  ;;  %v6861_v48 = vmax.bf16 %v18027_v35, %v6860_v40  ;;  %v7180_v34 = vmax.bf16 %v18155_v25, %v7179_v28  ;;  %v18160_v43 = vld [vmem:[%s19188_s18 + $0x1944] ss:$460 sps:$4 sm:$0xff]  }
 0x2f6   : > { %v7016_v47 = vmax.bf16 %v17913_v31, %v7015_v39  ;;  %v18157_v31 = vld [vmem:[%s19188_s18 + $0x193c] ss:$460 sps:$4 sm:$0xff]   ;;  %v18045_v39 = vld [vmem:[%s19188_s18 + $0xf14] ss:$460 sps:$4 sm:$0xff]   ;;  %v18172_v28 = vld [vmem:[%s19188_s18 + $0x1964] ss:$460 sps:$4 sm:$0xff]  }
 0x2f7   : > { %v6700_v6 = vmax.bf16 %v17789_v54, %v6699_v0  ;;  %v6862_v54 = vmax.bf16 %v18028_v41, %v6861_v48  ;;  %v7181_v40 = vmax.bf16 %v18157_v31, %v7180_v34  ;;  %v18173_v34 = vld [vmem:[%s19188_s18 + $0x1968] ss:$460 sps:$4 sm:$0xff]  }
 0x2f8   : > { %v7017_v53 = vmax.bf16 %v17915_v37, %v7016_v47  ;;  %v18158_v37 = vld [vmem:[%s19188_s18 + $0x1940] ss:$460 sps:$4 sm:$0xff]  }
 0x2f9   : > { %v6701_v12 = vmax.bf16 %v17791_v60, %v6700_v6  ;;  %v6863_v59 = vmax.bf16 %v18030_v49, %v6862_v54  ;;  %v18033_v60 = vld [vmem:[%s19188_s18 + $0xef4] ss:$460 sps:$4 sm:$0xff]  }
 0x2fa   : > { %v7018_v58 = vmax.bf16 %v17916_v45, %v7017_v53  ;;  %v18046_v45 = vld [vmem:[%s19188_s18 + $0xf18] ss:$460 sps:$4 sm:$0xff]   ;;  %v18161_v49 = vld [vmem:[%s19188_s18 + $0x1948] ss:$460 sps:$4 sm:$0xff]  }
 0x2fb   : > { %v6702_v18 = vmax.bf16 %v17792_v2, %v6701_v12  ;;  %v6864_v1 = vmax.bf16 %v18031_v55, %v6863_v59  ;;  %v18034_v2 = vld [vmem:[%s19188_s18 + $0xef8] ss:$460 sps:$4 sm:$0xff]   ;;  %v18037_v12 = vld [vmem:[%s19188_s18 + $0xf00] ss:$460 sps:$4 sm:$0xff]  }
 0x2fc   : > { %v7019_v0 = vmax.bf16 %v17918_v51, %v7018_v58  ;;  %v18048_v51 = vld [vmem:[%s19188_s18 + $0xf1c] ss:$460 sps:$4 sm:$0xff]   ;;  %v18163_v55 = vld [vmem:[%s19188_s18 + $0x194c] ss:$460 sps:$4 sm:$0xff]  }
 0x2fd   : > { %v6703_v24 = vmax.bf16 %v17794_v8, %v6702_v18  ;;  %v6865_v6 = vmax.bf16 %v18033_v60, %v6864_v1  ;;  %v17927_v18 = vld [vmem:[%s19188_s18 + $0x133c] ss:$460 sps:$4 sm:$0xff]  }
 0x2fe   : > { %v7020_v5 = vmax.bf16 %v17919_v57, %v7019_v0  ;;  %v18049_v57 = vld [vmem:[%s19188_s18 + $0xf20] ss:$460 sps:$4 sm:$0xff]  }
 0x2ff   : > { %v6704_v30 = vmax.bf16 %v17795_v14, %v6703_v24  ;;  %v6866_v11 = vmax.bf16 %v18034_v2, %v6865_v6 }
 0x300   : > { %v7021_v10 = vmax.bf16 %v17921_v63, %v7020_v5  ;;  %v18051_v63 = vld [vmem:[%s19188_s18 + $0xf24] ss:$460 sps:$4 sm:$0xff]   ;;  %v18052_v5 = vld [vmem:[%s19188_s18 + $0xf28] ss:$460 sps:$4 sm:$0xff]  }
 0x301   : > { %v6705_v36 = vmax.bf16 %v17797_v20, %v6704_v30  ;;  %v6867_v15 = vmax.bf16 %v18036_v7, %v6866_v11  ;;  %v18040_v20 = vld [vmem:[%s19188_s18 + $0xf08] ss:$460 sps:$4 sm:$0xff]   ;;  %v18054_v11 = vld [vmem:[%s19188_s18 + $0xf2c] ss:$460 sps:$4 sm:$0xff]  }
 0x302   : > { %v7022_v14 = vmax.bf16 %v17922_v4, %v7021_v10  ;;  %v17939_v4 = vld [vmem:[%s19188_s18 + $0x135c] ss:$460 sps:$4 sm:$0xff]   ;;  %v17940_v10 = vld [vmem:[%s19188_s18 + $0x1360] ss:$460 sps:$4 sm:$0xff]  }
 0x303   : > { %v6706_v44 = vmax.bf16 %v17798_v26, %v6705_v36  ;;  %v6868_v19 = vmax.bf16 %v18037_v12, %v6867_v15  ;;  %v17928_v26 = vld [vmem:[%s19188_s18 + $0x1340] ss:$460 sps:$4 sm:$0xff]   ;;  %v18169_v15 = vld [vmem:[%s19188_s18 + $0x195c] ss:$460 sps:$4 sm:$0xff]  }
 0x304   : > { %v7023_v17 = vmax.bf16 %v17924_v9, %v7022_v14  ;;  %v18167_v9 = vld [vmem:[%s19188_s18 + $0x1958] ss:$460 sps:$4 sm:$0xff]  }
 0x305   : > { %v6707_v50 = vmax.bf16 %v17800_v32, %v6706_v44  ;;  %v6869_v24 = vmax.bf16 %v18039_v16, %v6868_v19  ;;  %v17930_v32 = vld [vmem:[%s19188_s18 + $0x1344] ss:$460 sps:$4 sm:$0xff]   ;;  %v17933_v44 = vld [vmem:[%s19188_s18 + $0x134c] ss:$460 sps:$4 sm:$0xff]  }
 0x306   : > { %v7024_v23 = vmax.bf16 %v17925_v13, %v7023_v17  ;;  %v17942_v16 = vld [vmem:[%s19188_s18 + $0x1364] ss:$460 sps:$4 sm:$0xff]  }
 0x307   : > { %v6708_v56 = vmax.bf16 %v17801_v38, %v6707_v50  ;;  %v6870_v30 = vmax.bf16 %v18040_v20, %v6869_v24  ;;  %v17931_v38 = vld [vmem:[%s19188_s18 + $0x1348] ss:$460 sps:$4 sm:$0xff]   ;;  %v17934_v50 = vld [vmem:[%s19188_s18 + $0x1350] ss:$460 sps:$4 sm:$0xff]  }
 0x308   : > { %v7025_v29 = vmax.bf16 %v17927_v18, %v7024_v23  ;;  %v18055_v17 = vld [vmem:[%s19188_s18 + $0xf30] ss:$460 sps:$4 sm:$0xff]   ;;  %v18057_v23 = vld [vmem:[%s19188_s18 + $0xf34] ss:$460 sps:$4 sm:$0xff]  }
 0x309   : > { %v6709_v61 = vmax.bf16 %v17803_v46, %v6708_v56  ;;  %v6871_v36 = vmax.bf16 %v18042_v27, %v6870_v30  ;;  %v7182_v46 = vmax.bf16 %v18158_v37, %v7181_v40  ;;  %v17936_v56 = vld [vmem:[%s19188_s18 + $0x1354] ss:$460 sps:$4 sm:$0xff]   ;;  %v10440_v27 = vpop.xlane.xlu1 %10439  ;;  %v18058_v30 = vld [vmem:[%s19188_s18 + $0xf38] ss:$460 sps:$4 sm:$0xff]  }
 0x30a   : > { %v7026_v35 = vmax.bf16 %v17928_v26, %v7025_v29  ;;  %v17945_v29 = vld [vmem:[%s19188_s18 + $0x136c] ss:$460 sps:$4 sm:$0xff]   ;;  %16256 = vmatprep.subr.bf16.mxu1 %v10440_v27 }
 0x30b   : > { %v6710_v3 = vmax.bf16 %v17804_v52, %v6709_v61  ;;  %v6872_v42 = vmax.bf16 %v18043_v33, %v6871_v36  ;;  %v7183_v52 = vmax.bf16 %v18160_v43, %v7182_v46  ;;  %v18164_v61 = vld [vmem:[%s19188_s18 + $0x1950] ss:$460 sps:$4 sm:$0xff]   ;;  %v18175_v40 = vld [vmem:[%s19188_s18 + $0x196c] ss:$460 sps:$4 sm:$0xff]  }
 0x30c   : > { %v7027_v41 = vmax.bf16 %v17930_v32, %v7026_v35  ;;  %v17946_v35 = vld [vmem:[%s19188_s18 + $0x1370] ss:$460 sps:$4 sm:$0xff]   ;;  %v17961_v27 = vld [vmem:[%s19188_s18 + $0x1398] ss:$460 sps:$4 sm:$0xff]  }
 0x30d   : > { %v6711_v8 = vmax.bf16 %v6710_v3, %v6598_v62  ;;  %v6873_v48 = vmax.bf16 %v18045_v39, %v6872_v42  ;;  %v7184_v58 = vmax.bf16 %v18161_v49, %v7183_v52  ;;  %v17937_v62 = vld [vmem:[%s19188_s18 + $0x1358] ss:$460 sps:$4 sm:$0xff]   ;;  %v18166_v3 = vld [vmem:[%s19188_s18 + $0x1954] ss:$460 sps:$4 sm:$0xff]   ;;  %v18060_v36 = vld [vmem:[%s19188_s18 + $0xf3c] ss:$460 sps:$4 sm:$0xff]  }
 0x30e   : > { %v7028_v47 = vmax.bf16 %v17931_v38, %v7027_v41  ;;  %v17948_v41 = vld [vmem:[%s19188_s18 + $0x1374] ss:$460 sps:$4 sm:$0xff]   ;;  %v17951_v49 = vld [vmem:[%s19188_s18 + $0x137c] ss:$460 sps:$4 sm:$0xff]  }
 0x30f   : > { %6712 = vmax.xlane.bf16.xlu0 %v6711_v8  ;;  %v6874_v54 = vmax.bf16 %v18046_v45, %v6873_v48  ;;  %v7185_v0 = vmax.bf16 %v18163_v55, %v7184_v58  ;;  %v18061_v42 = vld [vmem:[%s19188_s18 + $0xf40] ss:$460 sps:$4 sm:$0xff]   ;;  %v17949_v45 = vld [vmem:[%s19188_s18 + $0x1378] ss:$460 sps:$4 sm:$0xff]   ;;  %v18176_v48 = vld [vmem:[%s19188_s18 + $0x1970] ss:$460 sps:$4 sm:$0xff]  }
 0x310   : > { %v7029_v53 = vmax.bf16 %v17933_v44, %v7028_v47  ;;  %v18063_v47 = vld [vmem:[%s19188_s18 + $0xf44] ss:$460 sps:$4 sm:$0xff]   ;;  %v18178_v52 = vld [vmem:[%s19188_s18 + $0x1974] ss:$460 sps:$4 sm:$0xff]  }
 0x311   : > { %v6875_v60 = vmax.bf16 %v18048_v51, %v6874_v54  ;;  %v7186_v6 = vmax.bf16 %v18164_v61, %v7185_v0  ;;  %v17952_v55 = vld [vmem:[%s19188_s18 + $0x1380] ss:$460 sps:$4 sm:$0xff]   ;;  %v18179_v58 = vld [vmem:[%s19188_s18 + $0x1978] ss:$460 sps:$4 sm:$0xff]   ;;  %v18181_v0 = vld [vmem:[%s19188_s18 + $0x197c] ss:$460 sps:$4 sm:$0xff]  }
 0x312   : > { %v7030_v59 = vmax.bf16 %v17934_v50, %v7029_v53  ;;  %v18064_v50 = vld [vmem:[%s19188_s18 + $0xf48] ss:$460 sps:$4 sm:$0xff]   ;;  %v17954_v61 = vld [vmem:[%s19188_s18 + $0x1384] ss:$460 sps:$4 sm:$0xff]  }
 0x313   : > { %v6876_v2 = vmax.bf16 %v18049_v57, %v6875_v60  ;;  %v7187_v12 = vmax.bf16 %v18166_v3, %v7186_v6  ;;  %v17955_v3 = vld [vmem:[%s19188_s18 + $0x1388] ss:$460 sps:$4 sm:$0xff]   ;;  %v18182_v6 = vld [vmem:[%s19188_s18 + $0x1980] ss:$460 sps:$4 sm:$0xff]  }
 0x314   : > { %v7031_v1 = vmax.bf16 %v17936_v56, %v7030_v59  ;;  %v18066_v56 = vld [vmem:[%s19188_s18 + $0xf4c] ss:$460 sps:$4 sm:$0xff]  }
 0x315   : > { %v6877_v8 = vmax.bf16 %v18051_v63, %v6876_v2  ;;  %v7188_v18 = vmax.bf16 %v18167_v9, %v7187_v12  ;;  %v17957_v9 = vld [vmem:[%s19188_s18 + $0x138c] ss:$460 sps:$4 sm:$0xff]   ;;  %v18184_v12 = vld [vmem:[%s19188_s18 + $0x1984] ss:$460 sps:$4 sm:$0xff]  }
 0x316   : > { %v7032_v7 = vmax.bf16 %v17937_v62, %v7031_v1  ;;  %v18067_v62 = vld [vmem:[%s19188_s18 + $0xf50] ss:$460 sps:$4 sm:$0xff]  }
 0x317   : > { %v6878_v14 = vmax.bf16 %v18052_v5, %v6877_v8  ;;  %v7189_v24 = vmax.bf16 %v18169_v15, %v7188_v18  ;;  %v17958_v15 = vld [vmem:[%s19188_s18 + $0x1390] ss:$460 sps:$4 sm:$0xff]   ;;  %v18185_v18 = vld [vmem:[%s19188_s18 + $0x1988] ss:$460 sps:$4 sm:$0xff]  }
 0x318   : > { %v7033_v13 = vmax.bf16 %v17939_v4, %v7032_v7  ;;  %v18069_v4 = vld [vmem:[%s19188_s18 + $0xf54] ss:$460 sps:$4 sm:$0xff]  }
 0x319   : > { %v6879_v20 = vmax.bf16 %v18054_v11, %v6878_v14  ;;  %v7190_v31 = vmax.bf16 %v18170_v21, %v7189_v24  ;;  %v17960_v21 = vld [vmem:[%s19188_s18 + $0x1394] ss:$460 sps:$4 sm:$0xff]   ;;  %v18187_v24 = vld [vmem:[%s19188_s18 + $0x198c] ss:$460 sps:$4 sm:$0xff]  }
 0x31a   : > { %v7034_v19 = vmax.bf16 %v17940_v10, %v7033_v13  ;;  %v18070_v10 = vld [vmem:[%s19188_s18 + $0xf58] ss:$460 sps:$4 sm:$0xff]  }
 0x31b   : > { %v6880_v26 = vmax.bf16 %v18055_v17, %v6879_v20  ;;  %v7191_v37 = vmax.bf16 %v18172_v28, %v7190_v31  ;;  %v18075_v28 = vld [vmem:[%s19188_s18 + $0xf64] ss:$460 sps:$4 sm:$0xff]  }
 0x31c   : > { %v7035_v25 = vmax.bf16 %v17942_v16, %v7034_v19  ;;  %v18072_v16 = vld [vmem:[%s19188_s18 + $0xf5c] ss:$460 sps:$4 sm:$0xff]  }
 0x31d   : > { %v6881_v33 = vmax.bf16 %v18057_v23, %v6880_v26  ;;  %v7192_v43 = vmax.bf16 %v18173_v34, %v7191_v37  ;;  %v18076_v34 = vld [vmem:[%s19188_s18 + $0xf68] ss:$460 sps:$4 sm:$0xff]  }
 0x31e   : > { %v7036_v32 = vmax.bf16 %v17943_v22, %v7035_v25  ;;  %v18073_v22 = vld [vmem:[%s19188_s18 + $0xf60] ss:$460 sps:$4 sm:$0xff]  }
 0x31f   : > { %v6882_v39 = vmax.bf16 %v18058_v30, %v6881_v33  ;;  %v7193_v51 = vmax.bf16 %v18175_v40, %v7192_v43  ;;  %v18188_v30 = vld [vmem:[%s19188_s18 + $0x1990] ss:$460 sps:$4 sm:$0xff]   ;;  %v18078_v40 = vld [vmem:[%s19188_s18 + $0xf6c] ss:$460 sps:$4 sm:$0xff]  }
 0x320   : > { %v7037_v38 = vmax.bf16 %v17945_v29, %v7036_v32  ;;  %v17963_v33 = vld [vmem:[%s19188_s18 + $0x139c] ss:$460 sps:$4 sm:$0xff]  }
 0x321   : > { %v6883_v46 = vmax.bf16 %v18060_v36, %v6882_v39  ;;  %v7194_v57 = vmax.bf16 %v18176_v48, %v7193_v51  ;;  %v18190_v36 = vld [vmem:[%s19188_s18 + $0x1994] ss:$460 sps:$4 sm:$0xff]   ;;  %v18193_v48 = vld [vmem:[%s19188_s18 + $0x199c] ss:$460 sps:$4 sm:$0xff]  }
 0x322   : > { %v7038_v44 = vmax.bf16 %v17946_v35, %v7037_v38  ;;  %v17964_v39 = vld [vmem:[%s19188_s18 + $0x13a0] ss:$460 sps:$4 sm:$0xff]   ;;  %v17967_v51 = vld [vmem:[%s19188_s18 + $0x13a8] ss:$460 sps:$4 sm:$0xff]  }
 0x323   : > { %v6884_v54 = vmax.bf16 %v18061_v42, %v6883_v46  ;;  %v7195_v63 = vmax.bf16 %v18178_v52, %v7194_v57  ;;  %v18191_v42 = vld [vmem:[%s19188_s18 + $0x1998] ss:$460 sps:$4 sm:$0xff]   ;;  %v18079_v46 = vld [vmem:[%s19188_s18 + $0xf70] ss:$460 sps:$4 sm:$0xff]   ;;  %v18081_v52 = vld [vmem:[%s19188_s18 + $0xf74] ss:$460 sps:$4 sm:$0xff]  }
 0x324   : > { %v7039_v53 = vmax.bf16 %v17948_v41, %v7038_v44  ;;  %v17969_v57 = vld [vmem:[%s19188_s18 + $0x13ac] ss:$460 sps:$4 sm:$0xff]  }
 0x325   : > { %v6885_v60 = vmax.bf16 %v18063_v47, %v6884_v54  ;;  %v7196_v5 = vmax.bf16 %v18179_v58, %v7195_v63  ;;  %v18194_v54 = vld [vmem:[%s19188_s18 + $0x19a0] ss:$460 sps:$4 sm:$0xff]   ;;  %v18082_v58 = vld [vmem:[%s19188_s18 + $0xf78] ss:$460 sps:$4 sm:$0xff]   ;;  %v17970_v63 = vld [vmem:[%s19188_s18 + $0x13b0] ss:$460 sps:$4 sm:$0xff]  }
 0x326   : > { %v7040_v59 = vmax.bf16 %v17949_v45, %v7039_v53  ;;  %v17966_v45 = vld [vmem:[%s19188_s18 + $0x13a4] ss:$460 sps:$4 sm:$0xff]  }
 0x327   : > { %v6886_v2 = vmax.bf16 %v18064_v50, %v6885_v60  ;;  %v7197_v11 = vmax.bf16 %v18181_v0, %v7196_v5  ;;  %v18196_v60 = vld [vmem:[%s19188_s18 + $0x19a4] ss:$460 sps:$4 sm:$0xff]   ;;  %v18084_v0 = vld [vmem:[%s19188_s18 + $0xf7c] ss:$460 sps:$4 sm:$0xff]   ;;  %v17972_v5 = vld [vmem:[%s19188_s18 + $0x13b4] ss:$460 sps:$4 sm:$0xff]  }
 0x328   : > { %v7041_v1 = vmax.bf16 %v17951_v49, %v7040_v59 }
 0x329   : > { %v6887_v8 = vmax.bf16 %v18066_v56, %v6886_v2  ;;  %v7198_v17 = vmax.bf16 %v18182_v6, %v7197_v11  ;;  %v18197_v2 = vld [vmem:[%s19188_s18 + $0x19a8] ss:$460 sps:$4 sm:$0xff]   ;;  %v18085_v6 = vld [vmem:[%s19188_s18 + $0xf80] ss:$460 sps:$4 sm:$0xff]   ;;  %v17973_v11 = vld [vmem:[%s19188_s18 + $0x13b8] ss:$460 sps:$4 sm:$0xff]  }
 0x32a   : > { %v7042_v7 = vmax.bf16 %v17952_v55, %v7041_v1 }
 0x32b   : > { %v6888_v14 = vmax.bf16 %v18067_v62, %v6887_v8  ;;  %v7199_v23 = vmax.bf16 %v18184_v12, %v7198_v17  ;;  %v18199_v8 = vld [vmem:[%s19188_s18 + $0x19ac] ss:$460 sps:$4 sm:$0xff]   ;;  %v18087_v12 = vld [vmem:[%s19188_s18 + $0xf84] ss:$460 sps:$4 sm:$0xff]  }
 0x32c   : > { %v7043_v13 = vmax.bf16 %v17954_v61, %v7042_v7 }
 0x32d   : > { %v6889_v20 = vmax.bf16 %v18069_v4, %v6888_v14  ;;  %v7200_v29 = vmax.bf16 %v18185_v18, %v7199_v23  ;;  %v18200_v14 = vld [vmem:[%s19188_s18 + $0x19b0] ss:$460 sps:$4 sm:$0xff]  }
 0x32e   : > { %v7044_v19 = vmax.bf16 %v17955_v3, %v7043_v13 }
 0x32f   : > { %v6890_v26 = vmax.bf16 %v18070_v10, %v6889_v20  ;;  %v7201_v35 = vmax.bf16 %v18187_v24, %v7200_v29  ;;  %v18088_v20 = vld [vmem:[%s19188_s18 + $0xf88] ss:$460 sps:$4 sm:$0xff]  }
 0x330   : > { %v7045_v25 = vmax.bf16 %v17957_v9, %v7044_v19  ;;  %v17975_v19 = vld [vmem:[%s19188_s18 + $0x13bc] ss:$460 sps:$4 sm:$0xff]  }
 0x331   : > { %v6891_v32 = vmax.bf16 %v18072_v16, %v6890_v26  ;;  %v7202_v41 = vmax.bf16 %v18188_v30, %v7201_v35  ;;  %v17807_v16 = vld [vmem:[%s19188_s18 + $0x11fc] ss:$460 sps:$4 sm:$0xff]   ;;  %v18090_v26 = vld [vmem:[%s19188_s18 + $0xf8c] ss:$460 sps:$4 sm:$0xff]  }
 0x332   : > { %v7046_v31 = vmax.bf16 %v17958_v15, %v7045_v25  ;;  %v17805_v15 = vld [vmem:[%s19188_s18 + $0x11f8] ss:$460 sps:$4 sm:$0xff]   ;;  %v17976_v25 = vld [vmem:[%s19188_s18 + $0x13c0] ss:$460 sps:$4 sm:$0xff]  }
 0x333   : > { %v6892_v38 = vmax.bf16 %v18073_v22, %v6891_v32  ;;  %v7203_v47 = vmax.bf16 %v18190_v36, %v7202_v41  ;;  %v18202_v22 = vld [vmem:[%s19188_s18 + $0x19b4] ss:$460 sps:$4 sm:$0xff]   ;;  %v6946_v35 = vmax.bf16 %v17807_v16, %v17805_v15  ;;  %v18332_v16 = vld [vmem:[%s19188_s18 + $0x15ac] ss:$460 sps:$4 sm:$0xff]  }
 0x334   : > { %v7047_v37 = vmax.bf16 %v17960_v21, %v7046_v31  ;;  %v18091_v31 = vld [vmem:[%s19188_s18 + $0xf90] ss:$460 sps:$4 sm:$0xff]  }
 0x335   : > { %v6893_v44 = vmax.bf16 %v18075_v28, %v6892_v38  ;;  %v7204_v53 = vmax.bf16 %v18191_v42, %v7203_v47  ;;  %v18203_v28 = vld [vmem:[%s19188_s18 + $0x19b8] ss:$460 sps:$4 sm:$0xff]   ;;  %v18096_v47 = vld [vmem:[%s19188_s18 + $0xf9c] ss:$460 sps:$4 sm:$0xff]  }
 0x336   : > { %v7048_v43 = vmax.bf16 %v17961_v27, %v7047_v37  ;;  %v18093_v37 = vld [vmem:[%s19188_s18 + $0xf94] ss:$460 sps:$4 sm:$0xff]   ;;  %v18094_v42 = vld [vmem:[%s19188_s18 + $0xf98] ss:$460 sps:$4 sm:$0xff]  }
 0x337   : > { %v6894_v50 = vmax.bf16 %v18076_v34, %v6893_v44  ;;  %v7205_v59 = vmax.bf16 %v18193_v48, %v7204_v53  ;;  %v18208_v44 = vld [vmem:[%s19188_s18 + $0x19c4] ss:$460 sps:$4 sm:$0xff]  }
 0x338   : > { %v7049_v49 = vmax.bf16 %v17963_v33, %v7048_v43  ;;  %v18205_v33 = vld [vmem:[%s19188_s18 + $0x19bc] ss:$460 sps:$4 sm:$0xff]  }
 0x339   : > { %v6895_v56 = vmax.bf16 %v18078_v40, %v6894_v50  ;;  %v7206_v1 = vmax.bf16 %v18194_v54, %v7205_v59  ;;  %v18097_v54 = vld [vmem:[%s19188_s18 + $0xfa0] ss:$460 sps:$4 sm:$0xff]   ;;  %v18326_v59 = vld [vmem:[%s19188_s18 + $0x159c] ss:$460 sps:$4 sm:$0xff]  }
 0x33a   : > { %v7050_v55 = vmax.bf16 %v17964_v39, %v7049_v49  ;;  %v18206_v39 = vld [vmem:[%s19188_s18 + $0x19c0] ss:$460 sps:$4 sm:$0xff]   ;;  %v18209_v49 = vld [vmem:[%s19188_s18 + $0x19c8] ss:$460 sps:$4 sm:$0xff]  }
 0x33b   : > { %v6896_v62 = vmax.bf16 %v18079_v46, %v6895_v56  ;;  %v7207_v7 = vmax.bf16 %v18196_v60, %v7206_v1  ;;  %v18099_v60 = vld [vmem:[%s19188_s18 + $0xfa4] ss:$460 sps:$4 sm:$0xff]  }
 0x33c   : > { %v7051_v61 = vmax.bf16 %v17966_v45, %v7050_v55 }
 0x33d   : > { %v6897_v4 = vmax.bf16 %v18081_v52, %v6896_v62  ;;  %v7208_v13 = vmax.bf16 %v18197_v2, %v7207_v7  ;;  %v18211_v52 = vld [vmem:[%s19188_s18 + $0x19cc] ss:$460 sps:$4 sm:$0xff]   ;;  %v18100_v2 = vld [vmem:[%s19188_s18 + $0xfa8] ss:$460 sps:$4 sm:$0xff]  }
 0x33e   : > { %v7052_v3 = vmax.bf16 %v17967_v51, %v7051_v61  ;;  %v18327_v62 = vld [vmem:[%s19188_s18 + $0x15a0] ss:$460 sps:$4 sm:$0xff]  }
 0x33f   : > { %v6898_v10 = vmax.bf16 %v18082_v58, %v6897_v4  ;;  %v7209_v21 = vmax.bf16 %v18199_v8, %v7208_v13  ;;  %v18324_v58 = vld [vmem:[%s19188_s18 + $0x1598] ss:$460 sps:$4 sm:$0xff]  }
 0x340   : > { %v7053_v9 = vmax.bf16 %v17969_v57, %v7052_v3  ;;  %v18212_v57 = vld [vmem:[%s19188_s18 + $0x19d0] ss:$460 sps:$4 sm:$0xff]   ;;  %v7063_v1 = vmax.bf16 %v18326_v59, %v18324_v58  ;;  %v18102_v8 = vld [vmem:[%s19188_s18 + $0xfac] ss:$460 sps:$4 sm:$0xff]   ;;  %v18342_v58 = vld [vmem:[%s19188_s18 + $0x15c8] ss:$460 sps:$4 sm:$0xff]  }
 0x341   : > { %v6899_v18 = vmax.bf16 %v18084_v0, %v6898_v10  ;;  %v7210_v27 = vmax.bf16 %v18200_v14, %v7209_v21  ;;  %v18214_v0 = vld [vmem:[%s19188_s18 + $0x19d4] ss:$460 sps:$4 sm:$0xff]   ;;  %v18329_v4 = vld [vmem:[%s19188_s18 + $0x15a4] ss:$460 sps:$4 sm:$0xff]  }
 0x342   : > { %v7054_v17 = vmax.bf16 %v17970_v63, %v7053_v9  ;;  %v7064_v7 = vmax.bf16 %v18327_v62, %v7063_v1  ;;  %v18330_v10 = vld [vmem:[%s19188_s18 + $0x15a8] ss:$460 sps:$4 sm:$0xff]   ;;  %v18103_v14 = vld [vmem:[%s19188_s18 + $0xfb0] ss:$460 sps:$4 sm:$0xff]  }
 0x343   : > { %v6900_v24 = vmax.bf16 %v18085_v6, %v6899_v18  ;;  %v7211_v32 = vmax.bf16 %v18202_v22, %v7210_v27  ;;  %v18215_v6 = vld [vmem:[%s19188_s18 + $0x19d8] ss:$460 sps:$4 sm:$0xff]   ;;  %v18218_v18 = vld [vmem:[%s19188_s18 + $0x19e0] ss:$460 sps:$4 sm:$0xff]   ;;  %v18333_v22 = vld [vmem:[%s19188_s18 + $0x15b0] ss:$460 sps:$4 sm:$0xff]  }
 0x344   : > { %v7055_v23 = vmax.bf16 %v17972_v5, %v7054_v17  ;;  %v7065_v13 = vmax.bf16 %v18329_v4, %v7064_v7  ;;  %v18115_v62 = vld [vmem:[%s19188_s18 + $0xfd0] ss:$460 sps:$4 sm:$0xff]   ;;  %v18117_v4 = vld [vmem:[%s19188_s18 + $0xfd4] ss:$460 sps:$4 sm:$0xff]  }
 0x345   : > { %v6901_v30 = vmax.bf16 %v18087_v12, %v6900_v24  ;;  %v7212_v38 = vmax.bf16 %v18203_v28, %v7211_v32  ;;  %v18217_v12 = vld [vmem:[%s19188_s18 + $0x19dc] ss:$460 sps:$4 sm:$0xff]   ;;  %v18220_v24 = vld [vmem:[%s19188_s18 + $0x19e4] ss:$460 sps:$4 sm:$0xff]   ;;  %v18335_v28 = vld [vmem:[%s19188_s18 + $0x15b4] ss:$460 sps:$4 sm:$0xff]  }
 0x346   : > { %v7056_v29 = vmax.bf16 %v17973_v11, %v7055_v23  ;;  %v18108_v32 = vld [vmem:[%s19188_s18 + $0xfbc] ss:$460 sps:$4 sm:$0xff]  }
 0x347   : > { %v6902_v36 = vmax.bf16 %v18088_v20, %v6901_v30  ;;  %v7213_v43 = vmax.bf16 %v18205_v33, %v7212_v38  ;;  %v18105_v20 = vld [vmem:[%s19188_s18 + $0xfb4] ss:$460 sps:$4 sm:$0xff]  }
 0x348   : > { %v7057_v34 = vmax.bf16 %v17975_v19, %v7056_v29  ;;  %v7066_v19 = vmax.bf16 %v18330_v10, %v7065_v13  ;;  %v18221_v30 = vld [vmem:[%s19188_s18 + $0x19e8] ss:$460 sps:$4 sm:$0xff]   ;;  %v18109_v38 = vld [vmem:[%s19188_s18 + $0xfc0] ss:$460 sps:$4 sm:$0xff]   ;;  %v18118_v10 = vld [vmem:[%s19188_s18 + $0xfd8] ss:$460 sps:$4 sm:$0xff]  }
 0x349   : > { %v6903_v41 = vmax.bf16 %v18090_v26, %v6902_v36  ;;  %v7214_v48 = vmax.bf16 %v18206_v39, %v7213_v43  ;;  %v18106_v26 = vld [vmem:[%s19188_s18 + $0xfb8] ss:$460 sps:$4 sm:$0xff]  }
 0x34a   : > { %v7058_v40 = vmax.bf16 %v17976_v25, %v7057_v34  ;;  %v7067_v25 = vmax.bf16 %v18332_v16, %v7066_v19  ;;  %v18336_v34 = vld [vmem:[%s19188_s18 + $0x15b8] ss:$460 sps:$4 sm:$0xff]   ;;  %v18120_v16 = vld [vmem:[%s19188_s18 + $0xfdc] ss:$460 sps:$4 sm:$0xff]  }
 0x34b   : > { %v6904_v46 = vmax.bf16 %v18091_v31, %v6903_v41  ;;  %v7215_v51 = vmax.bf16 %v18208_v44, %v7214_v48  ;;  %v18223_v36 = vld [vmem:[%s19188_s18 + $0x19ec] ss:$460 sps:$4 sm:$0xff]   ;;  %v18111_v44 = vld [vmem:[%s19188_s18 + $0xfc4] ss:$460 sps:$4 sm:$0xff]   ;;  %v18226_v48 = vld [vmem:[%s19188_s18 + $0x19f4] ss:$460 sps:$4 sm:$0xff]  }
 0x34c   : > { %v7059_v45 = vmax.bf16 %v7058_v40, %v6946_v35  ;;  %v7068_v31 = vmax.bf16 %v18333_v22, %v7067_v25  ;;  %v18338_v40 = vld [vmem:[%s19188_s18 + $0x15bc] ss:$460 sps:$4 sm:$0xff]   ;;  %v18121_v22 = vld [vmem:[%s19188_s18 + $0xfe0] ss:$460 sps:$4 sm:$0xff]  }
 0x34d   : > { %v6905_v50 = vmax.bf16 %v18093_v37, %v6904_v46  ;;  %v7216_v55 = vmax.bf16 %v18209_v49, %v7215_v51  ;;  %v18339_v46 = vld [vmem:[%s19188_s18 + $0x15c0] ss:$460 sps:$4 sm:$0xff]  }
 0x34e   : > { %7060 = vmax.xlane.bf16.xlu1 %v7059_v45  ;;  %v7069_v37 = vmax.bf16 %v18335_v28, %v7068_v31  ;;  %v18123_v28 = vld [vmem:[%s19188_s18 + $0xfe4] ss:$460 sps:$4 sm:$0xff]  }
 0x34f   : > { %v6906_v53 = vmax.bf16 %v18094_v42, %v6905_v50  ;;  %v7217_v61 = vmax.bf16 %v18211_v52, %v7216_v55  ;;  %v18224_v42 = vld [vmem:[%s19188_s18 + $0x19f0] ss:$460 sps:$4 sm:$0xff]   ;;  %v18112_v50 = vld [vmem:[%s19188_s18 + $0xfc8] ss:$460 sps:$4 sm:$0xff]  }
 0x350   : > { %v7070_v43 = vmax.bf16 %v18336_v34, %v7069_v37  ;;  %v18341_v52 = vld [vmem:[%s19188_s18 + $0x15c4] ss:$460 sps:$4 sm:$0xff]   ;;  %v18124_v34 = vld [vmem:[%s19188_s18 + $0xfe8] ss:$460 sps:$4 sm:$0xff]  }
 0x351   : > { %v6907_v56 = vmax.bf16 %v18096_v47, %v6906_v53  ;;  %v7218_v3 = vmax.bf16 %v18212_v57, %v7217_v61 }
 0x352   : > { %v7071_v49 = vmax.bf16 %v18338_v40, %v7070_v43  ;;  %v18126_v40 = vld [vmem:[%s19188_s18 + $0xfec] ss:$460 sps:$4 sm:$0xff]  }
 0x353   : > { %v6908_v63 = vmax.bf16 %v18097_v54, %v6907_v56  ;;  %v7219_v9 = vmax.bf16 %v18214_v0, %v7218_v3  ;;  %v18227_v54 = vld [vmem:[%s19188_s18 + $0x19f8] ss:$460 sps:$4 sm:$0xff]  }
 0x354   : > { %v7072_v55 = vmax.bf16 %v18339_v46, %v7071_v49  ;;  %v18114_v56 = vld [vmem:[%s19188_s18 + $0xfcc] ss:$460 sps:$4 sm:$0xff]   ;;  %v18127_v46 = vld [vmem:[%s19188_s18 + $0xff0] ss:$460 sps:$4 sm:$0xff]  }
 0x355   : > { %v6909_v5 = vmax.bf16 %v18099_v60, %v6908_v63  ;;  %v7220_v15 = vmax.bf16 %v18215_v6, %v7219_v9  ;;  %v18229_v60 = vld [vmem:[%s19188_s18 + $0x19fc] ss:$460 sps:$4 sm:$0xff]   ;;  %v18344_v0 = vld [vmem:[%s19188_s18 + $0x15cc] ss:$460 sps:$4 sm:$0xff]  }
 0x356   : > { %v7073_v61 = vmax.bf16 %v18341_v52, %v7072_v55  ;;  %v18345_v6 = vld [vmem:[%s19188_s18 + $0x15d0] ss:$460 sps:$4 sm:$0xff]   ;;  %v18129_v52 = vld [vmem:[%s19188_s18 + $0xff4] ss:$460 sps:$4 sm:$0xff]  }
 0x357   : > { %v6910_v11 = vmax.bf16 %v18100_v2, %v6909_v5  ;;  %v7221_v21 = vmax.bf16 %v18217_v12, %v7220_v15  ;;  %v18230_v2 = vld [vmem:[%s19188_s18 + $0x1a00] ss:$460 sps:$4 sm:$0xff]  }
 0x358   : > { %v7074_v3 = vmax.bf16 %v18342_v58, %v7073_v61  ;;  %v18347_v12 = vld [vmem:[%s19188_s18 + $0x15d4] ss:$460 sps:$4 sm:$0xff]   ;;  %v18130_v58 = vld [vmem:[%s19188_s18 + $0xff8] ss:$460 sps:$4 sm:$0xff]  }
 0x359   : > { %v6911_v17 = vmax.bf16 %v18102_v8, %v6910_v11  ;;  %v7222_v27 = vmax.bf16 %v18218_v18, %v7221_v21  ;;  %v18232_v8 = vld [vmem:[%s19188_s18 + $0x1a04] ss:$460 sps:$4 sm:$0xff]  }
 0x35a   : > { %v7075_v9 = vmax.bf16 %v18344_v0, %v7074_v3  ;;  %v18348_v18 = vld [vmem:[%s19188_s18 + $0x15d8] ss:$460 sps:$4 sm:$0xff]   ;;  %v18132_v0 = vld [vmem:[%s19188_s18 + $0xffc] ss:$460 sps:$4 sm:$0xff]  }
 0x35b   : > { %v6912_v23 = vmax.bf16 %v18103_v14, %v6911_v17  ;;  %v7223_v33 = vmax.bf16 %v18220_v24, %v7222_v27  ;;  %v18233_v14 = vld [vmem:[%s19188_s18 + $0x1a08] ss:$460 sps:$4 sm:$0xff]  }
 0x35c   : > { %v7076_v15 = vmax.bf16 %v18345_v6, %v7075_v9  ;;  %v18350_v24 = vld [vmem:[%s19188_s18 + $0x15dc] ss:$460 sps:$4 sm:$0xff]   ;;  %v18133_v6 = vld [vmem:[%s19188_s18 + $0x1000] ss:$460 sps:$4 sm:$0xff]  }
 0x35d   : > { %v6913_v29 = vmax.bf16 %v18105_v20, %v6912_v23  ;;  %v7224_v39 = vmax.bf16 %v18221_v30, %v7223_v33  ;;  %v18235_v20 = vld [vmem:[%s19188_s18 + $0x1a0c] ss:$460 sps:$4 sm:$0xff]  }
 0x35e   : > { %v7077_v21 = vmax.bf16 %v18347_v12, %v7076_v15  ;;  %v18351_v30 = vld [vmem:[%s19188_s18 + $0x15e0] ss:$460 sps:$4 sm:$0xff]   ;;  %v18135_v12 = vld [vmem:[%s19188_s18 + $0x1004] ss:$460 sps:$4 sm:$0xff]  }
 0x35f   : > { %v6914_v35 = vmax.bf16 %v18106_v26, %v6913_v29  ;;  %v7225_v45 = vmax.bf16 %v18223_v36, %v7224_v39  ;;  %v18236_v26 = vld [vmem:[%s19188_s18 + $0x1a10] ss:$460 sps:$4 sm:$0xff]  }
 0x360   : > { %v7078_v27 = vmax.bf16 %v18348_v18, %v7077_v21  ;;  %v18353_v36 = vld [vmem:[%s19188_s18 + $0x15e4] ss:$460 sps:$4 sm:$0xff]   ;;  %v18136_v18 = vld [vmem:[%s19188_s18 + $0x1008] ss:$460 sps:$4 sm:$0xff]  }
 0x361   : > { %v6915_v41 = vmax.bf16 %v18108_v32, %v6914_v35  ;;  %v7226_v51 = vmax.bf16 %v18224_v42, %v7225_v45  ;;  %v18238_v32 = vld [vmem:[%s19188_s18 + $0x1a14] ss:$460 sps:$4 sm:$0xff]  }
 0x362   : > { %v7079_v33 = vmax.bf16 %v18350_v24, %v7078_v27  ;;  %v18354_v42 = vld [vmem:[%s19188_s18 + $0x15e8] ss:$460 sps:$4 sm:$0xff]   ;;  %v18138_v24 = vld [vmem:[%s19188_s18 + $0x100c] ss:$460 sps:$4 sm:$0xff]  }
 0x363   : > { %v6916_v47 = vmax.bf16 %v18109_v38, %v6915_v41  ;;  %v7227_v57 = vmax.bf16 %v18226_v48, %v7226_v51  ;;  %v18239_v38 = vld [vmem:[%s19188_s18 + $0x1a18] ss:$460 sps:$4 sm:$0xff]  }
 0x364   : > { %v7080_v39 = vmax.bf16 %v18351_v30, %v7079_v33  ;;  %v18356_v48 = vld [vmem:[%s19188_s18 + $0x15ec] ss:$460 sps:$4 sm:$0xff]   ;;  %v18139_v30 = vld [vmem:[%s19188_s18 + $0x1010] ss:$460 sps:$4 sm:$0xff]  }
 0x365   : > { %v6917_v53 = vmax.bf16 %v18111_v44, %v6916_v47  ;;  %v7228_v63 = vmax.bf16 %v18227_v54, %v7227_v57  ;;  %v18241_v44 = vld [vmem:[%s19188_s18 + $0x1a1c] ss:$460 sps:$4 sm:$0xff]  }
 0x366   : > { %v7081_v45 = vmax.bf16 %v18353_v36, %v7080_v39  ;;  %v18357_v54 = vld [vmem:[%s19188_s18 + $0x15f0] ss:$460 sps:$4 sm:$0xff]   ;;  %v18141_v36 = vld [vmem:[%s19188_s18 + $0x1014] ss:$460 sps:$4 sm:$0xff]  }
 0x367   : > { %v6918_v59 = vmax.bf16 %v18112_v50, %v6917_v53  ;;  %v7229_v5 = vmax.bf16 %v18229_v60, %v7228_v63  ;;  %v18242_v50 = vld [vmem:[%s19188_s18 + $0x1a20] ss:$460 sps:$4 sm:$0xff]  }
 0x368   : > { %v7082_v51 = vmax.bf16 %v18354_v42, %v7081_v45  ;;  %v18359_v60 = vld [vmem:[%s19188_s18 + $0x15f4] ss:$460 sps:$4 sm:$0xff]   ;;  %v18142_v42 = vld [vmem:[%s19188_s18 + $0x1018] ss:$460 sps:$4 sm:$0xff]  }
 0x369   : > { %v6919_v1 = vmax.bf16 %v18114_v56, %v6918_v59  ;;  %v7230_v11 = vmax.bf16 %v18230_v2, %v7229_v5  ;;  %v18244_v56 = vld [vmem:[%s19188_s18 + $0x1a24] ss:$460 sps:$4 sm:$0xff]  }
 0x36a   : > { %v7083_v57 = vmax.bf16 %v18356_v48, %v7082_v51  ;;  %v18360_v2 = vld [vmem:[%s19188_s18 + $0x15f8] ss:$460 sps:$4 sm:$0xff]   ;;  %v18144_v48 = vld [vmem:[%s19188_s18 + $0x101c] ss:$460 sps:$4 sm:$0xff]  }
 0x36b   : > { %v6920_v7 = vmax.bf16 %v18115_v62, %v6919_v1  ;;  %v7231_v17 = vmax.bf16 %v18232_v8, %v7230_v11  ;;  %v18245_v62 = vld [vmem:[%s19188_s18 + $0x1a28] ss:$460 sps:$4 sm:$0xff]  }
 0x36c   : > { %v7084_v63 = vmax.bf16 %v18357_v54, %v7083_v57  ;;  %v18362_v8 = vld [vmem:[%s19188_s18 + $0x15fc] ss:$460 sps:$4 sm:$0xff]   ;;  %v18145_v54 = vld [vmem:[%s19188_s18 + $0x1020] ss:$460 sps:$4 sm:$0xff]  }
 0x36d   : > { %v6921_v13 = vmax.bf16 %v18117_v4, %v6920_v7  ;;  %v7232_v23 = vmax.bf16 %v18233_v14, %v7231_v17  ;;  %v18247_v4 = vld [vmem:[%s19188_s18 + $0x1a2c] ss:$460 sps:$4 sm:$0xff]  }
 0x36e   : > { %v7085_v5 = vmax.bf16 %v18359_v60, %v7084_v63  ;;  %v18363_v14 = vld [vmem:[%s19188_s18 + $0x1600] ss:$460 sps:$4 sm:$0xff]   ;;  %v18260_v60 = vld [vmem:[%s19188_s18 + $0x1a50] ss:$460 sps:$4 sm:$0xff]  }
 0x36f   : > { %v6922_v19 = vmax.bf16 %v18118_v10, %v6921_v13  ;;  %v7233_v29 = vmax.bf16 %v18235_v20, %v7232_v23  ;;  %v18248_v10 = vld [vmem:[%s19188_s18 + $0x1a30] ss:$460 sps:$4 sm:$0xff]   ;;  %v17977_v57 = vld [vmem:[%s19188_s18 + $0xe60] ss:$460 sps:$4 sm:$0xff]  }
 0x370   : > { %v7086_v11 = vmax.bf16 %v18360_v2, %v7085_v5  ;;  %v18365_v20 = vld [vmem:[%s19188_s18 + $0x1604] ss:$460 sps:$4 sm:$0xff]   ;;  %v18262_v2 = vld [vmem:[%s19188_s18 + $0x1a54] ss:$460 sps:$4 sm:$0xff]  }
 0x371   : > { %v6923_v25 = vmax.bf16 %v18120_v16, %v6922_v19  ;;  %v7234_v35 = vmax.bf16 %v18236_v26, %v7233_v29  ;;  %v18250_v16 = vld [vmem:[%s19188_s18 + $0x1a34] ss:$460 sps:$4 sm:$0xff]  }
 0x372   : > { %v7087_v17 = vmax.bf16 %v18362_v8, %v7086_v11  ;;  %v18366_v26 = vld [vmem:[%s19188_s18 + $0x1608] ss:$460 sps:$4 sm:$0xff]  }
 0x373   : > { %v6924_v31 = vmax.bf16 %v18121_v22, %v6923_v25  ;;  %v7235_v41 = vmax.bf16 %v18238_v32, %v7234_v35  ;;  %v18251_v22 = vld [vmem:[%s19188_s18 + $0x1a38] ss:$460 sps:$4 sm:$0xff]  }
 0x374   : > { %v7088_v23 = vmax.bf16 %v18363_v14, %v7087_v17  ;;  %v18368_v32 = vld [vmem:[%s19188_s18 + $0x160c] ss:$460 sps:$4 sm:$0xff]   ;;  %v18265_v14 = vld [vmem:[%s19188_s18 + $0x1a5c] ss:$460 sps:$4 sm:$0xff]  }
 0x375   : > { %v6925_v37 = vmax.bf16 %v18123_v28, %v6924_v31  ;;  %v7236_v47 = vmax.bf16 %v18239_v38, %v7235_v41  ;;  %v18253_v28 = vld [vmem:[%s19188_s18 + $0x1a3c] ss:$460 sps:$4 sm:$0xff]   ;;  %v18380_v17 = vld [vmem:[%s19188_s18 + $0x162c] ss:$460 sps:$4 sm:$0xff]  }
 0x376   : > { %v7089_v29 = vmax.bf16 %v18365_v20, %v7088_v23  ;;  %v18369_v38 = vld [vmem:[%s19188_s18 + $0x1610] ss:$460 sps:$4 sm:$0xff]  }
 0x377   : > { %v6926_v43 = vmax.bf16 %v18124_v34, %v6925_v37  ;;  %v7237_v53 = vmax.bf16 %v18241_v44, %v7236_v47  ;;  %v18254_v34 = vld [vmem:[%s19188_s18 + $0x1a40] ss:$460 sps:$4 sm:$0xff]   ;;  %v18268_v23 = vld [vmem:[%s19188_s18 + $0x1a64] ss:$460 sps:$4 sm:$0xff]  }
 0x378   : > { %v7090_v35 = vmax.bf16 %v18366_v26, %v7089_v29  ;;  %v18371_v44 = vld [vmem:[%s19188_s18 + $0x1614] ss:$460 sps:$4 sm:$0xff]  }
 0x379   : > { %v6927_v49 = vmax.bf16 %v18126_v40, %v6926_v43  ;;  %v7238_v59 = vmax.bf16 %v18242_v50, %v7237_v53  ;;  %v18256_v40 = vld [vmem:[%s19188_s18 + $0x1a44] ss:$460 sps:$4 sm:$0xff]   ;;  %v18383_v26 = vld [vmem:[%s19188_s18 + $0x1634] ss:$460 sps:$4 sm:$0xff]  }
 0x37a   : > { %v7091_v41 = vmax.bf16 %v18368_v32, %v7090_v35  ;;  %v18372_v50 = vld [vmem:[%s19188_s18 + $0x1618] ss:$460 sps:$4 sm:$0xff]   ;;  %v18272_v35 = vld [vmem:[%s19188_s18 + $0x1a70] ss:$460 sps:$4 sm:$0xff]  }
 0x37b   : > { %v6928_v55 = vmax.bf16 %v18127_v46, %v6927_v49  ;;  %v7239_v1 = vmax.bf16 %v18244_v56, %v7238_v59  ;;  %v18257_v46 = vld [vmem:[%s19188_s18 + $0x1a48] ss:$460 sps:$4 sm:$0xff]  }
 0x37c   : > { %v7092_v47 = vmax.bf16 %v18369_v38, %v7091_v41  ;;  %v18374_v56 = vld [vmem:[%s19188_s18 + $0x161c] ss:$460 sps:$4 sm:$0xff]   ;;  %v18387_v38 = vld [vmem:[%s19188_s18 + $0x1640] ss:$460 sps:$4 sm:$0xff]  }
 0x37d   : > { %v6929_v61 = vmax.bf16 %v18129_v52, %v6928_v55  ;;  %v7240_v7 = vmax.bf16 %v18245_v62, %v7239_v1  ;;  %v18259_v52 = vld [vmem:[%s19188_s18 + $0x1a4c] ss:$460 sps:$4 sm:$0xff]   ;;  %v18147_v62 = vld [vmem:[%s19188_s18 + $0x1024] ss:$460 sps:$4 sm:$0xff]  }
 0x37e   : > { %v7093_v53 = vmax.bf16 %v18371_v44, %v7092_v47  ;;  %v18277_v47 = vld [vmem:[%s19188_s18 + $0x1a7c] ss:$460 sps:$4 sm:$0xff]  }
 0x37f   : > { %v6930_v3 = vmax.bf16 %v18130_v58, %v6929_v61  ;;  %v7241_v13 = vmax.bf16 %v18247_v4, %v7240_v7  ;;  %v17979_v58 = vld [vmem:[%s19188_s18 + $0xe64] ss:$460 sps:$4 sm:$0xff]   ;;  %v18148_v4 = vld [vmem:[%s19188_s18 + $0x1028] ss:$460 sps:$4 sm:$0xff]  }
 0x380   : > { %v7094_v61 = vmax.bf16 %v18372_v50, %v7093_v53  ;;  %v6830_v8 = vmax.bf16 %v17979_v58, %v17977_v57  ;;  %v18392_v50 = vld [vmem:[%s19188_s18 + $0x164c] ss:$460 sps:$4 sm:$0xff]   ;;  %v18395_v58 = vld [vmem:[%s19188_s18 + $0x1654] ss:$460 sps:$4 sm:$0xff]  }
 0x381   : > { %v6931_v9 = vmax.bf16 %v18132_v0, %v6930_v3  ;;  %v7242_v19 = vmax.bf16 %v18248_v10, %v7241_v13  ;;  %v18375_v0 = vld [vmem:[%s19188_s18 + $0x1620] ss:$460 sps:$4 sm:$0xff]  }
 0x382   : > { %v7095_v3 = vmax.bf16 %v18374_v56, %v7094_v61 }
 0x383   : > { %v6932_v15 = vmax.bf16 %v18133_v6, %v6931_v9  ;;  %v7243_v25 = vmax.bf16 %v18250_v16, %v7242_v19  ;;  %v18377_v6 = vld [vmem:[%s19188_s18 + $0x1624] ss:$460 sps:$4 sm:$0xff]   ;;  %v18266_v19 = vld [vmem:[%s19188_s18 + $0x1a60] ss:$460 sps:$4 sm:$0xff]  }
 0x384   : > { %v18263_v9 = vld [vmem:[%s19188_s18 + $0x1a58] ss:$460 sps:$4 sm:$0xff]   ;;  %v7096_v10 = vmax.bf16 %v18375_v0, %v7095_v3  ;;  %v18284_v3 = vld [vmem:[%s19188_s18 + $0x1a90] ss:$460 sps:$4 sm:$0xff]  }
 0x385   : > { %v6933_v21 = vmax.bf16 %v18135_v12, %v6932_v15  ;;  %v7244_v31 = vmax.bf16 %v18251_v22, %v7243_v25  ;;  %v18378_v12 = vld [vmem:[%s19188_s18 + $0x1628] ss:$460 sps:$4 sm:$0xff]   ;;  %v18381_v22 = vld [vmem:[%s19188_s18 + $0x1630] ss:$460 sps:$4 sm:$0xff]  }
 0x386   : > { %v7097_v15 = vmax.bf16 %v18377_v6, %v7096_v10  ;;  %v18399_v6 = vld [vmem:[%s19188_s18 + $0x1660] ss:$460 sps:$4 sm:$0xff]   ;;  %v18401_v10 = vld [vmem:[%s19188_s18 + $0x1664] ss:$460 sps:$4 sm:$0xff]  }
 0x387   : > { %v6934_v27 = vmax.bf16 %v18136_v18, %v6933_v21  ;;  %v7245_v37 = vmax.bf16 %v18253_v28, %v7244_v31  ;;  %v18271_v31 = vld [vmem:[%s19188_s18 + $0x1a6c] ss:$460 sps:$4 sm:$0xff]  }
 0x388   : > { %v7098_v20 = vmax.bf16 %v18378_v12, %v7097_v15  ;;  %v18402_v15 = vld [vmem:[%s19188_s18 + $0x1668] ss:$460 sps:$4 sm:$0xff]  }
 0x389   : > { %v6935_v33 = vmax.bf16 %v18138_v24, %v6934_v27  ;;  %v7246_v43 = vmax.bf16 %v18254_v34, %v7245_v37  ;;  %v18269_v27 = vld [vmem:[%s19188_s18 + $0x1a68] ss:$460 sps:$4 sm:$0xff]  }
 0x38a   : > { %v7099_v24 = vmax.bf16 %v18380_v17, %v7098_v20  ;;  %v18386_v34 = vld [vmem:[%s19188_s18 + $0x163c] ss:$460 sps:$4 sm:$0xff]   ;;  %v18290_v20 = vld [vmem:[%s19188_s18 + $0x1aa0] ss:$460 sps:$4 sm:$0xff]  }
 0x38b   : > { %v6936_v39 = vmax.bf16 %v18139_v30, %v6935_v33  ;;  %v7247_v49 = vmax.bf16 %v18256_v40, %v7246_v43  ;;  %v18384_v30 = vld [vmem:[%s19188_s18 + $0x1638] ss:$460 sps:$4 sm:$0xff]  }
 0x38c   : > { %v7100_v28 = vmax.bf16 %v18381_v22, %v7099_v24  ;;  %v18275_v43 = vld [vmem:[%s19188_s18 + $0x1a78] ss:$460 sps:$4 sm:$0xff]  }
 0x38d   : > { %v6937_v45 = vmax.bf16 %v18141_v36, %v6936_v39  ;;  %v7248_v55 = vmax.bf16 %v18257_v46, %v7247_v49  ;;  %v18274_v39 = vld [vmem:[%s19188_s18 + $0x1a74] ss:$460 sps:$4 sm:$0xff]   ;;  %v18292_v24 = vld [vmem:[%s19188_s18 + $0x1aa4] ss:$460 sps:$4 sm:$0xff]  }
 0x38e   : > { %v7101_v32 = vmax.bf16 %v18383_v26, %v7100_v28  ;;  %v18390_v46 = vld [vmem:[%s19188_s18 + $0x1648] ss:$460 sps:$4 sm:$0xff]  }
 0x38f   : > { %v6938_v51 = vmax.bf16 %v18142_v42, %v6937_v45  ;;  %v7249_v63 = vmax.bf16 %v18259_v52, %v7248_v55  ;;  %v18389_v42 = vld [vmem:[%s19188_s18 + $0x1644] ss:$460 sps:$4 sm:$0xff]   ;;  %v18293_v28 = vld [vmem:[%s19188_s18 + $0x1aa8] ss:$460 sps:$4 sm:$0xff]  }
 0x390   : > { %v7102_v36 = vmax.bf16 %v18384_v30, %v7101_v32  ;;  %v18280_v55 = vld [vmem:[%s19188_s18 + $0x1a84] ss:$460 sps:$4 sm:$0xff]  }
 0x391   : > { %v6939_v59 = vmax.bf16 %v18144_v48, %v6938_v51  ;;  %v7250_v5 = vmax.bf16 %v18260_v60, %v7249_v63  ;;  %v18278_v51 = vld [vmem:[%s19188_s18 + $0x1a80] ss:$460 sps:$4 sm:$0xff]   ;;  %v18408_v32 = vld [vmem:[%s19188_s18 + $0x1678] ss:$460 sps:$4 sm:$0xff]  }
 0x392   : > { %v7103_v40 = vmax.bf16 %v18386_v34, %v7102_v36  ;;  %v18283_v63 = vld [vmem:[%s19188_s18 + $0x1a8c] ss:$460 sps:$4 sm:$0xff]   ;;  %v18410_v36 = vld [vmem:[%s19188_s18 + $0x167c] ss:$460 sps:$4 sm:$0xff]  }
 0x393   : > { %v6940_v1 = vmax.bf16 %v18145_v54, %v6939_v59  ;;  %v7251_v11 = vmax.bf16 %v18262_v2, %v7250_v5  ;;  %v18393_v54 = vld [vmem:[%s19188_s18 + $0x1650] ss:$460 sps:$4 sm:$0xff]   ;;  %v18281_v59 = vld [vmem:[%s19188_s18 + $0x1a88] ss:$460 sps:$4 sm:$0xff]  }
 0x394   : > { %v7104_v44 = vmax.bf16 %v18387_v38, %v7103_v40  ;;  %v18398_v2 = vld [vmem:[%s19188_s18 + $0x165c] ss:$460 sps:$4 sm:$0xff]   ;;  %v18411_v40 = vld [vmem:[%s19188_s18 + $0x1680] ss:$460 sps:$4 sm:$0xff]  }
 0x395   : > { %v6941_v7 = vmax.bf16 %v18147_v62, %v6940_v1  ;;  %v7252_v16 = vmax.bf16 %v18263_v9, %v7251_v11  ;;  %v18396_v62 = vld [vmem:[%s19188_s18 + $0x1658] ss:$460 sps:$4 sm:$0xff]  }
 0x396   : > { %v7105_v48 = vmax.bf16 %v18389_v42, %v7104_v44  ;;  %v18287_v11 = vld [vmem:[%s19188_s18 + $0x1a98] ss:$460 sps:$4 sm:$0xff]  }
 0x397   : > { %v6942_v13 = vmax.bf16 %v18148_v4, %v6941_v7  ;;  %v7253_v21 = vmax.bf16 %v18265_v14, %v7252_v16  ;;  %v18286_v7 = vld [vmem:[%s19188_s18 + $0x1a94] ss:$460 sps:$4 sm:$0xff]   ;;  %v18289_v16 = vld [vmem:[%s19188_s18 + $0x1a9c] ss:$460 sps:$4 sm:$0xff]   ;;  %v18413_v44 = vld [vmem:[%s19188_s18 + $0x1684] ss:$460 sps:$4 sm:$0xff]  }
 0x398   : > { %v7106_v52 = vmax.bf16 %v18390_v46, %v7105_v48 }
 0x399   : > { %v6943_v18 = vmax.bf16 %v6942_v13, %v6830_v8  ;;  %v7254_v25 = vmax.bf16 %v18266_v19, %v7253_v21  ;;  %v10176_v13 = vpop.xlane.xlu1 %10175  ;;  %v18404_v19 = vld [vmem:[%s19188_s18 + $0x166c] ss:$460 sps:$4 sm:$0xff]  }
 0x39a   : > { %v7107_v56 = vmax.bf16 %v18392_v50, %v7106_v52  ;;  %16258 = vmatpush3.bf16.msra.mxu1 %v10176_v13  ;;  %v18301_v50 = vld [vmem:[%s19188_s18 + $0x1abc] ss:$460 sps:$4 sm:$0xff]  }
 0x39b   : > { %6944 = vmax.xlane.bf16.xlu0 %v6943_v18  ;;  %v7255_v29 = vmax.bf16 %v18268_v23, %v7254_v25  ;;  %v18405_v23 = vld [vmem:[%s19188_s18 + $0x1670] ss:$460 sps:$4 sm:$0xff]   ;;  %v10872_v13 = vld [vmem:[%s19163_s14 + $0x648] sm:$0xff] }
 0x39c   : > { %v7108_v60 = vmax.bf16 %v18393_v54, %v7107_v56  ;;  %v18302_v54 = vld [vmem:[%s19188_s18 + $0x1ac0] ss:$460 sps:$4 sm:$0xff]  }
 0x39d   : > { %v7256_v33 = vmax.bf16 %v18269_v27, %v7255_v29  ;;  %v18407_v27 = vld [vmem:[%s19188_s18 + $0x1674] ss:$460 sps:$4 sm:$0xff]   ;;  %v10473_v30 = vpop.xlane.xlu1 %10472 }
 0x39e   : > { %v7109_v0 = vmax.bf16 %v18395_v58, %v7108_v60  ;;  %16260 = vmatprep.subr.bf16.mxu1 %v10473_v30  ;;  %v18304_v58 = vld [vmem:[%s19188_s18 + $0x1ac4] ss:$460 sps:$4 sm:$0xff]   ;;  %v18313_v30 = vld [vmem:[%s19188_s18 + $0x1adc] ss:$460 sps:$4 sm:$0xff]  }
 0x39f   : > { %v7257_v37 = vmax.bf16 %v18271_v31, %v7256_v33  ;;  %v18295_v33 = vld [vmem:[%s19188_s18 + $0x1aac] ss:$460 sps:$4 sm:$0xff]  }
 0x3a0   : > { %v7110_v4 = vmax.bf16 %v18396_v62, %v7109_v0  ;;  %v18305_v62 = vld [vmem:[%s19188_s18 + $0x1ac8] ss:$460 sps:$4 sm:$0xff]   ;;  %v10871_v0 = vld [vmem:[%s19163_s14 + $0x640] sm:$0xff] }
 0x3a1   : > { %v7258_v41 = vmax.bf16 %v18272_v35, %v7257_v37  ;;  %v18296_v37 = vld [vmem:[%s19188_s18 + $0x1ab0] ss:$460 sps:$4 sm:$0xff]  }
 0x3a2   : > { %v7111_v8 = vmax.bf16 %v18398_v2, %v7110_v4  ;;  %v18420_v4 = vld [vmem:[%s19188_s18 + $0x1698] ss:$460 sps:$4 sm:$0xff]  }
 0x3a3   : > { %v7259_v45 = vmax.bf16 %v18274_v39, %v7258_v41  ;;  %v18298_v41 = vld [vmem:[%s19188_s18 + $0x1ab4] ss:$460 sps:$4 sm:$0xff]  }
 0x3a4   : > { %v7112_v12 = vmax.bf16 %v18399_v6, %v7111_v8  ;;  %v18422_v8 = vld [vmem:[%s19188_s18 + $0x169c] ss:$460 sps:$4 sm:$0xff]  }
 0x3a5   : > { %v7260_v49 = vmax.bf16 %v18275_v43, %v7259_v45  ;;  %v18299_v45 = vld [vmem:[%s19188_s18 + $0x1ab8] ss:$460 sps:$4 sm:$0xff]  }
 0x3a6   : > { %v7113_v17 = vmax.bf16 %v18401_v10, %v7112_v12 }
 0x3a7   : > { %v7261_v53 = vmax.bf16 %v18277_v47, %v7260_v49  ;;  %v10209_v47 = vpop.xlane.xlu1 %10208  ;;  %v18414_v49 = vld [vmem:[%s19188_s18 + $0x1688] ss:$460 sps:$4 sm:$0xff]  }
 0x3a8   : > { %v7114_v21 = vmax.bf16 %v18402_v15, %v7113_v17  ;;  %16262 = vmatpush3.bf16.msra.mxu1 %v10209_v47  ;;  %v18310_v17 = vld [vmem:[%s19188_s18 + $0x1ad4] ss:$460 sps:$4 sm:$0xff]  }
 0x3a9   : > { %v7262_v57 = vmax.bf16 %v18278_v51, %v7261_v53  ;;  %v18416_v53 = vld [vmem:[%s19188_s18 + $0x168c] ss:$460 sps:$4 sm:$0xff]  }
 0x3aa   : > { %v7115_v25 = vmax.bf16 %v18404_v19, %v7114_v21 }
 0x3ab   : > { %v7263_v61 = vmax.bf16 %v18280_v55, %v7262_v57  ;;  %v18417_v57 = vld [vmem:[%s19188_s18 + $0x1690] ss:$460 sps:$4 sm:$0xff]   ;;  %v10506_v2 = vpop.xlane.xlu1 %10505 }
 0x3ac   : > { %v7116_v29 = vmax.bf16 %v18405_v23, %v7115_v25  ;;  %16264 = vmatprep.subr.bf16.mxu1 %v10506_v2  ;;  %v18311_v23 = vld [vmem:[%s19188_s18 + $0x1ad8] ss:$460 sps:$4 sm:$0xff]  }
 0x3ad   : > { %v7264_v1 = vmax.bf16 %v18281_v59, %v7263_v61  ;;  %v18419_v61 = vld [vmem:[%s19188_s18 + $0x1694] ss:$460 sps:$4 sm:$0xff]   ;;  %v10874_v2 = vld [vmem:[%s19163_s14 + $0x658] sm:$0xff] }
 0x3ae   : > { %v7117_v34 = vmax.bf16 %v18407_v27, %v7116_v29  ;;  %v10807_v25 = vld [vmem:[%s19163_s14 + $0x440] sm:$0xff]  ;;  %v18426_v29 = vld [vmem:[%s19188_s18 + $0x16a8] ss:$460 sps:$4 sm:$0xff]  }
 0x3af   : > { %v7265_v5 = vmax.bf16 %v18283_v63, %v7264_v1  ;;  %v10875_v1 = vld [vmem:[%s19163_s14 + $0x660] sm:$0xff]  ;;  %v10242_v27 = vpop.xlane.xlu1 %10241 }
 0x3b0   : > { %v7118_v38 = vmax.bf16 %v18408_v32, %v7117_v34  ;;  %v15555_v10 = vcombine.high %v10871_v0, %v10875_v1  ;;  %16266 = vmatpush3.bf16.msra.mxu1 %v10242_v27  ;;  %v18428_v34 = vld [vmem:[%s19188_s18 + $0x16ac] ss:$460 sps:$4 sm:$0xff]  }
 0x3b1   : > { %v7266_v9 = vmax.bf16 %v18284_v3, %v7265_v5  ;;  %v18307_v5 = vld [vmem:[%s19188_s18 + $0x1acc] ss:$460 sps:$4 sm:$0xff]  }
 0x3b2   : > { %v7119_v42 = vmax.bf16 %v18410_v36, %v7118_v38  ;;  %v10877_v36 = vld [vmem:[%s19163_s14 + $0x670] sm:$0xff] }
 0x3b3   : > { %v7267_v14 = vmax.bf16 %v18286_v7, %v7266_v9  ;;  %v15554_v9 = vcombine.low %v10871_v0, %v10875_v1  ;;  %v18434_v1 = vld [vmem:[%s19188_s18 + $0x16bc] ss:$460 sps:$4 sm:$0xff]  }
 0x3b4   : > { %v7120_v46 = vmax.bf16 %v18411_v40, %v7119_v42  ;;  %v18314_v40 = vld [vmem:[%s19188_s18 + $0x1ae0] ss:$460 sps:$4 sm:$0xff]  }
 0x3b5   : > { %v7268_v18 = vmax.bf16 %v18287_v11, %v7267_v14  ;;  %v18308_v11 = vld [vmem:[%s19188_s18 + $0x1ad0] ss:$460 sps:$4 sm:$0xff]   ;;  %v10876_v14 = vld [vmem:[%s19163_s14 + $0x668] sm:$0xff] }
 0x3b6   : > { %v7121_v51 = vmax.bf16 %v18413_v44, %v7120_v46  ;;  %v15556_v21 = vcombine.low %v10872_v13, %v10876_v14  ;;  %v15557_v32 = vcombine.high %v10872_v13, %v10876_v14  ;;  %v10808_v42 = vld [vmem:[%s19163_s14 + $0x448] sm:$0xff]  ;;  %v18316_v46 = vld [vmem:[%s19188_s18 + $0x1ae4] ss:$460 sps:$4 sm:$0xff]   ;;  %v20138_v13 = vpop.xlane.xlu0 %729 }
 0x3b7   : > { %v7269_v22 = vmax.bf16 %v18289_v16, %v7268_v18  ;;  %v18423_v16 = vld [vmem:[%s19188_s18 + $0x16a0] ss:$460 sps:$4 sm:$0xff]   ;;  %v18320_v14 = vld [vmem:[%s19188_s18 + $0x1af0] ss:$460 sps:$4 sm:$0xff]  }
 0x3b8   : > { %v7122_v55 = vmax.bf16 %v18414_v49, %v7121_v51 }
 0x3b9   : > { %v7270_v26 = vmax.bf16 %v18290_v20, %v7269_v22  ;;  %v18425_v20 = vld [vmem:[%s19188_s18 + $0x16a4] ss:$460 sps:$4 sm:$0xff]   ;;  %v12476_v22 = vmax.bf16 %v15555_v10, %v15554_v9 }
 0x3ba   : > { %v7123_v59 = vmax.bf16 %v18416_v53, %v7122_v55  ;;  %v10883_v55 = vld [vmem:[%s19163_s14 + $0x6a0] sm:$0xff] }
 0x3bb   : > { %v7271_v31 = vmax.bf16 %v18292_v24, %v7270_v26  ;;  %v10811_v26 = vld [vmem:[%s19163_s14 + $0x460] sm:$0xff] }
 0x3bc   : > { %v7124_v63 = vmax.bf16 %v18417_v57, %v7123_v59  ;;  %v15490_v38 = vcombine.low %v10807_v25, %v10811_v26  ;;  %v18149_v59 = vld [vmem:[%s19188_s18 + $0x1928] ss:$460 sps:$4 sm:$0xff]  }
 0x3bd   : > { %v7272_v35 = vmax.bf16 %v18293_v28, %v7271_v31 }
 0x3be   : > { %v7125_v6 = vmax.bf16 %v18419_v61, %v7124_v63  ;;  %v18319_v63 = vld [vmem:[%s19188_s18 + $0x1aec] ss:$460 sps:$4 sm:$0xff]  }
 0x3bf   : > { %v7273_v39 = vmax.bf16 %v18295_v33, %v7272_v35  ;;  %v10873_v35 = vld [vmem:[%s19163_s14 + $0x650] sm:$0xff] }
 0x3c0   : > { %v7126_v12 = vmax.bf16 %v18420_v4, %v7125_v6 }
 0x3c1   : > { %v7274_v43 = vmax.bf16 %v18296_v37, %v7273_v39  ;;  %v12477_v37 = vmax.bf16 %v15556_v21, %v12476_v22  ;;  %v15491_v39 = vcombine.high %v10807_v25, %v10811_v26  ;;  %v18437_v26 = vld [vmem:[%s19188_s18 + $0x16c4] ss:$460 sps:$4 sm:$0xff]  }
 0x3c2   : > { %v7127_v18 = vmax.bf16 %v18422_v8, %v7126_v12  ;;  %v10884_v12 = vld [vmem:[%s19163_s14 + $0x6a8] sm:$0xff] }
 0x3c3   : > { %v7275_v48 = vmax.bf16 %v18298_v41, %v7274_v43  ;;  %v10812_v43 = vld [vmem:[%s19163_s14 + $0x468] sm:$0xff]  ;;  %v12478_v51 = vmax.bf16 %v15557_v32, %v12477_v37  ;;  %v12380_v53 = vmax.bf16 %v15491_v39, %v15490_v38  ;;  %v20147_v32 = vpop.xlane.xlu0 %689 }
 0x3c4   : > { %v7128_v24 = vmax.bf16 %v18423_v16, %v7127_v18  ;;  %v15493_v9 = vcombine.high %v10808_v42, %v10812_v43  ;;  %v10809_v16 = vld [vmem:[%s19163_s14 + $0x450] sm:$0xff] }
 0x3c5   : > { %v7276_v52 = vmax.bf16 %v18299_v45, %v7275_v48  ;;  %v18429_v45 = vld [vmem:[%s19188_s18 + $0x16b0] ss:$460 sps:$4 sm:$0xff]   ;;  %v15558_v48 = vcombine.low %v10873_v35, %v10877_v36  ;;  %v18438_v38 = vld [vmem:[%s19188_s18 + $0x16c8] ss:$460 sps:$4 sm:$0xff]  }
 0x3c6   : > { %v7129_v31 = vmax.bf16 %v18425_v20, %v7128_v24  ;;  %v18435_v20 = vld [vmem:[%s19188_s18 + $0x16c0] ss:$460 sps:$4 sm:$0xff]  }
 0x3c7   : > { %v7277_v56 = vmax.bf16 %v18301_v50, %v7276_v52  ;;  %v18431_v50 = vld [vmem:[%s19188_s18 + $0x16b4] ss:$460 sps:$4 sm:$0xff]   ;;  %v15492_v52 = vcombine.low %v10808_v42, %v10812_v43  ;;  %v12479_v8 = vmax.bf16 %v15558_v48, %v12478_v51  ;;  %v10816_v51 = vld [vmem:[%s19163_s14 + $0x488] sm:$0xff] }
 0x3c8   : > { %v7130_v41 = vmax.bf16 %v18426_v29, %v7129_v31  ;;  %v10819_v31 = vld [vmem:[%s19163_s14 + $0x4a0] sm:$0xff]  ;;  %v20151_v42 = vld [vmem:[%s19163_s14 + $0x690] sm:$0xff] }
 0x3c9   : > { %v7278_v60 = vmax.bf16 %v18302_v54, %v7277_v56  ;;  %v10879_v54 = vld [vmem:[%s19163_s14 + $0x680] sm:$0xff]  ;;  %v18317_v56 = vld [vmem:[%s19188_s18 + $0x1ae8] ss:$460 sps:$4 sm:$0xff]   ;;  %v12381_v10 = vmax.bf16 %v15492_v52, %v12380_v53  ;;  %v20159_v53 = vpop.xlane.xlu0 %734 }
 0x3ca   : > { %v7131_v47 = vmax.bf16 %v18428_v34, %v7130_v41  ;;  %v15562_v4 = vcombine.low %v10879_v54, %v10883_v55  ;;  %v20154_v43 = vld [vmem:[%s19163_s14 + $0x6b0] sm:$0xff]  ;;  %v10820_v52 = vld [vmem:[%s19163_s14 + $0x4a8] sm:$0xff] }
 0x3cb   : > { %v7279_v3 = vmax.bf16 %v18304_v58, %v7278_v60  ;;  %v10539_v58 = vpop.xlane.xlu1 %10538  ;;  %v18151_v60 = vld [vmem:[%s19188_s18 + $0x192c] ss:$460 sps:$4 sm:$0xff]   ;;  %v12382_v29 = vmax.bf16 %v15493_v9, %v12381_v10 }
 0x3cc   : > { %v7132_v57 = vmax.bf16 %v18429_v45, %v7131_v47  ;;  %16268 = vmatprep.subr.bf16.mxu1 %v10539_v58  ;;  %v18440_v47 = vld [vmem:[%s19188_s18 + $0x16cc] ss:$460 sps:$4 sm:$0xff]   ;;  %v18441_v58 = vld [vmem:[%s19188_s18 + $0x16d0] ss:$460 sps:$4 sm:$0xff]  }
 0x3cd   : > { %v7280_v7 = vmax.bf16 %v18305_v62, %v7279_v3  ;;  %v18432_v62 = vld [vmem:[%s19188_s18 + $0x16b8] ss:$460 sps:$4 sm:$0xff]   ;;  %v15559_v3 = vcombine.high %v10873_v35, %v10877_v36 }
 0x3ce   : > { %v7133_v0 = vmax.bf16 %v18431_v50, %v7132_v57  ;;  %v12629_v36 = vld [vmem:[#allocation3 + $0x60] sm:$0xff]  ;;  %v10814_v57 = vld [vmem:[%s19163_s14 + $0x478] sm:$0xff] }
 0x3cf   : > { %v7281_v15 = vmax.bf16 %v18307_v5, %v7280_v7  ;;  %v15563_v5 = vcombine.high %v10879_v54, %v10883_v55  ;;  %v10878_v7 = vld [vmem:[%s19163_s14 + $0x678] sm:$0xff]  ;;  %v12480_v27 = vmax.bf16 %v15559_v3, %v12479_v8  ;;  %v10275_v35 = vpop.xlane.xlu1 %10274  ;;  %12918 = vmatprep.mubr.f32.mxu1 %v12629_v36  ;;  %v10891_v8 = vld [vmem:[%s19163_s14 + $0x6e0] sm:$0xff] }
 0x3d0   : > { %v15560_v22 = vcombine.low %v10874_v2, %v10878_v7  ;;  %v15561_v34 = vcombine.high %v10874_v2, %v10878_v7  ;;  %16270 = vmatpush3.bf16.msra.mxu1 %v10275_v35  ;;  %v12633_v10 = vld [vmem:[#allocation3 + $0xb8] sm:$0xff] }
 0x3d1   : > { %v7282_v19 = vmax.bf16 %v18308_v11, %v7281_v15  ;;  %v10880_v11 = vld [vmem:[%s19163_s14 + $0x688] sm:$0xff]  ;;  %v7134_v15 = vmax.bf16 %v18432_v62, %v7133_v0  ;;  %v12488_v24 = vmax.bf16 %v15563_v5, %v15562_v4  ;;  %v15500_v62 = vcombine.low %v10816_v51, %v10820_v52  ;;  %v18443_v0 = vld [vmem:[%s19188_s18 + $0x16d4] ss:$460 sps:$4 sm:$0xff]  }
 0x3d2   : > { %v15565_v39 = vcombine.high %v10880_v11, %v10884_v12  ;;  %v12481_v48 = vmax.bf16 %v15560_v22, %v12480_v27  ;;  %v12483_v55 = vsel %vm12181_vm2, %v15561_v34, 4286644096  ;;  %v10887_v4 = vld [vmem:[%s19163_s14 + $0x6c0] sm:$0xff]  ;;  %v10892_v34 = vld [vmem:[%s19163_s14 + $0x6e8] sm:$0xff] }
 0x3d3   : > { %v7283_v28 = vmax.bf16 %v18310_v17, %v7282_v19  ;;  %v10813_v17 = vld [vmem:[%s19163_s14 + $0x470] sm:$0xff]  ;;  %v7178_v19 = vmax.bf16 %v18151_v60, %v18149_v59  ;;  %v7135_v21 = vmax.bf16 %v18434_v1, %v7134_v15  ;;  %v15566_v59 = vcombine.low %v20151_v42, %v20154_v43  ;;  %v10572_v9 = vpop.xlane.xlu1 %10571  ;;  %v18447_v35 = vld [vmem:[%s19188_s18 + $0x16e0] ss:$460 sps:$4 sm:$0xff]  }
 0x3d4   : > { %v12485_v1 = vmax.bf16 %v12483_v55, %v12481_v48  ;;  %v12637_v15 = vld [vmem:[#allocation3 + $0x110] sm:$0xff]  ;;  %v15571_v27 = vcombine.high %v10887_v4, %v10891_v8  ;;  %16272 = vmatprep.subr.bf16.mxu1 %v10572_v9 }
 0x3d5   : > { %v7284_v33 = vmax.bf16 %v18311_v23, %v7283_v28  ;;  %v15564_v23 = vcombine.low %v10880_v11, %v10884_v12  ;;  %v15494_v28 = vcombine.low %v10809_v16, %v10813_v17  ;;  %v12632_v11 = vld [vmem:[#allocation3 + $0xb0] sm:$0xff] }
 0x3d6   : > { %v18444_v12 = vld [vmem:[%s19188_s18 + $0x16d8] ss:$460 sps:$4 sm:$0xff]   ;;  %v10893_v9 = vld [vmem:[%s19163_s14 + $0x6f0] sm:$0xff] }
 0x3d7   : > { %v7285_v44 = vmax.bf16 %v18313_v30, %v7284_v33  ;;  %v10815_v30 = vld [vmem:[%s19163_s14 + $0x480] sm:$0xff]  ;;  %v7136_v33 = vmax.bf16 %v18435_v20, %v7135_v21  ;;  %v12383_v50 = vmax.bf16 %v15494_v28, %v12382_v29  ;;  %v15501_v21 = vcombine.high %v10816_v51, %v10820_v52  ;;  %v12636_v28 = vld [vmem:[#allocation3 + $0x108] sm:$0xff]  ;;  %v10308_v55 = vpop.xlane.xlu1 %10307 }
 0x3d8   : > { %v15498_v45 = vcombine.low %v10815_v30, %v10819_v31  ;;  %v12640_v51 = vld [vmem:[#allocation3 + $0x160] sm:$0xff]  ;;  %16274 = vmatpush3.bf16.msra.mxu1 %v10308_v55  ;;  %v10829_v55 = vld [vmem:[%s19163_s14 + $0x4f0] sm:$0xff] }
 0x3d9   : > { %v7286_v49 = vmax.bf16 %v18314_v40, %v7285_v44  ;;  %v12628_v40 = vld [vmem:[#allocation3 + $0x58] sm:$0xff]  ;;  %v7137_v41 = vmax.bf16 %v18437_v26, %v7136_v33  ;;  %v12489_v44 = vmax.bf16 %v15564_v23, %v12488_v24  ;;  %v10817_v24 = vld [vmem:[%s19163_s14 + $0x490] sm:$0xff]  ;;  %v15570_v26 = vcombine.low %v10887_v4, %v10891_v8  ;;  %v10888_v33 = vld [vmem:[%s19163_s14 + $0x6c8] sm:$0xff] }
 0x3da   : > { %12919 = vmatmul.mubr.f32.gmra.mrb[2].mxu1 %v12628_v40  ;;  %v18450_v52 = vld [vmem:[%s19188_s18 + $0x16e8] ss:$460 sps:$4 sm:$0xff]  }
 0x3db   : > { %v7287_v61 = vmax.bf16 %v18316_v46, %v7286_v49  ;;  %v15499_v46 = vcombine.high %v10815_v30, %v10819_v31  ;;  %v15495_v49 = vcombine.high %v10809_v16, %v10813_v17  ;;  %v7138_v54 = vmax.bf16 %v18438_v38, %v7137_v41  ;;  %12923 = vmatprep.mubr.f32.mxu1 %v12633_v10  ;;  %v18446_v17 = vld [vmem:[%s19188_s18 + $0x16dc] ss:$460 sps:$4 sm:$0xff]  }
 0x3dc   : > { %v10824_v10 = vld [vmem:[%s19163_s14 + $0x4c8] sm:$0xff] }
 0x3dd   : > { %v7288_v6 = vmax.bf16 %v18317_v56, %v7287_v61  ;;  %v10810_v56 = vld [vmem:[%s19163_s14 + $0x458] sm:$0xff]  ;;  %v7139_v60 = vmax.bf16 %v18440_v47, %v7138_v54  ;;  %v12490_v61 = vmax.bf16 %v15565_v39, %v12489_v44  ;;  %v12384_v3 = vmax.bf16 %v15495_v49, %v12383_v50  ;;  %v10827_v49 = vld [vmem:[%s19163_s14 + $0x4e0] sm:$0xff]  ;;  %v12641_v50 = vld [vmem:[#allocation3 + $0x168] sm:$0xff] }
 0x3de   : > { %v15496_v2 = vcombine.low %v10810_v56, %v10814_v57  ;;  %v15497_v7 = vcombine.high %v10810_v56, %v10814_v57  ;;  %12924 = vmatmul.mubr.f32.gmra.mrb[4].mxu1 %v12632_v11  ;;  %v15572_v44 = vcombine.low %v10888_v33, %v10892_v34  ;;  %v18452_v57 = vld [vmem:[%s19188_s18 + $0x16ec] ss:$460 sps:$4 sm:$0xff]  }
 0x3df   : > { %v7289_v18 = vmax.bf16 %v18319_v63, %v7288_v6  ;;  %v12392_v63 = vmax.bf16 %v15499_v46, %v15498_v45  ;;  %v7140_v5 = vmax.bf16 %v18441_v58, %v7139_v60  ;;  %v20169_v6 = vpop.xlane.xlu0 %694  ;;  %v12491_v20 = vmax.bf16 %v15566_v59, %v12490_v61  ;;  %12928 = vmatprep.mubr.f32.mxu1 %v12637_v15  ;;  %v10823_v46 = vld [vmem:[%s19163_s14 + $0x4c0] sm:$0xff]  ;;  %v10818_v59 = vld [vmem:[%s19163_s14 + $0x498] sm:$0xff]  ;;  %v10828_v11 = vld [vmem:[%s19163_s14 + $0x4e8] sm:$0xff] }
 0x3e0   : > { %v12385_v23 = vmax.bf16 %v15496_v2, %v12384_v3  ;;  %v12387_v31 = vsel %vm12181_vm2, %v15497_v7, 4286644096  ;;  %v12500_v45 = vmax.bf16 %v15571_v27, %v15570_v26  ;;  %v15506_v3 = vcombine.low %v10823_v46, %v10827_v49 }
 0x3e1   : > { %v7290_v25 = vmax.bf16 %v18320_v14, %v7289_v18  ;;  %v15567_v14 = vcombine.high %v20151_v42, %v20154_v43  ;;  %v7141_v16 = vmax.bf16 %v18443_v0, %v7140_v5  ;;  %v10882_v18 = vld [vmem:[%s19163_s14 + $0x698] sm:$0xff]  ;;  %v12393_v22 = vmax.bf16 %v15500_v62, %v12392_v63  ;;  %v18449_v42 = vld [vmem:[%s19188_s18 + $0x16e4] ss:$460 sps:$4 sm:$0xff]  }
 0x3e2   : > { %12929 = vmatmul.mubr.f32.gmra.mrb[6].mxu1 %v12636_v28  ;;  %v12389_v43 = vmax.bf16 %v12387_v31, %v12385_v23  ;;  %v12645_v62 = vld [vmem:[#allocation3 + $0x1c0] sm:$0xff]  ;;  %v10822_v63 = vld [vmem:[%s19163_s14 + $0x4b8] sm:$0xff]  ;;  %v20197_v0 = vld [vmem:[%s19163_s14 + $0x6d0] sm:$0xff]  ;;  %v12501_v2 = vmax.bf16 %v15572_v44, %v12500_v45  ;;  %v15507_v4 = vcombine.high %v10823_v46, %v10827_v49  ;;  %v10605_v28 = vpop.xlane.xlu1 %10604  ;;  %v15509_v44 = vcombine.high %v10824_v10, %v10828_v11 }
 0x3e3   : > { %v7291_v37 = vmax.bf16 %v7290_v25, %v7178_v19  ;;  %v10886_v19 = vld [vmem:[%s19163_s14 + $0x6b8] sm:$0xff]  ;;  %v10821_v25 = vld [vmem:[%s19163_s14 + $0x4b0] sm:$0xff]  ;;  %v7142_v29 = vmax.bf16 %v18444_v12, %v7141_v16  ;;  %v20180_v30 = vpop.xlane.xlu0 %739  ;;  %v12492_v39 = vmax.bf16 %v15567_v14, %v12491_v20  ;;  %v12394_v41 = vmax.bf16 %v15501_v21, %v12393_v22  ;;  %12933 = vmatprep.mubr.f32.mxu1 %v12641_v50  ;;  %v10895_v23 = vld [vmem:[%s19163_s14 + $0x700] sm:$0xff] }
 0x3e4   : > { %v15568_v36 = vcombine.low %v10882_v18, %v10886_v19  ;;  %v15502_v40 = vcombine.low %v10817_v24, %v10821_v25  ;;  %v15503_v60 = vcombine.high %v10817_v24, %v10821_v25  ;;  %v12644_v5 = vld [vmem:[#allocation3 + $0x1b8] sm:$0xff]  ;;  %v15504_v16 = vcombine.low %v10818_v59, %v10822_v63  ;;  %v12648_v31 = vld [vmem:[#allocation3 + $0x210] sm:$0xff]  ;;  %16276 = vmatprep.subr.bf16.mxu1 %v10605_v28  ;;  %v10896_v46 = vld [vmem:[%s19163_s14 + $0x708] sm:$0xff] }
 0x3e5   : > { %7292 = vmax.xlane.bf16.xlu1 %v7291_v37  ;;  %v15569_v37 = vcombine.high %v10882_v18, %v10886_v19  ;;  %v7143_v38 = vmax.bf16 %v18446_v17, %v7142_v29  ;;  %v18453_v12 = vld [vmem:[%s19188_s18 + $0x16f0] ss:$460 sps:$4 sm:$0xff]   ;;  %v18455_v18 = vld [vmem:[%s19188_s18 + $0x16f4] ss:$460 sps:$4 sm:$0xff]   ;;  %v15574_v19 = vcombine.low %v20197_v0, %v10893_v9  ;;  %v15508_v21 = vcombine.low %v10824_v10, %v10828_v11  ;;  %v20241_v28 = vld [vmem:[%s19163_s14 + $0x528] sm:$0xff] }
 0x3e6   : > { %v12493_v58 = vmax.bf16 %v15568_v36, %v12492_v39  ;;  %v12395_v61 = vmax.bf16 %v15502_v40, %v12394_v41  ;;  %12934 = vmatmul.mubr.f32.gmra.mrb[8].mxu1 %v12640_v51  ;;  %v12404_v22 = vmax.bf16 %v15507_v4, %v15506_v3  ;;  %v10899_v24 = vld [vmem:[%s19163_s14 + $0x720] sm:$0xff]  ;;  %v15505_v26 = vcombine.high %v10818_v59, %v10822_v63  ;;  %v18458_v36 = vld [vmem:[%s19188_s18 + $0x16fc] ss:$460 sps:$4 sm:$0xff]  }
 0x3e7   : > { %v7144_v47 = vmax.bf16 %v18447_v35, %v7143_v38  ;;  %v20188_v48 = vpop.xlane.xlu0 %699  ;;  %v12495_v54 = vsel %vm12181_vm2, %v15569_v37, 4286644096  ;;  %12938 = vmatprep.mubr.f32.mxu1 %v12645_v62  ;;  %v12649_v29 = vld [vmem:[#allocation3 + $0x218] sm:$0xff]  ;;  %v15575_v39 = vcombine.high %v20197_v0, %v10893_v9  ;;  %v15578_v40 = vcombine.low %v10895_v23, %v10899_v24  ;;  %v12652_v49 = vld [vmem:[#allocation3 + $0x268] sm:$0xff]  ;;  %v12656_v10 = vld [vmem:[#allocation3 + $0x2c0] sm:$0xff] }
 0x3e8   : > { %v12497_v15 = vmax.bf16 %v12495_v54, %v12493_v58  ;;  %v12396_v17 = vmax.bf16 %v15503_v60, %v12395_v61  ;;  %v10890_v37 = vld [vmem:[%s19163_s14 + $0x6d8] sm:$0xff]  ;;  %v15579_v41 = vcombine.high %v10895_v23, %v10899_v24  ;;  %v12405_v45 = vmax.bf16 %v15508_v21, %v12404_v22  ;;  %v10825_v54 = vld [vmem:[%s19163_s14 + $0x4d0] sm:$0xff]  ;;  %v10835_v3 = vld [vmem:[%s19163_s14 + $0x520] sm:$0xff] }
 0x3e9   : > { %v7145_v56 = vmax.bf16 %v18449_v42, %v7144_v47  ;;  %v10894_v38 = vld [vmem:[%s19163_s14 + $0x6f8] sm:$0xff]  ;;  %v10900_v47 = vld [vmem:[%s19163_s14 + $0x728] sm:$0xff]  ;;  %v12399_v51 = vsel %vm12181_vm2, %v15505_v26, 4286644096  ;;  %v18461_v61 = vld [vmem:[%s19188_s18 + $0x1704] ss:$460 sps:$4 sm:$0xff]   ;;  %v15510_v0 = vcombine.low %v10825_v54, %v10829_v55  ;;  %v15511_v24 = vcombine.high %v10825_v54, %v10829_v55 }
 0x3ea   : > { %12939 = vmatmul.mubr.f32.gmra.mrb[10].mxu1 %v12644_v5  ;;  %v12397_v42 = vmax.bf16 %v15504_v16, %v12396_v17  ;;  %v15576_v58 = vcombine.low %v10890_v37, %v10894_v38  ;;  %v15580_v59 = vcombine.low %v10896_v46, %v10900_v47  ;;  %v12512_v60 = vmax.bf16 %v15579_v41, %v15578_v40  ;;  %v12657_v9 = vld [vmem:[#allocation3 + $0x2c8] sm:$0xff]  ;;  %v12661_v22 = vld [vmem:[#allocation3 + $0x320] sm:$0xff] }
 0x3eb   : > { %v7146_v7 = vmax.bf16 %v18450_v52, %v7145_v56  ;;  %v20199_v8 = vpop.xlane.xlu0 %744  ;;  %12943 = vmatprep.mubr.f32.mxu1 %v12649_v29  ;;  %v18459_v56 = vld [vmem:[%s19188_s18 + $0x1700] ss:$460 sps:$4 sm:$0xff]   ;;  %v15577_v5 = vcombine.high %v10890_v37, %v10894_v38  ;;  %v18462_v11 = vld [vmem:[%s19188_s18 + $0x1708] ss:$460 sps:$4 sm:$0xff]   ;;  %v18465_v37 = vld [vmem:[%s19188_s18 + $0x1710] ss:$460 sps:$4 sm:$0xff]  }
 0x3ec   : > { %v12401_v62 = vmax.bf16 %v12399_v51, %v12397_v42  ;;  %v20232_v17 = vld [vmem:[%s19163_s14 + $0x710] sm:$0xff]  ;;  %v20238_v26 = vld [vmem:[%s19163_s14 + $0x508] sm:$0xff]  ;;  %v12660_v29 = vld [vmem:[#allocation3 + $0x318] sm:$0xff] }
 0x3ed   : > { %12486 = vmax.xlane.bf16.xlu1 %v12485_v1  ;;  %v15573_v1 = vcombine.high %v10888_v33, %v10892_v34  ;;  %v7147_v14 = vmax.bf16 %v18452_v57, %v7146_v7  ;;  %v18456_v33 = vld [vmem:[%s19188_s18 + $0x16f8] ss:$460 sps:$4 sm:$0xff]   ;;  %v15516_v41 = vcombine.low %v20238_v26, %v20241_v28 }
 0x3ee   : > { %v12653_v34 = vld [vmem:[#allocation3 + $0x270] sm:$0xff]  ;;  %12944 = vmatmul.mubr.f32.gmra.mrb[12].mxu1 %v12648_v31  ;;  %v10907_v54 = vld [vmem:[%s19163_s14 + $0x760] sm:$0xff] }
 0x3ef   : > { %v12502_v20 = vmax.bf16 %v15573_v1, %v12501_v2  ;;  %v7148_v25 = vmax.bf16 %v18453_v12, %v7147_v14  ;;  %v20209_v27 = vpop.xlane.xlu0 %704  ;;  %12948 = vmatprep.mubr.f32.mxu1 %v12653_v34  ;;  %v12406_v1 = vmax.bf16 %v15509_v44, %v12405_v45  ;;  %v10831_v2 = vld [vmem:[%s19163_s14 + $0x500] sm:$0xff]  ;;  %v18464_v12 = vld [vmem:[%s19188_s18 + $0x170c] ss:$460 sps:$4 sm:$0xff]   ;;  %v15581_v14 = vcombine.high %v10896_v46, %v10900_v47 }
 0x3f0   : > { %v15515_v21 = vcombine.high %v10831_v2, %v10835_v3  ;;  %v10826_v34 = vld [vmem:[%s19163_s14 + $0x4d8] sm:$0xff]  ;;  %v10903_v47 = vld [vmem:[%s19163_s14 + $0x740] sm:$0xff] }
 0x3f1   : > { %v7149_v35 = vmax.bf16 %v18455_v18, %v7148_v25  ;;  %v20235_v18 = vld [vmem:[%s19163_s14 + $0x730] sm:$0xff]  ;;  %v12407_v25 = vmax.bf16 %v15510_v0, %v12406_v1  ;;  %v10902_v0 = vld [vmem:[%s19163_s14 + $0x738] sm:$0xff] }
 0x3f2   : > { %12949 = vmatmul.mubr.f32.gmra.mrb[14].mxu1 %v12652_v49  ;;  %v15582_v38 = vcombine.low %v20232_v17, %v20235_v18 }
 0x3f3   : > { %v7150_v50 = vmax.bf16 %v18456_v33, %v7149_v35  ;;  %v20219_v52 = vpop.xlane.xlu0 %749  ;;  %12953 = vmatprep.mubr.f32.mxu1 %v12657_v9  ;;  %v12507_v33 = vsel %vm12181_vm2, %v15577_v5, 4286644096  ;;  %v10830_v35 = vld [vmem:[%s19163_s14 + $0x4f8] sm:$0xff]  ;;  %v12408_v46 = vmax.bf16 %v15511_v24, %v12407_v25  ;;  %v20267_v5 = vld [vmem:[%s19163_s14 + $0x510] sm:$0xff]  ;;  %v10747_v24 = vld [vmem:[%s19163_s14 + $0x260] sm:$0xff] }
 0x3f4   : > { %v15512_v45 = vcombine.low %v10826_v34, %v10830_v35  ;;  %v20270_v9 = vld [vmem:[%s19163_s14 + $0x530] sm:$0xff] }
 0x3f5   : > { %12390 = vmax.xlane.bf16.xlu1 %v12389_v43  ;;  %v12503_v43 = vmax.bf16 %v15574_v19, %v12502_v20  ;;  %v7151_v57 = vmax.bf16 %v18458_v36, %v7150_v50  ;;  %v12513_v19 = vmax.bf16 %v15580_v59, %v12512_v60  ;;  %v15514_v20 = vcombine.low %v10831_v2, %v10835_v3  ;;  %v12669_v60 = vld [vmem:[#allocation3 + $0x3d0] sm:$0xff] }
 0x3f6   : > { %12954 = vmatmul.mubr.f32.gmra.mrb[16].mxu1 %v12656_v10  ;;  %v15513_v50 = vcombine.high %v10826_v34, %v10830_v35  ;;  %v15583_v59 = vcombine.high %v20232_v17, %v20235_v18  ;;  %v15517_v2 = vcombine.high %v20238_v26, %v20241_v28  ;;  %v15586_v10 = vcombine.low %v10903_v47, %v10907_v54  ;;  %v20277_v17 = vld [vmem:[%s19163_s14 + $0x768] sm:$0xff] }
 0x3f7   : > { %v12504_v63 = vmax.bf16 %v15575_v39, %v12503_v43  ;;  %v7152_v4 = vmax.bf16 %v18459_v56, %v7151_v57  ;;  %v20227_v7 = vpop.xlane.xlu0 %709  ;;  %12958 = vmatprep.mubr.f32.mxu1 %v12661_v22  ;;  %v12514_v40 = vmax.bf16 %v15581_v14, %v12513_v19  ;;  %v12416_v42 = vmax.bf16 %v15515_v21, %v15514_v20  ;;  %v18467_v43 = vld [vmem:[%s19188_s18 + $0x1714] ss:$460 sps:$4 sm:$0xff]  }
 0x3f8   : > { %v12665_v56 = vld [vmem:[#allocation3 + $0x378] sm:$0xff]  ;;  %v12664_v57 = vld [vmem:[#allocation3 + $0x370] sm:$0xff]  ;;  %v15518_v26 = vcombine.low %v20267_v5, %v20270_v9 }
 0x3f9   : > { %v7153_v16 = vmax.bf16 %v18461_v61, %v7152_v4  ;;  %v12505_v23 = vmax.bf16 %v15576_v58, %v12504_v63  ;;  %v18468_v58 = vld [vmem:[%s19188_s18 + $0x1718] ss:$460 sps:$4 sm:$0xff]   ;;  %v12515_v1 = vmax.bf16 %v15582_v38, %v12514_v40  ;;  %v12417_v3 = vmax.bf16 %v15516_v41, %v12416_v42  ;;  %v18471_v19 = vld [vmem:[%s19188_s18 + $0x1720] ss:$460 sps:$4 sm:$0xff]  }
 0x3fa   : > { %12959 = vmatmul.mubr.f32.gmra.mrb[18].mxu1 %v12660_v29  ;;  %v10898_v63 = vld [vmem:[%s19163_s14 + $0x718] sm:$0xff]  ;;  %v12409_v4 = vmax.bf16 %v15512_v45, %v12408_v46  ;;  %v18473_v29 = vld [vmem:[%s19188_s18 + $0x1724] ss:$460 sps:$4 sm:$0xff]   ;;  %v20299_v45 = vld [vmem:[%s19163_s14 + $0x268] sm:$0xff] }
 0x3fb   : > { %v7154_v31 = vmax.bf16 %v18462_v11, %v7153_v16  ;;  %v20246_v36 = vpop.xlane.xlu0 %754  ;;  %v12509_v44 = vmax.bf16 %v12507_v33, %v12505_v23  ;;  %12963 = vmatprep.mubr.f32.mxu1 %v12665_v56  ;;  %v15587_v11 = vcombine.high %v10903_v47, %v10907_v54  ;;  %v20274_v16 = vld [vmem:[%s19163_s14 + $0x748] sm:$0xff]  ;;  %v15584_v20 = vcombine.low %v10898_v63, %v10902_v0  ;;  %v10743_v23 = vld [vmem:[%s19163_s14 + $0x240] sm:$0xff]  ;;  %v20305_v56 = vld [vmem:[%s19163_s14 + $0x518] sm:$0xff] }
 0x3fc   : > { %v15585_v21 = vcombine.high %v10898_v63, %v10902_v0  ;;  %v12516_v25 = vmax.bf16 %v15583_v59, %v12515_v1  ;;  %v12418_v28 = vmax.bf16 %v15517_v2, %v12417_v3  ;;  %v15588_v34 = vcombine.low %v20274_v16, %v20277_v17  ;;  %v12673_v41 = vld [vmem:[#allocation3 + $0x428] sm:$0xff]  ;;  %v12672_v42 = vld [vmem:[#allocation3 + $0x420] sm:$0xff]  ;;  %v12676_v3 = vld [vmem:[#allocation3 + $0x478] sm:$0xff] }
 0x3fd   : > { %12498 = vmax.xlane.bf16.xlu1 %v12497_v15  ;;  %v10341_v15 = vpop.xlane.xlu1 %10340  ;;  %v7155_v39 = vmax.bf16 %v18464_v12, %v7154_v31  ;;  %v12668_v12 = vld [vmem:[#allocation3 + $0x3c8] sm:$0xff]  ;;  %v12524_v35 = vmax.bf16 %v15587_v11, %v15586_v10  ;;  %v15426_v46 = vcombine.low %v10743_v23, %v10747_v24  ;;  %v15427_v47 = vcombine.high %v10743_v23, %v10747_v24 }
 0x3fe   : > { %16278 = vmatpush3.bf16.msra.mxu1 %v10341_v15  ;;  %v12411_v15 = vsel %vm12181_vm2, %v15513_v50, 4286644096  ;;  %v18474_v31 = vld [vmem:[%s19188_s18 + $0x1728] ss:$460 sps:$4 sm:$0xff]   ;;  %v12419_v59 = vmax.bf16 %v15518_v26, %v12418_v28  ;;  %v15589_v63 = vcombine.high %v20274_v16, %v20277_v17  ;;  %v18477_v11 = vld [vmem:[%s19188_s18 + $0x1730] ss:$460 sps:$4 sm:$0xff]  }
 0x3ff   : > { %v7156_v49 = vmax.bf16 %v18465_v37, %v7155_v39  ;;  %v20255_v51 = vpop.xlane.xlu0 %714  ;;  %12964 = vmatmul.mubr.f32.gmra.mrb[20].mxu1 %v12664_v57  ;;  %v12413_v33 = vmax.bf16 %v12411_v15, %v12409_v4  ;;  %v10839_v37 = vld [vmem:[%s19163_s14 + $0x540] sm:$0xff]  ;;  %v20308_v57 = vld [vmem:[%s19163_s14 + $0x538] sm:$0xff]  ;;  %v12525_v0 = vmax.bf16 %v15588_v34, %v12524_v35  ;;  %v20321_v10 = vld [vmem:[%s19163_s14 + $0x548] sm:$0xff] }
 0x400   : > { %12968 = vmatprep.mubr.f32.mxu1 %v12669_v60  ;;  %v10843_v39 = vld [vmem:[%s19163_s14 + $0x560] sm:$0xff]  ;;  %v15520_v17 = vcombine.low %v20305_v56, %v20308_v57 }
 0x401   : > { %v10638_v55 = vpop.xlane.xlu1 %10637  ;;  %v7157_v61 = vmax.bf16 %v18467_v43, %v7156_v49  ;;  %v18476_v43 = vld [vmem:[%s19188_s18 + $0x172c] ss:$460 sps:$4 sm:$0xff]   ;;  %v20302_v49 = vsel %vm12181_vm2, %v15585_v21, 4286644096  ;;  %v12677_v60 = vld [vmem:[#allocation3 + $0x480] sm:$0xff]  ;;  %v15522_v1 = vcombine.low %v10839_v37, %v10843_v39  ;;  %v15523_v2 = vcombine.high %v10839_v37, %v10843_v39  ;;  %v20348_v39 = vld [vmem:[%s19163_s14 + $0x250] sm:$0xff] }
 0x402   : > { %16280 = vmatprep.subr.bf16.mxu1 %v10638_v55  ;;  %v12517_v55 = vmax.bf16 %v15584_v20, %v12516_v25  ;;  %v18479_v20 = vld [vmem:[%s19188_s18 + $0x1734] ss:$460 sps:$4 sm:$0xff]  }
 0x403   : > { %v7158_v14 = vmax.bf16 %v18468_v58, %v7157_v61  ;;  %v20279_v18 = vpop.xlane.xlu0 %759  ;;  %12969 = vmatmul.mubr.f32.gmra.mrb[22].mxu1 %v12668_v12  ;;  %v15519_v58 = vcombine.high %v20267_v5, %v20270_v9  ;;  %v20313_v61 = vld [vmem:[%s19163_s14 + $0x750] sm:$0xff]  ;;  %v20324_v5 = vld [vmem:[%s19163_s14 + $0x568] sm:$0xff]  ;;  %v12428_v24 = vmax.bf16 %v15523_v2, %v15522_v1  ;;  %v10911_v25 = vld [vmem:[%s19163_s14 + $0x780] sm:$0xff] }
 0x404   : > { %12973 = vmatprep.mubr.f32.mxu1 %v12673_v41  ;;  %v12521_v16 = vmax.bf16 %v20302_v49, %v12517_v55  ;;  %v15524_v23 = vcombine.low %v20321_v10, %v20324_v5  ;;  %v10915_v26 = vld [vmem:[%s19163_s14 + $0x7a0] sm:$0xff]  ;;  %v12680_v37 = vld [vmem:[#allocation3 + $0x4d0] sm:$0xff] }
 0x405   : > { %12402 = vmax.xlane.bf16.xlu1 %v12401_v62  ;;  %v18470_v62 = vld [vmem:[%s19188_s18 + $0x171c] ss:$460 sps:$4 sm:$0xff]   ;;  %v10374_v50 = vpop.xlane.xlu1 %10373  ;;  %v12420_v21 = vmax.bf16 %v15519_v58, %v12419_v59  ;;  %v15594_v55 = vcombine.low %v10911_v25, %v10915_v26  ;;  %v15525_v58 = vcombine.high %v20321_v10, %v20324_v5  ;;  %v20379_v2 = vld [vmem:[%s19163_s14 + $0x550] sm:$0xff]  ;;  %v18483_v10 = vld [vmem:[%s19188_s18 + $0x1740] ss:$460 sps:$4 sm:$0xff]  }
 0x406   : > { %v7159_v22 = vmax.bf16 %v18470_v62, %v7158_v14  ;;  %v20316_v62 = vld [vmem:[%s19163_s14 + $0x770] sm:$0xff]  ;;  %16282 = vmatpush3.bf16.msra.mxu1 %v10374_v50  ;;  %v12284_v14 = vmax.bf16 %v15427_v47, %v15426_v46  ;;  %v12681_v35 = vld [vmem:[#allocation3 + $0x4d8] sm:$0xff]  ;;  %v12429_v59 = vmax.bf16 %v15524_v23, %v12428_v24 }
 0x407   : > { %v20292_v40 = vpop.xlane.xlu0 %719  ;;  %12974 = vmatmul.mubr.f32.gmra.mrb[24].mxu1 %v12672_v42  ;;  %v20353_v47 = vld [vmem:[%s19163_s14 + $0x270] sm:$0xff]  ;;  %v20356_v49 = vld [vmem:[%s19163_s14 + $0x758] sm:$0xff] }
 0x408   : > { %v7160_v38 = vmax.bf16 %v18471_v19, %v7159_v22  ;;  %12978 = vmatprep.mubr.f32.mxu1 %v12677_v60  ;;  %v15590_v19 = vcombine.low %v20313_v61, %v20316_v62  ;;  %v12526_v22 = vmax.bf16 %v15589_v63, %v12525_v0  ;;  %v20359_v50 = vld [vmem:[%s19163_s14 + $0x778] sm:$0xff]  ;;  %v20369_v60 = vld [vmem:[%s19163_s14 + $0x788] sm:$0xff]  ;;  %v20375_v63 = vld [vmem:[%s19188_s18 + $0x1594] ss:$460 sps:$4 sm:$0xff]   ;;  %v15430_v5 = vcombine.low %v20348_v39, %v20353_v47 }
 0x409   : > { %v12475_v34 = vpop.xlane.xlu1 %12474 }
 0x40a   : > { %v7161_v54 = vmax.bf16 %v18473_v29, %v7160_v38  ;;  %v18480_v29 = vld [vmem:[%s19188_s18 + $0x1738] ss:$460 sps:$4 sm:$0xff]   ;;  %v18482_v38 = vld [vmem:[%s19188_s18 + $0x173c] ss:$460 sps:$4 sm:$0xff]   ;;  %16316 = vmatprep.subr.bf16.mxu1 %v12475_v34 }
 0x40b   : > { %v20326_v9 = vpop.xlane.xlu0 %764  ;;  %12979 = vmatmul.mubr.f32.gmra.mrb[26].mxu1 %v12676_v3  ;;  %v20382_v3 = vld [vmem:[%s19163_s14 + $0x570] sm:$0xff]  ;;  %v20405_v34 = vld [vmem:[%s19163_s14 + $0x278] sm:$0xff] }
 0x40c   : > { %v7162_v4 = vmax.bf16 %v18474_v31, %v7161_v54  ;;  %v15521_v31 = vcombine.high %v20305_v56, %v20308_v57  ;;  %12983 = vmatprep.mubr.f32.mxu1 %v12681_v35  ;;  %v15591_v54 = vcombine.high %v20313_v61, %v20316_v62  ;;  %v12421_v56 = vmax.bf16 %v15520_v17, %v12420_v21  ;;  %v20372_v61 = vld [vmem:[%s19163_s14 + $0x7a8] sm:$0xff] }
 0x40d   : > { %12510 = vmax.xlane.bf16.xlu1 %v12509_v44  ;;  %v20296_v44 = vld [vmem:[%s19163_s14 + $0x248] sm:$0xff]  ;;  %v12527_v57 = vmax.bf16 %v15590_v19, %v12526_v22  ;;  %v15592_v17 = vcombine.low %v20356_v49, %v20359_v50  ;;  %v15596_v19 = vcombine.low %v20369_v60, %v20372_v61  ;;  %v20398_v22 = vld [vmem:[%s19163_s14 + $0x258] sm:$0xff] }
 0x40e   : > { %v15428_v12 = vcombine.low %v20296_v44, %v20299_v45  ;;  %v7163_v15 = vmax.bf16 %v18476_v43, %v7162_v4  ;;  %v15429_v41 = vcombine.high %v20296_v44, %v20299_v45  ;;  %v12685_v43 = vld [vmem:[#allocation3 + $0x530] sm:$0xff]  ;;  %v15595_v44 = vcombine.high %v10911_v25, %v10915_v26  ;;  %v12684_v62 = vld [vmem:[#allocation3 + $0x528] sm:$0xff] }
 0x40f   : > { %12984 = vmatmul.mubr.f32.gmra.mrb[28].mxu1 %v12680_v37  ;;  %v20364_v45 = vld [vmem:[%s19188_s18 + $0x1590] ss:$460 sps:$4 sm:$0xff]   ;;  %v12423_v1 = vsel %vm12181_vm2, %v15521_v31, 4286644096  ;;  %v18486_v21 = vld [vmem:[%s19188_s18 + $0x1748] ss:$460 sps:$4 sm:$0xff]   ;;  %v12528_v24 = vmax.bf16 %v15591_v54, %v12527_v57  ;;  %v15526_v25 = vcombine.low %v20379_v2, %v20382_v3  ;;  %v12430_v26 = vmax.bf16 %v15525_v58, %v12429_v59 }
 0x410   : > { %v7164_v28 = vmax.bf16 %v18477_v11, %v7163_v15  ;;  %v12285_v42 = vmax.bf16 %v15428_v12, %v12284_v14  ;;  %12988 = vmatprep.mubr.f32.mxu1 %v12685_v43  ;;  %v10679_v12 = vld [vmem:[%s19163_s14 + $0x40] sm:$0xff]  ;;  %v12425_v23 = vmax.bf16 %v12423_v1, %v12421_v56  ;;  %v13139_v43 = vld [vmem:[#allocation3 + $0x28] sm:$0xff]  ;;  %v15431_v54 = vcombine.high %v20348_v39, %v20353_v47 }
 0x411   : > { %v10683_v14 = vld [vmem:[%s19163_s14 + $0x60] sm:$0xff]  ;;  %v20419_v56 = vld [vmem:[%s19163_s14 + $0x68] sm:$0xff] }
 0x412   : > { %v7165_v46 = vmax.bf16 %v18479_v20, %v7164_v28  ;;  %v12286_v11 = vmax.bf16 %v15429_v41, %v12285_v42  ;;  %v12536_v20 = vmax.bf16 %v15595_v44, %v15594_v55  ;;  %v10847_v28 = vld [vmem:[%s19163_s14 + $0x580] sm:$0xff]  ;;  %v15362_v35 = vcombine.low %v10679_v12, %v10683_v14  ;;  %v13140_v41 = vld [vmem:[#allocation3 + $0x30] sm:$0xff]  ;;  %v20416_v44 = vld [vmem:[%s19163_s14 + $0x48] sm:$0xff] }
 0x413   : > { %12989 = vmatmul.mubr.f32.gmra.mrb[30].mxu1 %v12684_v62  ;;  %v15363_v37 = vcombine.high %v10679_v12, %v10683_v14  ;;  %v10751_v57 = vld [vmem:[%s19163_s14 + $0x280] sm:$0xff]  ;;  %v20426_v62 = vld [vmem:[%s19163_s14 + $0x790] sm:$0xff]  ;;  %v20437_v12 = vld [vmem:[%s19163_s14 + $0x588] sm:$0xff] }
 0x414   : > { %v7166_v0 = vmax.bf16 %v18480_v29, %v7165_v46  ;;  %v10851_v29 = vld [vmem:[%s19163_s14 + $0x5a0] sm:$0xff]  ;;  %v12287_v55 = vmax.bf16 %v15430_v5, %v12286_v11  ;;  %13235 = vmatprep.mubr.f32.mxu1 %v13140_v41  ;;  %v12537_v39 = vmax.bf16 %v15596_v19, %v12536_v20  ;;  %v15527_v5 = vcombine.high %v20379_v2, %v20382_v3  ;;  %v20440_v14 = vld [vmem:[%s19163_s14 + $0x5a8] sm:$0xff]  ;;  %v18489_v2 = vld [vmem:[%s19188_s18 + $0x1750] ss:$460 sps:$4 sm:$0xff]  }
 0x415   : > { %12414 = vmax.xlane.bf16.xlu1 %v12413_v33  ;;  %v20344_v33 = vpop.xlane.xlu0 %724  ;;  %v10755_v59 = vld [vmem:[%s19163_s14 + $0x2a0] sm:$0xff]  ;;  %v15530_v47 = vcombine.low %v10847_v28, %v10851_v29  ;;  %v15531_v1 = vcombine.high %v10847_v28, %v10851_v29  ;;  %v12431_v11 = vmax.bf16 %v15526_v25, %v12430_v26  ;;  %v12188_v19 = vmax.bf16 %v15363_v37, %v15362_v35  ;;  %v20451_v25 = vld [vmem:[%s19163_s14 + $0x50] sm:$0xff]  ;;  %v20459_v35 = vld [vmem:[%s19163_s14 + $0x288] sm:$0xff] }
 0x416   : > { %v7167_v15 = vmax.bf16 %v18482_v38, %v7166_v0  ;;  %v15593_v38 = vcombine.high %v20356_v49, %v20359_v50  ;;  %v15597_v49 = vcombine.high %v20369_v60, %v20372_v61  ;;  %v12379_v50 = vpop.xlane.xlu1 %12378  ;;  %v20429_v0 = vld [vmem:[%s19163_s14 + $0x7b0] sm:$0xff]  ;;  %v12529_v61 = vmax.bf16 %v15592_v17, %v12528_v24  ;;  %v10846_v17 = vld [vmem:[%s19163_s14 + $0x578] sm:$0xff]  ;;  %v20462_v37 = vld [vmem:[%s19163_s14 + $0x2a8] sm:$0xff] }
 0x417   : > { %13236 = vmatmul.mubr.f32.vlgmr.msra.gmra.mrb[32].mxu1 %v13139_v43  ;;  %v15435_v26 = vcombine.high %v10751_v57, %v10755_v59  ;;  %v15598_v28 = vcombine.low %v20426_v62, %v20429_v0  ;;  %v15532_v41 = vcombine.low %v20437_v12, %v20440_v14  ;;  %v12440_v43 = vmax.bf16 %v15531_v1, %v15530_v47  ;;  %v10919_v47 = vld [vmem:[%s19163_s14 + $0x7c0] sm:$0xff] }
 0x418   : > { %v7168_v31 = vmax.bf16 %v18483_v10, %v7167_v15  ;;  %v18488_v10 = vld [vmem:[%s19188_s18 + $0x174c] ss:$460 sps:$4 sm:$0xff]   ;;  %v12531_v20 = vsel %vm12181_vm2, %v15593_v38, 4286644096  ;;  %16318 = vmatpush3.bf16.msra.mxu1 %v12379_v50  ;;  %v12538_v38 = vmax.bf16 %v15597_v49, %v12537_v39  ;;  %v18491_v50 = vld [vmem:[%s19188_s18 + $0x1754] ss:$460 sps:$4 sm:$0xff]   ;;  %v15365_v49 = vcombine.high %v20416_v44, %v20419_v56 }
 0x419   : > { %v20384_v4 = vpop.xlane.xlu0 %12282  ;;  %v10923_v1 = vld [vmem:[%s19163_s14 + $0x7e0] sm:$0xff] }
 0x41d   : > { %12522 = vmax.xlane.bf16.xlu1 %v12521_v16  ;;  %v18485_v16 = vld [vmem:[%s19188_s18 + $0x1744] ss:$460 sps:$4 sm:$0xff]   ;;  %v20409_v42 = vpop.xlane.xlu0 %12186 }
 0x41e   : > { %v7169_v58 = vmax.bf16 %v18485_v16, %v7168_v31  ;;  %v15364_v16 = vcombine.low %v20416_v44, %v20419_v56  ;;  %v20456_v31 = vld [vmem:[%s19163_s14 + $0x70] sm:$0xff]  ;;  %v10691_v56 = vld [vmem:[%s19163_s14 + $0xa0] sm:$0xff] }
 0x420   : > { %v7170_v15 = vmax.bf16 %v18486_v21, %v7169_v58  ;;  %v15434_v21 = vcombine.low %v10751_v57, %v10755_v59  ;;  %v6597_v57 = vpop.xlane.xlu1 %6596  ;;  %v12288_v58 = vmax.bf16 %v15431_v54, %v12287_v55  ;;  %v12533_v59 = vmax.bf16 %v12531_v20, %v12529_v61 }
 0x421   : > { %v6481_v24 = vpop.xlane.xlu0 %6480  ;;  %v12189_v39 = vmax.bf16 %v15364_v16, %v12188_v19  ;;  %v15366_v54 = vcombine.low %v20451_v25, %v20456_v31  ;;  %v15436_v55 = vcombine.low %v20459_v35, %v20462_v37  ;;  %v10914_v16 = vld [vmem:[%s19163_s14 + $0x798] sm:$0xff]  ;;  %v12539_v20 = vmax.bf16 %v15598_v28, %v12538_v38  ;;  %v20497_v38 = vld [vmem:[%s19163_s14 + $0x7e8] sm:$0xff] }
 0x422   : > { %16156 = vmatprep.subr.bf16.mxu0 %v6481_v24  ;;  %v7171_v29 = vmax.bf16 %v18488_v10, %v7170_v15  ;;  %v12432_v15 = vmax.bf16 %v15527_v5, %v12431_v11  ;;  %v12296_v61 = vmax.bf16 %v15435_v26, %v15434_v21  ;;  %v10687_v5 = vld [vmem:[%s19163_s14 + $0x80] sm:$0xff]  ;;  %v15599_v11 = vcombine.high %v20426_v62, %v20429_v0  ;;  %v10918_v19 = vld [vmem:[%s19163_s14 + $0x7b8] sm:$0xff]  ;;  %v20485_v21 = vld [vmem:[%s19163_s14 + $0x590] sm:$0xff] }
 0x423   : > { %16158 = vmatpush3.bf16.msra.mxu0 %v6481_v24  ;;  %v18492_v24 = vld [vmem:[%s19188_s18 + $0x1758] ss:$460 sps:$4 sm:$0xff]   ;;  %v20488_v26 = vld [vmem:[%s19163_s14 + $0x5b0] sm:$0xff]  ;;  %v15602_v62 = vcombine.low %v10919_v47, %v10923_v1  ;;  %v15603_v0 = vcombine.high %v10919_v47, %v10923_v1  ;;  %v12190_v28 = vmax.bf16 %v15365_v49, %v12189_v39  ;;  %v20509_v39 = vld [vmem:[%s19163_s14 + $0x88] sm:$0xff] }
 0x424   : > { %16160 = vmatprep.subr.bf16.mxu0 %v6597_v57  ;;  %v7172_v3 = vmax.bf16 %v18489_v2, %v7171_v29  ;;  %v20494_v29 = vld [vmem:[%s19163_s14 + $0x7c8] sm:$0xff]  ;;  %v20506_v49 = vld [vmem:[%s19163_s14 + $0x2b0] sm:$0xff]  ;;  %v6829_v1 = vpop.xlane.xlu1 %6828 }
 0x425   : > { %12426 = vmax.xlane.bf16.xlu1 %v12425_v23  ;;  %v10842_v23 = vld [vmem:[%s19163_s14 + $0x558] sm:$0xff]  ;;  %v6713_v46 = vpop.xlane.xlu0 %6712 }
 0x426   : > { %v15528_v10 = vcombine.low %v10842_v23, %v10846_v17  ;;  %v15529_v60 = vcombine.high %v10842_v23, %v10846_v17  ;;  %v7173_v44 = vmax.bf16 %v18491_v50, %v7172_v3  ;;  %v15533_v23 = vcombine.high %v20437_v12, %v20440_v14 }
 0x427   : > { %v12441_v17 = vmax.bf16 %v15532_v41, %v12440_v43  ;;  %16162 = vmatpush3.bf16.msra.mxu0 %v6597_v57  ;;  %v15437_v12 = vcombine.high %v20459_v35, %v20462_v37  ;;  %v20500_v41 = vld [vmem:[%s19163_s14 + $0x290] sm:$0xff]  ;;  %v12297_v43 = vmax.bf16 %v15436_v55, %v12296_v61  ;;  %v15370_v57 = vcombine.low %v10687_v5, %v10691_v56  ;;  %v20512_v35 = vld [vmem:[%s19163_s14 + $0xa8] sm:$0xff] }
 0x428   : > { %v12433_v2 = vmax.bf16 %v15528_v10, %v12432_v15  ;;  %16164 = vmatprep.subr.bf16.mxu0 %v6713_v46  ;;  %v7174_v3 = vmax.bf16 %v18492_v24, %v7173_v44  ;;  %v12435_v14 = vsel %vm12181_vm2, %v15529_v60, 4286644096  ;;  %v15371_v50 = vcombine.high %v10687_v5, %v10691_v56 }
 0x429   : > { %v21003_v10 = vmax.bf16 %v20375_v63, %v20364_v45  ;;  %v12540_v60 = vmax.bf16 %v15599_v11, %v12539_v20  ;;  %v15534_v37 = vcombine.low %v20485_v21, %v20488_v26  ;;  %v12442_v47 = vmax.bf16 %v15533_v23, %v12441_v17  ;;  %v10682_v23 = vld [vmem:[%s19163_s14 + $0x58] sm:$0xff] }
 0x42a   : > { %v12437_v24 = vmax.bf16 %v12435_v14, %v12433_v2  ;;  %v15601_v45 = vcombine.high %v10914_v16, %v10918_v19  ;;  %v15604_v63 = vcombine.low %v20494_v29, %v20497_v38  ;;  %v12548_v55 = vmax.bf16 %v15603_v0, %v15602_v62  ;;  %v10686_v17 = vld [vmem:[%s19163_s14 + $0x78] sm:$0xff] }
 0x42b   : > { %v7175_v15 = vmax.bf16 %v7174_v3, %v21003_v10  ;;  %16166 = vmatpush3.bf16.msra.mxu0 %v6713_v46  ;;  %v21004_v61 = vcombine.low %v20398_v22, %v20405_v34  ;;  %v21005_v11 = vcombine.high %v20398_v22, %v20405_v34  ;;  %v15367_v46 = vcombine.high %v20451_v25, %v20456_v31  ;;  %v10850_v3 = vld [vmem:[%s19163_s14 + $0x598] sm:$0xff] }
 0x42c   : > { %16168 = vmatprep.subr.bf16.mxu0 %v6829_v1  ;;  %v12191_v56 = vmax.bf16 %v15366_v54, %v12190_v28  ;;  %v6945_v20 = vpop.xlane.xlu0 %6944  ;;  %v12298_v2 = vmax.bf16 %v15437_v12, %v12297_v43  ;;  %v15372_v22 = vcombine.low %v20509_v39, %v20512_v35  ;;  %v12200_v34 = vmax.bf16 %v15371_v50, %v15370_v57  ;;  %v10854_v28 = vld [vmem:[%s19163_s14 + $0x5b8] sm:$0xff]  ;;  %v20543_v12 = vld [vmem:[%s19163_s14 + $0x7d0] sm:$0xff]  ;;  %v20549_v50 = vld [vmem:[%s19163_s14 + $0x5c8] sm:$0xff] }
 0x42d   : > { %12534 = vmax.xlane.bf16.xlu1 %v12533_v59  ;;  %v15600_v59 = vcombine.low %v10914_v16, %v10918_v19  ;;  %7176 = vmax.xlane.bf16.xlu0 %v7175_v15  ;;  %v12289_v5 = vmax.bf16 %v21004_v61, %v12288_v58  ;;  %v12291_v44 = vsel %vm12181_vm2, %v21005_v11, 4286644096  ;;  %v10855_v16 = vld [vmem:[%s19163_s14 + $0x5c0] sm:$0xff]  ;;  %v15438_v58 = vcombine.low %v20500_v41, %v20506_v49  ;;  %v7061_v11 = vpop.xlane.xlu1 %7060 }
 0x42e   : > { %v10859_v19 = vld [vmem:[%s19163_s14 + $0x5e0] sm:$0xff]  ;;  %v15535_v25 = vcombine.high %v20485_v21, %v20488_v26  ;;  %v12443_v31 = vmax.bf16 %v15534_v37, %v12442_v47  ;;  %v15605_v54 = vcombine.high %v20494_v29, %v20497_v38  ;;  %v12543_v0 = vsel %vm12181_vm2, %v15601_v45, 4286644096  ;;  %v20546_v38 = vld [vmem:[%s19163_s14 + $0x7f0] sm:$0xff]  ;;  %v10758_v45 = vld [vmem:[%s19163_s14 + $0x2b8] sm:$0xff] }
 0x42f   : > { %v12541_v62 = vmax.bf16 %v15600_v59, %v12540_v60  ;;  %16170 = vmatpush3.bf16.msra.mxu0 %v6829_v1  ;;  %v12549_v14 = vmax.bf16 %v15604_v63, %v12548_v55  ;;  %v15538_v21 = vcombine.low %v10855_v16, %v10859_v19  ;;  %v15539_v26 = vcombine.high %v10855_v16, %v10859_v19  ;;  %v20552_v59 = vld [vmem:[%s19163_s14 + $0x5e8] sm:$0xff]  ;;  %v10759_v47 = vld [vmem:[%s19163_s14 + $0x2c0] sm:$0xff] }
 0x430   : > { %16172 = vmatprep.subr.bf16.mxu0 %v6945_v20  ;;  %v12293_v43 = vmax.bf16 %v12291_v44, %v12289_v5  ;;  %v15368_v57 = vcombine.low %v10682_v23, %v10686_v17  ;;  %v12192_v29 = vmax.bf16 %v15367_v46, %v12191_v56  ;;  %v15369_v10 = vcombine.high %v10682_v23, %v10686_v17  ;;  %v10763_v1 = vld [vmem:[%s19163_s14 + $0x2e0] sm:$0xff]  ;;  %v10689_v44 = vld [vmem:[%s19163_s14 + $0x90] sm:$0xff] }
 0x431   : > { %v15439_v15 = vcombine.high %v20500_v41, %v20506_v49  ;;  %v12299_v60 = vmax.bf16 %v15438_v58, %v12298_v2  ;;  %v15373_v37 = vcombine.high %v20509_v39, %v20512_v35  ;;  %v12201_v63 = vmax.bf16 %v15372_v22, %v12200_v34  ;;  %v10693_v46 = vld [vmem:[%s19163_s14 + $0xb0] sm:$0xff]  ;;  %v10760_v2 = vld [vmem:[%s19163_s14 + $0x2c8] sm:$0xff] }
 0x432   : > { %v12545_v55 = vmax.bf16 %v12543_v0, %v12541_v62  ;;  %v15536_v61 = vcombine.low %v10850_v3, %v10854_v28  ;;  %v12444_v5 = vmax.bf16 %v15535_v25, %v12443_v31  ;;  %v15606_v41 = vcombine.low %v20543_v12, %v20546_v38  ;;  %v10764_v22 = vld [vmem:[%s19163_s14 + $0x2e8] sm:$0xff]  ;;  %v10922_v0 = vld [vmem:[%s19163_s14 + $0x7d8] sm:$0xff] }
 0x433   : > { %16174 = vmatpush3.bf16.msra.mxu0 %v6945_v20  ;;  %v12550_v49 = vmax.bf16 %v15605_v54, %v12549_v14  ;;  %v15540_v39 = vcombine.low %v20549_v50, %v20552_v59  ;;  %v12452_v35 = vmax.bf16 %v15539_v26, %v15538_v21  ;;  %v12193_v56 = vmax.bf16 %v15368_v57, %v12192_v29 }
 0x434   : > { %16176 = vmatprep.subr.bf16.mxu0 %v7061_v11  ;;  %v15442_v16 = vcombine.low %v10759_v47, %v10763_v1  ;;  %v15443_v19 = vcombine.high %v10759_v47, %v10763_v1  ;;  %v15537_v20 = vcombine.high %v10850_v3, %v10854_v28  ;;  %v12195_v23 = vsel %vm12181_vm2, %v15369_v10, 4286644096  ;;  %v10926_v3 = vld [vmem:[%s19163_s14 + $0x7f8] sm:$0xff] }
 0x435   : > { %12438 = vmax.xlane.bf16.xlu1 %v12437_v24  ;;  %v10754_v24 = vld [vmem:[%s19163_s14 + $0x298] sm:$0xff]  ;;  %12294 = vmax.xlane.bf16.xlu0 %v12293_v43  ;;  %v12300_v34 = vmax.bf16 %v15439_v15, %v12299_v60  ;;  %v15374_v62 = vcombine.low %v10689_v44, %v10693_v46  ;;  %v12202_v25 = vmax.bf16 %v15373_v37, %v12201_v63  ;;  %v10695_v60 = vld [vmem:[%s19163_s14 + $0xc0] sm:$0xff] }
 0x436   : > { %v15440_v17 = vcombine.low %v10754_v24, %v10758_v45  ;;  %v15441_v58 = vcombine.high %v10754_v24, %v10758_v45  ;;  %v15607_v31 = vcombine.high %v20543_v12, %v20546_v38  ;;  %v12445_v54 = vmax.bf16 %v15536_v61, %v12444_v5  ;;  %v10857_v12 = vld [vmem:[%s19163_s14 + $0x5d0] sm:$0xff]  ;;  %v10699_v37 = vld [vmem:[%s19163_s14 + $0xe0] sm:$0xff]  ;;  %v10690_v24 = vld [vmem:[%s19163_s14 + $0x98] sm:$0xff] }
 0x437   : > { %16178 = vmatpush3.bf16.msra.mxu0 %v7061_v11  ;;  %v12551_v28 = vmax.bf16 %v15606_v41, %v12550_v49  ;;  %v15541_v14 = vcombine.high %v20549_v50, %v20552_v59  ;;  %v12453_v21 = vmax.bf16 %v15540_v39, %v12452_v35  ;;  %v12197_v26 = vmax.bf16 %v12195_v23, %v12193_v56  ;;  %v10861_v38 = vld [vmem:[%s19163_s14 + $0x5f0] sm:$0xff]  ;;  %v10694_v45 = vld [vmem:[%s19163_s14 + $0xb8] sm:$0xff]  ;;  %v10696_v35 = vld [vmem:[%s19163_s14 + $0xc8] sm:$0xff] }
 0x438   : > { %v15444_v43 = vcombine.low %v10760_v2, %v10764_v22  ;;  %v12308_v57 = vmax.bf16 %v15443_v19, %v15442_v16  ;;  %v12447_v29 = vsel %vm12181_vm2, %v15537_v20, 4286644096  ;;  %v12303_v10 = vsel %vm12181_vm2, %v15441_v58, 4286644096  ;;  %v10761_v11 = vld [vmem:[%s19163_s14 + $0x2d0] sm:$0xff]  ;;  %v10700_v56 = vld [vmem:[%s19163_s14 + $0xe8] sm:$0xff] }
 0x439   : > { %v15375_v15 = vcombine.high %v10689_v44, %v10693_v46  ;;  %v12301_v47 = vmax.bf16 %v15440_v17, %v12300_v34  ;;  %v12203_v1 = vmax.bf16 %v15374_v62, %v12202_v25  ;;  %v15445_v50 = vcombine.high %v10760_v2, %v10764_v22  ;;  %v10765_v41 = vld [vmem:[%s19163_s14 + $0x2f0] sm:$0xff]  ;;  %v10767_v58 = vld [vmem:[%s19163_s14 + $0x300] sm:$0xff] }
 0x43a   : > { %v15608_v59 = vcombine.low %v10922_v0, %v10926_v3  ;;  %v12449_v63 = vmax.bf16 %v12447_v29, %v12445_v54  ;;  %v15542_v61 = vcombine.low %v10857_v12, %v10861_v38  ;;  %v12454_v5 = vmax.bf16 %v15541_v14, %v12453_v21  ;;  %v10771_v2 = vld [vmem:[%s19163_s14 + $0x320] sm:$0xff]  ;;  %v10766_v29 = vld [vmem:[%s19163_s14 + $0x2f8] sm:$0xff] }
 0x43b   : > { %v12309_v44 = vmax.bf16 %v15444_v43, %v12308_v57  ;;  %v15378_v46 = vcombine.low %v10695_v60, %v10699_v37  ;;  %v15379_v49 = vcombine.high %v10695_v60, %v10699_v37  ;;  %v15609_v39 = vcombine.high %v10922_v0, %v10926_v3  ;;  %v10858_v3 = vld [vmem:[%s19163_s14 + $0x5d8] sm:$0xff] }
 0x43c   : > { %v12305_v16 = vmax.bf16 %v12303_v10, %v12301_v47  ;;  %v15376_v19 = vcombine.low %v10690_v24, %v10694_v45  ;;  %v15377_v20 = vcombine.high %v10690_v24, %v10694_v45  ;;  %v12204_v23 = vmax.bf16 %v15375_v15, %v12203_v1  ;;  %v10762_v57 = vld [vmem:[%s19163_s14 + $0x2d8] sm:$0xff]  ;;  %v10768_v1 = vld [vmem:[%s19163_s14 + $0x308] sm:$0xff]  ;;  %v10697_v45 = vld [vmem:[%s19163_s14 + $0xd0] sm:$0xff] }
 0x43d   : > { %12546 = vmax.xlane.bf16.xlu1 %v12545_v55  ;;  %v12552_v55 = vmax.bf16 %v15607_v31, %v12551_v28  ;;  %12198 = vmax.xlane.bf16.xlu0 %v12197_v26  ;;  %v15446_v17 = vcombine.low %v10761_v11, %v10765_v41  ;;  %v15543_v34 = vcombine.high %v10857_v12, %v10861_v38  ;;  %v12555_v0 = vsel %vm12181_vm2, %v15609_v39, 4286644096  ;;  %v10862_v28 = vld [vmem:[%s19163_s14 + $0x5f8] sm:$0xff]  ;;  %v12688_v24 = vld [vmem:[#allocation3 + $0x20] sm:$0xff] }
 0x43e   : > { %v12455_v62 = vmax.bf16 %v15542_v61, %v12454_v5  ;;  %v12310_v25 = vmax.bf16 %v15445_v50, %v12309_v44  ;;  %v15380_v31 = vcombine.low %v10696_v35, %v10700_v56  ;;  %v12212_v54 = vmax.bf16 %v15379_v49, %v15378_v46  ;;  %v10772_v50 = vld [vmem:[%s19163_s14 + $0x328] sm:$0xff]  ;;  %16096 = vmatprep.mubr.f32.mxu0 %v12688_v24  ;;  %v10703_v39 = vld [vmem:[%s19163_s14 + $0x100] sm:$0xff] }
 0x43f   : > { %v12553_v22 = vmax.bf16 %v15608_v59, %v12552_v55  ;;  %v12205_v14 = vmax.bf16 %v15376_v19, %v12204_v23  ;;  %v12207_v21 = vsel %vm12181_vm2, %v15377_v20, 4286644096  ;;  %v15447_v26 = vcombine.high %v10761_v11, %v10765_v41  ;;  %v10769_v20 = vld [vmem:[%s19163_s14 + $0x310] sm:$0xff] }
 0x440   : > { %v15450_v43 = vcombine.low %v10767_v58, %v10771_v2  ;;  %v15451_v12 = vcombine.high %v10767_v58, %v10771_v2  ;;  %v15544_v10 = vcombine.low %v10858_v3, %v10862_v28  ;;  %v12456_v15 = vmax.bf16 %v15543_v34, %v12455_v62 }
 0x441   : > { %v12557_v38 = vmax.bf16 %v12555_v0, %v12553_v22  ;;  %v12311_v60 = vmax.bf16 %v15446_v17, %v12310_v25  ;;  %v15381_v37 = vcombine.high %v10696_v35, %v10700_v56  ;;  %v12213_v47 = vmax.bf16 %v15380_v31, %v12212_v54  ;;  %v10707_v35 = vld [vmem:[%s19163_s14 + $0x120] sm:$0xff]  ;;  %v10773_v25 = vld [vmem:[%s19163_s14 + $0x330] sm:$0xff]  ;;  %v10704_v31 = vld [vmem:[%s19163_s14 + $0x108] sm:$0xff] }
 0x442   : > { %v15545_v59 = vcombine.high %v10858_v3, %v10862_v28  ;;  %v15448_v55 = vcombine.low %v10762_v57, %v10766_v29  ;;  %v12209_v61 = vmax.bf16 %v12207_v21, %v12205_v14  ;;  %v15452_v5 = vcombine.low %v10768_v1, %v10772_v50  ;;  %v10708_v54 = vld [vmem:[%s19163_s14 + $0x128] sm:$0xff]  ;;  %v10698_v3 = vld [vmem:[%s19163_s14 + $0xd8] sm:$0xff] }
 0x443   : > { %v12320_v11 = vmax.bf16 %v15451_v12, %v15450_v43  ;;  %v12457_v41 = vmax.bf16 %v15544_v10, %v12456_v15  ;;  %v12312_v44 = vmax.bf16 %v15447_v26, %v12311_v60  ;;  %v12214_v49 = vmax.bf16 %v15381_v37, %v12213_v47  ;;  %v10702_v28 = vld [vmem:[%s19163_s14 + $0xf8] sm:$0xff]  ;;  %v10775_v10 = vld [vmem:[%s19163_s14 + $0x340] sm:$0xff] }
 0x444   : > { %v12459_v56 = vsel %vm12181_vm2, %v15545_v59, 4286644096  ;;  %v15453_v19 = vcombine.high %v10768_v1, %v10772_v50  ;;  %v15386_v17 = vcombine.low %v10703_v39, %v10707_v35  ;;  %v15387_v58 = vcombine.high %v10703_v39, %v10707_v35  ;;  %v10779_v15 = vld [vmem:[%s19163_s14 + $0x360] sm:$0xff]  ;;  %v10770_v60 = vld [vmem:[%s19163_s14 + $0x318] sm:$0xff] }
 0x445   : > { %12450 = vmax.xlane.bf16.xlu1 %v12449_v63  ;;  %12306 = vmax.xlane.bf16.xlu0 %v12305_v16  ;;  %v10701_v63 = vld [vmem:[%s19163_s14 + $0xf0] sm:$0xff]  ;;  %v15449_v16 = vcombine.high %v10762_v57, %v10766_v29  ;;  %v12321_v23 = vmax.bf16 %v15452_v5, %v12320_v11  ;;  %v12461_v2 = vmax.bf16 %v12459_v56, %v12457_v41  ;;  %v10774_v37 = vld [vmem:[%s19163_s14 + $0x338] sm:$0xff]  ;;  %v10776_v11 = vld [vmem:[%s19163_s14 + $0x348] sm:$0xff] }
 0x446   : > { %v15382_v46 = vcombine.low %v10697_v45, %v10701_v63  ;;  %v12313_v22 = vmax.bf16 %v15448_v55, %v12312_v44  ;;  %v15383_v34 = vcombine.high %v10697_v45, %v10701_v63  ;;  %v15454_v14 = vcombine.low %v10769_v20, %v10773_v25  ;;  %v10705_v45 = vld [vmem:[%s19163_s14 + $0x110] sm:$0xff]  ;;  %v10780_v41 = vld [vmem:[%s19163_s14 + $0x368] sm:$0xff] }
 0x447   : > { %v12315_v0 = vsel %vm12181_vm2, %v15449_v16, 4286644096  ;;  %v12322_v21 = vmax.bf16 %v15453_v19, %v12321_v23  ;;  %v15388_v26 = vcombine.low %v10704_v31, %v10708_v54  ;;  %v12224_v43 = vmax.bf16 %v15387_v58, %v15386_v17  ;;  %v10709_v63 = vld [vmem:[%s19163_s14 + $0x130] sm:$0xff]  ;;  %v10715_v23 = vld [vmem:[%s19163_s14 + $0x160] sm:$0xff] }
 0x448   : > { %v12215_v62 = vmax.bf16 %v15382_v46, %v12214_v49  ;;  %v12317_v57 = vmax.bf16 %v12315_v0, %v12313_v22  ;;  %v15384_v29 = vcombine.low %v10698_v3, %v10702_v28  ;;  %v15455_v47 = vcombine.high %v10769_v20, %v10773_v25  ;;  %v10711_v20 = vld [vmem:[%s19163_s14 + $0x140] sm:$0xff]  ;;  %v10777_v25 = vld [vmem:[%s19163_s14 + $0x350] sm:$0xff] }
 0x449   : > { %v12323_v1 = vmax.bf16 %v15454_v14, %v12322_v21  ;;  %v15389_v50 = vcombine.high %v10704_v31, %v10708_v54  ;;  %v12225_v59 = vmax.bf16 %v15388_v26, %v12224_v43  ;;  %v15458_v55 = vcombine.low %v10775_v10, %v10779_v15  ;;  %v10712_v14 = vld [vmem:[%s19163_s14 + $0x148] sm:$0xff] }
 0x44a   : > { %v12216_v12 = vmax.bf16 %v15383_v34, %v12215_v62  ;;  %v15456_v44 = vcombine.low %v10770_v60, %v10774_v37  ;;  %v15457_v46 = vcombine.high %v10770_v60, %v10774_v37  ;;  %v15390_v39 = vcombine.low %v10705_v45, %v10709_v63  ;;  %v10706_v34 = vld [vmem:[%s19163_s14 + $0x118] sm:$0xff]  ;;  %v10716_v21 = vld [vmem:[%s19163_s14 + $0x168] sm:$0xff]  ;;  %v10787_v60 = vld [vmem:[%s19163_s14 + $0x3a0] sm:$0xff] }
 0x44b   : > { %v12324_v49 = vmax.bf16 %v15455_v47, %v12323_v1  ;;  %v12226_v35 = vmax.bf16 %v15389_v50, %v12225_v59  ;;  %v15460_v16 = vcombine.low %v10776_v11, %v10780_v41  ;;  %v10710_v62 = vld [vmem:[%s19163_s14 + $0x138] sm:$0xff]  ;;  %v15461_v31 = vcombine.high %v10776_v11, %v10780_v41  ;;  %v10788_v11 = vld [vmem:[%s19163_s14 + $0x3a8] sm:$0xff] }
 0x44c   : > { %v12217_v24 = vmax.bf16 %v15384_v29, %v12216_v12  ;;  %v12327_v58 = vsel %vm12181_vm2, %v15457_v46, 4286644096  ;;  %v15394_v0 = vcombine.low %v10711_v20, %v10715_v23  ;;  %v15392_v43 = vcombine.low %v10706_v34, %v10710_v62  ;;  %v10778_v47 = vld [vmem:[%s19163_s14 + $0x358] sm:$0xff]  ;;  %v10717_v46 = vld [vmem:[%s19163_s14 + $0x170] sm:$0xff] }
 0x44d   : > { %12558 = vmax.xlane.bf16.xlu1 %v12557_v38  ;;  %12210 = vmax.xlane.bf16.xlu0 %v12209_v61  ;;  %v15385_v38 = vcombine.high %v10698_v3, %v10702_v28  ;;  %v15459_v61 = vcombine.high %v10775_v10, %v10779_v15  ;;  %v12325_v17 = vmax.bf16 %v15456_v44, %v12324_v49  ;;  %v10781_v28 = vld [vmem:[%s19163_s14 + $0x370] sm:$0xff]  ;;  %v10783_v15 = vld [vmem:[%s19163_s14 + $0x380] sm:$0xff] }
 0x44e   : > { %v12227_v22 = vmax.bf16 %v15390_v39, %v12226_v35  ;;  %v15395_v3 = vcombine.high %v10711_v20, %v10715_v23  ;;  %v15462_v29 = vcombine.low %v10777_v25, %v10781_v28  ;;  %v15393_v37 = vcombine.high %v10706_v34, %v10710_v62  ;;  %v10713_v44 = vld [vmem:[%s19163_s14 + $0x150] sm:$0xff]  ;;  %v10719_v23 = vld [vmem:[%s19163_s14 + $0x180] sm:$0xff] }
 0x44f   : > { %v12219_v5 = vsel %vm12181_vm2, %v15385_v38, 4286644096  ;;  %v12332_v19 = vmax.bf16 %v15459_v61, %v15458_v55  ;;  %v12329_v26 = vmax.bf16 %v12327_v58, %v12325_v17  ;;  %v15396_v38 = vcombine.low %v10712_v14, %v10716_v21  ;;  %v10723_v17 = vld [vmem:[%s19163_s14 + $0x1a0] sm:$0xff] }
 0x450   : > { %v12221_v56 = vmax.bf16 %v12219_v5, %v12217_v24  ;;  %v12236_v10 = vmax.bf16 %v15395_v3, %v15394_v0  ;;  %v15463_v1 = vcombine.high %v10777_v25, %v10781_v28  ;;  %v15466_v50 = vcombine.low %v10783_v15, %v10787_v60  ;;  %v10784_v5 = vld [vmem:[%s19163_s14 + $0x388] sm:$0xff] }
 0x451   : > { %v12333_v54 = vmax.bf16 %v15460_v16, %v12332_v19  ;;  %v15467_v59 = vcombine.high %v10783_v15, %v10787_v60  ;;  %v15397_v55 = vcombine.high %v10712_v14, %v10716_v21  ;;  %v12231_v41 = vsel %vm12181_vm2, %v15393_v37, 4286644096  ;;  %v10789_v14 = vld [vmem:[%s19163_s14 + $0x3b0] sm:$0xff]  ;;  %v10720_v21 = vld [vmem:[%s19163_s14 + $0x188] sm:$0xff]  ;;  %v13143_v37 = vld [vmem:[#allocation3 + $0xd8] sm:$0xff] }
 0x452   : > { %v12237_v61 = vmax.bf16 %v15396_v38, %v12236_v10  ;;  %v15468_v39 = vcombine.low %v10784_v5, %v10788_v11  ;;  %v15398_v19 = vcombine.low %v10713_v44, %v10717_v46  ;;  %v15469_v34 = vcombine.high %v10784_v5, %v10788_v11 }
 0x453   : > { %v12334_v12 = vmax.bf16 %v15461_v31, %v12333_v54  ;;  %v12344_v35 = vmax.bf16 %v15467_v59, %v15466_v50  ;;  %v15402_v25 = vcombine.low %v10719_v23, %v10723_v17  ;;  %v15403_v31 = vcombine.high %v10719_v23, %v10723_v17  ;;  %v13141_v54 = vld [vmem:[#allocation3 + $0x80] sm:$0xff] }
 0x454   : > { %v12238_v20 = vmax.bf16 %v15397_v55, %v12237_v61  ;;  %v15399_v3 = vcombine.high %v10713_v44, %v10717_v46  ;;  %v10786_v55 = vld [vmem:[%s19163_s14 + $0x398] sm:$0xff]  ;;  %v10792_v23 = vld [vmem:[%s19163_s14 + $0x3c8] sm:$0xff] }
 0x455   : > { %12462 = vmax.xlane.bf16.xlu1 %v12461_v2  ;;  %12318 = vmax.xlane.bf16.xlu0 %v12317_v57  ;;  %v15391_v2 = vcombine.high %v10705_v45, %v10709_v63  ;;  %v10782_v45 = vld [vmem:[%s19163_s14 + $0x378] sm:$0xff]  ;;  %v12335_v63 = vmax.bf16 %v15462_v29, %v12334_v12  ;;  %v12345_v62 = vmax.bf16 %v15468_v39, %v12344_v35  ;;  %v13144_v12 = vld [vmem:[#allocation3 + $0xe0] sm:$0xff]  ;;  %v10721_v39 = vld [vmem:[%s19163_s14 + $0x190] sm:$0xff] }
 0x456   : > { %v15464_v49 = vcombine.low %v10778_v47, %v10782_v45  ;;  %v15465_v58 = vcombine.high %v10778_v47, %v10782_v45  ;;  %v12239_v28 = vmax.bf16 %v15398_v19, %v12238_v20  ;;  %v10718_v29 = vld [vmem:[%s19163_s14 + $0x178] sm:$0xff]  ;;  %v12248_v60 = vmax.bf16 %v15403_v31, %v15402_v25  ;;  %v10795_v45 = vld [vmem:[%s19163_s14 + $0x3e0] sm:$0xff]  ;;  %v10725_v35 = vld [vmem:[%s19163_s14 + $0x1b0] sm:$0xff] }
 0x457   : > { %v12228_v57 = vmax.bf16 %v15391_v2, %v12227_v22  ;;  %v12336_v16 = vmax.bf16 %v15463_v1, %v12335_v63  ;;  %v13142_v2 = vld [vmem:[#allocation3 + $0x88] sm:$0xff]  ;;  %v12346_v10 = vmax.bf16 %v15469_v34, %v12345_v62  ;;  %v13146_v63 = vld [vmem:[#allocation3 + $0x138] sm:$0xff]  ;;  %v13145_v44 = vld [vmem:[#allocation3 + $0x130] sm:$0xff]  ;;  %v15406_v62 = vcombine.low %v10721_v39, %v10725_v35 }
 0x458   : > { %v10785_v22 = vld [vmem:[%s19163_s14 + $0x390] sm:$0xff]  ;;  %13240 = vmatprep.mubr.f32.mxu1 %v13142_v2  ;;  %v12240_v50 = vmax.bf16 %v15399_v3, %v12239_v28  ;;  %v10796_v17 = vld [vmem:[%s19163_s14 + $0x3e8] sm:$0xff] }
 0x459   : > { %v12229_v24 = vmax.bf16 %v15392_v43, %v12228_v57  ;;  %v12337_v0 = vmax.bf16 %v15464_v49, %v12336_v16  ;;  %13241 = vmatmul.mubr.f32.gmra.mrb[34].mxu1 %v13141_v54  ;;  %v12339_v43 = vsel %vm12181_vm2, %v15465_v58, 4286644096  ;;  %v10714_v57 = vld [vmem:[%s19163_s14 + $0x158] sm:$0xff]  ;;  %v15470_v38 = vcombine.low %v10785_v22, %v10789_v14  ;;  %v13147_v2 = vld [vmem:[#allocation3 + $0x188] sm:$0xff] }
 0x45a   : > { %13245 = vmatprep.mubr.f32.mxu1 %v13144_v12  ;;  %v15400_v1 = vcombine.low %v10714_v57, %v10718_v29  ;;  %v15401_v59 = vcombine.high %v10714_v57, %v10718_v29  ;;  %v15471_v61 = vcombine.high %v10785_v22, %v10789_v14  ;;  %v10790_v49 = vld [vmem:[%s19163_s14 + $0x3b8] sm:$0xff]  ;;  %v10727_v14 = vld [vmem:[%s19163_s14 + $0x1c0] sm:$0xff]  ;;  %v15407_v12 = vcombine.high %v10721_v39, %v10725_v35 }
 0x45b   : > { %v12341_v47 = vmax.bf16 %v12339_v43, %v12337_v0  ;;  %v12347_v5 = vmax.bf16 %v15470_v38, %v12346_v10  ;;  %v13148_v58 = vld [vmem:[#allocation3 + $0x190] sm:$0xff]  ;;  %v15472_v22 = vcombine.low %v10786_v55, %v10790_v49  ;;  %v15473_v54 = vcombine.high %v10786_v55, %v10790_v49  ;;  %v13149_v43 = vld [vmem:[#allocation3 + $0x1e0] sm:$0xff] }
 0x45c   : > { %v12241_v46 = vmax.bf16 %v15400_v1, %v12240_v50  ;;  %v12243_v20 = vsel %vm12181_vm2, %v15401_v59, 4286644096  ;;  %v15476_v0 = vcombine.low %v10792_v23, %v10796_v17  ;;  %v10722_v29 = vld [vmem:[%s19163_s14 + $0x198] sm:$0xff]  ;;  %v15477_v10 = vcombine.high %v10792_v23, %v10796_v17 }
 0x45d   : > { %12222 = vmax.xlane.bf16.xlu0 %v12221_v56  ;;  %v12233_v56 = vmax.bf16 %v12231_v41, %v12229_v24  ;;  %13246 = vmatmul.mubr.f32.gmra.mrb[36].mxu1 %v13143_v37  ;;  %v10791_v24 = vld [vmem:[%s19163_s14 + $0x3c0] sm:$0xff]  ;;  %v12348_v34 = vmax.bf16 %v15471_v61, %v12347_v5  ;;  %v10793_v37 = vld [vmem:[%s19163_s14 + $0x3d0] sm:$0xff]  ;;  %v10794_v17 = vld [vmem:[%s19163_s14 + $0x3d8] sm:$0xff] }
 0x45e   : > { %13250 = vmatprep.mubr.f32.mxu1 %v13146_v63  ;;  %v15475_v16 = vcombine.high %v10791_v24, %v10795_v45  ;;  %v12245_v31 = vmax.bf16 %v12243_v20, %v12241_v46  ;;  %v13152_v5 = vld [vmem:[#allocation3 + $0x240] sm:$0xff]  ;;  %v13153_v20 = vld [vmem:[#allocation3 + $0x290] sm:$0xff] }
 0x45f   : > { %v12349_v57 = vmax.bf16 %v15472_v22, %v12348_v34 }
 0x461   : > { %13251 = vmatmul.mubr.f32.gmra.mrb[38].mxu1 %v13145_v44 }
 0x462   : > { %13255 = vmatprep.mubr.f32.mxu1 %v13148_v58  ;;  %v10798_v58 = vld [vmem:[%s19163_s14 + $0x3f8] sm:$0xff] }
 0x465   : > { %12330 = vmax.xlane.bf16.xlu0 %v12329_v26  ;;  %v10724_v26 = vld [vmem:[%s19163_s14 + $0x1a8] sm:$0xff]  ;;  %13256 = vmatmul.mubr.f32.gmra.mrb[40].mxu1 %v13147_v2 }
 0x466   : > { %v15404_v15 = vcombine.low %v10720_v21, %v10724_v26  ;;  %v15405_v11 = vcombine.high %v10720_v21, %v10724_v26  ;;  %v10731_v21 = vld [vmem:[%s19163_s14 + $0x1e0] sm:$0xff]  ;;  %v13150_v26 = vld [vmem:[#allocation3 + $0x1e8] sm:$0xff] }
 0x467   : > { %13260 = vmatprep.mubr.f32.mxu1 %v13150_v26  ;;  %v15410_v50 = vcombine.low %v10727_v14, %v10731_v21  ;;  %v15411_v59 = vcombine.high %v10727_v14, %v10731_v21 }
 0x468   : > { %v12249_v41 = vmax.bf16 %v15404_v15, %v12248_v60  ;;  %v12351_v15 = vsel %vm12181_vm2, %v15473_v54, 4286644096  ;;  %v10726_v60 = vld [vmem:[%s19163_s14 + $0x1b8] sm:$0xff] }
 0x469   : > { %13261 = vmatmul.mubr.f32.gmra.mrb[42].mxu1 %v13149_v43  ;;  %v12353_v63 = vmax.bf16 %v12351_v15, %v12349_v57  ;;  %v15408_v55 = vcombine.low %v10722_v29, %v10726_v60  ;;  %v12260_v49 = vmax.bf16 %v15411_v59, %v15410_v50  ;;  %v15409_v35 = vcombine.high %v10722_v29, %v10726_v60  ;;  %v13156_v54 = vld [vmem:[#allocation3 + $0x2f0] sm:$0xff]  ;;  %v13158_v29 = vld [vmem:[#allocation3 + $0x348] sm:$0xff]  ;;  %v13159_v50 = vld [vmem:[#allocation3 + $0x398] sm:$0xff] }
 0x46a   : > { %v12250_v25 = vmax.bf16 %v15405_v11, %v12249_v41  ;;  %v13151_v11 = vld [vmem:[#allocation3 + $0x238] sm:$0xff]  ;;  %13265 = vmatprep.mubr.f32.mxu1 %v13152_v5  ;;  %v15481_v57 = vcombine.high %v10794_v17, %v10798_v58  ;;  %v13161_v5 = vld [vmem:[#allocation3 + $0x3f0] sm:$0xff] }
 0x46c   : > { %v12251_v38 = vmax.bf16 %v15406_v62, %v12250_v25  ;;  %v12255_v62 = vsel %vm12181_vm2, %v15409_v35, 4286644096  ;;  %v10729_v25 = vld [vmem:[%s19163_s14 + $0x1d0] sm:$0xff]  ;;  %v12363_v60 = vsel %vm12181_vm2, %v15481_v57, 4286644096 }
 0x46d   : > { %12234 = vmax.xlane.bf16.xlu0 %v12233_v56  ;;  %v15474_v56 = vcombine.low %v10791_v24, %v10795_v45  ;;  %v10728_v24 = vld [vmem:[%s19163_s14 + $0x1c8] sm:$0xff]  ;;  %13266 = vmatmul.mubr.f32.gmra.mrb[44].mxu1 %v13151_v11 }
 0x46e   : > { %v10732_v45 = vld [vmem:[%s19163_s14 + $0x1e8] sm:$0xff]  ;;  %v12252_v41 = vmax.bf16 %v15407_v12, %v12251_v38 }
 0x46f   : > { %v12356_v3 = vmax.bf16 %v15475_v16, %v15474_v56  ;;  %v15412_v46 = vcombine.low %v10728_v24, %v10732_v45  ;;  %v13154_v56 = vld [vmem:[#allocation3 + $0x298] sm:$0xff]  ;;  %v15413_v22 = vcombine.high %v10728_v24, %v10732_v45  ;;  %v13157_v12 = vld [vmem:[#allocation3 + $0x340] sm:$0xff]  ;;  %v13166_v35 = vld [vmem:[#allocation3 + $0x4a8] sm:$0xff] }
 0x470   : > { %13270 = vmatprep.mubr.f32.mxu1 %v13154_v56  ;;  %v12253_v23 = vmax.bf16 %v15408_v55, %v12252_v41  ;;  %v13165_v56 = vld [vmem:[#allocation3 + $0x4a0] sm:$0xff] }
 0x471   : > { %v12357_v1 = vmax.bf16 %v15476_v0, %v12356_v3  ;;  %v12261_v34 = vmax.bf16 %v15412_v46, %v12260_v49  ;;  %13271 = vmatmul.mubr.f32.gmra.mrb[46].mxu1 %v13153_v20  ;;  %v15480_v0 = vcombine.low %v10794_v17, %v10798_v58  ;;  %v13155_v3 = vld [vmem:[#allocation3 + $0x2e8] sm:$0xff]  ;;  %v13167_v20 = vld [vmem:[#allocation3 + $0x4f8] sm:$0xff]  ;;  %v13169_v58 = vld [vmem:[#allocation3 + $0x550] sm:$0xff] }
 0x472   : > { %13275 = vmatprep.mubr.f32.mxu1 %v13156_v54  ;;  %v13163_v46 = vld [vmem:[#allocation3 + $0x448] sm:$0xff]  ;;  %v13170_v17 = vld [vmem:[#allocation3 + $0x558] sm:$0xff] }
 0x473   : > { %v12358_v44 = vmax.bf16 %v15477_v10, %v12357_v1  ;;  %v12262_v26 = vmax.bf16 %v15413_v22, %v12261_v34  ;;  %v13160_v1 = vld [vmem:[#allocation3 + $0x3a0] sm:$0xff]  ;;  %v13335_v22 = vld [vmem:[#allocation3 + $0x50] sm:$0xff]  ;;  %v12689_v54 = vld [vmem:[#allocation3 + $0x78] sm:$0xff] }
 0x475   : > { %12342 = vmax.xlane.bf16.xlu0 %v12341_v47  ;;  %v10797_v47 = vld [vmem:[%s19163_s14 + $0x3f0] sm:$0xff]  ;;  %13276 = vmatmul.mubr.f32.gmra.mrb[48].mxu1 %v13155_v3 }
 0x476   : > { %v20653_v19 = vpop.xlane.xlu1 %7292  ;;  %v15478_v61 = vcombine.low %v10793_v37, %v10797_v47  ;;  %v15479_v16 = vcombine.high %v10793_v37, %v10797_v47  ;;  %13280 = vmatprep.mubr.f32.mxu1 %v13158_v29  ;;  %v10730_v37 = vld [vmem:[%s19163_s14 + $0x1d8] sm:$0xff]  ;;  %v12691_v3 = vld [vmem:[#allocation3 + $0x128] sm:$0xff] }
 0x477   : > { %v10734_v47 = vld [vmem:[%s19163_s14 + $0x1f8] sm:$0xff] }
 0x478   : > { %v12359_v2 = vmax.bf16 %v15478_v61, %v12358_v44  ;;  %v15416_v24 = vcombine.low %v10730_v37, %v10734_v47  ;;  %v15417_v55 = vcombine.high %v10730_v37, %v10734_v47  ;;  %v13162_v61 = vld [vmem:[#allocation3 + $0x3f8] sm:$0xff]  ;;  %v13164_v44 = vld [vmem:[#allocation3 + $0x450] sm:$0xff] }
 0x479   : > { %13281 = vmatmul.mubr.f32.gmra.mrb[50].mxu1 %v13157_v12  ;;  %v13334_v12 = vld [vmem:[#allocation3 + $0x48] sm:$0xff]  ;;  %v13347_v47 = vld [vmem:[#allocation3 + $0x158] sm:$0xff] }
 0x47a   : > { %v12360_v14 = vmax.bf16 %v15479_v16, %v12359_v2  ;;  %13285 = vmatprep.mubr.f32.mxu1 %v13160_v1  ;;  %v12267_v41 = vsel %vm12181_vm2, %v15417_v55, 4286644096  ;;  %v13168_v16 = vld [vmem:[#allocation3 + $0x500] sm:$0xff] }
 0x47b   : > { %v12639_v1 = vld [vmem:[#allocation3 + $0x120] sm:$0xff] }
 0x47c   : > { %v12361_v38 = vmax.bf16 %v15480_v0, %v12360_v14  ;;  %v12690_v0 = vld [vmem:[#allocation3 + $0xd0] sm:$0xff] }
 0x47d   : > { %12246 = vmax.xlane.bf16.xlu0 %v12245_v31  ;;  %v10733_v31 = vld [vmem:[%s19163_s14 + $0x1f0] sm:$0xff]  ;;  %13286 = vmatmul.mubr.f32.gmra.mrb[52].mxu1 %v13159_v50 }
 0x47e   : > { %v12487_v28 = vpop.xlane.xlu1 %12486  ;;  %v15414_v21 = vcombine.low %v10729_v25, %v10733_v31  ;;  %v15415_v10 = vcombine.high %v10729_v25, %v10733_v31  ;;  %v12365_v59 = vmax.bf16 %v12363_v60, %v12361_v38  ;;  %13290 = vmatprep.mubr.f32.mxu1 %v13162_v61  ;;  %v12631_v38 = vld [vmem:[#allocation3 + $0x70] sm:$0xff]  ;;  %v12635_v60 = vld [vmem:[#allocation3 + $0xc8] sm:$0xff] }
 0x47f   : > { %16320 = vmatprep.subr.bf16.mxu1 %v12487_v28  ;;  %v12257_v28 = vmax.bf16 %v12255_v62, %v12253_v23 }
 0x480   : > { %v12263_v15 = vmax.bf16 %v15414_v21, %v12262_v26  ;;  %v12693_v21 = vld [vmem:[#allocation3 + $0x1d8] sm:$0xff]  ;;  %v12698_v26 = vld [vmem:[#allocation3 + $0x390] sm:$0xff] }
 0x481   : > { %13291 = vmatmul.mubr.f32.gmra.mrb[54].mxu1 %v13161_v5  ;;  %v12643_v5 = vld [vmem:[#allocation3 + $0x178] sm:$0xff] }
 0x482   : > { %v12264_v45 = vmax.bf16 %v15415_v10, %v12263_v15  ;;  %13295 = vmatprep.mubr.f32.mxu1 %v13164_v44  ;;  %v13338_v10 = vld [vmem:[#allocation3 + $0xa0] sm:$0xff]  ;;  %v12630_v15 = vld [vmem:[#allocation3 + $0x68] sm:$0xff] }
 0x483   : > { %v13350_v44 = vld [vmem:[#allocation3 + $0x1a8] sm:$0xff] }
 0x484   : > { %v12265_v11 = vmax.bf16 %v15416_v24, %v12264_v45  ;;  %v13351_v24 = vld [vmem:[#allocation3 + $0x1b0] sm:$0xff] }
 0x485   : > { %12354 = vmax.xlane.bf16.xlu0 %v12353_v63  ;;  %13296 = vmatmul.mubr.f32.gmra.mrb[56].mxu1 %v13163_v46 }
 0x486   : > { %v12391_v39 = vpop.xlane.xlu1 %12390  ;;  %v12269_v49 = vmax.bf16 %v12267_v41, %v12265_v11  ;;  %13300 = vmatprep.mubr.f32.mxu1 %v13166_v35 }
 0x487   : > { %16322 = vmatpush3.bf16.msra.mxu1 %v12391_v39 }
 0x489   : > { %13301 = vmatmul.mubr.f32.gmra.mrb[58].mxu1 %v13165_v56  ;;  %v12642_v56 = vld [vmem:[#allocation3 + $0x170] sm:$0xff] }
 0x48a   : > { %13305 = vmatprep.mubr.f32.mxu1 %v13168_v16 }
 0x48d   : > { %12258 = vmax.xlane.bf16.xlu0 %v12257_v28  ;;  %13306 = vmatmul.mubr.f32.gmra.mrb[60].mxu1 %v13167_v20  ;;  %v12692_v28 = vld [vmem:[#allocation3 + $0x180] sm:$0xff] }
 0x48e   : > { %v12499_v43 = vpop.xlane.xlu1 %12498  ;;  %13310 = vmatprep.mubr.f32.mxu1 %v13170_v17 }
 0x48f   : > { %16324 = vmatprep.subr.bf16.mxu1 %v12499_v43  ;;  %v12702_v43 = vld [vmem:[#allocation3 + $0x4f0] sm:$0xff] }
 0x491   : > { %13311 = vmatmul.mubr.f32.gmra.mrb[62].mxu1 %v13169_v58 }
 0x492   : > { %13605 = vmatprep.mubr.f32.mxu1 %v13335_v22 }
 0x495   : > { %12366 = vmax.xlane.bf16.xlu0 %v12365_v59  ;;  %v13346_v59 = vld [vmem:[#allocation3 + $0x150] sm:$0xff] }
 0x496   : > { %v12403_v63 = vpop.xlane.xlu1 %12402 }
 0x497   : > { %16326 = vmatpush3.bf16.msra.mxu1 %v12403_v63  ;;  %v12638_v63 = vld [vmem:[#allocation3 + $0x118] sm:$0xff] }
 0x49d   : > { %12270 = vmax.xlane.bf16.xlu0 %v12269_v49 }
 0x49e   : > { %v12511_v39 = vpop.xlane.xlu1 %12510 }
 0x49f   : > { %16328 = vmatprep.subr.bf16.mxu1 %v12511_v39  ;;  %v13355_v39 = vld [vmem:[#allocation3 + $0x208] sm:$0xff] }
 0x4a6   : > { %v12415_v23 = vpop.xlane.xlu1 %12414 }
 0x4a7   : > { %16330 = vmatpush3.bf16.msra.mxu1 %v12415_v23  ;;  %v12647_v23 = vld [vmem:[#allocation3 + $0x1d0] sm:$0xff] }
 0x4ae   : > { %v12523_v2 = vpop.xlane.xlu1 %12522 }
 0x4af   : > { %16332 = vmatprep.subr.bf16.mxu1 %v12523_v2  ;;  %v13354_v2 = vld [vmem:[#allocation3 + $0x200] sm:$0xff] }
 0x4b6   : > { %v12427_v34 = vpop.xlane.xlu1 %12426 }
 0x4b7   : > { %16334 = vmatpush3.bf16.msra.mxu1 %v12427_v34 }
 0x4be   : > { %v12535_v62 = vpop.xlane.xlu1 %12534  ;;  %v7177_v25 = vpop.xlane.xlu0 %7176 }
 0x4bf   : > { %16336 = vmatprep.subr.bf16.mxu1 %v12535_v62  ;;  %16180 = vmatprep.subr.bf16.mxu0 %v7177_v25  ;;  %v13359_v62 = vld [vmem:[#allocation3 + $0x260] sm:$0xff] }
 0x4c0   : > { %16182 = vmatpush3.bf16.msra.mxu0 %v7177_v25 }
 0x4c1   : > { %16184 = vmatprep.subr.bf16.mxu0 %v20653_v19 }
 0x4c4   : > { %16186 = vmatpush3.bf16.msra.mxu0 %v20653_v19  ;;  %v12694_v19 = vld [vmem:[#allocation3 + $0x230] sm:$0xff] }
 0x4c5   : > { %16220 = vmatprep.subr.bf16.mxu0 %v20138_v13  ;;  %v12695_v13 = vld [vmem:[#allocation3 + $0x288] sm:$0xff] }
 0x4c6   : > { %v12439_v31 = vpop.xlane.xlu1 %12438 }
 0x4c7   : > { %16338 = vmatpush3.bf16.msra.mxu1 %v12439_v31  ;;  %16097 = vmatmul.mubr.f32.vlgmr.msra.gmra.mrb[0].mxu0 %v12689_v54  ;;  %v12646_v31 = vld [vmem:[#allocation3 + $0x1c8] sm:$0xff] }
 0x4c8   : > { %16222 = vmatpush3.bf16.msra.mxu0 %v20147_v32  ;;  %16099 = vmatprep.mubr.f32.mxu0 %v12690_v0  ;;  %v12696_v32 = vld [vmem:[#allocation3 + $0x2e0] sm:$0xff] }
 0x4c9   : > { %16224 = vmatprep.subr.bf16.mxu0 %v20159_v53 }
 0x4cb   : > { %16100 = vmatmul.mubr.f32.gmra.mrb[2].mxu0 %v12691_v3  ;;  %v12651_v3 = vld [vmem:[#allocation3 + $0x228] sm:$0xff] }
 0x4cc   : > { %16226 = vmatpush3.bf16.msra.mxu0 %v20169_v6  ;;  %16102 = vmatprep.mubr.f32.mxu0 %v12692_v28  ;;  %v12697_v6 = vld [vmem:[#allocation3 + $0x338] sm:$0xff] }
 0x4cd   : > { %16228 = vmatprep.subr.bf16.mxu0 %v20180_v30  ;;  %v12699_v30 = vld [vmem:[#allocation3 + $0x3e8] sm:$0xff] }
 0x4ce   : > { %v12547_v14 = vpop.xlane.xlu1 %12546 }
 0x4cf   : > { %16340 = vmatprep.subr.bf16.mxu1 %v12547_v14  ;;  %16103 = vmatmul.mubr.f32.gmra.mrb[4].mxu0 %v12693_v21  ;;  %v13358_v14 = vld [vmem:[#allocation3 + $0x258] sm:$0xff] }
 0x4d0   : > { %16230 = vmatpush3.bf16.msra.mxu0 %v20188_v48  ;;  %16105 = vmatprep.mubr.f32.mxu0 %v12694_v19  ;;  %v12700_v48 = vld [vmem:[#allocation3 + $0x440] sm:$0xff]  ;;  %v13363_v19 = vld [vmem:[#allocation3 + $0x2b8] sm:$0xff] }
 0x4d1   : > { %16232 = vmatprep.subr.bf16.mxu0 %v20199_v8 }
 0x4d3   : > { %16106 = vmatmul.mubr.f32.gmra.mrb[6].mxu0 %v12695_v13  ;;  %v12650_v13 = vld [vmem:[#allocation3 + $0x220] sm:$0xff] }
 0x4d4   : > { %16234 = vmatpush3.bf16.msra.mxu0 %v20209_v27  ;;  %16108 = vmatprep.mubr.f32.mxu0 %v12696_v32  ;;  %v12701_v27 = vld [vmem:[#allocation3 + $0x498] sm:$0xff]  ;;  %v12655_v32 = vld [vmem:[#allocation3 + $0x280] sm:$0xff] }
 0x4d5   : > { %16236 = vmatprep.subr.bf16.mxu0 %v20219_v52  ;;  %v12295_v52 = vpop.xlane.xlu0 %12294 }
 0x4d6   : > { %v12451_v53 = vpop.xlane.xlu1 %12450 }
 0x4d7   : > { %16342 = vmatpush3.bf16.msra.mxu1 %v12451_v53  ;;  %16109 = vmatmul.mubr.f32.gmra.mrb[8].mxu0 %v12697_v6  ;;  %v13362_v6 = vld [vmem:[#allocation3 + $0x2b0] sm:$0xff] }
 0x4d8   : > { %16238 = vmatpush3.bf16.msra.mxu0 %v20227_v7  ;;  %16111 = vmatprep.mubr.f32.mxu0 %v12698_v26  ;;  %v12703_v7 = vld [vmem:[#allocation3 + $0x548] sm:$0xff]  ;;  %v13367_v26 = vld [vmem:[#allocation3 + $0x310] sm:$0xff] }
 0x4d9   : > { %16240 = vmatprep.subr.bf16.mxu0 %v20246_v36  ;;  %v12627_v36 = vld [vmem:[#allocation3 + $0x18] sm:$0xff]  ;;  %v12199_v29 = vpop.xlane.xlu0 %12198 }
 0x4db   : > { %16112 = vmatmul.mubr.f32.gmra.mrb[10].mxu0 %v12699_v30  ;;  %v12654_v30 = vld [vmem:[#allocation3 + $0x278] sm:$0xff] }
 0x4dc   : > { %16242 = vmatpush3.bf16.msra.mxu0 %v20255_v51  ;;  %16114 = vmatprep.mubr.f32.mxu0 %v12700_v48  ;;  %v13339_v51 = vld [vmem:[#allocation3 + $0xa8] sm:$0xff]  ;;  %v12659_v48 = vld [vmem:[#allocation3 + $0x2d8] sm:$0xff] }
 0x4dd   : > { %16244 = vmatprep.subr.bf16.mxu0 %v20279_v18  ;;  %v12626_v18 = vld [vmem:[#allocation3 + $0x10] sm:$0xff] }
 0x4de   : > { %v12559_v8 = vpop.xlane.xlu1 %12558 }
 0x4df   : > { %16344 = vmatprep.subr.bf16.mxu1 %v12559_v8  ;;  %16115 = vmatmul.mubr.f32.gmra.mrb[12].mxu0 %v12701_v27  ;;  %v13366_v8 = vld [vmem:[#allocation3 + $0x308] sm:$0xff] }
 0x4e0   : > { %16246 = vmatpush3.bf16.msra.mxu0 %v20292_v40  ;;  %16117 = vmatprep.mubr.f32.mxu0 %v12702_v43  ;;  %v12307_v40 = vpop.xlane.xlu0 %12306  ;;  %v13371_v27 = vld [vmem:[#allocation3 + $0x368] sm:$0xff]  ;;  %v12658_v43 = vld [vmem:[#allocation3 + $0x2d0] sm:$0xff] }
 0x4e1   : > { %16248 = vmatprep.subr.bf16.mxu0 %v20326_v9  ;;  %v13343_v9 = vld [vmem:[#allocation3 + $0x100] sm:$0xff] }
 0x4e3   : > { %16118 = vmatmul.mubr.f32.gmra.mrb[14].mxu0 %v12703_v7 }
 0x4e4   : > { %16250 = vmatpush3.bf16.msra.mxu0 %v20344_v33  ;;  %13058 = vmatprep.mubr.f32.mxu0 %v12627_v36  ;;  %v12211_v37 = vpop.xlane.xlu0 %12210  ;;  %v13342_v33 = vld [vmem:[#allocation3 + $0xf8] sm:$0xff]  ;;  %v13370_v36 = vld [vmem:[#allocation3 + $0x360] sm:$0xff] }
 0x4e5   : > { %16284 = vmatprep.subr.bf16.mxu0 %v20384_v4  ;;  %v12634_v4 = vld [vmem:[#allocation3 + $0xc0] sm:$0xff] }
 0x4e6   : > { %v12463_v57 = vpop.xlane.xlu1 %12462 }
 0x4e7   : > { %16346 = vmatpush3.bf16.msra.mxu1 %v12463_v57  ;;  %13059 = vmatmul.mubr.f32.vlgmr.msra.gmra.mrb[16].mxu0 %v12626_v18  ;;  %v13375_v57 = vld [vmem:[#allocation3 + $0x3c0] sm:$0xff]  ;;  %v13379_v18 = vld [vmem:[#allocation3 + $0x418] sm:$0xff] }
 0x4e8   : > { %16286 = vmatpush3.bf16.msra.mxu0 %v20409_v42  ;;  %13063 = vmatprep.mubr.f32.mxu0 %v12631_v38  ;;  %v12319_v50 = vpop.xlane.xlu0 %12318  ;;  %v15679_v42 = vpop.f32.mrb[0].mxu1  ;;  %v12666_v38 = vld [vmem:[#allocation3 + $0x380] sm:$0xff] }
 0x4e9   : > { %16288 = vmatprep.subr.bf16.mxu0 %v12295_v52  ;;  %v15680_v45 = vpop.f32.mrb[1].mxu1  ;;  %v12663_v52 = vld [vmem:[#allocation3 + $0x330] sm:$0xff] }
 0x4ea   : > { %13606 = vmatmul.mubr.f32.vlgmr.msra.gmra.mrb[64].mxu1 %v13334_v12  ;;  %v20696_v55 = vadd.f32 %v15680_v45, %v15679_v42  ;;  %v15682_v61 = vpop.f32.mrb[2].mxu1  ;;  %v12667_v12 = vld [vmem:[#allocation3 + $0x388] sm:$0xff]  ;;  %v13391_v42 = vld [vmem:[#allocation3 + $0x520] sm:$0xff] }
 0x4eb   : > { %13610 = vmatprep.mubr.f32.mxu1 %v13339_v51  ;;  %13064 = vmatmul.mubr.f32.gmra.mrb[18].mxu0 %v12630_v15  ;;  %v15683_v11 = vpop.f32.mrb[3].mxu1  ;;  %v13374_v51 = vld [vmem:[#allocation3 + $0x3b8] sm:$0xff]  ;;  %v13383_v15 = vld [vmem:[#allocation3 + $0x470] sm:$0xff]  ;;  %v12683_v45 = vld [vmem:[#allocation3 + $0x4e8] sm:$0xff] }
 0x4ec   : > { %16290 = vmatpush3.bf16.msra.mxu0 %v12199_v29  ;;  %13068 = vmatprep.mubr.f32.mxu0 %v12635_v60  ;;  %v20698_v46 = vadd.f32 %v15683_v11, %v15682_v61  ;;  %v15685_v49 = vpop.f32.mrb[4].mxu1  ;;  %v12662_v29 = vld [vmem:[#allocation3 + $0x328] sm:$0xff]  ;;  %v12670_v60 = vld [vmem:[#allocation3 + $0x3d8] sm:$0xff] }
 0x4ed   : > { %16292 = vmatprep.subr.bf16.mxu0 %v12307_v40  ;;  %v15686_v35 = vpop.f32.mrb[5].mxu1  ;;  %v12671_v40 = vld [vmem:[#allocation3 + $0x3e0] sm:$0xff]  ;;  %v13395_v61 = vld [vmem:[#allocation3 + $0x578] sm:$0xff] }
 0x4ee   : > { %13611 = vmatmul.mubr.f32.gmra.mrb[66].mxu1 %v13338_v10  ;;  %v12223_v41 = vpop.xlane.xlu0 %12222  ;;  %v20700_v16 = vadd.f32 %v15686_v35, %v15685_v49  ;;  %v15688_v20 = vpop.f32.mrb[6].mxu1 }
 0x4ef   : > { %13615 = vmatprep.mubr.f32.mxu1 %v13343_v9  ;;  %13069 = vmatmul.mubr.f32.gmra.mrb[20].mxu0 %v12634_v4  ;;  %v15689_v17 = vpop.f32.mrb[7].mxu1  ;;  %v13378_v9 = vld [vmem:[#allocation3 + $0x410] sm:$0xff] }
 0x4f0   : > { %16294 = vmatpush3.bf16.msra.mxu0 %v12211_v37  ;;  %13073 = vmatprep.mubr.f32.mxu0 %v12639_v1  ;;  %v20702_v22 = vadd.f32 %v15689_v17, %v15688_v20  ;;  %v15691_v34 = vpop.f32.mrb[8].mxu1  ;;  %v12675_v37 = vld [vmem:[#allocation3 + $0x438] sm:$0xff]  ;;  %v12674_v4 = vld [vmem:[#allocation3 + $0x430] sm:$0xff] }
 0x4f1   : > { %16296 = vmatprep.subr.bf16.mxu0 %v12319_v50  ;;  %v15692_v25 = vpop.f32.mrb[9].mxu1  ;;  %v12679_v1 = vld [vmem:[#allocation3 + $0x490] sm:$0xff] }
 0x4f2   : > { %13616 = vmatmul.mubr.f32.gmra.mrb[68].mxu1 %v13342_v33  ;;  %v20704_v54 = vadd.f32 %v15692_v25, %v15691_v34  ;;  %v15694_v0 = vpop.f32.mrb[10].mxu1  ;;  %v13382_v33 = vld [vmem:[#allocation3 + $0x468] sm:$0xff] }
 0x4f3   : > { %13620 = vmatprep.mubr.f32.mxu1 %v13347_v47  ;;  %13074 = vmatmul.mubr.f32.gmra.mrb[22].mxu0 %v12638_v63  ;;  %v15695_v28 = vpop.f32.mrb[11].mxu1  ;;  %v13387_v47 = vld [vmem:[#allocation3 + $0x4c8] sm:$0xff]  ;;  %v13390_v63 = vld [vmem:[#allocation3 + $0x518] sm:$0xff] }
 0x4f4   : > { %16298 = vmatpush3.bf16.msra.mxu0 %v12223_v41  ;;  %13078 = vmatprep.mubr.f32.mxu0 %v12643_v5  ;;  %v20706_v21 = vadd.f32 %v15695_v28, %v15694_v0  ;;  %v12682_v5 = vld [vmem:[#allocation3 + $0x4e0] sm:$0xff]  ;;  %v15697_v11 = vpop.f32.mrb[12].mxu1 }
 0x4f5   : > { %v12687_v41 = vld [vmem:[#allocation3 + $0x540] sm:$0xff] }
 0x4f6   : > { %13621 = vmatmul.mubr.f32.gmra.mrb[70].mxu1 %v13346_v59  ;;  %v12331_v58 = vpop.xlane.xlu0 %12330  ;;  %v13386_v59 = vld [vmem:[#allocation3 + $0x4c0] sm:$0xff] }
 0x4f7   : > { %13625 = vmatprep.mubr.f32.mxu1 %v13351_v24  ;;  %13079 = vmatmul.mubr.f32.gmra.mrb[24].mxu0 %v12642_v56  ;;  %v12678_v24 = vld [vmem:[#allocation3 + $0x488] sm:$0xff]  ;;  %v12686_v56 = vld [vmem:[#allocation3 + $0x538] sm:$0xff] }
 0x4f8   : > { %16300 = vmatprep.subr.bf16.mxu0 %v12331_v58  ;;  %13083 = vmatprep.mubr.f32.mxu0 %v12647_v23  ;;  %v13333_v23 = vld [vmem:[#allocation3 + $0x40] sm:$0xff] }
 0x4fa   : > { %13626 = vmatmul.mubr.f32.gmra.mrb[72].mxu1 %v13350_v44  ;;  %v15698_v44 = vpop.f32.mrb[13].mxu1 }
 0x4fb   : > { %13630 = vmatprep.mubr.f32.mxu1 %v13355_v39  ;;  %13084 = vmatmul.mubr.f32.gmra.mrb[26].mxu0 %v12646_v31  ;;  %v13394_v39 = vld [vmem:[#allocation3 + $0x570] sm:$0xff]  ;;  %v20708_v35 = vadd.f32 %v15698_v44, %v15697_v11  ;;  %v15700_v20 = vpop.f32.mrb[14].mxu1 }
 0x4fc   : > { %13088 = vmatprep.mubr.f32.mxu0 %v12651_v3  ;;  %v15701_v17 = vpop.f32.mrb[15].mxu1 }
 0x4fd   : > { %v20710_v58 = vadd.f32 %v15701_v17, %v15700_v20  ;;  %v13365_v20 = vld [vmem:[#allocation3 + $0x300] sm:$0xff] }
 0x4fe   : > { %13631 = vmatmul.mubr.f32.gmra.mrb[74].mxu1 %v13354_v2  ;;  %v12235_v53 = vpop.xlane.xlu0 %12234  ;;  %v15703_v2 = vpop.f32.mrb[16].mxu1 }
 0x4ff   : > { %13635 = vmatprep.mubr.f32.mxu1 %v13359_v62  ;;  %13089 = vmatmul.mubr.f32.gmra.mrb[28].mxu0 %v12650_v13  ;;  %v15704_v34 = vpop.f32.mrb[17].mxu1 }
 0x500   : > { %16302 = vmatpush3.bf16.msra.mxu0 %v12235_v53  ;;  %13093 = vmatprep.mubr.f32.mxu0 %v12655_v32  ;;  %v20712_v25 = vadd.f32 %v15704_v34, %v15703_v2  ;;  %v15706_v31 = vpop.f32.mrb[18].mxu1  ;;  %v13332_v32 = vld [vmem:[#allocation3 + $0x38] sm:$0xff] }
 0x501   : > { %v15707_v0 = vpop.f32.mrb[19].mxu1  ;;  %v13337_v53 = vld [vmem:[#allocation3 + $0x98] sm:$0xff] }
 0x502   : > { %13636 = vmatmul.mubr.f32.gmra.mrb[76].mxu1 %v13358_v14  ;;  %v20714_v3 = vadd.f32 %v15707_v0, %v15706_v31  ;;  %v15709_v28 = vpop.f32.mrb[20].mxu1  ;;  %v13364_v2 = vld [vmem:[#allocation3 + $0x2f8] sm:$0xff] }
 0x503   : > { %13640 = vmatprep.mubr.f32.mxu1 %v13363_v19  ;;  %13094 = vmatmul.mubr.f32.gmra.mrb[30].mxu0 %v12654_v30  ;;  %v15710_v14 = vpop.f32.mrb[21].mxu1 }
 0x504   : > { %13098 = vmatprep.mubr.f32.mxu0 %v12659_v48  ;;  %v20716_v13 = vadd.f32 %v15710_v14, %v15709_v28  ;;  %v13368_v28 = vld [vmem:[#allocation3 + $0x350] sm:$0xff] }
 0x506   : > { %13641 = vmatmul.mubr.f32.gmra.mrb[78].mxu1 %v13362_v6  ;;  %v12343_v7 = vpop.xlane.xlu0 %12342  ;;  %v15712_v6 = vpop.f32.mrb[22].mxu1 }
 0x507   : > { %13645 = vmatprep.mubr.f32.mxu1 %v13367_v26  ;;  %13099 = vmatmul.mubr.f32.gmra.mrb[32].mxu0 %v12658_v43  ;;  %v15713_v26 = vpop.f32.mrb[23].mxu1  ;;  %v13341_v43 = vld [vmem:[#allocation3 + $0xf0] sm:$0xff] }
 0x508   : > { %16304 = vmatprep.subr.bf16.mxu0 %v12343_v7  ;;  %13103 = vmatprep.mubr.f32.mxu0 %v12663_v52  ;;  %v20718_v30 = vadd.f32 %v15713_v26, %v15712_v6  ;;  %v15715_v48 = vpop.f32.mrb[24].mxu1  ;;  %v13377_v26 = vld [vmem:[#allocation3 + $0x408] sm:$0xff] }
 0x50a   : > { %13646 = vmatmul.mubr.f32.gmra.mrb[80].mxu1 %v13366_v8  ;;  %v13336_v8 = vld [vmem:[#allocation3 + $0x90] sm:$0xff] }
 0x50b   : > { %13650 = vmatprep.mubr.f32.mxu1 %v13371_v27  ;;  %13104 = vmatmul.mubr.f32.gmra.mrb[34].mxu0 %v12662_v29  ;;  %v15716_v27 = vpop.f32.mrb[25].mxu1 }
 0x50c   : > { %13108 = vmatprep.mubr.f32.mxu0 %v12667_v12  ;;  %v20720_v52 = vadd.f32 %v15716_v27, %v15715_v48  ;;  %v15718_v7 = vpop.f32.mrb[26].mxu1  ;;  %v13340_v12 = vld [vmem:[#allocation3 + $0xe8] sm:$0xff]  ;;  %v13376_v27 = vld [vmem:[#allocation3 + $0x400] sm:$0xff] }
 0x50e   : > { %13651 = vmatmul.mubr.f32.gmra.mrb[82].mxu1 %v13370_v36  ;;  %v12247_v10 = vpop.xlane.xlu0 %12246  ;;  %v15719_v36 = vpop.f32.mrb[27].mxu1 }
 0x50f   : > { %13655 = vmatprep.mubr.f32.mxu1 %v13375_v57  ;;  %13109 = vmatmul.mubr.f32.gmra.mrb[36].mxu0 %v12666_v38  ;;  %v20722_v57 = vadd.f32 %v15719_v36, %v15718_v7  ;;  %v15721_v29 = vpop.f32.mrb[28].mxu1  ;;  %v13381_v7 = vld [vmem:[#allocation3 + $0x460] sm:$0xff] }
 0x510   : > { %16306 = vmatpush3.bf16.msra.mxu0 %v12247_v10  ;;  %13113 = vmatprep.mubr.f32.mxu0 %v12671_v40 }
 0x512   : > { %13656 = vmatmul.mubr.f32.gmra.mrb[84].mxu1 %v13374_v51  ;;  %v15722_v51 = vpop.f32.mrb[29].mxu1 }
 0x513   : > { %13660 = vmatprep.mubr.f32.mxu1 %v13379_v18  ;;  %13114 = vmatmul.mubr.f32.gmra.mrb[38].mxu0 %v12670_v60  ;;  %v13345_v18 = vld [vmem:[#allocation3 + $0x148] sm:$0xff]  ;;  %v20724_v38 = vadd.f32 %v15722_v51, %v15721_v29  ;;  %v15724_v40 = vpop.f32.mrb[30].mxu1  ;;  %v13349_v60 = vld [vmem:[#allocation3 + $0x1a0] sm:$0xff] }
 0x514   : > { %13118 = vmatprep.mubr.f32.mxu0 %v12675_v37  ;;  %v15725_v10 = vpop.f32.mrb[31].mxu1 }
 0x515   : > { %v15839_v37 = vpop.f32.mrb[32].mxu1 }
 0x516   : > { %13661 = vmatmul.mubr.f32.gmra.mrb[86].mxu1 %v13378_v9  ;;  %v12355_v50 = vpop.xlane.xlu0 %12354  ;;  %v13344_v9 = vld [vmem:[#allocation3 + $0x140] sm:$0xff] }
 0x517   : > { %13665 = vmatprep.mubr.f32.mxu1 %v13383_v15  ;;  %13119 = vmatmul.mubr.f32.gmra.mrb[40].mxu0 %v12674_v4  ;;  %v20726_v15 = vadd.f32 %v15725_v10, %v15724_v40 }
 0x518   : > { %16308 = vmatprep.subr.bf16.mxu0 %v12355_v50  ;;  %13123 = vmatprep.mubr.f32.mxu0 %v12679_v1  ;;  %v13353_v1 = vld [vmem:[#allocation3 + $0x1f8] sm:$0xff] }
 0x51a   : > { %13666 = vmatmul.mubr.f32.gmra.mrb[88].mxu1 %v13382_v33  ;;  %v15840_v33 = vpop.f32.mrb[33].mxu1 }
 0x51b   : > { %13670 = vmatprep.mubr.f32.mxu1 %v13387_v47  ;;  %13124 = vmatmul.mubr.f32.gmra.mrb[42].mxu0 %v12678_v24  ;;  %v13348_v47 = vld [vmem:[#allocation3 + $0x198] sm:$0xff]  ;;  %v20728_v4 = vadd.f32 %v15840_v33, %v15839_v37  ;;  %v13389_v37 = vld [vmem:[#allocation3 + $0x510] sm:$0xff] }
 0x51c   : > { %13128 = vmatprep.mubr.f32.mxu0 %v12683_v45  ;;  %v13357_v45 = vld [vmem:[#allocation3 + $0x250] sm:$0xff] }
 0x51e   : > { %13671 = vmatmul.mubr.f32.gmra.mrb[90].mxu1 %v13386_v59  ;;  %v12259_v49 = vpop.xlane.xlu0 %12258 }
 0x51f   : > { %13675 = vmatprep.mubr.f32.mxu1 %v13391_v42  ;;  %13129 = vmatmul.mubr.f32.gmra.mrb[44].mxu0 %v12682_v5  ;;  %v13352_v42 = vld [vmem:[#allocation3 + $0x1f0] sm:$0xff]  ;;  %v13356_v5 = vld [vmem:[#allocation3 + $0x248] sm:$0xff] }
 0x520   : > { %16310 = vmatpush3.bf16.msra.mxu0 %v12259_v49  ;;  %13133 = vmatprep.mubr.f32.mxu0 %v12687_v41  ;;  %v13361_v41 = vld [vmem:[#allocation3 + $0x2a8] sm:$0xff] }
 0x522   : > { %13676 = vmatmul.mubr.f32.gmra.mrb[92].mxu1 %v13390_v63 }
 0x523   : > { %13680 = vmatprep.mubr.f32.mxu1 %v13395_v61  ;;  %13134 = vmatmul.mubr.f32.gmra.mrb[46].mxu0 %v12686_v56 }
 0x524   : > { %13460 = vmatprep.mubr.f32.mxu0 %v13333_v23 }
 0x526   : > { %13681 = vmatmul.mubr.f32.gmra.mrb[94].mxu1 %v13394_v39  ;;  %v12367_v62 = vpop.xlane.xlu0 %12366  ;;  %v13360_v39 = vld [vmem:[#allocation3 + $0x2a0] sm:$0xff] }
 0x527   : > { %16312 = vmatprep.subr.bf16.mxu0 %v12367_v62  ;;  %v13369_v62 = vld [vmem:[#allocation3 + $0x358] sm:$0xff] }
 0x52c   : > { %v15842_v50 = vpop.f32.mrb[34].mxu1 }
 0x52d   : > { %v15843_v59 = vpop.f32.mrb[35].mxu1 }
 0x52e   : > { %v12271_v19 = vpop.xlane.xlu0 %12270  ;;  %v20730_v24 = vadd.f32 %v15843_v59, %v15842_v50  ;;  %v13393_v59 = vld [vmem:[#allocation3 + $0x568] sm:$0xff] }
 0x52f   : > { %16314 = vmatpush3.bf16.msra.mxu0 %v12271_v19  ;;  %v13373_v19 = vld [vmem:[#allocation3 + $0x3b0] sm:$0xff] }
 0x530   : > { %v15845_v63 = vpop.f32.mrb[36].mxu1 }
 0x531   : > { %v15846_v61 = vpop.f32.mrb[37].mxu1 }
 0x532   : > { %13461 = vmatmul.mubr.f32.vlgmr.msra.gmra.mrb[48].mxu0 %v13332_v32  ;;  %v20732_v11 = vadd.f32 %v15846_v61, %v15845_v63  ;;  %v13392_v63 = vld [vmem:[#allocation3 + $0x560] sm:$0xff] }
 0x533   : > { %13465 = vmatprep.mubr.f32.mxu0 %v13337_v53  ;;  %v13372_v53 = vld [vmem:[#allocation3 + $0x3a8] sm:$0xff] }
 0x534   : > { %v15848_v44 = vpop.f32.mrb[38].mxu1 }
 0x535   : > { %v15849_v49 = vpop.f32.mrb[39].mxu1 }
 0x536   : > { %13466 = vmatmul.mubr.f32.gmra.mrb[50].mxu0 %v13336_v8  ;;  %v20734_v56 = vadd.f32 %v15849_v49, %v15848_v44 }
 0x537   : > { %13470 = vmatprep.mubr.f32.mxu0 %v13341_v43 }
 0x538   : > { %v15851_v23 = vpop.f32.mrb[40].mxu1 }
 0x539   : > { %v15852_v17 = vpop.f32.mrb[41].mxu1 }
 0x53a   : > { %13471 = vmatmul.mubr.f32.gmra.mrb[52].mxu0 %v13340_v12  ;;  %v20736_v34 = vadd.f32 %v15852_v17, %v15851_v23  ;;  %v13380_v12 = vld [vmem:[#allocation3 + $0x458] sm:$0xff] }
 0x53b   : > { %13475 = vmatprep.mubr.f32.mxu0 %v13345_v18  ;;  %v13385_v18 = vld [vmem:[#allocation3 + $0x4b8] sm:$0xff] }
 0x53c   : > { %v15854_v31 = vpop.f32.mrb[42].mxu1 }
 0x53d   : > { %v15855_v0 = vpop.f32.mrb[43].mxu1 }
 0x53e   : > { %13476 = vmatmul.mubr.f32.gmra.mrb[54].mxu0 %v13344_v9  ;;  %v20738_v14 = vadd.f32 %v15855_v0, %v15854_v31  ;;  %v13384_v9 = vld [vmem:[#allocation3 + $0x4b0] sm:$0xff] }
 0x53f   : > { %13480 = vmatprep.mubr.f32.mxu0 %v13349_v60 }
 0x540   : > { %v15857_v32 = vpop.f32.mrb[44].mxu1 }
 0x541   : > { %v15858_v6 = vpop.f32.mrb[45].mxu1 }
 0x542   : > { %13481 = vmatmul.mubr.f32.gmra.mrb[56].mxu0 %v13348_v47  ;;  %v20740_v48 = vadd.f32 %v15858_v6, %v15857_v32 }
 0x543   : > { %13485 = vmatprep.mubr.f32.mxu0 %v13353_v1  ;;  %v13388_v1 = vld [vmem:[#allocation3 + $0x508] sm:$0xff] }
 0x544   : > { %v15860_v8 = vpop.f32.mrb[46].mxu1 }
 0x545   : > { %v15861_v43 = vpop.f32.mrb[47].mxu1 }
 0x546   : > { %13486 = vmatmul.mubr.f32.gmra.mrb[58].mxu0 %v13352_v42  ;;  %v20742_v36 = vadd.f32 %v15861_v43, %v15860_v8 }
 0x547   : > { %13490 = vmatprep.mubr.f32.mxu0 %v13357_v45 }
 0x548   : > { %v15863_v29 = vpop.f32.mrb[48].mxu1 }
 0x549   : > { %v15864_v51 = vpop.f32.mrb[49].mxu1 }
 0x54a   : > { %13491 = vmatmul.mubr.f32.gmra.mrb[60].mxu0 %v13356_v5  ;;  %v20744_v40 = vadd.f32 %v15864_v51, %v15863_v29 }
 0x54b   : > { %13495 = vmatprep.mubr.f32.mxu0 %v13361_v41 }
 0x54c   : > { %v15866_v10 = vpop.f32.mrb[50].mxu1 }
 0x54d   : > { %v15867_v60 = vpop.f32.mrb[51].mxu1 }
 0x54e   : > { %13496 = vmatmul.mubr.f32.gmra.mrb[62].mxu0 %v13360_v39  ;;  %v20746_v33 = vadd.f32 %v15867_v60, %v15866_v10 }
 0x54f   : > { %13500 = vmatprep.mubr.f32.mxu0 %v13365_v20 }
 0x550   : > { %v15869_v47 = vpop.f32.mrb[52].mxu1 }
 0x551   : > { %v15870_v50 = vpop.f32.mrb[53].mxu1 }
 0x552   : > { %13501 = vmatmul.mubr.f32.gmra.mrb[64].mxu0 %v13364_v2  ;;  %v20748_v42 = vadd.f32 %v15870_v50, %v15869_v47 }
 0x553   : > { %13505 = vmatprep.mubr.f32.mxu0 %v13369_v62 }
 0x554   : > { %v15872_v45 = vpop.f32.mrb[54].mxu1 }
 0x555   : > { %v15873_v61 = vpop.f32.mrb[55].mxu1 }
 0x556   : > { %13506 = vmatmul.mubr.f32.gmra.mrb[66].mxu0 %v13368_v28  ;;  %v20750_v5 = vadd.f32 %v15873_v61, %v15872_v45 }
 0x557   : > { %13510 = vmatprep.mubr.f32.mxu0 %v13373_v19  ;;  %v18540_v19 = vmov 0.0|0.0  }
 0x558   : > { %v15875_v41 = vpop.f32.mrb[56].mxu1  ;;  %16347 = vmatprep.subr.bf16.mxu0 %v18540_v19 }
 0x559   : > { %v15876_v44 = vpop.f32.mrb[57].mxu1 }
 0x55a   : > { %13511 = vmatmul.mubr.f32.gmra.mrb[68].mxu0 %v13372_v53  ;;  %v20752_v49 = vadd.f32 %v15876_v44, %v15875_v41 }
 0x55b   : > { %13515 = vmatprep.mubr.f32.mxu0 %v13377_v26 }
 0x55c   : > { %v15878_v39 = vpop.f32.mrb[58].mxu1 }
 0x55d   : > { %v15879_v20 = vpop.f32.mrb[59].mxu1 }
 0x55e   : > { %13516 = vmatmul.mubr.f32.gmra.mrb[70].mxu0 %v13376_v27  ;;  %v20754_v23 = vadd.f32 %v15879_v20, %v15878_v39 }
 0x55f   : > { %13520 = vmatprep.mubr.f32.mxu0 %v13381_v7 }
 0x560   : > { %v15881_v17 = vpop.f32.mrb[60].mxu1 }
 0x561   : > { %v15882_v2 = vpop.f32.mrb[61].mxu1 }
 0x562   : > { %13521 = vmatmul.mubr.f32.gmra.mrb[72].mxu0 %v13380_v12  ;;  %v20756_v62 = vadd.f32 %v15882_v2, %v15881_v17 }
 0x563   : > { %13525 = vmatprep.mubr.f32.mxu0 %v13385_v18 }
 0x564   : > { %v15884_v31 = vpop.f32.mrb[62].mxu1 }
 0x565   : > { %v15885_v0 = vpop.f32.mrb[63].mxu1 }
 0x566   : > { %13526 = vmatmul.mubr.f32.gmra.mrb[74].mxu0 %v13384_v9  ;;  %v20758_v28 = vadd.f32 %v15885_v0, %v15884_v31 }
 0x567   : > { %13530 = vmatprep.mubr.f32.mxu0 %v13389_v37 }
 0x56a   : > { %13531 = vmatmul.mubr.f32.gmra.mrb[76].mxu0 %v13388_v1 }
 0x56b   : > { %13535 = vmatprep.mubr.f32.mxu0 %v13393_v59 }
 0x56e   : > { %13536 = vmatmul.mubr.f32.gmra.mrb[78].mxu0 %v13392_v63 }
 0x59a   : > { %v16098_v32 = vpop.f32.mrb[0].mxu0 }
 0x59b   : > { %v12921_v53 = vadd.f32 %v16098_v32, %v20698_v46  ;;  %v12770_v6 = vpop.f32.mrb[1].mxu0 }
 0x59c   : > { %v12916_v26 = vadd.f32 %v20696_v55, %v12770_v6 }
 0x59e   : > { %v16101_v8 = vpop.f32.mrb[2].mxu0 }
 0x59f   : > { %v12931_v27 = vadd.f32 %v16101_v8, %v20702_v22  ;;  %v12780_v43 = vpop.f32.mrb[3].mxu0 }
 0x5a0   : > { %v12926_v7 = vadd.f32 %v20700_v16, %v12780_v43 }
 0x5a2   : > { %v16104_v29 = vpop.f32.mrb[4].mxu0 }
 0x5a3   : > { %v20766_v12 = vadd.f32 %v16104_v29, %v20706_v21  ;;  %v12790_v51 = vpop.f32.mrb[5].mxu0 }
 0x5a4   : > { %v12936_v18 = vadd.f32 %v20704_v54, %v12790_v51 }
 0x5a6   : > { %v16107_v10 = vpop.f32.mrb[6].mxu0 }
 0x5a7   : > { %v20770_v9 = vadd.f32 %v16107_v10, %v20710_v58  ;;  %v12800_v46 = vpop.f32.mrb[7].mxu0 }
 0x5a8   : > { %v20773_v55 = vadd.f32 %v20708_v35, %v12800_v46 }
 0x5aa   : > { %v16110_v60 = vpop.f32.mrb[8].mxu0 }
 0x5ab   : > { %v20776_v22 = vadd.f32 %v16110_v60, %v20714_v3  ;;  %v12810_v16 = vpop.f32.mrb[9].mxu0 }
 0x5ac   : > { %v20779_v37 = vadd.f32 %v20712_v25, %v12810_v16 }
 0x5ae   : > { %v16113_v21 = vpop.f32.mrb[10].mxu0 }
 0x5af   : > { %v12820_v47 = vpop.f32.mrb[11].mxu0  ;;  %v20782_v54 = vadd.f32 %v16113_v21, %v20718_v30 }
 0x5b0   : > { %v20785_v58 = vadd.f32 %v20716_v13, %v12820_v47 }
 0x5b2   : > { %v16116_v1 = vpop.f32.mrb[12].mxu0 }
 0x5b3   : > { %v12830_v50 = vpop.f32.mrb[13].mxu0  ;;  %v20788_v35 = vadd.f32 %v16116_v1, %v20722_v57 }
 0x5b4   : > { %v20791_v3 = vadd.f32 %v20720_v52, %v12830_v50 }
 0x5b6   : > { %v16119_v59 = vpop.f32.mrb[14].mxu0 }
 0x5b7   : > { %v12840_v45 = vpop.f32.mrb[15].mxu0  ;;  %v20794_v25 = vadd.f32 %v16119_v59, %v20726_v15 }
 0x5b8   : > { %v20797_v63 = vadd.f32 %v20724_v38, %v12840_v45 }
 0x5ba   : > { %v15759_v13 = vpop.f32.mrb[16].mxu0 }
 0x5bb   : > { %v15760_v44 = vpop.f32.mrb[17].mxu0 }
 0x5bc   : > { %v15761_v39 = vadd.f32 %v15760_v44, %v15759_v13 }
 0x5bd   : > { %v15999_v30 = vpop.f32.mrb[64].mxu1 }
 0x5be   : > { %v16000_v61 = vpop.f32.mrb[65].mxu1  ;;  %v13061_v17 = vadd.f32 %v15761_v39, %v12916_v26  ;;  %v15762_v52 = vpop.f32.mrb[18].mxu0 }
 0x5bf   : > { %v20799_v41 = vadd.f32 %v16000_v61, %v15999_v30  ;;  %v15763_v31 = vpop.f32.mrb[19].mxu0 }
 0x5c0   : > { %v20804_v15 = vadd.f32 %v20728_v4, %v13061_v17  ;;  %v15764_v0 = vadd.f32 %v15763_v31, %v15762_v52  ;;  %v18542_v31 = vmov 0.0  }
 0x5c1   : > { %v16002_v57 = vpop.f32.mrb[66].mxu1  ;;  %16152 = vmatprep.mubr.msk.f32.mxu0 %vm18541_vm3, %v18542_v31 }
 0x5c2   : > { %v16003_v20 = vpop.f32.mrb[67].mxu1  ;;  %v13066_v6 = vadd.f32 %v15764_v0, %v12921_v53  ;;  %v15765_v8 = vpop.f32.mrb[20].mxu0 }
 0x5c3   : > { %v20801_v2 = vadd.f32 %v16003_v20, %v16002_v57  ;;  %v15766_v29 = vpop.f32.mrb[21].mxu0 }
 0x5c4   : > { %v20809_v51 = vadd.f32 %v20730_v24, %v13066_v6  ;;  %v15767_v10 = vadd.f32 %v15766_v29, %v15765_v8 }
 0x5c5   : > { %v16005_v38 = vpop.f32.mrb[68].mxu1 }
 0x5c6   : > { %v16006_v32 = vpop.f32.mrb[69].mxu1  ;;  %v13071_v60 = vadd.f32 %v15767_v10, %v12926_v7  ;;  %v15768_v16 = vpop.f32.mrb[22].mxu0 }
 0x5c7   : > { %v20806_v43 = vadd.f32 %v16006_v32, %v16005_v38  ;;  %v15769_v4 = vpop.f32.mrb[23].mxu0 }
 0x5c8   : > { %v20814_v47 = vadd.f32 %v20732_v11, %v13071_v60  ;;  %v15770_v1 = vadd.f32 %v15769_v4, %v15768_v16 }
 0x5c9   : > { %v16008_v26 = vpop.f32.mrb[70].mxu1 }
 0x5ca   : > { %v16009_v46 = vpop.f32.mrb[71].mxu1  ;;  %v13076_v59 = vadd.f32 %v15770_v1, %v12931_v27  ;;  %v15771_v45 = vpop.f32.mrb[24].mxu0 }
 0x5cb   : > { %v20811_v21 = vadd.f32 %v16009_v46, %v16008_v26  ;;  %v15772_v24 = vpop.f32.mrb[25].mxu0 }
 0x5cc   : > { %v20819_v61 = vadd.f32 %v20734_v56, %v13076_v59  ;;  %v15773_v13 = vadd.f32 %v15772_v24, %v15771_v45 }
 0x5cd   : > { %v16011_v53 = vpop.f32.mrb[72].mxu1 }
 0x5ce   : > { %v16012_v50 = vpop.f32.mrb[73].mxu1  ;;  %v13081_v39 = vadd.f32 %v15773_v13, %v12936_v18  ;;  %v15774_v57 = vpop.f32.mrb[26].mxu0 }
 0x5cf   : > { %v20816_v30 = vadd.f32 %v16012_v50, %v16011_v53  ;;  %v15775_v11 = vpop.f32.mrb[27].mxu0 }
 0x5d0   : > { %v20824_v17 = vadd.f32 %v20736_v34, %v13081_v39  ;;  %v15776_v52 = vadd.f32 %v15775_v11, %v15774_v57 }
 0x5d1   : > { %v16014_v7 = vpop.f32.mrb[74].mxu1 }
 0x5d2   : > { %v16015_v44 = vpop.f32.mrb[75].mxu1  ;;  %v13086_v56 = vadd.f32 %v15776_v52, %v20766_v12  ;;  %v15777_v38 = vpop.f32.mrb[28].mxu0 }
 0x5d3   : > { %v20821_v20 = vadd.f32 %v16015_v44, %v16014_v7  ;;  %v15778_v6 = vpop.f32.mrb[29].mxu0 }
 0x5d4   : > { %v20830_v18 = vadd.f32 %v20738_v14, %v13086_v56  ;;  %v15779_v8 = vadd.f32 %v15778_v6, %v15777_v38 }
 0x5d5   : > { %v16017_v27 = vpop.f32.mrb[76].mxu1 }
 0x5d6   : > { %v16018_v0 = vpop.f32.mrb[77].mxu1  ;;  %v13091_v34 = vadd.f32 %v15779_v8, %v20773_v55  ;;  %v15780_v26 = vpop.f32.mrb[30].mxu0 }
 0x5d7   : > { %v20827_v32 = vadd.f32 %v16018_v0, %v16017_v27  ;;  %v15781_v60 = vpop.f32.mrb[31].mxu0 }
 0x5d8   : > { %v20836_v16 = vadd.f32 %v20740_v48, %v13091_v34  ;;  %v15782_v12 = vadd.f32 %v15781_v60, %v15780_v26 }
 0x5d9   : > { %v16020_v29 = vpop.f32.mrb[78].mxu1 }
 0x5da   : > { %v16021_v10 = vpop.f32.mrb[79].mxu1  ;;  %v13096_v53 = vadd.f32 %v15782_v12, %v20770_v9  ;;  %v15783_v50 = vpop.f32.mrb[32].mxu0 }
 0x5db   : > { %v20833_v46 = vadd.f32 %v16021_v10, %v16020_v29  ;;  %v15784_v59 = vpop.f32.mrb[33].mxu0 }
 0x5dc   : > { %v20842_v45 = vadd.f32 %v20742_v36, %v13096_v53  ;;  %v15785_v55 = vadd.f32 %v15784_v59, %v15783_v50 }
 0x5dd   : > { %v16023_v4 = vpop.f32.mrb[80].mxu1 }
 0x5de   : > { %v16024_v1 = vpop.f32.mrb[81].mxu1  ;;  %v13101_v7 = vadd.f32 %v15785_v55, %v20779_v37  ;;  %v15786_v44 = vpop.f32.mrb[34].mxu0 }
 0x5df   : > { %v20839_v14 = vadd.f32 %v16024_v1, %v16023_v4  ;;  %v15787_v39 = vpop.f32.mrb[35].mxu0 }
 0x5e0   : > { %v20848_v57 = vadd.f32 %v20744_v40, %v13101_v7  ;;  %v15788_v9 = vadd.f32 %v15787_v39, %v15786_v44 }
 0x5e1   : > { %v16026_v24 = vpop.f32.mrb[82].mxu1 }
 0x5e2   : > { %v16027_v13 = vpop.f32.mrb[83].mxu1  ;;  %v13106_v27 = vadd.f32 %v15788_v9, %v20776_v22  ;;  %v15789_v31 = vpop.f32.mrb[36].mxu0 }
 0x5e3   : > { %v20845_v48 = vadd.f32 %v16027_v13, %v16026_v24  ;;  %v15790_v0 = vpop.f32.mrb[37].mxu0 }
 0x5e4   : > { %v20854_v56 = vadd.f32 %v20746_v33, %v13106_v27  ;;  %v15791_v37 = vadd.f32 %v15790_v0, %v15789_v31 }
 0x5e5   : > { %v16029_v11 = vpop.f32.mrb[84].mxu1 }
 0x5e6   : > { %v16030_v52 = vpop.f32.mrb[85].mxu1  ;;  %v13111_v8 = vadd.f32 %v15791_v37, %v20785_v58  ;;  %v15792_v29 = vpop.f32.mrb[38].mxu0 }
 0x5e7   : > { %v20851_v36 = vadd.f32 %v16030_v52, %v16029_v11  ;;  %v15793_v10 = vpop.f32.mrb[39].mxu0 }
 0x5e8   : > { %v20860_v34 = vadd.f32 %v20748_v42, %v13111_v8  ;;  %v15794_v22 = vadd.f32 %v15793_v10, %v15792_v29 }
 0x5e9   : > { %v16032_v38 = vpop.f32.mrb[86].mxu1 }
 0x5ea   : > { %v16033_v6 = vpop.f32.mrb[87].mxu1  ;;  %v13116_v12 = vadd.f32 %v15794_v22, %v20782_v54  ;;  %v15795_v4 = vpop.f32.mrb[40].mxu0 }
 0x5eb   : > { %v20857_v40 = vadd.f32 %v16033_v6, %v16032_v38  ;;  %v15796_v1 = vpop.f32.mrb[41].mxu0 }
 0x5ec   : > { %v20866_v53 = vadd.f32 %v20750_v5, %v13116_v12  ;;  %v15797_v58 = vadd.f32 %v15796_v1, %v15795_v4 }
 0x5ed   : > { %v16035_v26 = vpop.f32.mrb[88].mxu1 }
 0x5ee   : > { %v16036_v60 = vpop.f32.mrb[89].mxu1  ;;  %v13121_v55 = vadd.f32 %v15797_v58, %v20791_v3  ;;  %v15798_v24 = vpop.f32.mrb[42].mxu0 }
 0x5ef   : > { %v20863_v33 = vadd.f32 %v16036_v60, %v16035_v26  ;;  %v15799_v13 = vpop.f32.mrb[43].mxu0 }
 0x5f0   : > { %v20872_v7 = vadd.f32 %v20752_v49, %v13121_v55  ;;  %v15800_v54 = vadd.f32 %v15799_v13, %v15798_v24 }
 0x5f1   : > { %v16038_v50 = vpop.f32.mrb[90].mxu1 }
 0x5f2   : > { %v16039_v59 = vpop.f32.mrb[91].mxu1  ;;  %v13126_v9 = vadd.f32 %v15800_v54, %v20788_v35  ;;  %v15801_v11 = vpop.f32.mrb[44].mxu0 }
 0x5f3   : > { %v20869_v42 = vadd.f32 %v16039_v59, %v16038_v50  ;;  %v15802_v52 = vpop.f32.mrb[45].mxu0 }
 0x5f4   : > { %v20878_v27 = vadd.f32 %v20754_v23, %v13126_v9  ;;  %v15803_v3 = vadd.f32 %v15802_v52, %v15801_v11  ;;  %v13704_v11 = vld [vmem:[%s20992_s5 + $0x10] sm:$0xff] }
 0x5f5   : > { %v16041_v44 = vpop.f32.mrb[92].mxu1 }
 0x5f6   : > { %v16042_v39 = vpop.f32.mrb[93].mxu1  ;;  %v13131_v37 = vadd.f32 %v15803_v3, %v20797_v63  ;;  %v15804_v38 = vpop.f32.mrb[46].mxu0 }
 0x5f7   : > { %v20875_v5 = vadd.f32 %v16042_v39, %v16041_v44  ;;  %v15805_v6 = vpop.f32.mrb[47].mxu0 }
 0x5f8   : > { %v20884_v8 = vadd.f32 %v20756_v62, %v13131_v37  ;;  %v15806_v35 = vadd.f32 %v15805_v6, %v15804_v38  ;;  %v13702_v62 = vld [vmem:[%s20992_s5] sm:$0xff] }
 0x5f9   : > { %v16044_v31 = vpop.f32.mrb[94].mxu1 }
 0x5fa   : > { %v16045_v0 = vpop.f32.mrb[95].mxu1  ;;  %v13136_v29 = vadd.f32 %v15806_v35, %v20794_v25 }
 0x5fb   : > { %v20881_v49 = vadd.f32 %v16045_v0, %v16044_v31 }
 0x5fc   : > { %v20888_v10 = vadd.f32 %v20758_v28, %v13136_v29  ;;  %v13703_v28 = vld [vmem:[%s20992_s5 + $0x8] sm:$0xff] }
 0x605   : > { %v15919_v23 = vpop.f32.mrb[48].mxu0 }
 0x606   : > { %v15920_v22 = vpop.f32.mrb[49].mxu0 }
 0x607   : > { %v15921_v26 = vadd.f32 %v15920_v22, %v15919_v23 }
 0x609   : > { %v13608_v60 = vadd.f32 %v20799_v41, %v15921_v26  ;;  %v15922_v12 = vpop.f32.mrb[50].mxu0 }
 0x60a   : > { %v15923_v63 = vpop.f32.mrb[51].mxu0 }
 0x60b   : > { %v13686_v4 = vadd.f32 %v13608_v60, %v20804_v15  ;;  %v15924_v1 = vadd.f32 %v15923_v63, %v15922_v12  ;;  %v13706_v60 = vld [vmem:[%s20992_s5 + $0x20] sm:$0xff] }
 0x60d   : > { %v13613_v58 = vadd.f32 %v20801_v2, %v15924_v1  ;;  %v15925_v25 = vpop.f32.mrb[52].mxu0  ;;  %v13718_v59 = vadd.f32 %v13702_v62, %v13686_v4  ;;  %v13707_v4 = vld [vmem:[%s20992_s5 + $0x28] sm:$0xff] }
 0x60e   : > { %v15926_v50 = vpop.f32.mrb[53].mxu0 }
 0x60f   : > { %v13687_v41 = vadd.f32 %v13613_v58, %v20809_v51  ;;  %v15927_v55 = vadd.f32 %v15926_v50, %v15925_v25  ;;  %v13734_v44 = vmax.f32 %v13718_v59, 0.0  ;;  %v13705_v51 = vld [vmem:[%s20992_s5 + $0x18] sm:$0xff] }
 0x611   : > { %v13719_v24 = vadd.f32 %v13703_v28, %v13687_v41  ;;  %v13618_v15 = vadd.f32 %v20806_v43, %v15927_v55  ;;  %v15928_v13 = vpop.f32.mrb[54].mxu0 }
 0x612   : > { %v15929_v54 = vpop.f32.mrb[55].mxu0 }
 0x613   : > { %v13735_v39 = vmax.f32 %v13719_v24, 0.0  ;;  %v13688_v9 = vadd.f32 %v13618_v15, %v20814_v47  ;;  %v15930_v2 = vadd.f32 %v15929_v54, %v15928_v13  ;;  %v13708_v24 = vld [vmem:[%s20992_s5 + $0x30] sm:$0xff]  ;;  %v13709_v54 = vld [vmem:[%s20992_s5 + $0x38] sm:$0xff] }
 0x615   : > { %v13623_v52 = vadd.f32 %v20811_v21, %v15930_v2  ;;  %v15931_v3 = vpop.f32.mrb[56].mxu0  ;;  %v16348_v31 = vpack.c.bf16 %v13735_v39, %v13734_v44  ;;  %v13720_v0 = vadd.f32 %v13704_v11, %v13688_v9 }
 0x616   : > { %v15932_v43 = vpop.f32.mrb[57].mxu0 }
 0x617   : > { %v13689_v37 = vadd.f32 %v13623_v52, %v20819_v61  ;;  %v15933_v38 = vadd.f32 %v15932_v43, %v15931_v3  ;;  %16349 = vmatpush3.bf16.msra.mxu0 %v16348_v31  ;;  %v13736_v21 = vmax.f32 %v13720_v0, 0.0  ;;  %v13710_v43 = vld [vmem:[%s20992_s5 + $0x40] sm:$0xff] }
 0x618   : > { %16350 = vmatprep.subr.bf16.mxu0 %v18540_v19 }
 0x619   : > { %v13721_v47 = vadd.f32 %v13705_v51, %v13689_v37  ;;  %v13628_v6 = vadd.f32 %v20816_v30, %v15933_v38  ;;  %v15934_v35 = vpop.f32.mrb[58].mxu0  ;;  %v13711_v38 = vld [vmem:[%s20992_s5 + $0x48] sm:$0xff] }
 0x61a   : > { %v15935_v29 = vpop.f32.mrb[59].mxu0 }
 0x61b   : > { %v13737_v23 = vmax.f32 %v13721_v47, 0.0  ;;  %v13690_v22 = vadd.f32 %v13628_v6, %v20824_v17  ;;  %v15936_v26 = vadd.f32 %v15935_v29, %v15934_v35 }
 0x61d   : > { %v13633_v61 = vadd.f32 %v20821_v20, %v15936_v26  ;;  %v15937_v12 = vpop.f32.mrb[60].mxu0  ;;  %v16351_v63 = vpack.c.bf16 %v13737_v23, %v13736_v21  ;;  %v13722_v1 = vadd.f32 %v13706_v60, %v13690_v22 }
 0x61e   : > { %v15938_v30 = vpop.f32.mrb[61].mxu0 }
 0x61f   : > { %v13691_v62 = vadd.f32 %v13633_v61, %v20830_v18  ;;  %v15939_v58 = vadd.f32 %v15938_v30, %v15937_v12  ;;  %16352 = vmatpush3.bf16.msra.mxu0 %v16351_v63  ;;  %v13738_v20 = vmax.f32 %v13722_v1, 0.0  ;;  %v13712_v61 = vld [vmem:[%s20992_s5 + $0x50] sm:$0xff] }
 0x620   : > { %16353 = vmatprep.subr.bf16.mxu0 %v18540_v19 }
 0x621   : > { %v13723_v17 = vadd.f32 %v13707_v4, %v13691_v62  ;;  %v13638_v25 = vadd.f32 %v20827_v32, %v15939_v58  ;;  %v15940_v28 = vpop.f32.mrb[62].mxu0  ;;  %v13713_v4 = vld [vmem:[%s20992_s5 + $0x58] sm:$0xff] }
 0x622   : > { %v15941_v50 = vpop.f32.mrb[63].mxu0 }
 0x623   : > { %v13739_v59 = vmax.f32 %v13723_v17, 0.0  ;;  %v13692_v41 = vadd.f32 %v13638_v25, %v20836_v16  ;;  %v15942_v55 = vadd.f32 %v15941_v50, %v15940_v28 }
 0x625   : > { %v13643_v18 = vadd.f32 %v20833_v46, %v15942_v55  ;;  %v15943_v15 = vpop.f32.mrb[64].mxu0  ;;  %v16354_v13 = vpack.c.bf16 %v13739_v59, %v13738_v20  ;;  %v13724_v44 = vadd.f32 %v13708_v24, %v13692_v41  ;;  %v13714_v59 = vld [vmem:[%s20992_s5 + $0x60] sm:$0xff]  ;;  %v13715_v24 = vld [vmem:[%s20992_s5 + $0x68] sm:$0xff] }
 0x626   : > { %v15944_v32 = vpop.f32.mrb[65].mxu0 }
 0x627   : > { %v13693_v39 = vadd.f32 %v13643_v18, %v20842_v45  ;;  %v15945_v9 = vadd.f32 %v15944_v32, %v15943_v15  ;;  %16355 = vmatpush3.bf16.msra.mxu0 %v16354_v13  ;;  %v13740_v46 = vmax.f32 %v13724_v44, 0.0 }
 0x628   : > { %16356 = vmatprep.subr.bf16.mxu0 %v18540_v19 }
 0x629   : > { %v13725_v16 = vadd.f32 %v13709_v54, %v13693_v39  ;;  %v13648_v2 = vadd.f32 %v20839_v14, %v15945_v9  ;;  %v15946_v11 = vpop.f32.mrb[66].mxu0 }
 0x62a   : > { %v15947_v52 = vpop.f32.mrb[67].mxu0 }
 0x62b   : > { %v13741_v3 = vmax.f32 %v13725_v16, 0.0  ;;  %v13694_v31 = vadd.f32 %v13648_v2, %v20848_v57  ;;  %v15948_v51 = vadd.f32 %v15947_v52, %v15946_v11  ;;  %v13716_v2 = vld [vmem:[%s20992_s5 + $0x70] sm:$0xff]  ;;  %v13717_v52 = vld [vmem:[%s20992_s5 + $0x78] sm:$0xff] }
 0x62d   : > { %v13653_v45 = vadd.f32 %v20845_v48, %v15948_v51  ;;  %v15949_v0 = vpop.f32.mrb[68].mxu0  ;;  %v16357_v37 = vpack.c.bf16 %v13741_v3, %v13740_v46  ;;  %v13726_v47 = vadd.f32 %v13710_v43, %v13694_v31  ;;  %v13751_v43 = vld [vmem:[#allocation2] sm:$0x1] }
 0x62e   : > { %v15950_v14 = vpop.f32.mrb[69].mxu0 }
 0x62f   : > { %v13695_v6 = vadd.f32 %v13653_v45, %v20854_v56  ;;  %v15951_v35 = vadd.f32 %v15950_v14, %v15949_v0  ;;  %16358 = vmatpush3.bf16.msra.mxu0 %v16357_v37  ;;  %v13742_v48 = vmax.f32 %v13726_v47, 0.0 }
 0x630   : > { %16359 = vmatprep.subr.bf16.mxu0 %v18540_v19 }
 0x631   : > { %v13727_v57 = vadd.f32 %v13711_v38, %v13695_v6  ;;  %v13658_v29 = vadd.f32 %v20851_v36, %v15951_v35  ;;  %v15952_v21 = vpop.f32.mrb[70].mxu0 }
 0x632   : > { %v15953_v23 = vpop.f32.mrb[71].mxu0 }
 0x633   : > { %v13743_v22 = vmax.f32 %v13727_v57, 0.0  ;;  %v13696_v26 = vadd.f32 %v13658_v29, %v20860_v34  ;;  %v15954_v60 = vadd.f32 %v15953_v23, %v15952_v21 }
 0x635   : > { %v13663_v56 = vadd.f32 %v20857_v40, %v15954_v60  ;;  %v15955_v12 = vpop.f32.mrb[72].mxu0  ;;  %v16360_v63 = vpack.c.bf16 %v13743_v22, %v13742_v48  ;;  %v13728_v30 = vadd.f32 %v13712_v61, %v13696_v26 }
 0x636   : > { %v15956_v36 = vpop.f32.mrb[73].mxu0 }
 0x637   : > { %v13697_v1 = vadd.f32 %v13663_v56, %v20866_v53  ;;  %v15957_v62 = vadd.f32 %v15956_v36, %v15955_v12  ;;  %16361 = vmatpush3.bf16.msra.mxu0 %v16360_v63  ;;  %v13744_v40 = vmax.f32 %v13728_v30, 0.0 }
 0x638   : > { %16362 = vmatprep.subr.bf16.mxu0 %v18540_v19 }
 0x639   : > { %v13729_v34 = vadd.f32 %v13713_v4, %v13697_v1  ;;  %v13668_v58 = vadd.f32 %v20863_v33, %v15957_v62  ;;  %v15958_v17 = vpop.f32.mrb[74].mxu0 }
 0x63a   : > { %v15959_v25 = vpop.f32.mrb[75].mxu0 }
 0x63b   : > { %v13745_v28 = vmax.f32 %v13729_v34, 0.0  ;;  %v13698_v50 = vadd.f32 %v13668_v58, %v20872_v7  ;;  %v15960_v20 = vadd.f32 %v15959_v25, %v15958_v17 }
 0x63d   : > { %v13673_v53 = vadd.f32 %v20869_v42, %v15960_v20  ;;  %v15961_v41 = vpop.f32.mrb[76].mxu0  ;;  %v16363_v55 = vpack.c.bf16 %v13745_v28, %v13744_v40  ;;  %v13730_v18 = vadd.f32 %v13714_v59, %v13698_v50 }
 0x63e   : > { %v15962_v33 = vpop.f32.mrb[77].mxu0 }
 0x63f   : > { %v13699_v15 = vadd.f32 %v13673_v53, %v20878_v27  ;;  %v15963_v13 = vadd.f32 %v15962_v33, %v15961_v41  ;;  %16364 = vmatpush3.bf16.msra.mxu0 %v16363_v55  ;;  %v13746_v42 = vmax.f32 %v13730_v18, 0.0 }
 0x640   : > { %16365 = vmatprep.subr.bf16.mxu0 %v18540_v19 }
 0x641   : > { %v13731_v7 = vadd.f32 %v13715_v24, %v13699_v15  ;;  %v13678_v54 = vadd.f32 %v20875_v5, %v15963_v13  ;;  %v15964_v32 = vpop.f32.mrb[78].mxu0 }
 0x642   : > { %v15965_v44 = vpop.f32.mrb[79].mxu0 }
 0x643   : > { %v13747_v39 = vmax.f32 %v13731_v7, 0.0  ;;  %v13700_v9 = vadd.f32 %v13678_v54, %v20884_v8  ;;  %v15966_v16 = vadd.f32 %v15965_v44, %v15964_v32 }
 0x645   : > { %v13683_v27 = vadd.f32 %v20881_v49, %v15966_v16  ;;  %v16366_v11 = vpack.c.bf16 %v13747_v39, %v13746_v42  ;;  %v13732_v46 = vadd.f32 %v13716_v2, %v13700_v9  ;;  %v13750_v49 = vld [vmem:[%s20993_s6] sm:$0x1] }
 0x647   : > { %v13701_v5 = vadd.f32 %v13683_v27, %v20888_v10  ;;  %16367 = vmatpush3.bf16.msra.mxu0 %v16366_v11  ;;  %v13748_v8 = vmax.f32 %v13732_v46, 0.0 }
 0x648   : > { %16368 = vmatprep.subr.bf16.mxu0 %v18540_v19 }
 0x649   : > { %v13733_v3 = vadd.f32 %v13717_v52, %v13701_v5 }
 0x64b   : > { %v13749_v31 = vmax.f32 %v13733_v3, 0.0 }
 0x64d   : > { %v16369_v51 = vpack.c.bf16 %v13749_v31, %v13748_v8 }
 0x64f   : > { %16370 = vmatpush3.bf16.msra.mxu0 %v16369_v51 }
 0x652   : > { %16153 = vmatmul.mubr.f32.vlgmr.msra.gmra.mrb[80].mxu0 %v13750_v49 }
 0x725   : > { %v13818_v45 = vpop.f32.mrb[80].mxu0 }
 0x726   : > { %v13819_v0 = vadd.f32 %v13818_v45, %v13751_v43  ;;  %v16154_v37 = vpop.f32.mrb[81].mxu0 }
 0x728   : > { %v15610_v38 = vmul.f32 -1.442695, %v13819_v0 }
 0x72a   : > { %18493 = vpow2.f32 %v15610_v38 }
 0x734   : > { %v18494_v10 = vpop.eup %18493 }
 0x735   : > { %v13825_v14 = vadd.f32 1.0, %v18494_v10 }
 0x737   : > { %18495 = vrcp.f32 %v13825_v14 }
 0x741   : > { %v18496_v19 = vpop.eup %18495 }
 0x742   : > { %13829 = vst.msk [vmem:[%s378_s13] sm:$0x1] %vm13828_vm4, %v18496_v19 }
 0x743 PF: > { %s21_s29 = sadd.s32 1, %s18535_s29  }
 0x744   : > { %p18_p3 = scmp.ge.s32.totalorder %s21_s29, 4  }
 0x746   :  { %20 = sbr.rel (!%p18_p3) target bundleno = 4 (0x4), region = 96 }
 0x74d   :  { %13847 = vsyncpa [#allocation4], 1 }
 0x74e   :  { %13849 = vsyncpa [#allocation4 + $0x1], 1 }

</bundles_post_ra>
